<compile_context>
chip_gen: v5e
topology: v5e:2x2
jax: 0.10.0
libtpu: 0.0.40
codegen_flags: <defaults>
</compile_context>

<pallas_src>
import functools

import jax
import jax.numpy as jnp
from jax.experimental import pallas as pl
from jax.experimental.pallas import tpu as pltpu


# Set to jnp.float32 to recover the exact full-precision forward (at 2x the
# HBM weight traffic).  bf16 storage keeps the output within ~a few 1e-3 of
# the f32 forward (f32 accumulation on the MXU).
WEIGHT_DTYPE = jnp.bfloat16


def _round_up(x, m):
    return ((x + m - 1) // m) * m


def _device_kind():
    try:
        return jax.devices()[0].device_kind.lower()
    except Exception:
        return ""


def _select_config(weight_dtype=None):
    """Per-generation strategy: fuse layers on single-TC chips, split + megacore on v7x."""
    if weight_dtype is None:
        weight_dtype = WEIGHT_DTYPE
    itemsize = jnp.dtype(weight_dtype).itemsize
    kind = _device_kind()
    if "v7" in kind or "7x" in kind:
        # 2 TensorCores/chip: keep per-layer calls with a "parallel" N axis so
        # megacore shards the weight streaming; tn=512 gives each core 2
        # N-blocks (restores per-core double buffering).
        return {"fuse": False, "tn": 512}
    if any(s in kind for s in ("v6", "v5e", "v5 lite", "v5lite")):
        # Single TensorCore: fuse the whole MLP into one pallas_call.
        # bf16 2048x1024 weight double-buffer = 8 MiB -> fits v5e's 16 MiB
        # default scoped VMEM; fall back to tn=512 for 4-byte weights.
        return {"fuse": True, "tn": 1024 if itemsize <= 2 else 512}
    # Unknown / older generations: conservative, always-correct split path.
    return {"fuse": False, "tn": 512}


# ----------------------------------------------------------------------------
# Split-path kernel: one (m_pad, tn) output tile per grid step.
#   o = (x @ W_tile + b_tile) [tanh]
# ----------------------------------------------------------------------------
def _linear_kernel(x_ref, w_ref, b_ref, o_ref, *, apply_tanh):
    # Cast the (tiny) activation block to the weight dtype right before the
    # dot so bf16 weights get a genuine bf16 MXU pass with f32 accumulation.
    lhs = x_ref[...].astype(w_ref.dtype)
    out = jnp.dot(lhs, w_ref[...], preferred_element_type=jnp.float32)
    out = out + b_ref[...]              # (1, tn) bias broadcasts over rows
    if apply_tanh:
        out = jnp.tanh(out)             # EUP: free in this HBM-bound regime
    o_ref[...] = out.astype(o_ref.dtype)


def _mlp_forward_split(params, x_p):
    """Three pallas_calls; 'parallel' N axis so v7x megacore shards the streaming."""
    w, b = params["w"], params["b"]
    n_layers, n_tiles, k_pad, tn = w.shape
    n_pad = n_tiles * tn
    m_pad = x_p.shape[0]
    assert n_layers == 3 and x_p.shape[1] == k_pad and n_pad == k_pad

    def layer(h, layer_idx, apply_tanh):
        kernel = functools.partial(_linear_kernel, apply_tanh=apply_tanh)
        return pl.pallas_call(
            kernel,
            out_shape=jax.ShapeDtypeStruct((m_pad, n_pad), jnp.float32),
            grid_spec=pltpu.PrefetchScalarGridSpec(
                num_scalar_prefetch=0,
                grid=(n_tiles,),
                in_specs=[
                    # Activations: resident across all N tiles.
                    pl.BlockSpec((m_pad, k_pad), lambda j: (0, 0)),
                    # Weights: one contiguous (k_pad, tn) tile streamed per step.
                    pl.BlockSpec((None, None, k_pad, tn),
                                 lambda j, L=layer_idx: (L, j, 0, 0)),
                    # Bias tile.
                    pl.BlockSpec((None, 1, tn),
                                 lambda j, L=layer_idx: (L, 0, j)),
                ],
                out_specs=pl.BlockSpec((m_pad, tn), lambda j: (0, j)),
            ),
            compiler_params=pltpu.CompilerParams(
                dimension_semantics=("parallel",),
            ),
        )(h, w, b)

    h = layer(x_p, 0, True)
    h = layer(h, 1, True)
    return layer(h, 2, False)


# ----------------------------------------------------------------------------
# Fused-path kernel (single-TC chips): grid = (layer, N-tile).
# Inter-layer activations live in VMEM scratch tiled as (n_tiles, m_pad, tn)
# so all stores use a (dynamic) leading-axis index and all loads are static —
# no dynamic lane-dimension slicing.
# ----------------------------------------------------------------------------
def _fused_mlp_kernel(x_ref, w_ref, b_ref, o_ref, h0_ref, h1_ref, *, tn):
    layer_id = pl.program_id(0)
    j = pl.program_id(1)
    n_tiles = h0_ref.shape[0]

    def from_dense(act_f32):
        # act: (m_pad, k_pad) f32 -> one full-K MXU pass for this output tile.
        lhs = act_f32.astype(w_ref.dtype)
        return jnp.dot(lhs, w_ref[...], preferred_element_type=jnp.float32) + b_ref[...]

    def from_tiles(h_ref):
        # h_ref: (n_tiles, m_pad, tn) f32 activation tiles of the previous layer.
        acc = jnp.zeros((h_ref.shape[1], w_ref.shape[1]), jnp.float32)
        for kk in range(n_tiles):                       # static, unrolled
            lhs = h_ref[kk].astype(w_ref.dtype)         # (m_pad, tn)
            rhs = w_ref[kk * tn:(kk + 1) * tn, :]       # static row chunk (tn, tn)
            acc = acc + jnp.dot(lhs, rhs, preferred_element_type=jnp.float32)
        return acc + b_ref[...]

    @pl.when(layer_id == 0)
    def _():
        out = jnp.tanh(from_dense(x_ref[...]))
        h0_ref[j] = out
        o_ref[...] = out        # keeps the output buffer defined; layer 2 overwrites

    @pl.when(layer_id == 1)
    def _():
        out = jnp.tanh(from_tiles(h0_ref))
        h1_ref[j] = out
        o_ref[...] = out

    @pl.when(layer_id == 2)
    def _():
        o_ref[...] = from_tiles(h1_ref)


def _mlp_forward_fused(params, x_p):
    """Single pallas_call for all three layers (v5e / v6e single-TensorCore)."""
    w, b = params["w"], params["b"]
    n_layers, n_tiles, k_pad, tn = w.shape
    n_pad = n_tiles * tn
    m_pad = x_p.shape[0]
    assert n_layers == 3 and x_p.shape[1] == k_pad and n_pad == k_pad

    kernel = functools.partial(_fused_mlp_kernel, tn=tn)
    return pl.pallas_call(
        kernel,
        out_shape=jax.ShapeDtypeStruct((m_pad, n_pad), jnp.float32),
        grid_spec=pltpu.PrefetchScalarGridSpec(
            num_scalar_prefetch=0,
            grid=(n_layers, n_tiles),
            in_specs=[
                pl.BlockSpec((m_pad, k_pad), lambda l, j: (0, 0)),     # resident input
                pl.BlockSpec((None, None, k_pad, tn),
                             lambda l, j: (l, j, 0, 0)),               # contiguous tile
                pl.BlockSpec((None, 1, tn), lambda l, j: (l, 0, j)),   # bias tile
            ],
            out_specs=pl.BlockSpec((m_pad, tn), lambda l, j: (0, j)),
            scratch_shapes=[
                pltpu.VMEM((n_tiles, m_pad, tn), jnp.float32),  # layer-0 output
                pltpu.VMEM((n_tiles, m_pad, tn), jnp.float32),  # layer-1 output
            ],
        ),
        compiler_params=pltpu.CompilerParams(
            # The layer axis carries a data dependence through VMEM scratch and
            # the N axis feeds it, so both stay "arbitrary".  This path is only
            # selected on single-TensorCore chips (megacore handled by the
            # split path on v7x).
            dimension_semantics=("arbitrary", "arbitrary"),
        ),
    )(x_p, w, b)


# ----------------------------------------------------------------------------
# Parameters: PyTorch nn.Linear-style init, padded + pre-tiled once.
# ----------------------------------------------------------------------------
def init_params(key, dim=1936, middle_dim=2048, weight_dtype=None, tn=None):
    """Returns (kernel_params, ref_params).

    kernel_params["w"]: (3, n_tiles, k_pad, tn) weight_dtype — each (k_pad, tn)
        output tile is a fully contiguous HBM chunk (peak-efficiency DMA).
    kernel_params["b"]: (3, 1, n_pad) float32 — bias bytes are noise, kept f32.
    ref_params: unpadded f32 (w, b) per layer, for the plain-jnp reference.
    """
    if weight_dtype is None:
        weight_dtype = WEIGHT_DTYPE
    if tn is None:
        tn = _select_config(weight_dtype)["tn"]

    k_pad = _round_up(max(dim, middle_dim), 128)
    n_pad = _round_up(max(dim, middle_dim), 128)
    assert n_pad % tn == 0 and n_pad == k_pad
    n_tiles = n_pad // tn

    ks = jax.random.split(key, 6)
    layer_shapes = [(dim, middle_dim), (middle_dim, middle_dim), (middle_dim, dim)]
    w_tiles, b_rows, ref_params = [], [], []
    for i, (fan_in, fan_out) in enumerate(layer_shapes):
        bound = 1.0 / float(fan_in) ** 0.5
        w = jax.random.uniform(ks[2 * i], (fan_in, fan_out), jnp.float32, -bound, bound)
        b = jax.random.uniform(ks[2 * i + 1], (fan_out,), jnp.float32, -bound, bound)
        ref_params.append((w, b))
        # Zero-pad K and N so all layers share one stacked layout (zero K-pad
        # rows make the padded input columns inert), quantize, then pre-tile:
        # (k_pad, n_pad) -> (n_tiles, k_pad, tn), each tile contiguous.
        w_p = jnp.pad(w, ((0, k_pad - fan_in), (0, n_pad - fan_out))).astype(weight_dtype)
        w_tiles.append(w_p.reshape(k_pad, n_tiles, tn).transpose(1, 0, 2))
        b_rows.append(jnp.pad(b, (0, n_pad - fan_out)).reshape(1, n_pad))

    params = {"w": jnp.stack(w_tiles), "b": jnp.stack(b_rows)}
    return jax.device_put(params), ref_params


# ----------------------------------------------------------------------------
# get_derivatives forward:  out = net(y)   (t is ignored, as in PyTorch)
# ----------------------------------------------------------------------------
def get_derivatives_forward(params, t, y, *, out_dim):
    del t  # unused by the PyTorch forward; kept for signature parity
    m, k = y.shape
    _, n_tiles, k_pad, tn = params["w"].shape

    # Pad ONCE per forward (not per layer): rows to a multiple of 16 so the
    # bf16 LHS fills packed vregs, reduction dim to the stacked K (the extra
    # weight rows are zero, so the pad values are inert).
    m_pad = _round_up(max(m, 1), 16)
    if (m_pad, k_pad) != (m, k):
        y = jnp.pad(y, ((0, m_pad - m), (0, k_pad - k)))

    if _select_config()["fuse"]:
        out_p = _mlp_forward_fused(params, y)
    else:
        out_p = _mlp_forward_split(params, y)
    return out_p[:m, :out_dim]


def get_derivatives_reference(ref_params, t, y, *, weight_dtype=jnp.float32):
    """Plain-jnp reference.  weight_dtype=WEIGHT_DTYPE reproduces the kernel's
    numerics (bf16 operands, f32 accumulation); float32 is the exact forward."""
    del t
    exact = jnp.dtype(weight_dtype) == jnp.dtype(jnp.float32)
    h = y
    last = len(ref_params) - 1
    for i, (w, b) in enumerate(ref_params):
        lhs = h if exact else h.astype(weight_dtype)
        rhs = w if exact else w.astype(weight_dtype)
        h = jnp.dot(lhs, rhs,
                    precision=jax.lax.Precision.HIGHEST if exact else None,
                    preferred_element_type=jnp.float32) + b
        if i != last:
            h = jnp.tanh(h)
    return h


if __name__ == "__main__":
    key = jax.random.PRNGKey(0)
    k_params, k_y = jax.random.split(key)

    dim = 1936          # d_model for script_required=False (module default)
    middle_dim = 2048
    batch = 8

    params, ref_params = init_params(k_params, dim=dim, middle_dim=middle_dim)
    y = jax.random.normal(k_y, (batch, dim), dtype=jnp.float32)
    t = jnp.float32(0.0)

    fwd = jax.jit(functools.partial(get_derivatives_forward, out_dim=dim))
    out = jax.block_until_ready(fwd(params, t, y))
    assert out.shape == (batch, dim)

    # (1) Kernel correctness: match a jnp reference that uses the exact same
    #     numerics as the kernel (bf16 weights/LHS, f32 accumulation, f32 tanh).
    ref_matched = get_derivatives_reference(ref_params, t, y, weight_dtype=WEIGHT_DTYPE)
    assert jnp.allclose(out, ref_matched, atol=2e-3, rtol=2e-3), "mismatch vs matched reference"

    # (2) Quantization sanity: bf16 weight storage stays within a few 1e-3 of
    #     the full-f32 forward (set WEIGHT_DTYPE = jnp.float32 to recover it
    #     exactly if the application needs a strict 2e-3 match to f32).
    ref_f32 = get_derivatives_reference(ref_params, t, y, weight_dtype=jnp.float32)
    assert jnp.allclose(out, ref_f32, atol=2e-2, rtol=2e-2), "bf16 drift vs f32 reference"

    print("KERNEL_OK")
</pallas_src>

<mosaic_0001>
module attributes {stable_mosaic.version = 11 : i64} {
  func.func @_linear_kernel(%arg0: i32, %arg1: memref<16x2048xf32, #tpu.memory_space<vmem>>, %arg2: memref<1x1x2048x512xbf16, #tpu.memory_space<vmem>>, %arg3: memref<1x1x512xf32, #tpu.memory_space<vmem>>, %arg4: memref<16x512xf32, #tpu.memory_space<vmem>>) attributes {dimension_semantics = [#tpu.dimension_semantics<parallel>], iteration_bounds = array<i64: 4>, scalar_prefetch = 0 : i64, scratch_operands = 0 : i64, tpu.core_type = #tpu.core_type<tc>, window_params = [{pipeline_mode = #tpu.pipeline_mode<synchronous>, transform_indices = @transform_0, window_bounds = array<i64: 16, 2048>}, {transform_indices = @transform_1, window_bounds = array<i64: 1, 1, 2048, 512>}, {transform_indices = @transform_2, window_bounds = array<i64: 1, 1, 512>}, {transform_indices = @transform_3, window_bounds = array<i64: 16, 512>}]} {
    %c0 = arith.constant 0 : index
    %c0_0 = arith.constant 0 : index
    %0 = vector.load %arg1[%c0, %c0_0] : memref<16x2048xf32, #tpu.memory_space<vmem>>, vector<16x2048xf32>
    %1 = arith.truncf %0 : vector<16x2048xf32> to vector<16x2048xbf16>
    %c0_1 = arith.constant 0 : index
    %c0_2 = arith.constant 0 : index
    %c0_3 = arith.constant 0 : index
    %c0_4 = arith.constant 0 : index
    %2 = vector.load %arg2[%c0_1, %c0_2, %c0_3, %c0_4] : memref<1x1x2048x512xbf16, #tpu.memory_space<vmem>>, vector<1x1x2048x512xbf16>
    %3 = vector.shape_cast %2 : vector<1x1x2048x512xbf16> to vector<2048x512xbf16>
    %cst = arith.constant dense<0.000000e+00> : vector<16x512xf32>
    %4 = tpu.matmul %1, %3, %cst {dimension_numbers = #tpu.dot_dimension_numbers<[1], [0], [0], [1], [0, 0, 1, 1], [], []>} : vector<16x2048xbf16>, vector<2048x512xbf16>, vector<16x512xf32> -> vector<16x512xf32>
    %c0_5 = arith.constant 0 : index
    %c0_6 = arith.constant 0 : index
    %c0_7 = arith.constant 0 : index
    %5 = vector.load %arg3[%c0_5, %c0_6, %c0_7] : memref<1x1x512xf32, #tpu.memory_space<vmem>>, vector<1x1x512xf32>
    %6 = vector.shape_cast %5 : vector<1x1x512xf32> to vector<1x512xf32>
    %7 = vector.broadcast %6 : vector<1x512xf32> to vector<16x512xf32>
    %8 = arith.addf %4, %7 : vector<16x512xf32>
    %c0_8 = arith.constant 0 : index
    %c0_9 = arith.constant 0 : index
    %9 = vector.load %arg4[%c0_8, %c0_9] : memref<16x512xf32, #tpu.memory_space<vmem>>, vector<16x512xf32>
    tpu.vector_store %arg4[%c0_8, %c0_9], %8 {strides = array<i32>} : memref<16x512xf32, #tpu.memory_space<vmem>>, vector<16x512xf32>,
    return
  }
  func.func @transform_0(%arg0: i32) -> (i32, i32) {
    %c0_i32 = arith.constant 0 : i32
    %c0_i32_0 = arith.constant 0 : i32
    %c0_i32_1 = arith.constant 0 : i32
    return %c0_i32, %c0_i32_0 : i32, i32
  }
  func.func @transform_1(%arg0: i32) -> (i32, i32, i32, i32) {
    %c2_i32 = arith.constant 2 : i32
    %c0_i32 = arith.constant 0 : i32
    %c0_i32_0 = arith.constant 0 : i32
    %c0_i32_1 = arith.constant 0 : i32
    return %c2_i32, %arg0, %c0_i32, %c0_i32_0 : i32, i32, i32, i32
  }
  func.func @transform_2(%arg0: i32) -> (i32, i32, i32) {
    %c2_i32 = arith.constant 2 : i32
    %c0_i32 = arith.constant 0 : i32
    %c0_i32_0 = arith.constant 0 : i32
    return %c2_i32, %c0_i32, %arg0 : i32, i32, i32
  }
  func.func @transform_3(%arg0: i32) -> (i32, i32) {
    %c0_i32 = arith.constant 0 : i32
    %c0_i32_0 = arith.constant 0 : i32
    return %c0_i32, %arg0 : i32, i32
  }
}

module attributes {stable_mosaic.version = 11 : i64} {
  func.func @_linear_kernel(%arg0: i32, %arg1: memref<16x2048xf32, #tpu.memory_space<vmem>>, %arg2: memref<1x1x2048x512xbf16, #tpu.memory_space<vmem>>, %arg3: memref<1x1x512xf32, #tpu.memory_space<vmem>>, %arg4: memref<16x512xf32, #tpu.memory_space<vmem>>) attributes {dimension_semantics = [#tpu.dimension_semantics<parallel>], iteration_bounds = array<i64: 4>, scalar_prefetch = 0 : i64, scratch_operands = 0 : i64, tpu.core_type = #tpu.core_type<tc>, window_params = [{pipeline_mode = #tpu.pipeline_mode<synchronous>, transform_indices = @transform_0, window_bounds = array<i64: 16, 2048>}, {transform_indices = @transform_1, window_bounds = array<i64: 1, 1, 2048, 512>}, {transform_indices = @transform_2, window_bounds = array<i64: 1, 1, 512>}, {transform_indices = @transform_3, window_bounds = array<i64: 16, 512>}]} {
    %c0 = arith.constant 0 : index
    %c0_0 = arith.constant 0 : index
    %0 = vector.load %arg1[%c0, %c0_0] : memref<16x2048xf32, #tpu.memory_space<vmem>>, vector<16x2048xf32>
    %1 = arith.truncf %0 : vector<16x2048xf32> to vector<16x2048xbf16>
    %c0_1 = arith.constant 0 : index
    %c0_2 = arith.constant 0 : index
    %c0_3 = arith.constant 0 : index
    %c0_4 = arith.constant 0 : index
    %2 = vector.load %arg2[%c0_1, %c0_2, %c0_3, %c0_4] : memref<1x1x2048x512xbf16, #tpu.memory_space<vmem>>, vector<1x1x2048x512xbf16>
    %3 = vector.shape_cast %2 : vector<1x1x2048x512xbf16> to vector<2048x512xbf16>
    %cst = arith.constant dense<0.000000e+00> : vector<16x512xf32>
    %4 = tpu.matmul %1, %3, %cst {dimension_numbers = #tpu.dot_dimension_numbers<[1], [0], [0], [1], [0, 0, 1, 1], [], []>} : vector<16x2048xbf16>, vector<2048x512xbf16>, vector<16x512xf32> -> vector<16x512xf32>
    %c0_5 = arith.constant 0 : index
    %c0_6 = arith.constant 0 : index
    %c0_7 = arith.constant 0 : index
    %5 = vector.load %arg3[%c0_5, %c0_6, %c0_7] : memref<1x1x512xf32, #tpu.memory_space<vmem>>, vector<1x1x512xf32>
    %6 = vector.shape_cast %5 : vector<1x1x512xf32> to vector<1x512xf32>
    %7 = vector.broadcast %6 : vector<1x512xf32> to vector<16x512xf32>
    %8 = arith.addf %4, %7 : vector<16x512xf32>
    %9 = math.tanh %8 : vector<16x512xf32>
    %c0_8 = arith.constant 0 : index
    %c0_9 = arith.constant 0 : index
    %10 = vector.load %arg4[%c0_8, %c0_9] : memref<16x512xf32, #tpu.memory_space<vmem>>, vector<16x512xf32>
    tpu.vector_store %arg4[%c0_8, %c0_9], %9 {strides = array<i32>} : memref<16x512xf32, #tpu.memory_space<vmem>>, vector<16x512xf32>,
    return
  }
  func.func @transform_0(%arg0: i32) -> (i32, i32) {
    %c0_i32 = arith.constant 0 : i32
    %c0_i32_0 = arith.constant 0 : i32
    %c0_i32_1 = arith.constant 0 : i32
    return %c0_i32, %c0_i32_0 : i32, i32
  }
  func.func @transform_1(%arg0: i32) -> (i32, i32, i32, i32) {
    %c1_i32 = arith.constant 1 : i32
    %c0_i32 = arith.constant 0 : i32
    %c0_i32_0 = arith.constant 0 : i32
    %c0_i32_1 = arith.constant 0 : i32
    return %c1_i32, %arg0, %c0_i32, %c0_i32_0 : i32, i32, i32, i32
  }
  func.func @transform_2(%arg0: i32) -> (i32, i32, i32) {
    %c1_i32 = arith.constant 1 : i32
    %c0_i32 = arith.constant 0 : i32
    %c0_i32_0 = arith.constant 0 : i32
    return %c1_i32, %c0_i32, %arg0 : i32, i32, i32
  }
  func.func @transform_3(%arg0: i32) -> (i32, i32) {
    %c0_i32 = arith.constant 0 : i32
    %c0_i32_0 = arith.constant 0 : i32
    return %c0_i32, %arg0 : i32, i32
  }
}

module attributes {stable_mosaic.version = 11 : i64} {
  func.func @_linear_kernel(%arg0: i32, %arg1: memref<16x2048xf32, #tpu.memory_space<vmem>>, %arg2: memref<1x1x2048x512xbf16, #tpu.memory_space<vmem>>, %arg3: memref<1x1x512xf32, #tpu.memory_space<vmem>>, %arg4: memref<16x512xf32, #tpu.memory_space<vmem>>) attributes {dimension_semantics = [#tpu.dimension_semantics<parallel>], iteration_bounds = array<i64: 4>, scalar_prefetch = 0 : i64, scratch_operands = 0 : i64, tpu.core_type = #tpu.core_type<tc>, window_params = [{pipeline_mode = #tpu.pipeline_mode<synchronous>, transform_indices = @transform_0, window_bounds = array<i64: 16, 2048>}, {transform_indices = @transform_1, window_bounds = array<i64: 1, 1, 2048, 512>}, {transform_indices = @transform_2, window_bounds = array<i64: 1, 1, 512>}, {transform_indices = @transform_3, window_bounds = array<i64: 16, 512>}]} {
    %c0 = arith.constant 0 : index
    %c0_0 = arith.constant 0 : index
    %0 = vector.load %arg1[%c0, %c0_0] : memref<16x2048xf32, #tpu.memory_space<vmem>>, vector<16x2048xf32>
    %1 = arith.truncf %0 : vector<16x2048xf32> to vector<16x2048xbf16>
    %c0_1 = arith.constant 0 : index
    %c0_2 = arith.constant 0 : index
    %c0_3 = arith.constant 0 : index
    %c0_4 = arith.constant 0 : index
    %2 = vector.load %arg2[%c0_1, %c0_2, %c0_3, %c0_4] : memref<1x1x2048x512xbf16, #tpu.memory_space<vmem>>, vector<1x1x2048x512xbf16>
    %3 = vector.shape_cast %2 : vector<1x1x2048x512xbf16> to vector<2048x512xbf16>
    %cst = arith.constant dense<0.000000e+00> : vector<16x512xf32>
    %4 = tpu.matmul %1, %3, %cst {dimension_numbers = #tpu.dot_dimension_numbers<[1], [0], [0], [1], [0, 0, 1, 1], [], []>} : vector<16x2048xbf16>, vector<2048x512xbf16>, vector<16x512xf32> -> vector<16x512xf32>
    %c0_5 = arith.constant 0 : index
    %c0_6 = arith.constant 0 : index
    %c0_7 = arith.constant 0 : index
    %5 = vector.load %arg3[%c0_5, %c0_6, %c0_7] : memref<1x1x512xf32, #tpu.memory_space<vmem>>, vector<1x1x512xf32>
    %6 = vector.shape_cast %5 : vector<1x1x512xf32> to vector<1x512xf32>
    %7 = vector.broadcast %6 : vector<1x512xf32> to vector<16x512xf32>
    %8 = arith.addf %4, %7 : vector<16x512xf32>
    %9 = math.tanh %8 : vector<16x512xf32>
    %c0_8 = arith.constant 0 : index
    %c0_9 = arith.constant 0 : index
    %10 = vector.load %arg4[%c0_8, %c0_9] : memref<16x512xf32, #tpu.memory_space<vmem>>, vector<16x512xf32>
    tpu.vector_store %arg4[%c0_8, %c0_9], %9 {strides = array<i32>} : memref<16x512xf32, #tpu.memory_space<vmem>>, vector<16x512xf32>,
    return
  }
  func.func @transform_0(%arg0: i32) -> (i32, i32) {
    %c0_i32 = arith.constant 0 : i32
    %c0_i32_0 = arith.constant 0 : i32
    %c0_i32_1 = arith.constant 0 : i32
    return %c0_i32, %c0_i32_0 : i32, i32
  }
  func.func @transform_1(%arg0: i32) -> (i32, i32, i32, i32) {
    %c0_i32 = arith.constant 0 : i32
    %c0_i32_0 = arith.constant 0 : i32
    %c0_i32_1 = arith.constant 0 : i32
    %c0_i32_2 = arith.constant 0 : i32
    return %c0_i32, %arg0, %c0_i32_0, %c0_i32_1 : i32, i32, i32, i32
  }
  func.func @transform_2(%arg0: i32) -> (i32, i32, i32) {
    %c0_i32 = arith.constant 0 : i32
    %c0_i32_0 = arith.constant 0 : i32
    %c0_i32_1 = arith.constant 0 : i32
    return %c0_i32, %c0_i32_0, %arg0 : i32, i32, i32
  }
  func.func @transform_3(%arg0: i32) -> (i32, i32) {
    %c0_i32 = arith.constant 0 : i32
    %c0_i32_0 = arith.constant 0 : i32
    return %c0_i32, %arg0 : i32, i32
  }
}

</mosaic_0001>

<bundles_post_ra>
// kernel: get_derivatives_forward.5
= control target key start
LH: loop header
LB: loop body
LE: loop exit
PB: predicated region body
PF: predicated region fallthrough
CT: control target
= control target key end

     0   :  { %8 = vsyncpa [#allocation3], 0  ;;  %s8658_s0 = inlined_call_operand.vmem [shape: f32[16,2048], index: 0, kind: input, shape index: {}]   ;;  %s8659_s1 = inlined_call_operand.hbm [shape: bf16[3,4,2048,512], index: 1, kind: input, shape index: {}]   ;;  %s8660_s2 = inlined_call_operand.hbm [shape: f32[3,1,2048], index: 2, kind: input, shape index: {}]   ;;  %s8661_s3 = inlined_call_operand.vmem [shape: f32[16,2048], index: 3, kind: output, shape index: {}]  }
   0x1   :  { %10 = vsyncpa [#allocation3 + $0x1], 0 }
   0x2   :  { %11 = vsyncpa [#allocation5], 0 }
   0x3   :  { %13 = vsyncpa [#allocation5 + $0x1], 0  ;;  %s7142_s12 = smov 0   ;;  %s7144_s13 = smov 0  }
   0x4   :  { %s7146_s14 = smov 0   ;;  %s7148_s15 = smov 0  }
   0x5 LB: > { %s7161_s16 = sadd.s32 4294967295, %s7118_s15   ;;  %s7164_s17 = sadd.s32 1, %s7118_s15   ;;  %s7118_s15 = sphi %s7148_s15, %s8670_s15   ;;  %s7114_s14 = sphi %s7146_s14, %s8669_s14   ;;  %s7110_s13 = sphi %s7144_s13, %s8668_s13   ;;  %s7106_s12 = sphi %s7142_s12, %s8667_s12  }
   0x6   : > { %s44_s18 = ssub.s32 %s7118_s15, %s7164_s17  ;;  %s47_s19 = sadd.s32 1, %s7114_s14 }
   0x7   : > { %p45_p0 = scmp.eq.s32.totalorder %s44_s18, 0  ;;  %p54_p1 = scmp.ne.s32.totalorder %s7114_s14, %s7110_s13 }
   0x8   : > { %p55_p2 = scmp.eq.s32.totalorder %s7118_s15, 0  ;;  %p60_p3 = scmp.ne.s32.totalorder %s7110_s13, %s7106_s12 }
   0x9   : > { %s7174_s20 = scalar_select %p45_p0, %s7114_s14, %s47_s19  }
   0xa   : > { %p7176_p4 = por %p55_p2, %p54_p1  ;;  %p61_p5 = scmp.eq.s32.totalorder %s7161_s16, 0 }
   0xb   : > { %p110_p6 = scmp.eq.s32.totalorder %s7161_s16, 3  ;;  %p6983_p8 = scmp.lt.s32.totalorder %s7118_s15, 4 }
   0xc   : > { %p7182_p7 = por %p61_p5, %p60_p3  ;;  %s7192_s24 = sand.u32 1, %s7114_s14  }
   0xd   : > { %p7187_p9 = por %p110_p6, %p54_p1  ;;  %s4396_s25 = sshll.u32 %s7192_s24, 12 }
   0xe   : > { %s6458_s26 = sshll.u32 %s7118_s15, 12  ;;  %s143_s30 = scalar_lea.vmem [#allocation2], %s4396_s25 }
   0xf   : > { %s4328_s29 = scalar_lea.hbm %s8659_s1, %s6458_s26  ;;  %s152_s4 = sshll.u32 %s143_s30, 4  ;;  %s153_s4 = int_to_ptr.vmem [resolvable:$true] %s152_s4 }
  0x10   : > { %s4329_s5 = scalar_lea.hbm %s4328_s29, 32768  ;;  %p7201_p10 = pnand %p6983_p8, %p7176_p4 }
  0x11   : > { %s150_s6 = sshll.u32 %s4329_s5, 4  ;;  %s140_s8 = scalar_lea.sflag [#allocation3], %s7192_s24  ;;  %s151_s6 = int_to_ptr.hbm [resolvable:$true] %s150_s6 }
  0x12   : > { %s7020_s9 = sshra.s32 %s151_s6, 4  ;;  %p7024_p12 = pneg %p7201_p10  ;;  %s7021_s9 = int_to_ptr.hbm [resolvable:$true] %s7020_s9 }
  0x13   : > { %s7022_s10 = scalar_lea.hbm %s7021_s9, 4096  ;;  %s7027_s18 = scalar_lea.hbm %s8659_s1, 49152 }
  0x14   : > { %p7023_p11 = scmp.ne.s32.totalorder %s7021_s9, %s7022_s10  ;;  %p7028_p1 = scmp.lt.s32.totalorder %s7021_s9, %s8659_s1 }
  0x15   : > { %p7029_p2 = scmp.lt.s32.totalorder %s7027_s18, %s7022_s10 }
  0x16   : > { %p7025_p13 = pnand %p7024_p12, %p7023_p11 }
  0x17   : > { %p7030_p3 = por %p7029_p2, %p7028_p1 }
  0x18   : > { %p7026_p0 = pneg %p7025_p13 }
  0x1a   : > { %p7031_p4 = pnand %p7030_p3, %p7026_p0 }
  0x1c   : > { %7034 = shalt.err (!%p7031_p4)
}
  0x1d   : > { %s7120_s25 = smov 256   ;;  %s7121_s26 = smov 16  }
  0x1e   : > { %6979 = dma.hbm_to_vmem [thread:$0]  (!%p7201_p10), %s151_s6, 65536, %s153_s4, %s140_s8, %s7120_s25, %s7120_s25, %s7121_s26  }
  0x1f   : > { %p4401_p5 = scmp.ge.s32.totalorder %s7118_s15, 1  ;;  %p180_p6 = scmp.lt.s32.totalorder %s7118_s15, 5 }
  0x20   : > { %s4399_s27 = sshll.u32 %s7192_s24, 2  ;;  %s4400_s29 = sshll.u32 %s7118_s15, 2 }
  0x21   : > { %p7222_p8 = pnand %p4401_p5, %p180_p6  ;;  %s166_s30 = scalar_lea.vmem [#allocation4], %s4399_s27 }
  0x22   : > { %s175_s5 = sshll.u32 %s166_s30, 4  ;;  %s4334_s11 = scalar_lea.hbm %s8660_s2, %s4400_s29  ;;  %s176_s5 = int_to_ptr.vmem [resolvable:$true] %s175_s5 }
  0x23   : > { %s4335_s12 = scalar_lea.hbm %s4334_s11, 32  ;;  %s163_s4 = scalar_lea.sflag [#allocation5], %s7192_s24 }
  0x24   : > { %s173_s18 = sshll.u32 %s4335_s12, 4  ;;  %s7057_s21 = scalar_lea.hbm %s8660_s2, 48  ;;  %s174_s18 = int_to_ptr.hbm [resolvable:$true] %s173_s18 }
  0x25   : > { %s7050_s6 = sshra.s32 %s174_s18, 4  ;;  %s7051_s6 = int_to_ptr.hbm [resolvable:$true] %s7050_s6 }
  0x26   : > { %s7052_s8 = scalar_lea.hbm %s7051_s6, 4  ;;  %p7058_p1 = scmp.lt.s32.totalorder %s7051_s6, %s8660_s2 }
  0x27   : > { %p7053_p11 = scmp.ne.s32.totalorder %s7051_s6, %s7052_s8  ;;  %p7059_p2 = scmp.lt.s32.totalorder %s7057_s21, %s7052_s8 }
  0x29   : > { %p7055_p13 = pnand %p7053_p11, %p7024_p12  ;;  %p7060_p3 = por %p7059_p2, %p7058_p1 }
  0x2b   : > { %p7056_p0 = pneg %p7055_p13 }
  0x2d   : > { %p7061_p4 = pnand %p7060_p3, %p7056_p0 }
  0x2f   : > { %7064 = shalt.err (!%p7061_p4)
}
  0x30   : > { %6982 = dma.hbm_to_vmem [thread:$0]  (!%p7201_p10), %s174_s18, 64, %s176_s5, %s163_s4  }
  0x31   : > { %184 = sbr.rel (%p7222_p8) target bundleno = 733 (0x2dd), region = 32  ;;  %s7245_s24 = sand.u32 (!%p7222_p8), 1, %s7110_s13  }
  0x32   : > { %s4402_s27 = sshll.u32 (!%p7222_p8), %s7245_s24, 12  ;;  %s187_s29 = scalar_lea.sflag (!%p7222_p8), [#allocation3], %s7245_s24 }
  0x33   : > { %s7249_s30 = scalar_lea.vmem (!%p7222_p8), [#allocation2], %s4402_s27 }
  0x36   : > { %7097 = dma.done.wait (%p7182_p7), %s187_s29, 65536  }
  0x37   : > { %7099 = vsyncadd (%p7182_p7), %s187_s29, 4294901760  ;;  %s4403_s7 = sshll.u32 %s7245_s24, 2  ;;  %s197_s28 = scalar_lea.sflag [#allocation5], %s7245_s24 }
  0x38   : > { %s7257_s5 = scalar_lea.vmem [#allocation4], %s4403_s7 }
  0x39   : > { %7101 = dma.done.wait (%p7182_p7), %s197_s28, 64  }
  0x3a   : > { %7103 = vsyncadd (%p7182_p7), %s197_s28, 4294967232  ;;  %v4519_v0 = vld [vmem:[%s7249_s30 + $0xe0] sm:$0xf]  ;;  %v6489_v1 = vld [vmem:[%s7249_s30 + $0xec] sm:$0xf0]  ;;  %s4404_s19 = sshll.u32 %s7245_s24, 6 }
  0x3b   : > { %v4647_v2 = vld [vmem:[%s7249_s30 + $0x1e0] sm:$0xf]  ;;  %v4520_v3 = vor.u32 %v6489_v1, %v4519_v0  ;;  %v6521_v4 = vld [vmem:[%s7249_s30 + $0x1ec] sm:$0xf0]  ;;  %s8039_s21 = scalar_lea.vmem [#allocation6], %s4404_s19  ;;  %s6971_s24 = sshll.u32 (%p7187_p9), %s7161_s16, 5 }
  0x3c   : > { %v4775_v5 = vld [vmem:[%s7249_s30 + $0x2e0] sm:$0xf]  ;;  %v6553_v6 = vld [vmem:[%s7249_s30 + $0x2ec] sm:$0xf0]  ;;  %v4648_v7 = vor.u32 %v6521_v4, %v4647_v2  ;;  %s4273_s25 = scalar_lea.vmem (%p7187_p9), %s8661_s3, %s6971_s24 }
  0x3d   : > { %v4776_v8 = vor.u32 %v6553_v6, %v4775_v5  ;;  %v4903_v9 = vld [vmem:[%s7249_s30 + $0x3e0] sm:$0xf]  ;;  %v6585_v10 = vld [vmem:[%s7249_s30 + $0x3ec] sm:$0xf0]  ;;  %3360 = vmatpush.bf16.msra.mxu0 %v4520_v3 }
  0x3e   : > { %v4503_v11 = vld [vmem:[%s7249_s30 + $0xc0] sm:$0xf]  ;;  %v4904_v12 = vor.u32 %v6585_v10, %v4903_v9  ;;  %v6485_v13 = vld [vmem:[%s7249_s30 + $0xcc] sm:$0xf0]  ;;  %3374 = vmatpush.bf16.msra.mxu1 %v4648_v7 }
  0x3f   : > { %v4631_v14 = vld [vmem:[%s7249_s30 + $0x1c0] sm:$0xf]  ;;  %v6517_v15 = vld [vmem:[%s7249_s30 + $0x1cc] sm:$0xf0]  ;;  %3388 = vmatpush.bf16.msra.mxu2 %v4776_v8  ;;  %v4504_v16 = vor.u32 %v6485_v13, %v4503_v11 }
  0x40   : > { %v4632_v17 = vor.u32 %v6517_v15, %v4631_v14  ;;  %v4759_v18 = vld [vmem:[%s7249_s30 + $0x2c0] sm:$0xf]  ;;  %v6549_v19 = vld [vmem:[%s7249_s30 + $0x2cc] sm:$0xf0]  ;;  %3402 = vmatpush.bf16.msra.mxu3 %v4904_v12 }
  0x41   : > { %v4887_v20 = vld [vmem:[%s7249_s30 + $0x3c0] sm:$0xf]  ;;  %v4760_v21 = vor.u32 %v6549_v19, %v4759_v18  ;;  %v6581_v22 = vld [vmem:[%s7249_s30 + $0x3cc] sm:$0xf0]  ;;  %3361 = vmatpush.bf16.msra.mxu0 %v4504_v16 }
  0x42   : > { %v4487_v23 = vld [vmem:[%s7249_s30 + $0xa0] sm:$0xf]  ;;  %v6481_v24 = vld [vmem:[%s7249_s30 + $0xac] sm:$0xf0]  ;;  %v4888_v25 = vor.u32 %v6581_v22, %v4887_v20  ;;  %3375 = vmatpush.bf16.msra.mxu1 %v4632_v17 }
  0x43   : > { %v4615_v26 = vld [vmem:[%s7249_s30 + $0x1a0] sm:$0xf]  ;;  %v6513_v27 = vld [vmem:[%s7249_s30 + $0x1ac] sm:$0xf0]  ;;  %v4488_v29 = vor.u32 %v6481_v24, %v4487_v23  ;;  %3389 = vmatpush.bf16.msra.mxu2 %v4760_v21 }
  0x44   : > { %v4743_v28 = vld [vmem:[%s7249_s30 + $0x2a0] sm:$0xf]  ;;  %v6545_v30 = vld [vmem:[%s7249_s30 + $0x2ac] sm:$0xf0]  ;;  %v4616_v33 = vor.u32 %v6513_v27, %v4615_v26  ;;  %3403 = vmatpush.bf16.msra.mxu3 %v4888_v25 }
  0x45   : > { %v4871_v31 = vld [vmem:[%s7249_s30 + $0x3a0] sm:$0xf]  ;;  %v6577_v32 = vld [vmem:[%s7249_s30 + $0x3ac] sm:$0xf0]  ;;  %v4744_v34 = vor.u32 %v6545_v30, %v4743_v28  ;;  %3362 = vmatpush.bf16.msra.mxu0 %v4488_v29 }
  0x46   : > { %v4471_v35 = vld [vmem:[%s7249_s30 + $0x80] sm:$0xf]  ;;  %v6477_v36 = vld [vmem:[%s7249_s30 + $0x8c] sm:$0xf0]  ;;  %v4872_v38 = vor.u32 %v6577_v32, %v4871_v31  ;;  %3376 = vmatpush.bf16.msra.mxu1 %v4616_v33 }
  0x47   : > { %v4599_v37 = vld [vmem:[%s7249_s30 + $0x180] sm:$0xf]  ;;  %v6509_v39 = vld [vmem:[%s7249_s30 + $0x18c] sm:$0xf0]  ;;  %v4472_v44 = vor.u32 %v6477_v36, %v4471_v35  ;;  %3390 = vmatpush.bf16.msra.mxu2 %v4744_v34 }
  0x48   : > { %v4727_v40 = vld [vmem:[%s7249_s30 + $0x280] sm:$0xf]  ;;  %v6541_v41 = vld [vmem:[%s7249_s30 + $0x28c] sm:$0xf0]  ;;  %v4600_v45 = vor.u32 %v6509_v39, %v4599_v37  ;;  %3404 = vmatpush.bf16.msra.mxu3 %v4872_v38 }
  0x49   : > { %v4855_v42 = vld [vmem:[%s7249_s30 + $0x380] sm:$0xf]  ;;  %v6573_v43 = vld [vmem:[%s7249_s30 + $0x38c] sm:$0xf0]  ;;  %v4728_v46 = vor.u32 %v6541_v41, %v4727_v40  ;;  %3363 = vmatpush.bf16.msra.mxu0 %v4472_v44 }
  0x4a   : > { %v4455_v47 = vld [vmem:[%s7249_s30 + $0x60] sm:$0xf]  ;;  %v6473_v48 = vld [vmem:[%s7249_s30 + $0x6c] sm:$0xf0]  ;;  %v4856_v50 = vor.u32 %v6573_v43, %v4855_v42  ;;  %3377 = vmatpush.bf16.msra.mxu1 %v4600_v45 }
  0x4b   : > { %v4583_v49 = vld [vmem:[%s7249_s30 + $0x160] sm:$0xf]  ;;  %v6505_v51 = vld [vmem:[%s7249_s30 + $0x16c] sm:$0xf0]  ;;  %v4456_v56 = vor.u32 %v6473_v48, %v4455_v47  ;;  %3391 = vmatpush.bf16.msra.mxu2 %v4728_v46 }
  0x4c   : > { %v4711_v52 = vld [vmem:[%s7249_s30 + $0x260] sm:$0xf]  ;;  %v6537_v53 = vld [vmem:[%s7249_s30 + $0x26c] sm:$0xf0]  ;;  %v4584_v57 = vor.u32 %v6505_v51, %v4583_v49  ;;  %3405 = vmatpush.bf16.msra.mxu3 %v4856_v50 }
  0x4d   : > { %v4839_v54 = vld [vmem:[%s7249_s30 + $0x360] sm:$0xf]  ;;  %v6569_v55 = vld [vmem:[%s7249_s30 + $0x36c] sm:$0xf0]  ;;  %v4712_v58 = vor.u32 %v6537_v53, %v4711_v52  ;;  %3364 = vmatpush.bf16.msra.mxu0 %v4456_v56 }
  0x4e   : > { %v4439_v59 = vld [vmem:[%s7249_s30 + $0x40] sm:$0xf]  ;;  %v6469_v60 = vld [vmem:[%s7249_s30 + $0x4c] sm:$0xf0]  ;;  %v4840_v62 = vor.u32 %v6569_v55, %v4839_v54  ;;  %3378 = vmatpush.bf16.msra.mxu1 %v4584_v57 }
  0x4f   : > { %v4567_v61 = vld [vmem:[%s7249_s30 + $0x140] sm:$0xf]  ;;  %v6501_v63 = vld [vmem:[%s7249_s30 + $0x14c] sm:$0xf0]  ;;  %v4440_v4 = vor.u32 %v6469_v60, %v4439_v59  ;;  %3392 = vmatpush.bf16.msra.mxu2 %v4712_v58 }
  0x50   : > { %v4695_v0 = vld [vmem:[%s7249_s30 + $0x240] sm:$0xf]  ;;  %v6533_v1 = vld [vmem:[%s7249_s30 + $0x24c] sm:$0xf0]  ;;  %v4568_v5 = vor.u32 %v6501_v63, %v4567_v61  ;;  %3406 = vmatpush.bf16.msra.mxu3 %v4840_v62 }
  0x51   : > { %v4823_v2 = vld [vmem:[%s7249_s30 + $0x340] sm:$0xf]  ;;  %v6565_v3 = vld [vmem:[%s7249_s30 + $0x34c] sm:$0xf0]  ;;  %v4696_v6 = vor.u32 %v6533_v1, %v4695_v0  ;;  %3365 = vmatpush.bf16.msra.mxu0 %v4440_v4 }
  0x52   : > { %v4423_v7 = vld [vmem:[%s7249_s30 + $0x20] sm:$0xf]  ;;  %v6465_v8 = vld [vmem:[%s7249_s30 + $0x2c] sm:$0xf0]  ;;  %v4824_v10 = vor.u32 %v6565_v3, %v4823_v2  ;;  %3379 = vmatpush.bf16.msra.mxu1 %v4568_v5 }
  0x53   : > { %v4551_v9 = vld [vmem:[%s7249_s30 + $0x120] sm:$0xf]  ;;  %v6497_v11 = vld [vmem:[%s7249_s30 + $0x12c] sm:$0xf0]  ;;  %v4424_v16 = vor.u32 %v6465_v8, %v4423_v7  ;;  %3393 = vmatpush.bf16.msra.mxu2 %v4696_v6  ;;  %v231_v6 = vld [vmem:[%s8658_s0 + $0x8] sm:$0xff] }
  0x54   : > { %v4679_v12 = vld [vmem:[%s7249_s30 + $0x220] sm:$0xf]  ;;  %v6529_v13 = vld [vmem:[%s7249_s30 + $0x22c] sm:$0xf0]  ;;  %v4552_v19 = vor.u32 %v6497_v11, %v4551_v9  ;;  %3407 = vmatpush.bf16.msra.mxu3 %v4824_v10  ;;  %v247_v7 = vld [vmem:[%s8658_s0 + $0x88] sm:$0xff] }
  0x55   : > { %v4807_v14 = vld [vmem:[%s7249_s30 + $0x320] sm:$0xf]  ;;  %v6561_v15 = vld [vmem:[%s7249_s30 + $0x32c] sm:$0xf0]  ;;  %v4680_v20 = vor.u32 %v6529_v13, %v4679_v12  ;;  %3366 = vmatpush.bf16.msra.mxu0 %v4424_v16  ;;  %v233_v8 = vld [vmem:[%s8658_s0 + $0x18] sm:$0xff]  ;;  %v7378_v10 = vpack.c.bf16 %v247_v7, %v231_v6 }
  0x56   : > { %v4407_v17 = vld [vmem:[%s7249_s30] sm:$0xf]  ;;  %v6461_v18 = vld [vmem:[%s7249_s30 + $0xc] sm:$0xf0]  ;;  %v4808_v24 = vor.u32 %v6561_v15, %v4807_v14  ;;  %3380 = vmatpush.bf16.msra.mxu1 %v4552_v19  ;;  %v249_v11 = vld [vmem:[%s8658_s0 + $0x98] sm:$0xff] }
  0x57   : > { %v4535_v21 = vld [vmem:[%s7249_s30 + $0x100] sm:$0xf]  ;;  %v6493_v22 = vld [vmem:[%s7249_s30 + $0x10c] sm:$0xf0]  ;;  %v4408_v31 = vor.u32 %v6461_v18, %v4407_v17  ;;  %3394 = vmatpush.bf16.msra.mxu2 %v4680_v20  ;;  %v7386_v17 = vpack.c.bf16 %v249_v11, %v233_v8 }
  0x58   : > { %v4663_v23 = vld [vmem:[%s7249_s30 + $0x200] sm:$0xf]  ;;  %v6525_v25 = vld [vmem:[%s7249_s30 + $0x20c] sm:$0xf0]  ;;  %v4536_v35 = vor.u32 %v6493_v22, %v4535_v21  ;;  %3408 = vmatpush.bf16.msra.mxu3 %v4808_v24 }
  0x59   : > { %v4791_v26 = vld [vmem:[%s7249_s30 + $0x300] sm:$0xf]  ;;  %v6557_v27 = vld [vmem:[%s7249_s30 + $0x30c] sm:$0xf0]  ;;  %v4664_v36 = vor.u32 %v6525_v25, %v4663_v23  ;;  %3367 = vmatpush.bf16.msra.mxu0 %v4408_v31 }
  0x5a   : > { %v5031_v28 = vld [vmem:[%s7249_s30 + $0x4e0] sm:$0xf]  ;;  %v6617_v29 = vld [vmem:[%s7249_s30 + $0x4ec] sm:$0xf0]  ;;  %v4792_v39 = vor.u32 %v6557_v27, %v4791_v26  ;;  %3381 = vmatpush.bf16.msra.mxu1 %v4536_v35 }
  0x5b   : > { %v5159_v30 = vld [vmem:[%s7249_s30 + $0x5e0] sm:$0xf]  ;;  %v6649_v32 = vld [vmem:[%s7249_s30 + $0x5ec] sm:$0xf0]  ;;  %v5032_v40 = vor.u32 %v6617_v29, %v5031_v28  ;;  %3395 = vmatpush.bf16.msra.mxu2 %v4664_v36 }
  0x5c   : > { %v5287_v33 = vld [vmem:[%s7249_s30 + $0x6e0] sm:$0xf]  ;;  %v6681_v34 = vld [vmem:[%s7249_s30 + $0x6ec] sm:$0xf0]  ;;  %v5160_v43 = vor.u32 %v6649_v32, %v5159_v30  ;;  %3409 = vmatpush.bf16.msra.mxu3 %v4792_v39 }
  0x5d   : > { %v5415_v37 = vld [vmem:[%s7249_s30 + $0x7e0] sm:$0xf]  ;;  %v6713_v38 = vld [vmem:[%s7249_s30 + $0x7ec] sm:$0xf0]  ;;  %v5288_v44 = vor.u32 %v6681_v34, %v5287_v33  ;;  %3416 = vmatpush.bf16.msrb.mxu0 %v5032_v40  ;;  %3382 = vmatmul.bf16.vlgmr.msra.gmra.mxu1 %v7378_v10 }
  0x5e   : > { %v5015_v41 = vld [vmem:[%s7249_s30 + $0x4c0] sm:$0xf]  ;;  %v6613_v42 = vld [vmem:[%s7249_s30 + $0x4cc] sm:$0xf0]  ;;  %v5416_v48 = vor.u32 %v6713_v38, %v5415_v37  ;;  %3430 = vmatpush.bf16.msrb.mxu1 %v5160_v43 }
  0x5f   : > { %v5143_v45 = vld [vmem:[%s7249_s30 + $0x5c0] sm:$0xf]  ;;  %v6645_v46 = vld [vmem:[%s7249_s30 + $0x5cc] sm:$0xf0]  ;;  %v5016_v55 = vor.u32 %v6613_v42, %v5015_v41  ;;  %3444 = vmatpush.bf16.msrb.mxu2 %v5288_v44  ;;  %3410 = vmatmul.bf16.vlgmr.msra.gmra.mxu3 %v7386_v17 }
  0x60   : > { %v5271_v47 = vld [vmem:[%s7249_s30 + $0x6c0] sm:$0xf]  ;;  %v6677_v49 = vld [vmem:[%s7249_s30 + $0x6cc] sm:$0xf0]  ;;  %v5144_v60 = vor.u32 %v6645_v46, %v5143_v45  ;;  %3458 = vmatpush.bf16.msrb.mxu3 %v5416_v48 }
  0x61   : > { %v5399_v50 = vld [vmem:[%s7249_s30 + $0x7c0] sm:$0xf]  ;;  %v6709_v51 = vld [vmem:[%s7249_s30 + $0x7cc] sm:$0xf0]  ;;  %v5272_v61 = vor.u32 %v6677_v49, %v5271_v47  ;;  %3417 = vmatpush.bf16.msrb.mxu0 %v5016_v55 }
  0x62   : > { %v230_v52 = vld [vmem:[%s8658_s0] sm:$0xff]  ;;  %v232_v54 = vld [vmem:[%s8658_s0 + $0x10] sm:$0xff]  ;;  %v5400_v2 = vor.u32 %v6709_v51, %v5399_v50  ;;  %3431 = vmatpush.bf16.msrb.mxu1 %v5144_v60 }
  0x63   : > { %v246_v53 = vld [vmem:[%s8658_s0 + $0x80] sm:$0xff]  ;;  %v6609_v57 = vld [vmem:[%s7249_s30 + $0x4ac] sm:$0xf0]  ;;  %3445 = vmatpush.bf16.msrb.mxu2 %v5272_v61 }
  0x64   : > { %v4999_v56 = vld [vmem:[%s7249_s30 + $0x4a0] sm:$0xf]  ;;  %v7354_v58 = vpack.c.bf16 %v246_v53, %v230_v52  ;;  %v248_v59 = vld [vmem:[%s8658_s0 + $0x90] sm:$0xff]  ;;  %3459 = vmatpush.bf16.msrb.mxu3 %v5400_v2 }
  0x65   : > { %v5127_v62 = vld [vmem:[%s7249_s30 + $0x5a0] sm:$0xf]  ;;  %v6641_v63 = vld [vmem:[%s7249_s30 + $0x5ac] sm:$0xf0]  ;;  %v7362_v1 = vpack.c.bf16 %v248_v59, %v232_v54  ;;  %v5000_v9 = vor.u32 %v6609_v57, %v4999_v56 }
  0x66   : > { %v5255_v0 = vld [vmem:[%s7249_s30 + $0x6a0] sm:$0xf]  ;;  %v6673_v3 = vld [vmem:[%s7249_s30 + $0x6ac] sm:$0xf0]  ;;  %3368 = vmatmul.bf16.vlgmr.msra.gmra.mxu0 %v7354_v58  ;;  %v5128_v12 = vor.u32 %v6641_v63, %v5127_v62 }
  0x67   : > { %v5383_v4 = vld [vmem:[%s7249_s30 + $0x7a0] sm:$0xf]  ;;  %v6705_v5 = vld [vmem:[%s7249_s30 + $0x7ac] sm:$0xf0]  ;;  %3396 = vmatmul.bf16.vlgmr.msra.gmra.mxu2 %v7362_v1  ;;  %v5256_v13 = vor.u32 %v6673_v3, %v5255_v0  ;;  %3418 = vmatpush.bf16.msrb.mxu0 %v5000_v9 }
  0x68   : > { %v4983_v14 = vld [vmem:[%s7249_s30 + $0x480] sm:$0xf]  ;;  %v6605_v15 = vld [vmem:[%s7249_s30 + $0x48c] sm:$0xf0]  ;;  %v5384_v18 = vor.u32 %v6705_v5, %v5383_v4  ;;  %3432 = vmatpush.bf16.msrb.mxu1 %v5128_v12 }
  0x69   : > { %v5111_v16 = vld [vmem:[%s7249_s30 + $0x580] sm:$0xf]  ;;  %v6637_v19 = vld [vmem:[%s7249_s30 + $0x58c] sm:$0xf0]  ;;  %v4984_v24 = vor.u32 %v6605_v15, %v4983_v14  ;;  %3446 = vmatpush.bf16.msrb.mxu2 %v5256_v13 }
  0x6a   : > { %v5239_v20 = vld [vmem:[%s7249_s30 + $0x680] sm:$0xf]  ;;  %v6669_v21 = vld [vmem:[%s7249_s30 + $0x68c] sm:$0xf0]  ;;  %v5112_v25 = vor.u32 %v6637_v19, %v5111_v16  ;;  %3460 = vmatpush.bf16.msrb.mxu3 %v5384_v18 }
  0x6b   : > { %v5367_v22 = vld [vmem:[%s7249_s30 + $0x780] sm:$0xf]  ;;  %v6701_v23 = vld [vmem:[%s7249_s30 + $0x78c] sm:$0xf0]  ;;  %v5240_v26 = vor.u32 %v6669_v21, %v5239_v20  ;;  %3419 = vmatpush.bf16.msrb.mxu0 %v4984_v24 }
  0x6c   : > { %v4967_v27 = vld [vmem:[%s7249_s30 + $0x460] sm:$0xf]  ;;  %v6601_v28 = vld [vmem:[%s7249_s30 + $0x46c] sm:$0xf0]  ;;  %v5368_v30 = vor.u32 %v6701_v23, %v5367_v22  ;;  %3433 = vmatpush.bf16.msrb.mxu1 %v5112_v25 }
  0x6d   : > { %v5095_v29 = vld [vmem:[%s7249_s30 + $0x560] sm:$0xf]  ;;  %v6633_v31 = vld [vmem:[%s7249_s30 + $0x56c] sm:$0xf0]  ;;  %v4968_v36 = vor.u32 %v6601_v28, %v4967_v27  ;;  %3447 = vmatpush.bf16.msrb.mxu2 %v5240_v26  ;;  %v235_v27 = vld [vmem:[%s8658_s0 + $0x28] sm:$0xff] }
  0x6e   : > { %v5223_v32 = vld [vmem:[%s7249_s30 + $0x660] sm:$0xf]  ;;  %v6665_v33 = vld [vmem:[%s7249_s30 + $0x66c] sm:$0xf0]  ;;  %v5096_v37 = vor.u32 %v6633_v31, %v5095_v29  ;;  %3461 = vmatpush.bf16.msrb.mxu3 %v5368_v30  ;;  %v251_v30 = vld [vmem:[%s8658_s0 + $0xa8] sm:$0xff] }
  0x6f   : > { %v5351_v34 = vld [vmem:[%s7249_s30 + $0x760] sm:$0xf]  ;;  %v6697_v35 = vld [vmem:[%s7249_s30 + $0x76c] sm:$0xf0]  ;;  %v5224_v38 = vor.u32 %v6665_v33, %v5223_v32  ;;  %3420 = vmatpush.bf16.msrb.mxu0 %v4968_v36  ;;  %v237_v31 = vld [vmem:[%s8658_s0 + $0x38] sm:$0xff] }
  0x70   : > { %v4951_v39 = vld [vmem:[%s7249_s30 + $0x440] sm:$0xf]  ;;  %v6597_v40 = vld [vmem:[%s7249_s30 + $0x44c] sm:$0xf0]  ;;  %v5352_v42 = vor.u32 %v6697_v35, %v5351_v34  ;;  %3434 = vmatpush.bf16.msrb.mxu1 %v5096_v37  ;;  %v253_v32 = vld [vmem:[%s8658_s0 + $0xb8] sm:$0xff] }
  0x71   : > { %v5079_v41 = vld [vmem:[%s7249_s30 + $0x540] sm:$0xf]  ;;  %v6629_v43 = vld [vmem:[%s7249_s30 + $0x54c] sm:$0xf0]  ;;  %v4952_v48 = vor.u32 %v6597_v40, %v4951_v39  ;;  %3448 = vmatpush.bf16.msrb.mxu2 %v5224_v38 }
  0x72   : > { %v5207_v44 = vld [vmem:[%s7249_s30 + $0x640] sm:$0xf]  ;;  %v6661_v45 = vld [vmem:[%s7249_s30 + $0x64c] sm:$0xf0]  ;;  %v5080_v50 = vor.u32 %v6629_v43, %v5079_v41  ;;  %3462 = vmatpush.bf16.msrb.mxu3 %v5352_v42 }
  0x73   : > { %v5335_v46 = vld [vmem:[%s7249_s30 + $0x740] sm:$0xf]  ;;  %v6693_v47 = vld [vmem:[%s7249_s30 + $0x74c] sm:$0xf0]  ;;  %v5208_v51 = vor.u32 %v6661_v45, %v5207_v44  ;;  %3421 = vmatpush.bf16.msrb.mxu0 %v4952_v48  ;;  %v7469_v44 = vpack.c.bf16 %v251_v30, %v235_v27 }
  0x74   : > { %v4935_v49 = vld [vmem:[%s7249_s30 + $0x420] sm:$0xf]  ;;  %v6593_v52 = vld [vmem:[%s7249_s30 + $0x42c] sm:$0xf0]  ;;  %v5336_v55 = vor.u32 %v6693_v47, %v5335_v46  ;;  %3435 = vmatpush.bf16.msrb.mxu1 %v5080_v50  ;;  %v7473_v47 = vpack.c.bf16 %v253_v32, %v237_v31 }
  0x75   : > { %v5063_v53 = vld [vmem:[%s7249_s30 + $0x520] sm:$0xf]  ;;  %v6625_v54 = vld [vmem:[%s7249_s30 + $0x52c] sm:$0xf0]  ;;  %v4936_v63 = vor.u32 %v6593_v52, %v4935_v49  ;;  %3449 = vmatpush.bf16.msrb.mxu2 %v5208_v51 }
  0x76   : > { %v5191_v56 = vld [vmem:[%s7249_s30 + $0x620] sm:$0xf]  ;;  %v6657_v57 = vld [vmem:[%s7249_s30 + $0x62c] sm:$0xf0]  ;;  %v5064_v5 = vor.u32 %v6625_v54, %v5063_v53  ;;  %3463 = vmatpush.bf16.msrb.mxu3 %v5336_v55 }
  0x77   : > { %v5319_v59 = vld [vmem:[%s7249_s30 + $0x720] sm:$0xf]  ;;  %v6689_v60 = vld [vmem:[%s7249_s30 + $0x72c] sm:$0xf0]  ;;  %v5192_v6 = vor.u32 %v6657_v57, %v5191_v56  ;;  %3422 = vmatpush.bf16.msrb.mxu0 %v4936_v63 }
  0x78   : > { %v4919_v61 = vld [vmem:[%s7249_s30 + $0x400] sm:$0xf]  ;;  %v6589_v62 = vld [vmem:[%s7249_s30 + $0x40c] sm:$0xf0]  ;;  %v5320_v11 = vor.u32 %v6689_v60, %v5319_v59  ;;  %3436 = vmatpush.bf16.msrb.mxu1 %v5064_v5 }
  0x79   : > { %v5047_v0 = vld [vmem:[%s7249_s30 + $0x500] sm:$0xf]  ;;  %v6621_v2 = vld [vmem:[%s7249_s30 + $0x50c] sm:$0xf0]  ;;  %v4920_v19 = vor.u32 %v6589_v62, %v4919_v61  ;;  %3450 = vmatpush.bf16.msrb.mxu2 %v5192_v6 }
  0x7a   : > { %v5175_v3 = vld [vmem:[%s7249_s30 + $0x600] sm:$0xf]  ;;  %v6653_v4 = vld [vmem:[%s7249_s30 + $0x60c] sm:$0xf0]  ;;  %v5048_v23 = vor.u32 %v6621_v2, %v5047_v0  ;;  %3464 = vmatpush.bf16.msrb.mxu3 %v5320_v11 }
  0x7b   : > { %v5303_v7 = vld [vmem:[%s7249_s30 + $0x700] sm:$0xf]  ;;  %v6685_v8 = vld [vmem:[%s7249_s30 + $0x70c] sm:$0xf0]  ;;  %v5176_v24 = vor.u32 %v6653_v4, %v5175_v3  ;;  %3423 = vmatpush.bf16.msrb.mxu0 %v4920_v19 }
  0x7c   : > { %v5543_v9 = vld [vmem:[%s7249_s30 + $0x8e0] sm:$0xf]  ;;  %v6745_v12 = vld [vmem:[%s7249_s30 + $0x8ec] sm:$0xf0]  ;;  %v5304_v28 = vor.u32 %v6685_v8, %v5303_v7  ;;  %3437 = vmatpush.bf16.msrb.mxu1 %v5048_v23 }
  0x7d   : > { %v5671_v13 = vld [vmem:[%s7249_s30 + $0x9e0] sm:$0xf]  ;;  %v6777_v14 = vld [vmem:[%s7249_s30 + $0x9ec] sm:$0xf0]  ;;  %v5544_v29 = vor.u32 %v6745_v12, %v5543_v9  ;;  %3451 = vmatpush.bf16.msrb.mxu2 %v5176_v24 }
  0x7e   : > { %v5799_v15 = vld [vmem:[%s7249_s30 + $0xae0] sm:$0xf]  ;;  %v6809_v16 = vld [vmem:[%s7249_s30 + $0xaec] sm:$0xf0]  ;;  %v5672_v33 = vor.u32 %v6777_v14, %v5671_v13  ;;  %3465 = vmatpush.bf16.msrb.mxu3 %v5304_v28 }
  0x7f   : > { %v5927_v18 = vld [vmem:[%s7249_s30 + $0xbe0] sm:$0xf]  ;;  %v6841_v20 = vld [vmem:[%s7249_s30 + $0xbec] sm:$0xf0]  ;;  %v5800_v34 = vor.u32 %v6809_v16, %v5799_v15  ;;  %3472 = vmatpush.bf16.msra.mxu0 %v5544_v29  ;;  %3438 = vmatmul.bf16.vlgmr.msrb.gmra.mxu1 %v7469_v44 }
  0x80   : > { %v234_v21 = vld [vmem:[%s8658_s0 + $0x20] sm:$0xff]  ;;  %v236_v25 = vld [vmem:[%s8658_s0 + $0x30] sm:$0xff]  ;;  %v5928_v38 = vor.u32 %v6841_v20, %v5927_v18  ;;  %3486 = vmatpush.bf16.msra.mxu1 %v5672_v33 }
  0x81   : > { %v250_v22 = vld [vmem:[%s8658_s0 + $0xa0] sm:$0xff]  ;;  %v252_v26 = vld [vmem:[%s8658_s0 + $0xb0] sm:$0xff]  ;;  %3500 = vmatpush.bf16.msra.mxu2 %v5800_v34  ;;  %3466 = vmatmul.bf16.vlgmr.msrb.gmra.mxu3 %v7473_v47 }
  0x82   : > { %v5527_v35 = vld [vmem:[%s7249_s30 + $0x8c0] sm:$0xf]  ;;  %v6741_v36 = vld [vmem:[%s7249_s30 + $0x8cc] sm:$0xf0]  ;;  %v7462_v39 = vpack.c.bf16 %v250_v22, %v234_v21  ;;  %v7467_v43 = vpack.c.bf16 %v252_v26, %v236_v25  ;;  %3514 = vmatpush.bf16.msra.mxu3 %v5928_v38 }
  0x83   : > { %v5655_v37 = vld [vmem:[%s7249_s30 + $0x9c0] sm:$0xf]  ;;  %v6773_v40 = vld [vmem:[%s7249_s30 + $0x9cc] sm:$0xf0]  ;;  %v5528_v48 = vor.u32 %v6741_v36, %v5527_v35 }
  0x84   : > { %v5783_v41 = vld [vmem:[%s7249_s30 + $0xac0] sm:$0xf]  ;;  %v6805_v42 = vld [vmem:[%s7249_s30 + $0xacc] sm:$0xf0]  ;;  %v5656_v49 = vor.u32 %v6773_v40, %v5655_v37  ;;  %3424 = vmatmul.bf16.vlgmr.msrb.gmra.mxu0 %v7462_v39  ;;  %3452 = vmatmul.bf16.vlgmr.msrb.gmra.mxu2 %v7467_v43 }
  0x85   : > { %v5911_v45 = vld [vmem:[%s7249_s30 + $0xbc0] sm:$0xf]  ;;  %v6837_v46 = vld [vmem:[%s7249_s30 + $0xbcc] sm:$0xf0]  ;;  %v5784_v50 = vor.u32 %v6805_v42, %v5783_v41  ;;  %3473 = vmatpush.bf16.msra.mxu0 %v5528_v48 }
  0x86   : > { %v5511_v51 = vld [vmem:[%s7249_s30 + $0x8a0] sm:$0xf]  ;;  %v6737_v52 = vld [vmem:[%s7249_s30 + $0x8ac] sm:$0xf0]  ;;  %v5912_v54 = vor.u32 %v6837_v46, %v5911_v45  ;;  %3487 = vmatpush.bf16.msra.mxu1 %v5656_v49 }
  0x87   : > { %v5639_v53 = vld [vmem:[%s7249_s30 + $0x9a0] sm:$0xf]  ;;  %v6769_v55 = vld [vmem:[%s7249_s30 + $0x9ac] sm:$0xf0]  ;;  %v5512_v61 = vor.u32 %v6737_v52, %v5511_v51  ;;  %3501 = vmatpush.bf16.msra.mxu2 %v5784_v50 }
  0x88   : > { %v5767_v56 = vld [vmem:[%s7249_s30 + $0xaa0] sm:$0xf]  ;;  %v6801_v57 = vld [vmem:[%s7249_s30 + $0xaac] sm:$0xf0]  ;;  %v5640_v62 = vor.u32 %v6769_v55, %v5639_v53  ;;  %3515 = vmatpush.bf16.msra.mxu3 %v5912_v54 }
  0x89   : > { %v5895_v59 = vld [vmem:[%s7249_s30 + $0xba0] sm:$0xf]  ;;  %v6833_v60 = vld [vmem:[%s7249_s30 + $0xbac] sm:$0xf0]  ;;  %v5768_v63 = vor.u32 %v6801_v57, %v5767_v56  ;;  %3474 = vmatpush.bf16.msra.mxu0 %v5512_v61 }
  0x8a   : > { %v5495_v0 = vld [vmem:[%s7249_s30 + $0x880] sm:$0xf]  ;;  %v6733_v2 = vld [vmem:[%s7249_s30 + $0x88c] sm:$0xf0]  ;;  %v5896_v4 = vor.u32 %v6833_v60, %v5895_v59  ;;  %3488 = vmatpush.bf16.msra.mxu1 %v5640_v62 }
  0x8b   : > { %v5623_v3 = vld [vmem:[%s7249_s30 + $0x980] sm:$0xf]  ;;  %v6765_v5 = vld [vmem:[%s7249_s30 + $0x98c] sm:$0xf0]  ;;  %v5496_v11 = vor.u32 %v6733_v2, %v5495_v0  ;;  %3502 = vmatpush.bf16.msra.mxu2 %v5768_v63 }
  0x8c   : > { %v5751_v6 = vld [vmem:[%s7249_s30 + $0xa80] sm:$0xf]  ;;  %v6797_v7 = vld [vmem:[%s7249_s30 + $0xa8c] sm:$0xf0]  ;;  %v5624_v12 = vor.u32 %v6765_v5, %v5623_v3  ;;  %3516 = vmatpush.bf16.msra.mxu3 %v5896_v4 }
  0x8d   : > { %v5879_v8 = vld [vmem:[%s7249_s30 + $0xb80] sm:$0xf]  ;;  %v6829_v9 = vld [vmem:[%s7249_s30 + $0xb8c] sm:$0xf0]  ;;  %v5752_v13 = vor.u32 %v6797_v7, %v5751_v6  ;;  %3475 = vmatpush.bf16.msra.mxu0 %v5496_v11 }
  0x8e   : > { %v5479_v14 = vld [vmem:[%s7249_s30 + $0x860] sm:$0xf]  ;;  %v6729_v15 = vld [vmem:[%s7249_s30 + $0x86c] sm:$0xf0]  ;;  %v5880_v18 = vor.u32 %v6829_v9, %v5879_v8  ;;  %3489 = vmatpush.bf16.msra.mxu1 %v5624_v12 }
  0x8f   : > { %v5607_v16 = vld [vmem:[%s7249_s30 + $0x960] sm:$0xf]  ;;  %v6761_v19 = vld [vmem:[%s7249_s30 + $0x96c] sm:$0xf0]  ;;  %v5480_v24 = vor.u32 %v6729_v15, %v5479_v14  ;;  %3503 = vmatpush.bf16.msra.mxu2 %v5752_v13 }
  0x90   : > { %v5735_v20 = vld [vmem:[%s7249_s30 + $0xa60] sm:$0xf]  ;;  %v6793_v21 = vld [vmem:[%s7249_s30 + $0xa6c] sm:$0xf0]  ;;  %v5608_v25 = vor.u32 %v6761_v19, %v5607_v16  ;;  %3517 = vmatpush.bf16.msra.mxu3 %v5880_v18  ;;  %v239_v19 = vld [vmem:[%s8658_s0 + $0x48] sm:$0xff] }
  0x91   : > { %v5863_v22 = vld [vmem:[%s7249_s30 + $0xb60] sm:$0xf]  ;;  %v6825_v23 = vld [vmem:[%s7249_s30 + $0xb6c] sm:$0xf0]  ;;  %v5736_v26 = vor.u32 %v6793_v21, %v5735_v20  ;;  %3476 = vmatpush.bf16.msra.mxu0 %v5480_v24  ;;  %v257_v24 = vld [vmem:[%s8658_s0 + $0xd8] sm:$0xff] }
  0x92   : > { %v5463_v27 = vld [vmem:[%s7249_s30 + $0x840] sm:$0xf]  ;;  %v6725_v28 = vld [vmem:[%s7249_s30 + $0x84c] sm:$0xf0]  ;;  %v5864_v30 = vor.u32 %v6825_v23, %v5863_v22  ;;  %3490 = vmatpush.bf16.msra.mxu1 %v5608_v25  ;;  %v255_v22 = vld [vmem:[%s8658_s0 + $0xc8] sm:$0xff] }
  0x93   : > { %v5591_v29 = vld [vmem:[%s7249_s30 + $0x940] sm:$0xf]  ;;  %v6757_v31 = vld [vmem:[%s7249_s30 + $0x94c] sm:$0xf0]  ;;  %v5464_v36 = vor.u32 %v6725_v28, %v5463_v27  ;;  %3504 = vmatpush.bf16.msra.mxu2 %v5736_v26  ;;  %v241_v23 = vld [vmem:[%s8658_s0 + $0x58] sm:$0xff] }
  0x94   : > { %v5719_v32 = vld [vmem:[%s7249_s30 + $0xa40] sm:$0xf]  ;;  %v6789_v33 = vld [vmem:[%s7249_s30 + $0xa4c] sm:$0xf0]  ;;  %v5592_v38 = vor.u32 %v6757_v31, %v5591_v29  ;;  %3518 = vmatpush.bf16.msra.mxu3 %v5864_v30 }
  0x95   : > { %v5847_v34 = vld [vmem:[%s7249_s30 + $0xb40] sm:$0xf]  ;;  %v6821_v35 = vld [vmem:[%s7249_s30 + $0xb4c] sm:$0xf0]  ;;  %v5720_v40 = vor.u32 %v6789_v33, %v5719_v32  ;;  %3477 = vmatpush.bf16.msra.mxu0 %v5464_v36  ;;  %v7569_v36 = vpack.c.bf16 %v255_v22, %v239_v19 }
  0x96   : > { %v5447_v37 = vld [vmem:[%s7249_s30 + $0x820] sm:$0xf]  ;;  %v6721_v41 = vld [vmem:[%s7249_s30 + $0x82c] sm:$0xf0]  ;;  %v5848_v46 = vor.u32 %v6821_v35, %v5847_v34  ;;  %3491 = vmatpush.bf16.msra.mxu1 %v5592_v38 }
  0x97   : > { %v5575_v42 = vld [vmem:[%s7249_s30 + $0x920] sm:$0xf]  ;;  %v6753_v45 = vld [vmem:[%s7249_s30 + $0x92c] sm:$0xf0]  ;;  %v5448_v54 = vor.u32 %v6721_v41, %v5447_v37  ;;  %3505 = vmatpush.bf16.msra.mxu2 %v5720_v40  ;;  %v7573_v40 = vpack.c.bf16 %v257_v24, %v241_v23 }
  0x98   : > { %v5703_v48 = vld [vmem:[%s7249_s30 + $0xa20] sm:$0xf]  ;;  %v6785_v49 = vld [vmem:[%s7249_s30 + $0xa2c] sm:$0xf0]  ;;  %v5576_v60 = vor.u32 %v6753_v45, %v5575_v42  ;;  %3519 = vmatpush.bf16.msra.mxu3 %v5848_v46 }
  0x99   : > { %v5831_v50 = vld [vmem:[%s7249_s30 + $0xb20] sm:$0xf]  ;;  %v6817_v51 = vld [vmem:[%s7249_s30 + $0xb2c] sm:$0xf0]  ;;  %v5704_v61 = vor.u32 %v6785_v49, %v5703_v48  ;;  %3478 = vmatpush.bf16.msra.mxu0 %v5448_v54 }
  0x9a   : > { %v5431_v52 = vld [vmem:[%s7249_s30 + $0x800] sm:$0xf]  ;;  %v6717_v53 = vld [vmem:[%s7249_s30 + $0x80c] sm:$0xf0]  ;;  %v5832_v2 = vor.u32 %v6817_v51, %v5831_v50  ;;  %3492 = vmatpush.bf16.msra.mxu1 %v5576_v60 }
  0x9b   : > { %v5559_v55 = vld [vmem:[%s7249_s30 + $0x900] sm:$0xf]  ;;  %v6749_v56 = vld [vmem:[%s7249_s30 + $0x90c] sm:$0xf0]  ;;  %v5432_v9 = vor.u32 %v6717_v53, %v5431_v52  ;;  %3506 = vmatpush.bf16.msra.mxu2 %v5704_v61 }
  0x9c   : > { %v5687_v57 = vld [vmem:[%s7249_s30 + $0xa00] sm:$0xf]  ;;  %v6781_v59 = vld [vmem:[%s7249_s30 + $0xa0c] sm:$0xf0]  ;;  %v5560_v14 = vor.u32 %v6749_v56, %v5559_v55  ;;  %3520 = vmatpush.bf16.msra.mxu3 %v5832_v2 }
  0x9d   : > { %v5815_v62 = vld [vmem:[%s7249_s30 + $0xb00] sm:$0xf]  ;;  %v6813_v63 = vld [vmem:[%s7249_s30 + $0xb0c] sm:$0xf0]  ;;  %v5688_v15 = vor.u32 %v6781_v59, %v5687_v57  ;;  %3479 = vmatpush.bf16.msra.mxu0 %v5432_v9 }
  0x9e   : > { %v6055_v0 = vld [vmem:[%s7249_s30 + $0xce0] sm:$0xf]  ;;  %v6873_v3 = vld [vmem:[%s7249_s30 + $0xcec] sm:$0xf0]  ;;  %v5816_v20 = vor.u32 %v6813_v63, %v5815_v62  ;;  %3493 = vmatpush.bf16.msra.mxu1 %v5560_v14 }
  0x9f   : > { %v6183_v4 = vld [vmem:[%s7249_s30 + $0xde0] sm:$0xf]  ;;  %v6905_v5 = vld [vmem:[%s7249_s30 + $0xdec] sm:$0xf0]  ;;  %v6056_v21 = vor.u32 %v6873_v3, %v6055_v0  ;;  %3507 = vmatpush.bf16.msra.mxu2 %v5688_v15 }
  0xa0   : > { %v6311_v6 = vld [vmem:[%s7249_s30 + $0xee0] sm:$0xf]  ;;  %v6937_v7 = vld [vmem:[%s7249_s30 + $0xeec] sm:$0xf0]  ;;  %v6184_v25 = vor.u32 %v6905_v5, %v6183_v4  ;;  %3521 = vmatpush.bf16.msra.mxu3 %v5816_v20 }
  0xa1   : > { %v6439_v8 = vld [vmem:[%s7249_s30 + $0xfe0] sm:$0xf]  ;;  %v6969_v11 = vld [vmem:[%s7249_s30 + $0xfec] sm:$0xf0]  ;;  %v6312_v26 = vor.u32 %v6937_v7, %v6311_v6  ;;  %3528 = vmatpush.bf16.msrb.mxu0 %v6056_v21  ;;  %3494 = vmatmul.bf16.vlgmr.msra.gmra.mxu1 %v7569_v36 }
  0xa2   : > { %v238_v12 = vld [vmem:[%s8658_s0 + $0x40] sm:$0xff]  ;;  %v240_v16 = vld [vmem:[%s8658_s0 + $0x50] sm:$0xff]  ;;  %v6440_v30 = vor.u32 %v6969_v11, %v6439_v8  ;;  %3542 = vmatpush.bf16.msrb.mxu1 %v6184_v25 }
  0xa3   : > { %v254_v13 = vld [vmem:[%s8658_s0 + $0xc0] sm:$0xff]  ;;  %v256_v18 = vld [vmem:[%s8658_s0 + $0xd0] sm:$0xff]  ;;  %3556 = vmatpush.bf16.msrb.mxu2 %v6312_v26  ;;  %3522 = vmatmul.bf16.vlgmr.msra.gmra.mxu3 %v7573_v40 }
  0xa4   : > { %v6039_v27 = vld [vmem:[%s7249_s30 + $0xcc0] sm:$0xf]  ;;  %v6869_v28 = vld [vmem:[%s7249_s30 + $0xccc] sm:$0xf0]  ;;  %v7562_v31 = vpack.c.bf16 %v254_v13, %v238_v12  ;;  %v7567_v35 = vpack.c.bf16 %v256_v18, %v240_v16  ;;  %3570 = vmatpush.bf16.msrb.mxu3 %v6440_v30 }
  0xa5   : > { %v6167_v29 = vld [vmem:[%s7249_s30 + $0xdc0] sm:$0xf]  ;;  %v6901_v32 = vld [vmem:[%s7249_s30 + $0xdcc] sm:$0xf0]  ;;  %v6040_v41 = vor.u32 %v6869_v28, %v6039_v27 }
  0xa6   : > { %v6295_v33 = vld [vmem:[%s7249_s30 + $0xec0] sm:$0xf]  ;;  %v6933_v34 = vld [vmem:[%s7249_s30 + $0xecc] sm:$0xf0]  ;;  %v6168_v42 = vor.u32 %v6901_v32, %v6167_v29  ;;  %3480 = vmatmul.bf16.vlgmr.msra.gmra.mxu0 %v7562_v31  ;;  %3508 = vmatmul.bf16.vlgmr.msra.gmra.mxu2 %v7567_v35 }
  0xa7   : > { %v6423_v37 = vld [vmem:[%s7249_s30 + $0xfc0] sm:$0xf]  ;;  %v6965_v38 = vld [vmem:[%s7249_s30 + $0xfcc] sm:$0xf0]  ;;  %v6296_v45 = vor.u32 %v6933_v34, %v6295_v33  ;;  %3529 = vmatpush.bf16.msrb.mxu0 %v6040_v41 }
  0xa8   : > { %v6023_v46 = vld [vmem:[%s7249_s30 + $0xca0] sm:$0xf]  ;;  %v6865_v48 = vld [vmem:[%s7249_s30 + $0xcac] sm:$0xf0]  ;;  %v6424_v50 = vor.u32 %v6965_v38, %v6423_v37  ;;  %3543 = vmatpush.bf16.msrb.mxu1 %v6168_v42 }
  0xa9   : > { %v6151_v49 = vld [vmem:[%s7249_s30 + $0xda0] sm:$0xf]  ;;  %v6897_v51 = vld [vmem:[%s7249_s30 + $0xdac] sm:$0xf0]  ;;  %v6024_v56 = vor.u32 %v6865_v48, %v6023_v46  ;;  %3557 = vmatpush.bf16.msrb.mxu2 %v6296_v45 }
  0xaa   : > { %v6279_v52 = vld [vmem:[%s7249_s30 + $0xea0] sm:$0xf]  ;;  %v6929_v53 = vld [vmem:[%s7249_s30 + $0xeac] sm:$0xf0]  ;;  %v6152_v57 = vor.u32 %v6897_v51, %v6151_v49  ;;  %3571 = vmatpush.bf16.msrb.mxu3 %v6424_v50 }
  0xab   : > { %v6407_v54 = vld [vmem:[%s7249_s30 + $0xfa0] sm:$0xf]  ;;  %v6961_v55 = vld [vmem:[%s7249_s30 + $0xfac] sm:$0xf0]  ;;  %v6280_v59 = vor.u32 %v6929_v53, %v6279_v52  ;;  %3530 = vmatpush.bf16.msrb.mxu0 %v6024_v56 }
  0xac   : > { %v6007_v60 = vld [vmem:[%s7249_s30 + $0xc80] sm:$0xf]  ;;  %v6861_v61 = vld [vmem:[%s7249_s30 + $0xc8c] sm:$0xf0]  ;;  %v6408_v63 = vor.u32 %v6961_v55, %v6407_v54  ;;  %3544 = vmatpush.bf16.msrb.mxu1 %v6152_v57 }
  0xad   : > { %v6135_v62 = vld [vmem:[%s7249_s30 + $0xd80] sm:$0xf]  ;;  %v6893_v0 = vld [vmem:[%s7249_s30 + $0xd8c] sm:$0xf0]  ;;  %v6008_v6 = vor.u32 %v6861_v61, %v6007_v60  ;;  %3558 = vmatpush.bf16.msrb.mxu2 %v6280_v59 }
  0xae   : > { %v6263_v2 = vld [vmem:[%s7249_s30 + $0xe80] sm:$0xf]  ;;  %v6925_v3 = vld [vmem:[%s7249_s30 + $0xe8c] sm:$0xf0]  ;;  %v6136_v7 = vor.u32 %v6893_v0, %v6135_v62  ;;  %3572 = vmatpush.bf16.msrb.mxu3 %v6408_v63  ;;  %v6487_v0 = vld [vmem:[%s7249_s30 + $0xe4] sm:$0xf] }
  0xaf   : > { %v6391_v4 = vld [vmem:[%s7249_s30 + $0xf80] sm:$0xf]  ;;  %v6957_v5 = vld [vmem:[%s7249_s30 + $0xf8c] sm:$0xf0]  ;;  %v6264_v8 = vor.u32 %v6925_v3, %v6263_v2  ;;  %3531 = vmatpush.bf16.msrb.mxu0 %v6008_v6  ;;  %v4521_v3 = vld [vmem:[%s7249_s30 + $0xf0] sm:$0xf0] }
  0xb0   : > { %v5991_v9 = vld [vmem:[%s7249_s30 + $0xc60] sm:$0xf]  ;;  %v6857_v11 = vld [vmem:[%s7249_s30 + $0xc6c] sm:$0xf0]  ;;  %v6392_v13 = vor.u32 %v6957_v5, %v6391_v4  ;;  %3545 = vmatpush.bf16.msrb.mxu1 %v6136_v7  ;;  %v6519_v4 = vld [vmem:[%s7249_s30 + $0x1e4] sm:$0xf] }
  0xb1   : > { %v6119_v12 = vld [vmem:[%s7249_s30 + $0xd60] sm:$0xf]  ;;  %v6889_v14 = vld [vmem:[%s7249_s30 + $0xd6c] sm:$0xf0]  ;;  %v5992_v20 = vor.u32 %v6857_v11, %v5991_v9  ;;  %3559 = vmatpush.bf16.msrb.mxu2 %v6264_v8  ;;  %v4649_v5 = vld [vmem:[%s7249_s30 + $0x1f0] sm:$0xf0] }
  0xb2   : > { %v6247_v15 = vld [vmem:[%s7249_s30 + $0xe60] sm:$0xf]  ;;  %v6921_v16 = vld [vmem:[%s7249_s30 + $0xe6c] sm:$0xf0]  ;;  %v6120_v21 = vor.u32 %v6889_v14, %v6119_v12  ;;  %3573 = vmatpush.bf16.msrb.mxu3 %v6392_v13  ;;  %v6551_v6 = vld [vmem:[%s7249_s30 + $0x2e4] sm:$0xf] }
  0xb3   : > { %v6375_v18 = vld [vmem:[%s7249_s30 + $0xf60] sm:$0xf]  ;;  %v6953_v19 = vld [vmem:[%s7249_s30 + $0xf6c] sm:$0xf0]  ;;  %v6248_v22 = vor.u32 %v6921_v16, %v6247_v15  ;;  %3532 = vmatpush.bf16.msrb.mxu0 %v5992_v20  ;;  %v4777_v7 = vld [vmem:[%s7249_s30 + $0x2f0] sm:$0xf0] }
  0xb4   : > { %v5975_v23 = vld [vmem:[%s7249_s30 + $0xc40] sm:$0xf]  ;;  %v6853_v24 = vld [vmem:[%s7249_s30 + $0xc4c] sm:$0xf0]  ;;  %v6376_v26 = vor.u32 %v6953_v19, %v6375_v18  ;;  %3546 = vmatpush.bf16.msrb.mxu1 %v6120_v21  ;;  %v6583_v8 = vld [vmem:[%s7249_s30 + $0x3e4] sm:$0xf]  ;;  %v4524_v21 = vor.u32 %v6487_v0, %v4521_v3 }
  0xb5   : > { %v6103_v25 = vld [vmem:[%s7249_s30 + $0xd40] sm:$0xf]  ;;  %v6885_v27 = vld [vmem:[%s7249_s30 + $0xd4c] sm:$0xf0]  ;;  %v5976_v33 = vor.u32 %v6853_v24, %v5975_v23  ;;  %3560 = vmatpush.bf16.msrb.mxu2 %v6248_v22  ;;  %v4905_v11 = vld [vmem:[%s7249_s30 + $0x3f0] sm:$0xf0] }
  0xb6   : > { %v6231_v28 = vld [vmem:[%s7249_s30 + $0xe40] sm:$0xf]  ;;  %v6917_v29 = vld [vmem:[%s7249_s30 + $0xe4c] sm:$0xf0]  ;;  %v6104_v37 = vor.u32 %v6885_v27, %v6103_v25  ;;  %3574 = vmatpush.bf16.msrb.mxu3 %v6376_v26  ;;  %v243_v19 = vld [vmem:[%s8658_s0 + $0x68] sm:$0xff]  ;;  %v4652_v25 = vor.u32 %v6519_v4, %v4649_v5  ;;  %v4780_v26 = vor.u32 %v6551_v6, %v4777_v7 }
  0xb7   : > { %v6359_v30 = vld [vmem:[%s7249_s30 + $0xf40] sm:$0xf]  ;;  %v6949_v32 = vld [vmem:[%s7249_s30 + $0xf4c] sm:$0xf0]  ;;  %v6232_v38 = vor.u32 %v6917_v29, %v6231_v28  ;;  %3533 = vmatpush.bf16.msrb.mxu0 %v5976_v33  ;;  %v259_v22 = vld [vmem:[%s8658_s0 + $0xe8] sm:$0xff] }
  0xb8   : > { %v5959_v34 = vld [vmem:[%s7249_s30 + $0xc20] sm:$0xf]  ;;  %v6849_v41 = vld [vmem:[%s7249_s30 + $0xc2c] sm:$0xf0]  ;;  %v6360_v46 = vor.u32 %v6949_v32, %v6359_v30  ;;  %3547 = vmatpush.bf16.msrb.mxu1 %v6104_v37  ;;  %v245_v23 = vld [vmem:[%s8658_s0 + $0x78] sm:$0xff]  ;;  %v4908_v30 = vor.u32 %v6583_v8, %v4905_v11 }
  0xb9   : > { %v6087_v42 = vld [vmem:[%s7249_s30 + $0xd20] sm:$0xf]  ;;  %v6881_v45 = vld [vmem:[%s7249_s30 + $0xd2c] sm:$0xf0]  ;;  %v5960_v54 = vor.u32 %v6849_v41, %v5959_v34  ;;  %3561 = vmatpush.bf16.msrb.mxu2 %v6232_v38  ;;  %v261_v24 = vld [vmem:[%s8658_s0 + $0xf8] sm:$0xff]  ;;  %v7669_v41 = vpack.c.bf16 %v259_v22, %v243_v19 }
  0xba   : > { %v6215_v48 = vld [vmem:[%s7249_s30 + $0xe20] sm:$0xf]  ;;  %v6913_v49 = vld [vmem:[%s7249_s30 + $0xe2c] sm:$0xf0]  ;;  %v6088_v60 = vor.u32 %v6881_v45, %v6087_v42  ;;  %3575 = vmatpush.bf16.msrb.mxu3 %v6360_v46  ;;  %v6483_v27 = vld [vmem:[%s7249_s30 + $0xc4] sm:$0xf]  ;;  %v7673_v46 = vpack.c.bf16 %v261_v24, %v245_v23 }
  0xbb   : > { %v6343_v50 = vld [vmem:[%s7249_s30 + $0xf20] sm:$0xf]  ;;  %v6945_v51 = vld [vmem:[%s7249_s30 + $0xf2c] sm:$0xf0]  ;;  %v6216_v61 = vor.u32 %v6913_v49, %v6215_v48  ;;  %3534 = vmatpush.bf16.msrb.mxu0 %v5960_v54  ;;  %v4505_v28 = vld [vmem:[%s7249_s30 + $0xd0] sm:$0xf0] }
  0xbc   : > { %v5943_v52 = vld [vmem:[%s7249_s30 + $0xc00] sm:$0xf]  ;;  %v6845_v53 = vld [vmem:[%s7249_s30 + $0xc0c] sm:$0xf0]  ;;  %v6344_v2 = vor.u32 %v6945_v51, %v6343_v50  ;;  %3548 = vmatpush.bf16.msrb.mxu1 %v6088_v60  ;;  %v6515_v29 = vld [vmem:[%s7249_s30 + $0x1c4] sm:$0xf]  ;;  %v4508_v48 = vor.u32 %v6483_v27, %v4505_v28 }
  0xbd   : > { %v6071_v55 = vld [vmem:[%s7249_s30 + $0xd00] sm:$0xf]  ;;  %v6877_v56 = vld [vmem:[%s7249_s30 + $0xd0c] sm:$0xf0]  ;;  %v5944_v9 = vor.u32 %v6845_v53, %v5943_v52  ;;  %3562 = vmatpush.bf16.msrb.mxu2 %v6216_v61  ;;  %v4633_v33 = vld [vmem:[%s7249_s30 + $0x1d0] sm:$0xf0] }
  0xbe   : > { %v6199_v57 = vld [vmem:[%s7249_s30 + $0xe00] sm:$0xf]  ;;  %v6909_v59 = vld [vmem:[%s7249_s30 + $0xe0c] sm:$0xf0]  ;;  %v6072_v14 = vor.u32 %v6877_v56, %v6071_v55  ;;  %3576 = vmatpush.bf16.msrb.mxu3 %v6344_v2  ;;  %v6547_v34 = vld [vmem:[%s7249_s30 + $0x2c4] sm:$0xf]  ;;  %v4636_v49 = vor.u32 %v6515_v29, %v4633_v33 }
  0xbf   : > { %v6327_v62 = vld [vmem:[%s7249_s30 + $0xf00] sm:$0xf]  ;;  %v6941_v63 = vld [vmem:[%s7249_s30 + $0xf0c] sm:$0xf0]  ;;  %v6200_v15 = vor.u32 %v6909_v59, %v6199_v57  ;;  %3535 = vmatpush.bf16.msrb.mxu0 %v5944_v9  ;;  %v4761_v37 = vld [vmem:[%s7249_s30 + $0x2d0] sm:$0xf0] }
  0xc0   : > { %v242_v12 = vld [vmem:[%s8658_s0 + $0x60] sm:$0xff]  ;;  %v244_v16 = vld [vmem:[%s8658_s0 + $0x70] sm:$0xff]  ;;  %v6328_v20 = vor.u32 %v6941_v63, %v6327_v62  ;;  %3549 = vmatpush.bf16.msrb.mxu1 %v6072_v14  ;;  %v4764_v50 = vor.u32 %v6547_v34, %v4761_v37 }
  0xc1   : > { %v258_v13 = vld [vmem:[%s8658_s0 + $0xe0] sm:$0xff]  ;;  %v260_v18 = vld [vmem:[%s8658_s0 + $0xf0] sm:$0xff]  ;;  %3563 = vmatpush.bf16.msrb.mxu2 %v6200_v15 }
  0xc2   : > { %v7662_v32 = vpack.c.bf16 %v258_v13, %v242_v12  ;;  %v7667_v38 = vpack.c.bf16 %v260_v18, %v244_v16  ;;  %v6579_v42 = vld [vmem:[%s7249_s30 + $0x3c4] sm:$0xf]  ;;  %v4889_v45 = vld [vmem:[%s7249_s30 + $0x3d0] sm:$0xf0]  ;;  %3577 = vmatpush.bf16.msrb.mxu3 %v6328_v20 }
  0xc3   : > { %3584 = vmatpush.bf16.msra.mxu0 %v4524_v21  ;;  %v6479_v51 = vld [vmem:[%s7249_s30 + $0xa4] sm:$0xf]  ;;  %v4489_v52 = vld [vmem:[%s7249_s30 + $0xb0] sm:$0xf0]  ;;  %v4892_v54 = vor.u32 %v6579_v42, %v4889_v45  ;;  %3550 = vmatmul.bf16.vlgmr.msrb.gmra.mxu1 %v7669_v41 }
  0xc4   : > { %3598 = vmatpush.bf16.msra.mxu1 %v4652_v25  ;;  %v6511_v53 = vld [vmem:[%s7249_s30 + $0x1a4] sm:$0xf]  ;;  %3536 = vmatmul.bf16.vlgmr.msrb.gmra.mxu0 %v7662_v32  ;;  %v4617_v55 = vld [vmem:[%s7249_s30 + $0x1b0] sm:$0xf0]  ;;  %v4492_v61 = vor.u32 %v6479_v51, %v4489_v52 }
  0xc5   : > { %3612 = vmatpush.bf16.msra.mxu2 %v4780_v26  ;;  %v6543_v56 = vld [vmem:[%s7249_s30 + $0x2a4] sm:$0xf]  ;;  %v4745_v57 = vld [vmem:[%s7249_s30 + $0x2b0] sm:$0xf0]  ;;  %3578 = vmatmul.bf16.vlgmr.msrb.gmra.mxu3 %v7673_v46  ;;  %v4620_v62 = vor.u32 %v6511_v53, %v4617_v55 }
  0xc6   : > { %3626 = vmatpush.bf16.msra.mxu3 %v4908_v30  ;;  %3564 = vmatmul.bf16.vlgmr.msrb.gmra.mxu2 %v7667_v38  ;;  %v6575_v59 = vld [vmem:[%s7249_s30 + $0x3a4] sm:$0xf]  ;;  %v4873_v60 = vld [vmem:[%s7249_s30 + $0x3b0] sm:$0xf0]  ;;  %v4748_v63 = vor.u32 %v6543_v56, %v4745_v57 }
  0xc7   : > { %3585 = vmatpush.bf16.msra.mxu0 %v4508_v48  ;;  %v6475_v0 = vld [vmem:[%s7249_s30 + $0x84] sm:$0xf]  ;;  %v4473_v2 = vld [vmem:[%s7249_s30 + $0x90] sm:$0xf0]  ;;  %v4876_v4 = vor.u32 %v6575_v59, %v4873_v60 }
  0xc8   : > { %3599 = vmatpush.bf16.msra.mxu1 %v4636_v49  ;;  %v6507_v3 = vld [vmem:[%s7249_s30 + $0x184] sm:$0xf]  ;;  %v4601_v5 = vld [vmem:[%s7249_s30 + $0x190] sm:$0xf0]  ;;  %v4476_v11 = vor.u32 %v6475_v0, %v4473_v2 }
  0xc9   : > { %3613 = vmatpush.bf16.msra.mxu2 %v4764_v50  ;;  %v6539_v6 = vld [vmem:[%s7249_s30 + $0x284] sm:$0xf]  ;;  %v4729_v7 = vld [vmem:[%s7249_s30 + $0x290] sm:$0xf0]  ;;  %v4604_v12 = vor.u32 %v6507_v3, %v4601_v5 }
  0xca   : > { %3627 = vmatpush.bf16.msra.mxu3 %v4892_v54  ;;  %v6571_v8 = vld [vmem:[%s7249_s30 + $0x384] sm:$0xf]  ;;  %v4857_v9 = vld [vmem:[%s7249_s30 + $0x390] sm:$0xf0]  ;;  %v4732_v13 = vor.u32 %v6539_v6, %v4729_v7 }
  0xcb   : > { %3586 = vmatpush.bf16.msra.mxu0 %v4492_v61  ;;  %v6471_v14 = vld [vmem:[%s7249_s30 + $0x64] sm:$0xf]  ;;  %v4457_v15 = vld [vmem:[%s7249_s30 + $0x70] sm:$0xf0]  ;;  %v4860_v18 = vor.u32 %v6571_v8, %v4857_v9 }
  0xcc   : > { %3600 = vmatpush.bf16.msra.mxu1 %v4620_v62  ;;  %v6503_v16 = vld [vmem:[%s7249_s30 + $0x164] sm:$0xf]  ;;  %v4585_v19 = vld [vmem:[%s7249_s30 + $0x170] sm:$0xf0]  ;;  %v4460_v24 = vor.u32 %v6471_v14, %v4457_v15 }
  0xcd   : > { %3614 = vmatpush.bf16.msra.mxu2 %v4748_v63  ;;  %v6535_v20 = vld [vmem:[%s7249_s30 + $0x264] sm:$0xf]  ;;  %v4713_v21 = vld [vmem:[%s7249_s30 + $0x270] sm:$0xf0]  ;;  %v4588_v25 = vor.u32 %v6503_v16, %v4585_v19 }
  0xce   : > { %3628 = vmatpush.bf16.msra.mxu3 %v4876_v4  ;;  %v6567_v22 = vld [vmem:[%s7249_s30 + $0x364] sm:$0xf]  ;;  %v4841_v23 = vld [vmem:[%s7249_s30 + $0x370] sm:$0xf0]  ;;  %v4716_v26 = vor.u32 %v6535_v20, %v4713_v21 }
  0xcf   : > { %3587 = vmatpush.bf16.msra.mxu0 %v4476_v11  ;;  %v6467_v27 = vld [vmem:[%s7249_s30 + $0x44] sm:$0xf]  ;;  %v4441_v28 = vld [vmem:[%s7249_s30 + $0x50] sm:$0xf0]  ;;  %v4844_v30 = vor.u32 %v6567_v22, %v4841_v23 }
  0xd0   : > { %3601 = vmatpush.bf16.msra.mxu1 %v4604_v12  ;;  %v6499_v29 = vld [vmem:[%s7249_s30 + $0x144] sm:$0xf]  ;;  %v4569_v33 = vld [vmem:[%s7249_s30 + $0x150] sm:$0xf0]  ;;  %v4444_v48 = vor.u32 %v6467_v27, %v4441_v28 }
  0xd1   : > { %3615 = vmatpush.bf16.msra.mxu2 %v4732_v13  ;;  %v6531_v34 = vld [vmem:[%s7249_s30 + $0x244] sm:$0xf]  ;;  %v4697_v37 = vld [vmem:[%s7249_s30 + $0x250] sm:$0xf0]  ;;  %v4572_v49 = vor.u32 %v6499_v29, %v4569_v33 }
  0xd2   : > { %3629 = vmatpush.bf16.msra.mxu3 %v4860_v18  ;;  %v6563_v42 = vld [vmem:[%s7249_s30 + $0x344] sm:$0xf]  ;;  %v4825_v45 = vld [vmem:[%s7249_s30 + $0x350] sm:$0xf0]  ;;  %v4700_v50 = vor.u32 %v6531_v34, %v4697_v37 }
  0xd3   : > { %3588 = vmatpush.bf16.msra.mxu0 %v4460_v24  ;;  %v6463_v51 = vld [vmem:[%s7249_s30 + $0x24] sm:$0xf]  ;;  %v4425_v52 = vld [vmem:[%s7249_s30 + $0x30] sm:$0xf0]  ;;  %v4828_v54 = vor.u32 %v6563_v42, %v4825_v45 }
  0xd4   : > { %3602 = vmatpush.bf16.msra.mxu1 %v4588_v25  ;;  %v6495_v53 = vld [vmem:[%s7249_s30 + $0x124] sm:$0xf]  ;;  %v4553_v55 = vld [vmem:[%s7249_s30 + $0x130] sm:$0xf0]  ;;  %v4428_v61 = vor.u32 %v6463_v51, %v4425_v52 }
  0xd5   : > { %3616 = vmatpush.bf16.msra.mxu2 %v4716_v26  ;;  %v6527_v56 = vld [vmem:[%s7249_s30 + $0x224] sm:$0xf]  ;;  %v4681_v57 = vld [vmem:[%s7249_s30 + $0x230] sm:$0xf0]  ;;  %v4556_v0 = vor.u32 %v6495_v53, %v4553_v55 }
  0xd6   : > { %3630 = vmatpush.bf16.msra.mxu3 %v4844_v30  ;;  %v6559_v59 = vld [vmem:[%s7249_s30 + $0x324] sm:$0xf]  ;;  %v4809_v60 = vld [vmem:[%s7249_s30 + $0x330] sm:$0xf0]  ;;  %v4684_v2 = vor.u32 %v6527_v56, %v4681_v57 }
  0xd7   : > { %3589 = vmatpush.bf16.msra.mxu0 %v4444_v48  ;;  %v6459_v62 = vld [vmem:[%s7249_s30 + $0x4] sm:$0xf]  ;;  %v4409_v63 = vld [vmem:[%s7249_s30 + $0x10] sm:$0xf0]  ;;  %v4812_v6 = vor.u32 %v6559_v59, %v4809_v60 }
  0xd8   : > { %3603 = vmatpush.bf16.msra.mxu1 %v4572_v49  ;;  %v6491_v3 = vld [vmem:[%s7249_s30 + $0x104] sm:$0xf]  ;;  %v4537_v4 = vld [vmem:[%s7249_s30 + $0x110] sm:$0xf0]  ;;  %v4412_v14 = vor.u32 %v6459_v62, %v4409_v63 }
  0xd9   : > { %3617 = vmatpush.bf16.msra.mxu2 %v4700_v50  ;;  %v6523_v5 = vld [vmem:[%s7249_s30 + $0x204] sm:$0xf]  ;;  %v4665_v7 = vld [vmem:[%s7249_s30 + $0x210] sm:$0xf0]  ;;  %v4540_v19 = vor.u32 %v6491_v3, %v4537_v4 }
  0xda   : > { %3631 = vmatpush.bf16.msra.mxu3 %v4828_v54  ;;  %v6555_v8 = vld [vmem:[%s7249_s30 + $0x304] sm:$0xf]  ;;  %v4793_v9 = vld [vmem:[%s7249_s30 + $0x310] sm:$0xf0]  ;;  %v4668_v20 = vor.u32 %v6523_v5, %v4665_v7 }
  0xdb   : > { %v6615_v11 = vld [vmem:[%s7249_s30 + $0x4e4] sm:$0xf]  ;;  %v5033_v12 = vld [vmem:[%s7249_s30 + $0x4f0] sm:$0xf0]  ;;  %3590 = vmatpush.bf16.msra.mxu0 %v4428_v61  ;;  %v4796_v23 = vor.u32 %v6555_v8, %v4793_v9 }
  0xdc   : > { %v6647_v13 = vld [vmem:[%s7249_s30 + $0x5e4] sm:$0xf]  ;;  %v5161_v15 = vld [vmem:[%s7249_s30 + $0x5f0] sm:$0xf0]  ;;  %3604 = vmatpush.bf16.msra.mxu1 %v4556_v0  ;;  %v5036_v24 = vor.u32 %v6615_v11, %v5033_v12 }
  0xdd   : > { %v6679_v16 = vld [vmem:[%s7249_s30 + $0x6e4] sm:$0xf]  ;;  %v5289_v18 = vld [vmem:[%s7249_s30 + $0x6f0] sm:$0xf0]  ;;  %3618 = vmatpush.bf16.msra.mxu2 %v4684_v2  ;;  %v5164_v25 = vor.u32 %v6647_v13, %v5161_v15 }
  0xde   : > { %v6711_v21 = vld [vmem:[%s7249_s30 + $0x7e4] sm:$0xf]  ;;  %v5417_v22 = vld [vmem:[%s7249_s30 + $0x7f0] sm:$0xf0]  ;;  %3632 = vmatpush.bf16.msra.mxu3 %v4812_v6  ;;  %v5292_v26 = vor.u32 %v6679_v16, %v5289_v18 }
  0xdf   : > { %v6611_v27 = vld [vmem:[%s7249_s30 + $0x4c4] sm:$0xf]  ;;  %v5017_v28 = vld [vmem:[%s7249_s30 + $0x4d0] sm:$0xf0]  ;;  %3591 = vmatpush.bf16.msra.mxu0 %v4412_v14  ;;  %v5420_v30 = vor.u32 %v6711_v21, %v5417_v22 }
  0xe0   : > { %v6643_v29 = vld [vmem:[%s7249_s30 + $0x5c4] sm:$0xf]  ;;  %v5145_v33 = vld [vmem:[%s7249_s30 + $0x5d0] sm:$0xf0]  ;;  %3605 = vmatpush.bf16.msra.mxu1 %v4540_v19  ;;  %v5020_v48 = vor.u32 %v6611_v27, %v5017_v28 }
  0xe1   : > { %v6675_v34 = vld [vmem:[%s7249_s30 + $0x6c4] sm:$0xf]  ;;  %v5273_v37 = vld [vmem:[%s7249_s30 + $0x6d0] sm:$0xf0]  ;;  %3619 = vmatpush.bf16.msra.mxu2 %v4668_v20  ;;  %v5148_v49 = vor.u32 %v6643_v29, %v5145_v33 }
  0xe2   : > { %v6707_v42 = vld [vmem:[%s7249_s30 + $0x7c4] sm:$0xf]  ;;  %v5401_v45 = vld [vmem:[%s7249_s30 + $0x7d0] sm:$0xf0]  ;;  %3633 = vmatpush.bf16.msra.mxu3 %v4796_v23  ;;  %v5276_v50 = vor.u32 %v6675_v34, %v5273_v37  ;;  %3592 = vmatmul.bf16.vlgmr.msra.gmra.mxu0 %v7354_v58 }
  0xe3   : > { %3640 = vmatpush.bf16.msrb.mxu0 %v5036_v24  ;;  %v6607_v51 = vld [vmem:[%s7249_s30 + $0x4a4] sm:$0xf]  ;;  %v5001_v52 = vld [vmem:[%s7249_s30 + $0x4b0] sm:$0xf0]  ;;  %v5404_v54 = vor.u32 %v6707_v42, %v5401_v45  ;;  %3606 = vmatmul.bf16.vlgmr.msra.gmra.mxu1 %v7378_v10 }
  0xe4   : > { %3654 = vmatpush.bf16.msrb.mxu1 %v5164_v25  ;;  %v6639_v53 = vld [vmem:[%s7249_s30 + $0x5a4] sm:$0xf]  ;;  %v5129_v55 = vld [vmem:[%s7249_s30 + $0x5b0] sm:$0xf0]  ;;  %3620 = vmatmul.bf16.vlgmr.msra.gmra.mxu2 %v7362_v1  ;;  %v5004_v61 = vor.u32 %v6607_v51, %v5001_v52 }
  0xe5   : > { %3668 = vmatpush.bf16.msrb.mxu2 %v5292_v26  ;;  %v6671_v56 = vld [vmem:[%s7249_s30 + $0x6a4] sm:$0xf]  ;;  %v5257_v57 = vld [vmem:[%s7249_s30 + $0x6b0] sm:$0xf0]  ;;  %3634 = vmatmul.bf16.vlgmr.msra.gmra.mxu3 %v7386_v17  ;;  %v5132_v62 = vor.u32 %v6639_v53, %v5129_v55 }
  0xe6   : > { %3682 = vmatpush.bf16.msrb.mxu3 %v5420_v30  ;;  %v6703_v59 = vld [vmem:[%s7249_s30 + $0x7a4] sm:$0xf]  ;;  %v5385_v60 = vld [vmem:[%s7249_s30 + $0x7b0] sm:$0xf0]  ;;  %v5260_v63 = vor.u32 %v6671_v56, %v5257_v57 }
  0xe7   : > { %3641 = vmatpush.bf16.msrb.mxu0 %v5020_v48  ;;  %v6603_v0 = vld [vmem:[%s7249_s30 + $0x484] sm:$0xf]  ;;  %v4985_v2 = vld [vmem:[%s7249_s30 + $0x490] sm:$0xf0]  ;;  %v5388_v4 = vor.u32 %v6703_v59, %v5385_v60 }
  0xe8   : > { %3655 = vmatpush.bf16.msrb.mxu1 %v5148_v49  ;;  %v6635_v3 = vld [vmem:[%s7249_s30 + $0x584] sm:$0xf]  ;;  %v5113_v5 = vld [vmem:[%s7249_s30 + $0x590] sm:$0xf0]  ;;  %v4988_v11 = vor.u32 %v6603_v0, %v4985_v2 }
  0xe9   : > { %3669 = vmatpush.bf16.msrb.mxu2 %v5276_v50  ;;  %v6667_v6 = vld [vmem:[%s7249_s30 + $0x684] sm:$0xf]  ;;  %v5241_v7 = vld [vmem:[%s7249_s30 + $0x690] sm:$0xf0]  ;;  %v5116_v12 = vor.u32 %v6635_v3, %v5113_v5 }
  0xea   : > { %3683 = vmatpush.bf16.msrb.mxu3 %v5404_v54  ;;  %v6699_v8 = vld [vmem:[%s7249_s30 + $0x784] sm:$0xf]  ;;  %v5369_v9 = vld [vmem:[%s7249_s30 + $0x790] sm:$0xf0]  ;;  %v5244_v13 = vor.u32 %v6667_v6, %v5241_v7 }
  0xeb   : > { %3642 = vmatpush.bf16.msrb.mxu0 %v5004_v61  ;;  %v6599_v14 = vld [vmem:[%s7249_s30 + $0x464] sm:$0xf]  ;;  %v4969_v15 = vld [vmem:[%s7249_s30 + $0x470] sm:$0xf0]  ;;  %v5372_v18 = vor.u32 %v6699_v8, %v5369_v9 }
  0xec   : > { %3656 = vmatpush.bf16.msrb.mxu1 %v5132_v62  ;;  %v6631_v16 = vld [vmem:[%s7249_s30 + $0x564] sm:$0xf]  ;;  %v5097_v19 = vld [vmem:[%s7249_s30 + $0x570] sm:$0xf0]  ;;  %v4972_v24 = vor.u32 %v6599_v14, %v4969_v15 }
  0xed   : > { %3670 = vmatpush.bf16.msrb.mxu2 %v5260_v63  ;;  %v6663_v20 = vld [vmem:[%s7249_s30 + $0x664] sm:$0xf]  ;;  %v5225_v21 = vld [vmem:[%s7249_s30 + $0x670] sm:$0xf0]  ;;  %v5100_v25 = vor.u32 %v6631_v16, %v5097_v19 }
  0xee   : > { %3684 = vmatpush.bf16.msrb.mxu3 %v5388_v4  ;;  %v6695_v22 = vld [vmem:[%s7249_s30 + $0x764] sm:$0xf]  ;;  %v5353_v23 = vld [vmem:[%s7249_s30 + $0x770] sm:$0xf0]  ;;  %v5228_v26 = vor.u32 %v6663_v20, %v5225_v21 }
  0xef   : > { %3643 = vmatpush.bf16.msrb.mxu0 %v4988_v11  ;;  %v6595_v27 = vld [vmem:[%s7249_s30 + $0x444] sm:$0xf]  ;;  %v4953_v28 = vld [vmem:[%s7249_s30 + $0x450] sm:$0xf0]  ;;  %v5356_v30 = vor.u32 %v6695_v22, %v5353_v23 }
  0xf0   : > { %3657 = vmatpush.bf16.msrb.mxu1 %v5116_v12  ;;  %v6627_v29 = vld [vmem:[%s7249_s30 + $0x544] sm:$0xf]  ;;  %v5081_v33 = vld [vmem:[%s7249_s30 + $0x550] sm:$0xf0]  ;;  %v4956_v48 = vor.u32 %v6595_v27, %v4953_v28 }
  0xf1   : > { %3671 = vmatpush.bf16.msrb.mxu2 %v5244_v13  ;;  %v6659_v34 = vld [vmem:[%s7249_s30 + $0x644] sm:$0xf]  ;;  %v5209_v37 = vld [vmem:[%s7249_s30 + $0x650] sm:$0xf0]  ;;  %v5084_v49 = vor.u32 %v6627_v29, %v5081_v33 }
  0xf2   : > { %3685 = vmatpush.bf16.msrb.mxu3 %v5372_v18  ;;  %v6691_v42 = vld [vmem:[%s7249_s30 + $0x744] sm:$0xf]  ;;  %v5337_v45 = vld [vmem:[%s7249_s30 + $0x750] sm:$0xf0]  ;;  %v5212_v50 = vor.u32 %v6659_v34, %v5209_v37 }
  0xf3   : > { %3644 = vmatpush.bf16.msrb.mxu0 %v4972_v24  ;;  %v6591_v51 = vld [vmem:[%s7249_s30 + $0x424] sm:$0xf]  ;;  %v4937_v52 = vld [vmem:[%s7249_s30 + $0x430] sm:$0xf0]  ;;  %v5340_v54 = vor.u32 %v6691_v42, %v5337_v45 }
  0xf4   : > { %3658 = vmatpush.bf16.msrb.mxu1 %v5100_v25  ;;  %v6623_v53 = vld [vmem:[%s7249_s30 + $0x524] sm:$0xf]  ;;  %v5065_v55 = vld [vmem:[%s7249_s30 + $0x530] sm:$0xf0]  ;;  %v4940_v61 = vor.u32 %v6591_v51, %v4937_v52 }
  0xf5   : > { %3672 = vmatpush.bf16.msrb.mxu2 %v5228_v26  ;;  %v6655_v56 = vld [vmem:[%s7249_s30 + $0x624] sm:$0xf]  ;;  %v5193_v57 = vld [vmem:[%s7249_s30 + $0x630] sm:$0xf0]  ;;  %v5068_v0 = vor.u32 %v6623_v53, %v5065_v55 }
  0xf6   : > { %3686 = vmatpush.bf16.msrb.mxu3 %v5356_v30  ;;  %v6687_v59 = vld [vmem:[%s7249_s30 + $0x724] sm:$0xf]  ;;  %v5321_v60 = vld [vmem:[%s7249_s30 + $0x730] sm:$0xf0]  ;;  %v5196_v2 = vor.u32 %v6655_v56, %v5193_v57 }
  0xf7   : > { %3645 = vmatpush.bf16.msrb.mxu0 %v4956_v48  ;;  %v6587_v62 = vld [vmem:[%s7249_s30 + $0x404] sm:$0xf]  ;;  %v4921_v63 = vld [vmem:[%s7249_s30 + $0x410] sm:$0xf0]  ;;  %v5324_v6 = vor.u32 %v6687_v59, %v5321_v60 }
  0xf8   : > { %3659 = vmatpush.bf16.msrb.mxu1 %v5084_v49  ;;  %v6619_v3 = vld [vmem:[%s7249_s30 + $0x504] sm:$0xf]  ;;  %v5049_v4 = vld [vmem:[%s7249_s30 + $0x510] sm:$0xf0]  ;;  %v4924_v14 = vor.u32 %v6587_v62, %v4921_v63 }
  0xf9   : > { %3673 = vmatpush.bf16.msrb.mxu2 %v5212_v50  ;;  %v6651_v5 = vld [vmem:[%s7249_s30 + $0x604] sm:$0xf]  ;;  %v5177_v7 = vld [vmem:[%s7249_s30 + $0x610] sm:$0xf0]  ;;  %v5052_v19 = vor.u32 %v6619_v3, %v5049_v4 }
  0xfa   : > { %3687 = vmatpush.bf16.msrb.mxu3 %v5340_v54  ;;  %v6683_v8 = vld [vmem:[%s7249_s30 + $0x704] sm:$0xf]  ;;  %v5305_v9 = vld [vmem:[%s7249_s30 + $0x710] sm:$0xf0]  ;;  %v5180_v20 = vor.u32 %v6651_v5, %v5177_v7 }
  0xfb   : > { %v6743_v11 = vld [vmem:[%s7249_s30 + $0x8e4] sm:$0xf]  ;;  %v5545_v12 = vld [vmem:[%s7249_s30 + $0x8f0] sm:$0xf0]  ;;  %3646 = vmatpush.bf16.msrb.mxu0 %v4940_v61  ;;  %v5308_v23 = vor.u32 %v6683_v8, %v5305_v9 }
  0xfc   : > { %v6775_v13 = vld [vmem:[%s7249_s30 + $0x9e4] sm:$0xf]  ;;  %v5673_v15 = vld [vmem:[%s7249_s30 + $0x9f0] sm:$0xf0]  ;;  %3660 = vmatpush.bf16.msrb.mxu1 %v5068_v0  ;;  %v5548_v24 = vor.u32 %v6743_v11, %v5545_v12 }
  0xfd   : > { %v6807_v16 = vld [vmem:[%s7249_s30 + $0xae4] sm:$0xf]  ;;  %v5801_v18 = vld [vmem:[%s7249_s30 + $0xaf0] sm:$0xf0]  ;;  %3674 = vmatpush.bf16.msrb.mxu2 %v5196_v2  ;;  %v5676_v25 = vor.u32 %v6775_v13, %v5673_v15 }
  0xfe   : > { %v6839_v21 = vld [vmem:[%s7249_s30 + $0xbe4] sm:$0xf]  ;;  %v5929_v22 = vld [vmem:[%s7249_s30 + $0xbf0] sm:$0xf0]  ;;  %3688 = vmatpush.bf16.msrb.mxu3 %v5324_v6  ;;  %v5804_v26 = vor.u32 %v6807_v16, %v5801_v18 }
  0xff   : > { %v6739_v27 = vld [vmem:[%s7249_s30 + $0x8c4] sm:$0xf]  ;;  %v5529_v28 = vld [vmem:[%s7249_s30 + $0x8d0] sm:$0xf0]  ;;  %3647 = vmatpush.bf16.msrb.mxu0 %v4924_v14  ;;  %v5932_v30 = vor.u32 %v6839_v21, %v5929_v22  ;;  %v7837_v22 = vpop.f32.mrf.mxu0 }
 0x100   : > { %v6771_v29 = vld [vmem:[%s7249_s30 + $0x9c4] sm:$0xf]  ;;  %v5657_v33 = vld [vmem:[%s7249_s30 + $0x9d0] sm:$0xf0]  ;;  %3661 = vmatpush.bf16.msrb.mxu1 %v5052_v19  ;;  %v5532_v48 = vor.u32 %v6739_v27, %v5529_v28 }
 0x101   : > { %v6803_v34 = vld [vmem:[%s7249_s30 + $0xac4] sm:$0xf]  ;;  %v5785_v37 = vld [vmem:[%s7249_s30 + $0xad0] sm:$0xf0]  ;;  %3675 = vmatpush.bf16.msrb.mxu2 %v5180_v20  ;;  %v5660_v49 = vor.u32 %v6771_v29, %v5657_v33 }
 0x102   : > { %v6835_v42 = vld [vmem:[%s7249_s30 + $0xbc4] sm:$0xf]  ;;  %v5913_v45 = vld [vmem:[%s7249_s30 + $0xbd0] sm:$0xf0]  ;;  %3689 = vmatpush.bf16.msrb.mxu3 %v5308_v23  ;;  %v5788_v50 = vor.u32 %v6803_v34, %v5785_v37  ;;  %3648 = vmatmul.bf16.vlgmr.msrb.gmra.mxu0 %v7462_v39 }
 0x103   : > { %3696 = vmatpush.bf16.msra.mxu0 %v5548_v24  ;;  %v6735_v51 = vld [vmem:[%s7249_s30 + $0x8a4] sm:$0xf]  ;;  %v5513_v52 = vld [vmem:[%s7249_s30 + $0x8b0] sm:$0xf0]  ;;  %v5916_v54 = vor.u32 %v6835_v42, %v5913_v45  ;;  %3662 = vmatmul.bf16.vlgmr.msrb.gmra.mxu1 %v7469_v44 }
 0x104   : > { %3710 = vmatpush.bf16.msra.mxu1 %v5676_v25  ;;  %v6767_v53 = vld [vmem:[%s7249_s30 + $0x9a4] sm:$0xf]  ;;  %v5641_v55 = vld [vmem:[%s7249_s30 + $0x9b0] sm:$0xf0]  ;;  %3676 = vmatmul.bf16.vlgmr.msrb.gmra.mxu2 %v7467_v43  ;;  %v5516_v61 = vor.u32 %v6735_v51, %v5513_v52  ;;  %v7841_v25 = vpop.f32.mrf.mxu1 }
 0x105   : > { %3724 = vmatpush.bf16.msra.mxu2 %v5804_v26  ;;  %v6799_v56 = vld [vmem:[%s7249_s30 + $0xaa4] sm:$0xf]  ;;  %v5769_v57 = vld [vmem:[%s7249_s30 + $0xab0] sm:$0xf0]  ;;  %3690 = vmatmul.bf16.vlgmr.msrb.gmra.mxu3 %v7473_v47  ;;  %v5644_v62 = vor.u32 %v6767_v53, %v5641_v55 }
 0x106   : > { %3738 = vmatpush.bf16.msra.mxu3 %v5932_v30  ;;  %v6831_v59 = vld [vmem:[%s7249_s30 + $0xba4] sm:$0xf]  ;;  %v5897_v60 = vld [vmem:[%s7249_s30 + $0xbb0] sm:$0xf0]  ;;  %v5772_v63 = vor.u32 %v6799_v56, %v5769_v57  ;;  %v7857_v57 = vpop.f32.mrf.mxu2 }
 0x107   : > { %3697 = vmatpush.bf16.msra.mxu0 %v5532_v48  ;;  %v6731_v0 = vld [vmem:[%s7249_s30 + $0x884] sm:$0xf]  ;;  %v5497_v2 = vld [vmem:[%s7249_s30 + $0x890] sm:$0xf0]  ;;  %v5900_v4 = vor.u32 %v6831_v59, %v5897_v60 }
 0x108   : > { %3711 = vmatpush.bf16.msra.mxu1 %v5660_v49  ;;  %v6763_v3 = vld [vmem:[%s7249_s30 + $0x984] sm:$0xf]  ;;  %v5625_v5 = vld [vmem:[%s7249_s30 + $0x990] sm:$0xf0]  ;;  %v5500_v11 = vor.u32 %v6731_v0, %v5497_v2 }
 0x109   : > { %3725 = vmatpush.bf16.msra.mxu2 %v5788_v50  ;;  %v6795_v6 = vld [vmem:[%s7249_s30 + $0xa84] sm:$0xf]  ;;  %v5753_v7 = vld [vmem:[%s7249_s30 + $0xa90] sm:$0xf0]  ;;  %v5628_v12 = vor.u32 %v6763_v3, %v5625_v5 }
 0x10a   : > { %3739 = vmatpush.bf16.msra.mxu3 %v5916_v54  ;;  %v6827_v8 = vld [vmem:[%s7249_s30 + $0xb84] sm:$0xf]  ;;  %v5881_v9 = vld [vmem:[%s7249_s30 + $0xb90] sm:$0xf0]  ;;  %v5756_v13 = vor.u32 %v6795_v6, %v5753_v7  ;;  %v7869_v7 = vpop.f32.mrf.mxu0 }
 0x10b   : > { %3698 = vmatpush.bf16.msra.mxu0 %v5516_v61  ;;  %v6727_v14 = vld [vmem:[%s7249_s30 + $0x864] sm:$0xf]  ;;  %v5481_v15 = vld [vmem:[%s7249_s30 + $0x870] sm:$0xf0]  ;;  %v5884_v18 = vor.u32 %v6827_v8, %v5881_v9 }
 0x10c   : > { %3712 = vmatpush.bf16.msra.mxu1 %v5644_v62  ;;  %v6759_v16 = vld [vmem:[%s7249_s30 + $0x964] sm:$0xf]  ;;  %v5609_v19 = vld [vmem:[%s7249_s30 + $0x970] sm:$0xf0]  ;;  %v5484_v26 = vor.u32 %v6727_v14, %v5481_v15  ;;  %v7874_v14 = vpop.f32.mrf.mxu1 }
 0x10d   : > { %3726 = vmatpush.bf16.msra.mxu2 %v5772_v63  ;;  %v6791_v20 = vld [vmem:[%s7249_s30 + $0xa64] sm:$0xf]  ;;  %v5737_v21 = vld [vmem:[%s7249_s30 + $0xa70] sm:$0xf0]  ;;  %v5612_v27 = vor.u32 %v6759_v16, %v5609_v19  ;;  %v7862_v63 = vpop.f32.mrf.mxu3 }
 0x10e   : > { %3740 = vmatpush.bf16.msra.mxu3 %v5900_v4  ;;  %v6823_v23 = vld [vmem:[%s7249_s30 + $0xb64] sm:$0xf]  ;;  %v5865_v24 = vld [vmem:[%s7249_s30 + $0xb70] sm:$0xf0]  ;;  %v5740_v28 = vor.u32 %v6791_v20, %v5737_v21 }
 0x10f   : > { %3699 = vmatpush.bf16.msra.mxu0 %v5500_v11  ;;  %v6723_v29 = vld [vmem:[%s7249_s30 + $0x844] sm:$0xf]  ;;  %v5465_v30 = vld [vmem:[%s7249_s30 + $0x850] sm:$0xf0]  ;;  %v5868_v34 = vor.u32 %v6823_v23, %v5865_v24 }
 0x110   : > { %3713 = vmatpush.bf16.msra.mxu1 %v5628_v12  ;;  %v6755_v33 = vld [vmem:[%s7249_s30 + $0x944] sm:$0xf]  ;;  %v5593_v37 = vld [vmem:[%s7249_s30 + $0x950] sm:$0xf0]  ;;  %v5468_v51 = vor.u32 %v6723_v29, %v5465_v30 }
 0x111   : > { %3727 = vmatpush.bf16.msra.mxu2 %v5756_v13  ;;  %v6787_v42 = vld [vmem:[%s7249_s30 + $0xa44] sm:$0xf]  ;;  %v5721_v45 = vld [vmem:[%s7249_s30 + $0xa50] sm:$0xf0]  ;;  %v5596_v52 = vor.u32 %v6755_v33, %v5593_v37 }
 0x112   : > { %3741 = vmatpush.bf16.msra.mxu3 %v5884_v18  ;;  %v6819_v48 = vld [vmem:[%s7249_s30 + $0xb44] sm:$0xf]  ;;  %v5849_v49 = vld [vmem:[%s7249_s30 + $0xb50] sm:$0xf0]  ;;  %v5724_v53 = vor.u32 %v6787_v42, %v5721_v45 }
 0x113   : > { %v7852_v50 = vld [vmem:[%s7257_s5] sm:$0xf]  ;;  %3700 = vmatpush.bf16.msra.mxu0 %v5484_v26  ;;  %v5449_v55 = vld [vmem:[%s7249_s30 + $0x830] sm:$0xf0]  ;;  %v5852_v59 = vor.u32 %v6819_v48, %v5849_v49 }
 0x114   : > { %3714 = vmatpush.bf16.msra.mxu1 %v5612_v27  ;;  %v6719_v54 = vld [vmem:[%s7249_s30 + $0x824] sm:$0xf]  ;;  %v5577_v60 = vld [vmem:[%s7249_s30 + $0x930] sm:$0xf0]  ;;  %v792_v3 = vperm.slane %v7852_v50, 0 }
 0x115   : > { %3728 = vmatpush.bf16.msra.mxu2 %v5740_v28  ;;  %v6751_v56 = vld [vmem:[%s7249_s30 + $0x924] sm:$0xf]  ;;  %v5705_v62 = vld [vmem:[%s7249_s30 + $0xa30] sm:$0xf0]  ;;  %v5452_v4 = vor.u32 %v6719_v54, %v5449_v55  ;;  %v7893_v54 = vpop.f32.mrf.mxu2 }
 0x116   : > { %3742 = vmatpush.bf16.msra.mxu3 %v5868_v34  ;;  %v6783_v61 = vld [vmem:[%s7249_s30 + $0xa24] sm:$0xf]  ;;  %v5833_v2 = vld [vmem:[%s7249_s30 + $0xb30] sm:$0xf0]  ;;  %v5580_v8 = vor.u32 %v6751_v56, %v5577_v60  ;;  %v3370_v45 = vadd.f32 %v7837_v22, %v792_v3 }
 0x117   : > { %v6815_v0 = vld [vmem:[%s7249_s30 + $0xb24] sm:$0xf]  ;;  %3701 = vmatpush.bf16.msra.mxu0 %v5468_v51  ;;  %v5433_v6 = vld [vmem:[%s7249_s30 + $0x810] sm:$0xf0]  ;;  %v5708_v9 = vor.u32 %v6783_v61, %v5705_v62  ;;  %v7898_v61 = vpop.f32.mrf.mxu3 }
 0x118   : > { %v6715_v5 = vld [vmem:[%s7249_s30 + $0x804] sm:$0xf]  ;;  %3715 = vmatpush.bf16.msra.mxu1 %v5596_v52  ;;  %v5561_v12 = vld [vmem:[%s7249_s30 + $0x910] sm:$0xf0]  ;;  %v5836_v15 = vor.u32 %v6815_v0, %v5833_v2  ;;  %v3384_v2 = vadd.f32 %v7841_v25, %v3370_v45 }
 0x119   : > { %3729 = vmatpush.bf16.msra.mxu2 %v5724_v53  ;;  %v6747_v11 = vld [vmem:[%s7249_s30 + $0x904] sm:$0xf]  ;;  %v5689_v16 = vld [vmem:[%s7249_s30 + $0xa10] sm:$0xf0]  ;;  %v5436_v24 = vor.u32 %v6715_v5, %v5433_v6 }
 0x11a   : > { %v6779_v13 = vld [vmem:[%s7249_s30 + $0xa04] sm:$0xf]  ;;  %3743 = vmatpush.bf16.msra.mxu3 %v5852_v59  ;;  %v5817_v19 = vld [vmem:[%s7249_s30 + $0xb10] sm:$0xf0]  ;;  %v5564_v29 = vor.u32 %v6747_v11, %v5561_v12  ;;  %v7906_v12 = vpop.f32.mrf.mxu1 }
 0x11b   : > { %v6811_v18 = vld [vmem:[%s7249_s30 + $0xb04] sm:$0xf]  ;;  %v6057_v21 = vld [vmem:[%s7249_s30 + $0xcf0] sm:$0xf0]  ;;  %3702 = vmatpush.bf16.msra.mxu0 %v5452_v4  ;;  %v5692_v30 = vor.u32 %v6779_v13, %v5689_v16  ;;  %v3425_v4 = vpop.f32.mrf.mxu0 }
 0x11c   : > { %v6871_v20 = vld [vmem:[%s7249_s30 + $0xce4] sm:$0xf]  ;;  %v6185_v26 = vld [vmem:[%s7249_s30 + $0xdf0] sm:$0xf0]  ;;  %3716 = vmatpush.bf16.msra.mxu1 %v5580_v8  ;;  %v5820_v37 = vor.u32 %v6811_v18, %v5817_v19 }
 0x11d   : > { %v6903_v23 = vld [vmem:[%s7249_s30 + $0xde4] sm:$0xf]  ;;  %v6313_v28 = vld [vmem:[%s7249_s30 + $0xef0] sm:$0xf0]  ;;  %3730 = vmatpush.bf16.msra.mxu2 %v5708_v9  ;;  %v6060_v42 = vor.u32 %v6871_v20, %v6057_v21  ;;  %v3398_v21 = vadd.f32 %v7857_v57, %v3384_v2  ;;  %v7929_v45 = vpop.f32.mrf.mxu2 }
 0x11e   : > { %v6935_v27 = vld [vmem:[%s7249_s30 + $0xee4] sm:$0xf]  ;;  %v6441_v34 = vld [vmem:[%s7249_s30 + $0xff0] sm:$0xf0]  ;;  %3744 = vmatpush.bf16.msra.mxu3 %v5836_v15  ;;  %v6188_v48 = vor.u32 %v6903_v23, %v6185_v26 }
 0x11f   : > { %v6967_v33 = vld [vmem:[%s7249_s30 + $0xfe4] sm:$0xf]  ;;  %v6316_v49 = vor.u32 %v6935_v27, %v6313_v28  ;;  %v6041_v52 = vld [vmem:[%s7249_s30 + $0xcd0] sm:$0xf0]  ;;  %3703 = vmatpush.bf16.msra.mxu0 %v5436_v24 }
 0x120   : > { %v6867_v51 = vld [vmem:[%s7249_s30 + $0xcc4] sm:$0xf]  ;;  %v6444_v55 = vor.u32 %v6967_v33, %v6441_v34  ;;  %v6169_v56 = vld [vmem:[%s7249_s30 + $0xdd0] sm:$0xf0]  ;;  %3717 = vmatpush.bf16.msra.mxu1 %v5564_v29 }
 0x121   : > { %v6899_v53 = vld [vmem:[%s7249_s30 + $0xdc4] sm:$0xf]  ;;  %v6297_v60 = vld [vmem:[%s7249_s30 + $0xed0] sm:$0xf0]  ;;  %3731 = vmatpush.bf16.msra.mxu2 %v5692_v30  ;;  %v6044_v0 = vor.u32 %v6867_v51, %v6041_v52  ;;  %v7932_v51 = vpop.f32.mrf.mxu3 }
 0x122   : > { %v6931_v59 = vld [vmem:[%s7249_s30 + $0xec4] sm:$0xf]  ;;  %v6425_v62 = vld [vmem:[%s7249_s30 + $0xfd0] sm:$0xf0]  ;;  %3745 = vmatpush.bf16.msra.mxu3 %v5820_v37  ;;  %v6172_v5 = vor.u32 %v6899_v53, %v6169_v56  ;;  %3704 = vmatmul.bf16.vlgmr.msra.gmra.mxu0 %v7562_v31  ;;  %v3372_v37 = vadd.f32 %v7869_v7, %v792_v3  ;;  %v7943_v2 = vpop.f32.mrf.mxu1 }
 0x123   : > { %v6963_v22 = vld [vmem:[%s7249_s30 + $0xfc4] sm:$0xf]  ;;  %3752 = vmatpush.bf16.msrb.mxu0 %v6060_v42  ;;  %v6300_v6 = vor.u32 %v6931_v59, %v6297_v60  ;;  %v6025_v9 = vld [vmem:[%s7249_s30 + $0xcb0] sm:$0xf0]  ;;  %3718 = vmatmul.bf16.vlgmr.msra.gmra.mxu1 %v7569_v36 }
 0x124   : > { %3766 = vmatpush.bf16.msrb.mxu1 %v6188_v48  ;;  %v6863_v8 = vld [vmem:[%s7249_s30 + $0xca4] sm:$0xf]  ;;  %v6428_v13 = vor.u32 %v6963_v22, %v6425_v62  ;;  %v6153_v15 = vld [vmem:[%s7249_s30 + $0xdb0] sm:$0xf0]  ;;  %3732 = vmatmul.bf16.vlgmr.msra.gmra.mxu2 %v7567_v35  ;;  %v3427_v22 = vpop.f32.mrf.mxu0 }
 0x125   : > { %3780 = vmatpush.bf16.msrb.mxu2 %v6316_v49  ;;  %v6895_v11 = vld [vmem:[%s7249_s30 + $0xda4] sm:$0xf]  ;;  %v6281_v16 = vld [vmem:[%s7249_s30 + $0xeb0] sm:$0xf0]  ;;  %3746 = vmatmul.bf16.vlgmr.msra.gmra.mxu3 %v7573_v40  ;;  %v6028_v20 = vor.u32 %v6863_v8, %v6025_v9  ;;  %v3412_v49 = vadd.f32 %v7862_v63, %v3398_v21  ;;  %v3386_v63 = vadd.f32 %v7874_v14, %v3372_v37 }
 0x126   : > { %3794 = vmatpush.bf16.msrb.mxu3 %v6444_v55  ;;  %v6927_v25 = vld [vmem:[%s7249_s30 + $0xea4] sm:$0xf]  ;;  %v6409_v19 = vld [vmem:[%s7249_s30 + $0xfb0] sm:$0xf0]  ;;  %v6156_v23 = vor.u32 %v6895_v11, %v6153_v15 }
 0x127   : > { %v6959_v18 = vld [vmem:[%s7249_s30 + $0xfa4] sm:$0xf]  ;;  %3753 = vmatpush.bf16.msrb.mxu0 %v6044_v0  ;;  %v6284_v24 = vor.u32 %v6927_v25, %v6281_v16  ;;  %v6009_v27 = vld [vmem:[%s7249_s30 + $0xc90] sm:$0xf0] }
 0x128   : > { %3767 = vmatpush.bf16.msrb.mxu1 %v6172_v5  ;;  %v6859_v26 = vld [vmem:[%s7249_s30 + $0xc84] sm:$0xf]  ;;  %v6412_v29 = vor.u32 %v6959_v18, %v6409_v19  ;;  %v6137_v30 = vld [vmem:[%s7249_s30 + $0xd90] sm:$0xf0]  ;;  %v3400_v19 = vadd.f32 %v7893_v54, %v3386_v63  ;;  %v3455_v54 = vpop.f32.mrf.mxu2 }
 0x129   : > { %3781 = vmatpush.bf16.msrb.mxu2 %v6300_v6  ;;  %v6891_v28 = vld [vmem:[%s7249_s30 + $0xd84] sm:$0xf]  ;;  %v6265_v34 = vld [vmem:[%s7249_s30 + $0xe90] sm:$0xf0]  ;;  %v6012_v48 = vor.u32 %v6859_v26, %v6009_v27  ;;  %v3426_v6 = vadd.f32 %v3425_v4, %v3412_v49 }
 0x12a   : > { %3795 = vmatpush.bf16.msrb.mxu3 %v6428_v13  ;;  %v6923_v33 = vld [vmem:[%s7249_s30 + $0xe84] sm:$0xf]  ;;  %v6393_v42 = vld [vmem:[%s7249_s30 + $0xf90] sm:$0xf0]  ;;  %v6140_v50 = vor.u32 %v6891_v28, %v6137_v30 }
 0x12b   : > { %v6955_v57 = vld [vmem:[%s7249_s30 + $0xf84] sm:$0xf]  ;;  %3754 = vmatpush.bf16.msrb.mxu0 %v6028_v20  ;;  %v6268_v52 = vor.u32 %v6923_v33, %v6265_v34  ;;  %v5993_v7 = vld [vmem:[%s7249_s30 + $0xc70] sm:$0xf0] }
 0x12c   : > { %3768 = vmatpush.bf16.msrb.mxu1 %v6156_v23  ;;  %v6855_v3 = vld [vmem:[%s7249_s30 + $0xc64] sm:$0xf]  ;;  %v6396_v55 = vor.u32 %v6955_v57, %v6393_v42  ;;  %v6121_v56 = vld [vmem:[%s7249_s30 + $0xd70] sm:$0xf0]  ;;  %v3440_v23 = vadd.f32 %v7906_v12, %v3426_v6  ;;  %v3414_v12 = vadd.f32 %v7898_v61, %v3400_v19  ;;  %v7962_v57 = vpop.f32.mrf.mxu3  ;;  %v3481_v42 = vpop.f32.mrf.mxu0  ;;  %v4911_v19 = vld [vmem:[%s7249_s30 + $0x3e8] sm:$0xf] }
 0x12d   : > { %3782 = vmatpush.bf16.msrb.mxu2 %v6284_v24  ;;  %v6887_v53 = vld [vmem:[%s7249_s30 + $0xd64] sm:$0xf]  ;;  %v6249_v60 = vld [vmem:[%s7249_s30 + $0xe70] sm:$0xf0]  ;;  %v5996_v5 = vor.u32 %v6855_v3, %v5993_v7 }
 0x12e   : > { %3796 = vmatpush.bf16.msrb.mxu3 %v6412_v29  ;;  %v6919_v59 = vld [vmem:[%s7249_s30 + $0xe64] sm:$0xf]  ;;  %v6377_v0 = vld [vmem:[%s7249_s30 + $0xf70] sm:$0xf0]  ;;  %v6124_v8 = vor.u32 %v6887_v53, %v6121_v56  ;;  %v3454_v53 = vadd.f32 %v7929_v45, %v3440_v23  ;;  %v3428_v6 = vadd.f32 %v3427_v22, %v3414_v12  ;;  %v4527_v45 = vld [vmem:[%s7249_s30 + $0xe8] sm:$0xf] }
 0x12f   : > { %v6951_v62 = vld [vmem:[%s7249_s30 + $0xf64] sm:$0xf]  ;;  %3755 = vmatpush.bf16.msrb.mxu0 %v6012_v48  ;;  %v6252_v9 = vor.u32 %v6919_v59, %v6249_v60  ;;  %v5977_v13 = vld [vmem:[%s7249_s30 + $0xc50] sm:$0xf0]  ;;  %v6586_v22 = vld [vmem:[%s7249_s30 + $0x3f4] sm:$0xf0] }
 0x130   : > { %3769 = vmatpush.bf16.msrb.mxu1 %v6140_v50  ;;  %v6851_v11 = vld [vmem:[%s7249_s30 + $0xc44] sm:$0xf]  ;;  %v6380_v15 = vor.u32 %v6951_v62, %v6377_v0  ;;  %v6105_v25 = vld [vmem:[%s7249_s30 + $0xd50] sm:$0xf0]  ;;  %v3495_v50 = vpop.f32.mrf.mxu1  ;;  %v3442_v23 = vadd.f32 %v7943_v2, %v3428_v6  ;;  %v6550_v12 = vld [vmem:[%s7249_s30 + $0x2d4] sm:$0xf0] }
 0x131   : > { %3783 = vmatpush.bf16.msrb.mxu2 %v6268_v52  ;;  %v6883_v14 = vld [vmem:[%s7249_s30 + $0xd44] sm:$0xf]  ;;  %v6233_v18 = vld [vmem:[%s7249_s30 + $0xe50] sm:$0xf0]  ;;  %v5980_v21 = vor.u32 %v6851_v11, %v5977_v13  ;;  %v6522_v13 = vld [vmem:[%s7249_s30 + $0x1f4] sm:$0xf0] }
 0x132   : > { %3797 = vmatpush.bf16.msrb.mxu3 %v6396_v55  ;;  %v6915_v16 = vld [vmem:[%s7249_s30 + $0xe44] sm:$0xf]  ;;  %v6361_v4 = vld [vmem:[%s7249_s30 + $0xf50] sm:$0xf0]  ;;  %v6108_v24 = vor.u32 %v6883_v14, %v6105_v25  ;;  %v4783_v14 = vld [vmem:[%s7249_s30 + $0x2e8] sm:$0xf]  ;;  %v3468_v25 = vadd.f32 %v7932_v51, %v3454_v53 }
 0x133   : > { %v6947_v20 = vld [vmem:[%s7249_s30 + $0xf44] sm:$0xf]  ;;  %3756 = vmatpush.bf16.msrb.mxu0 %v5996_v5  ;;  %v6236_v26 = vor.u32 %v6915_v16, %v6233_v18  ;;  %v5961_v28 = vld [vmem:[%s7249_s30 + $0xc30] sm:$0xf0]  ;;  %v4895_v2 = vld [vmem:[%s7249_s30 + $0x3c8] sm:$0xf] }
 0x134   : > { %3770 = vmatpush.bf16.msrb.mxu1 %v6124_v8  ;;  %v6847_v27 = vld [vmem:[%s7249_s30 + $0xc24] sm:$0xf]  ;;  %v6364_v30 = vor.u32 %v6947_v20, %v6361_v4  ;;  %v6089_v33 = vld [vmem:[%s7249_s30 + $0xd30] sm:$0xf0]  ;;  %v6490_v8 = vld [vmem:[%s7249_s30 + $0xf4] sm:$0xf0]  ;;  %v3509_v20 = vpop.f32.mrf.mxu2  ;;  %v3523_v51 = vpop.f32.mrf.mxu3 }
 0x135   : > { %3784 = vmatpush.bf16.msrb.mxu2 %v6252_v9  ;;  %v6879_v29 = vld [vmem:[%s7249_s30 + $0xd24] sm:$0xf]  ;;  %v6217_v37 = vld [vmem:[%s7249_s30 + $0xe30] sm:$0xf0]  ;;  %v5964_v52 = vor.u32 %v6847_v27, %v5961_v28  ;;  %v4655_v9 = vld [vmem:[%s7249_s30 + $0x1e8] sm:$0xf] }
 0x136   : > { %3798 = vmatpush.bf16.msrb.mxu3 %v6380_v15  ;;  %v6911_v34 = vld [vmem:[%s7249_s30 + $0xe24] sm:$0xf]  ;;  %v6345_v49 = vld [vmem:[%s7249_s30 + $0xf30] sm:$0xf0]  ;;  %v6092_v61 = vor.u32 %v6879_v29, %v6089_v33  ;;  %v6554_v15 = vld [vmem:[%s7249_s30 + $0x2f4] sm:$0xf0]  ;;  %v4912_v33 = vor.u32 %v6586_v22, %v4911_v19 }
 0x137   : > { %v6943_v48 = vld [vmem:[%s7249_s30 + $0xf24] sm:$0xf]  ;;  %3757 = vmatpush.bf16.msrb.mxu0 %v5980_v21  ;;  %v5945_v7 = vld [vmem:[%s7249_s30 + $0xc10] sm:$0xf0]  ;;  %v6220_v55 = vor.u32 %v6911_v34, %v6217_v37  ;;  %v4528_v21 = vor.u32 %v6490_v8, %v4527_v45  ;;  %v4784_v27 = vor.u32 %v6554_v15, %v4783_v14  ;;  %v4511_v28 = vld [vmem:[%s7249_s30 + $0xc8] sm:$0xf] }
 0x138   : > { %v6843_v3 = vld [vmem:[%s7249_s30 + $0xc04] sm:$0xf]  ;;  %3771 = vmatpush.bf16.msrb.mxu1 %v6108_v24  ;;  %v6073_v59 = vld [vmem:[%s7249_s30 + $0xd10] sm:$0xf0]  ;;  %v6348_v63 = vor.u32 %v6943_v48, %v6345_v49  ;;  %v3482_v24 = vadd.f32 %v3481_v42, %v3468_v25  ;;  %v6486_v29 = vld [vmem:[%s7249_s30 + $0xd4] sm:$0xf0]  ;;  %v3456_v48 = vadd.f32 %v3455_v54, %v3442_v23  ;;  %v3483_v49 = vpop.f32.mrf.mxu0 }
 0x139   : > { %3785 = vmatpush.bf16.msrb.mxu2 %v6236_v26  ;;  %v6875_v56 = vld [vmem:[%s7249_s30 + $0xd04] sm:$0xf]  ;;  %v6201_v62 = vld [vmem:[%s7249_s30 + $0xe10] sm:$0xf0]  ;;  %v5948_v11 = vor.u32 %v6843_v3, %v5945_v7  ;;  %v4656_v26 = vor.u32 %v6522_v13, %v4655_v9  ;;  %v6518_v34 = vld [vmem:[%s7249_s30 + $0x1d4] sm:$0xf0]  ;;  %v4512_v3 = vor.u32 %v6486_v29, %v4511_v28 }
 0x13a   : > { %v6907_v60 = vld [vmem:[%s7249_s30 + $0xe04] sm:$0xf]  ;;  %3799 = vmatpush.bf16.msrb.mxu3 %v6364_v30  ;;  %v6329_v5 = vld [vmem:[%s7249_s30 + $0xf10] sm:$0xf0]  ;;  %v6076_v16 = vor.u32 %v6875_v56, %v6073_v59  ;;  %v4639_v30 = vld [vmem:[%s7249_s30 + $0x1c8] sm:$0xf]  ;;  %v3496_v7 = vadd.f32 %v3495_v50, %v3482_v24  ;;  %v3470_v50 = vadd.f32 %v7962_v57, %v3456_v48 }
 0x13b   : > { %v6939_v0 = vld [vmem:[%s7249_s30 + $0xf04] sm:$0xf]  ;;  %3758 = vmatpush.bf16.msrb.mxu0 %v5964_v52  ;;  %v6204_v18 = vor.u32 %v6907_v60, %v6201_v62  ;;  %v4767_v37 = vld [vmem:[%s7249_s30 + $0x2c8] sm:$0xf]  ;;  %v6582_v42 = vld [vmem:[%s7249_s30 + $0x3d4] sm:$0xf0]  ;;  %v3497_v52 = vpop.f32.mrf.mxu1  ;;  %v4640_v53 = vor.u32 %v6518_v34, %v4639_v30 }
 0x13c   : > { %3772 = vmatpush.bf16.msrb.mxu1 %v6092_v61  ;;  %v6332_v4 = vor.u32 %v6939_v0, %v6329_v5  ;;  %v4768_v54 = vor.u32 %v6550_v12, %v4767_v37  ;;  %v4495_v61 = vld [vmem:[%s7249_s30 + $0xa8] sm:$0xf]  ;;  %v4896_v59 = vor.u32 %v6582_v42, %v4895_v2  ;;  %v6514_v60 = vld [vmem:[%s7249_s30 + $0x1b4] sm:$0xf0]  ;;  %v3510_v0 = vadd.f32 %v3509_v20, %v3496_v7  ;;  %v3511_v25 = vpop.f32.mrf.mxu2  ;;  %v3525_v20 = vpop.f32.mrf.mxu3 }
 0x13d   : > { %3786 = vmatpush.bf16.msrb.mxu2 %v6220_v55  ;;  %v6482_v55 = vld [vmem:[%s7249_s30 + $0xb4] sm:$0xf0]  ;;  %v4623_v56 = vld [vmem:[%s7249_s30 + $0x1a8] sm:$0xf]  ;;  %v3484_v9 = vadd.f32 %v3483_v49, %v3470_v50 }
 0x13e   : > { %3800 = vmatpush.bf16.msrb.mxu3 %v6348_v63  ;;  %v4751_v63 = vld [vmem:[%s7249_s30 + $0x2a8] sm:$0xf]  ;;  %v6546_v62 = vld [vmem:[%s7249_s30 + $0x2b4] sm:$0xf0]  ;;  %v4496_v45 = vor.u32 %v6482_v55, %v4495_v61  ;;  %v4624_v57 = vor.u32 %v6514_v60, %v4623_v56  ;;  %v3524_v22 = vadd.f32 %v3523_v51, %v3510_v0 }
 0x13f   : > { %3759 = vmatpush.bf16.msrb.mxu0 %v5948_v11  ;;  %v4879_v5 = vld [vmem:[%s7249_s30 + $0x3a8] sm:$0xf]  ;;  %v6578_v6 = vld [vmem:[%s7249_s30 + $0x3b4] sm:$0xf0]  ;;  %v4752_v11 = vor.u32 %v6546_v62, %v4751_v63  ;;  %v3498_v28 = vadd.f32 %v3497_v52, %v3484_v9 }
 0x140   : > { %3773 = vmatpush.bf16.msrb.mxu1 %v6076_v16  ;;  %v4479_v8 = vld [vmem:[%s7249_s30 + $0x88] sm:$0xf]  ;;  %v6478_v13 = vld [vmem:[%s7249_s30 + $0x94] sm:$0xf0]  ;;  %v4880_v16 = vor.u32 %v6578_v6, %v4879_v5 }
 0x141   : > { %3787 = vmatpush.bf16.msrb.mxu2 %v6204_v18  ;;  %v4607_v14 = vld [vmem:[%s7249_s30 + $0x188] sm:$0xf]  ;;  %v6510_v15 = vld [vmem:[%s7249_s30 + $0x194] sm:$0xf0]  ;;  %v4480_v24 = vor.u32 %v6478_v13, %v4479_v8  ;;  %v3512_v2 = vadd.f32 %v3511_v25, %v3498_v28 }
 0x142   : > { %3801 = vmatpush.bf16.msrb.mxu3 %v6332_v4  ;;  %3760 = vmatmul.bf16.vlgmr.msrb.gmra.mxu0 %v7662_v32  ;;  %v4735_v18 = vld [vmem:[%s7249_s30 + $0x288] sm:$0xf]  ;;  %v6542_v19 = vld [vmem:[%s7249_s30 + $0x294] sm:$0xf0]  ;;  %v3537_v4 = vpop.f32.mrf.mxu0 }
 0x143   : > { %3808 = vmatpush.bf16.msra.mxu0 %v4528_v21  ;;  %3774 = vmatmul.bf16.vlgmr.msrb.gmra.mxu1 %v7669_v41  ;;  %v4863_v21 = vld [vmem:[%s7249_s30 + $0x388] sm:$0xf]  ;;  %v6574_v23 = vld [vmem:[%s7249_s30 + $0x394] sm:$0xf0]  ;;  %v3538_v29 = vadd.f32 %v3537_v4, %v3524_v22  ;;  %v4736_v51 = vor.u32 %v6542_v19, %v4735_v18  ;;  %v3526_v0 = vadd.f32 %v3525_v20, %v3512_v2 }
 0x144   : > { %3822 = vmatpush.bf16.msra.mxu1 %v4656_v26  ;;  %3788 = vmatmul.bf16.vlgmr.msrb.gmra.mxu2 %v7667_v38  ;;  %v4608_v26 = vor.u32 %v6510_v15, %v4607_v14  ;;  %v4463_v30 = vld [vmem:[%s7249_s30 + $0x68] sm:$0xf]  ;;  %v4864_v37 = vor.u32 %v6574_v23, %v4863_v21  ;;  %v6506_v12 = vld [vmem:[%s7249_s30 + $0x174] sm:$0xf0] }
 0x145   : > { %3836 = vmatpush.bf16.msra.mxu2 %v4784_v27  ;;  %3802 = vmatmul.bf16.vlgmr.msrb.gmra.mxu3 %v7673_v46  ;;  %v3551_v27 = vpop.f32.mrf.mxu1  ;;  %v4591_v34 = vld [vmem:[%s7249_s30 + $0x168] sm:$0xf]  ;;  %v6538_v49 = vld [vmem:[%s7249_s30 + $0x274] sm:$0xf0] }
 0x146   : > { %3850 = vmatpush.bf16.msra.mxu3 %v4912_v33  ;;  %v6474_v33 = vld [vmem:[%s7249_s30 + $0x74] sm:$0xf0]  ;;  %v4719_v48 = vld [vmem:[%s7249_s30 + $0x268] sm:$0xf] }
 0x147   : > { %3809 = vmatpush.bf16.msra.mxu0 %v4512_v3  ;;  %v4847_v42 = vld [vmem:[%s7249_s30 + $0x368] sm:$0xf]  ;;  %v6570_v52 = vld [vmem:[%s7249_s30 + $0x374] sm:$0xf0]  ;;  %v4464_v3 = vor.u32 %v6474_v33, %v4463_v30  ;;  %v4720_v61 = vor.u32 %v6538_v49, %v4719_v48 }
 0x148   : > { %3823 = vmatpush.bf16.msra.mxu1 %v4640_v53  ;;  %v4447_v7 = vld [vmem:[%s7249_s30 + $0x48] sm:$0xf]  ;;  %v3552_v53 = vadd.f32 %v3551_v27, %v3538_v29  ;;  %v6470_v55 = vld [vmem:[%s7249_s30 + $0x54] sm:$0xf0]  ;;  %v4848_v60 = vor.u32 %v6570_v52, %v4847_v42 }
 0x149   : > { %3837 = vmatpush.bf16.msra.mxu2 %v4768_v54  ;;  %v4592_v54 = vor.u32 %v6506_v12, %v4591_v34  ;;  %v4575_v56 = vld [vmem:[%s7249_s30 + $0x148] sm:$0xf]  ;;  %v3565_v63 = vpop.f32.mrf.mxu2  ;;  %v6534_v50 = vld [vmem:[%s7249_s30 + $0x254] sm:$0xf0] }
 0x14a   : > { %3851 = vmatpush.bf16.msra.mxu3 %v4896_v59  ;;  %v6502_v59 = vld [vmem:[%s7249_s30 + $0x154] sm:$0xf0]  ;;  %v4703_v62 = vld [vmem:[%s7249_s30 + $0x248] sm:$0xf]  ;;  %v3566_v5 = vadd.f32 %v3565_v63, %v3552_v53  ;;  %v3539_v6 = vpop.f32.mrf.mxu0 }
 0x14b   : > { %3810 = vmatpush.bf16.msra.mxu0 %v4496_v45  ;;  %v3579_v45 = vpop.f32.mrf.mxu3  ;;  %v4831_v8 = vld [vmem:[%s7249_s30 + $0x348] sm:$0xf]  ;;  %v6566_v9 = vld [vmem:[%s7249_s30 + $0x354] sm:$0xf0]  ;;  %v3540_v13 = vadd.f32 %v3539_v6, %v3526_v0  ;;  %v4704_v15 = vor.u32 %v6534_v50, %v4703_v62 }
 0x14c   : > { %3824 = vmatpush.bf16.msra.mxu1 %v4624_v57  ;;  %v4448_v57 = vor.u32 %v6470_v55, %v4447_v7  ;;  %v3580_v14 = vadd.f32 %v3579_v45, %v3566_v5  ;;  %v4431_v25 = vld [vmem:[%s7249_s30 + $0x28] sm:$0xf]  ;;  %v4832_v19 = vor.u32 %v6566_v9, %v4831_v8  ;;  %v6498_v20 = vld [vmem:[%s7249_s30 + $0x134] sm:$0xf0] }
 0x14d   : > { %3838 = vmatpush.bf16.msra.mxu2 %v4752_v11  ;;  %v4576_v11 = vor.u32 %v6502_v59, %v4575_v56  ;;  %v4559_v18 = vld [vmem:[%s7249_s30 + $0x128] sm:$0xf]  ;;  %v3553_v22 = vpop.f32.mrf.mxu1  ;;  %v6530_v21 = vld [vmem:[%s7249_s30 + $0x234] sm:$0xf0] }
 0x14e   : > { %3852 = vmatpush.bf16.msra.mxu3 %v4880_v16  ;;  %v6466_v16 = vld [vmem:[%s7249_s30 + $0x34] sm:$0xf0]  ;;  %v4687_v4 = vld [vmem:[%s7249_s30 + $0x228] sm:$0xf]  ;;  %4256 = vst [vmem:[%s8039_s21] sm:$0xff] %v3580_v14  ;;  %v3554_v29 = vadd.f32 %v3553_v22, %v3540_v13 }
 0x14f   : > { %3811 = vmatpush.bf16.msra.mxu0 %v4480_v24  ;;  %v4815_v23 = vld [vmem:[%s7249_s30 + $0x328] sm:$0xf]  ;;  %v6562_v24 = vld [vmem:[%s7249_s30 + $0x334] sm:$0xf0]  ;;  %v4688_v30 = vor.u32 %v6530_v21, %v4687_v4 }
 0x150   : > { %3825 = vmatpush.bf16.msra.mxu1 %v4608_v26  ;;  %v4432_v26 = vor.u32 %v6466_v16, %v4431_v25  ;;  %v4415_v27 = vld [vmem:[%s7249_s30 + $0x8] sm:$0xf]  ;;  %v6462_v28 = vld [vmem:[%s7249_s30 + $0x14] sm:$0xf0]  ;;  %v4816_v12 = vor.u32 %v6562_v24, %v4815_v23 }
 0x151   : > { %3839 = vmatpush.bf16.msra.mxu2 %v4736_v51  ;;  %v4560_v51 = vor.u32 %v6498_v20, %v4559_v18  ;;  %v4543_v33 = vld [vmem:[%s7249_s30 + $0x108] sm:$0xf]  ;;  %v6494_v34 = vld [vmem:[%s7249_s30 + $0x114] sm:$0xf0]  ;;  %v3567_v48 = vpop.f32.mrf.mxu2 }
 0x152   : > { %3853 = vmatpush.bf16.msra.mxu3 %v4864_v37  ;;  %v4671_v37 = vld [vmem:[%s7249_s30 + $0x208] sm:$0xf]  ;;  %v6526_v49 = vld [vmem:[%s7249_s30 + $0x214] sm:$0xf0]  ;;  %v3568_v52 = vadd.f32 %v3567_v48, %v3554_v29  ;;  %v4544_v63 = vor.u32 %v6494_v34, %v4543_v33 }
 0x153   : > { %3812 = vmatpush.bf16.msra.mxu0 %v4464_v3  ;;  %v4799_v2 = vld [vmem:[%s7249_s30 + $0x308] sm:$0xf]  ;;  %v6558_v42 = vld [vmem:[%s7249_s30 + $0x314] sm:$0xf0]  ;;  %v3581_v3 = vpop.f32.mrf.mxu3  ;;  %v4672_v62 = vor.u32 %v6526_v49, %v4671_v37 }
 0x154   : > { %3826 = vmatpush.bf16.msra.mxu1 %v4592_v54  ;;  %v5039_v7 = vld [vmem:[%s7249_s30 + $0x4e8] sm:$0xf]  ;;  %v6618_v53 = vld [vmem:[%s7249_s30 + $0x4f4] sm:$0xf0]  ;;  %v4800_v5 = vor.u32 %v6558_v42, %v4799_v2 }
 0x155   : > { %3840 = vmatpush.bf16.msra.mxu2 %v4720_v61  ;;  %v5167_v54 = vld [vmem:[%s7249_s30 + $0x5e8] sm:$0xf]  ;;  %v4416_v61 = vor.u32 %v6462_v28, %v4415_v27  ;;  %v6650_v55 = vld [vmem:[%s7249_s30 + $0x5f4] sm:$0xf0]  ;;  %v5040_v6 = vor.u32 %v6618_v53, %v5039_v7 }
 0x156   : > { %3854 = vmatpush.bf16.msra.mxu3 %v4848_v60  ;;  %v5295_v56 = vld [vmem:[%s7249_s30 + $0x6e8] sm:$0xf]  ;;  %v6682_v59 = vld [vmem:[%s7249_s30 + $0x6f4] sm:$0xf0]  ;;  %v3582_v60 = vadd.f32 %v3581_v3, %v3568_v52  ;;  %v5168_v8 = vor.u32 %v6650_v55, %v5167_v54 }
 0x157   : > { %3813 = vmatpush.bf16.msra.mxu0 %v4448_v57  ;;  %v5423_v50 = vld [vmem:[%s7249_s30 + $0x7e8] sm:$0xf]  ;;  %v6714_v0 = vld [vmem:[%s7249_s30 + $0x7f4] sm:$0xf0]  ;;  %v5296_v9 = vor.u32 %v6682_v59, %v5295_v56 }
 0x158   : > { %3827 = vmatpush.bf16.msra.mxu1 %v4576_v11  ;;  %v5023_v45 = vld [vmem:[%s7249_s30 + $0x4c8] sm:$0xf]  ;;  %4260 = vst [vmem:[%s8039_s21 + $0x20] sm:$0xff] %v3582_v60  ;;  %v6614_v57 = vld [vmem:[%s7249_s30 + $0x4d4] sm:$0xf0]  ;;  %v5424_v13 = vor.u32 %v6714_v0, %v5423_v50 }
 0x159   : > { %3841 = vmatpush.bf16.msra.mxu2 %v4704_v15  ;;  %v5151_v11 = vld [vmem:[%s7249_s30 + $0x5c8] sm:$0xf]  ;;  %v6646_v14 = vld [vmem:[%s7249_s30 + $0x5d4] sm:$0xf0] }
 0x15a   : > { %3855 = vmatpush.bf16.msra.mxu3 %v4832_v19  ;;  %v5279_v15 = vld [vmem:[%s7249_s30 + $0x6c8] sm:$0xf]  ;;  %v6678_v25 = vld [vmem:[%s7249_s30 + $0x6d4] sm:$0xf0]  ;;  %v5024_v19 = vor.u32 %v6614_v57, %v5023_v45  ;;  %v5152_v22 = vor.u32 %v6646_v14, %v5151_v11 }
 0x15b   : > { %3814 = vmatpush.bf16.msra.mxu0 %v4432_v26  ;;  %v5407_v16 = vld [vmem:[%s7249_s30 + $0x7c8] sm:$0xf]  ;;  %v6710_v18 = vld [vmem:[%s7249_s30 + $0x7d4] sm:$0xf0]  ;;  %v5280_v20 = vor.u32 %v6678_v25, %v5279_v15 }
 0x15c   : > { %3828 = vmatpush.bf16.msra.mxu1 %v4560_v51  ;;  %v5007_v4 = vld [vmem:[%s7249_s30 + $0x4a8] sm:$0xf]  ;;  %v6610_v21 = vld [vmem:[%s7249_s30 + $0x4b4] sm:$0xf0]  ;;  %v5408_v24 = vor.u32 %v6710_v18, %v5407_v16 }
 0x15d   : > { %3842 = vmatpush.bf16.msra.mxu2 %v4688_v30  ;;  %v5135_v23 = vld [vmem:[%s7249_s30 + $0x5a8] sm:$0xf]  ;;  %v6642_v26 = vld [vmem:[%s7249_s30 + $0x5b4] sm:$0xf0]  ;;  %v5008_v30 = vor.u32 %v6610_v21, %v5007_v4 }
 0x15e   : > { %3856 = vmatpush.bf16.msra.mxu3 %v4816_v12  ;;  %v5263_v27 = vld [vmem:[%s7249_s30 + $0x6a8] sm:$0xf]  ;;  %v6674_v28 = vld [vmem:[%s7249_s30 + $0x6b4] sm:$0xf0]  ;;  %v5136_v33 = vor.u32 %v6642_v26, %v5135_v23 }
 0x15f   : > { %3815 = vmatpush.bf16.msra.mxu0 %v4416_v61  ;;  %v5391_v29 = vld [vmem:[%s7249_s30 + $0x7a8] sm:$0xf]  ;;  %v6706_v51 = vld [vmem:[%s7249_s30 + $0x7b4] sm:$0xf0]  ;;  %v5264_v34 = vor.u32 %v6674_v28, %v5263_v27 }
 0x160   : > { %3829 = vmatpush.bf16.msra.mxu1 %v4544_v63  ;;  %v4991_v37 = vld [vmem:[%s7249_s30 + $0x488] sm:$0xf]  ;;  %v6606_v12 = vld [vmem:[%s7249_s30 + $0x494] sm:$0xf0]  ;;  %v5392_v49 = vor.u32 %v6706_v51, %v5391_v29 }
 0x161   : > { %3843 = vmatpush.bf16.msra.mxu2 %v4672_v62  ;;  %v5119_v48 = vld [vmem:[%s7249_s30 + $0x588] sm:$0xf]  ;;  %v6638_v2 = vld [vmem:[%s7249_s30 + $0x594] sm:$0xf0]  ;;  %v4992_v53 = vor.u32 %v6606_v12, %v4991_v37 }
 0x162   : > { %3857 = vmatpush.bf16.msra.mxu3 %v4800_v5  ;;  %3816 = vmatmul.bf16.vlgmr.msra.gmra.mxu0 %v7354_v58  ;;  %v5247_v42 = vld [vmem:[%s7249_s30 + $0x688] sm:$0xf]  ;;  %v6670_v52 = vld [vmem:[%s7249_s30 + $0x694] sm:$0xf0]  ;;  %v5120_v54 = vor.u32 %v6638_v2, %v5119_v48 }
 0x163   : > { %3864 = vmatpush.bf16.msrb.mxu0 %v5040_v6  ;;  %3830 = vmatmul.bf16.vlgmr.msra.gmra.mxu1 %v7378_v10  ;;  %v5375_v3 = vld [vmem:[%s7249_s30 + $0x788] sm:$0xf]  ;;  %v6702_v7 = vld [vmem:[%s7249_s30 + $0x794] sm:$0xf0]  ;;  %v5248_v61 = vor.u32 %v6670_v52, %v5247_v42 }
 0x164   : > { %3878 = vmatpush.bf16.msrb.mxu1 %v5168_v8  ;;  %3844 = vmatmul.bf16.vlgmr.msra.gmra.mxu2 %v7362_v1  ;;  %v4975_v55 = vld [vmem:[%s7249_s30 + $0x468] sm:$0xf]  ;;  %v6602_v56 = vld [vmem:[%s7249_s30 + $0x474] sm:$0xf0]  ;;  %v5376_v60 = vor.u32 %v6702_v7, %v5375_v3 }
 0x165   : > { %3892 = vmatpush.bf16.msrb.mxu2 %v5296_v9  ;;  %3858 = vmatmul.bf16.vlgmr.msra.gmra.mxu3 %v7386_v17  ;;  %v5103_v59 = vld [vmem:[%s7249_s30 + $0x568] sm:$0xf]  ;;  %v6634_v63 = vld [vmem:[%s7249_s30 + $0x574] sm:$0xf0]  ;;  %v4976_v6 = vor.u32 %v6602_v56, %v4975_v55 }
 0x166   : > { %3906 = vmatpush.bf16.msrb.mxu3 %v5424_v13  ;;  %v5231_v62 = vld [vmem:[%s7249_s30 + $0x668] sm:$0xf]  ;;  %v6666_v50 = vld [vmem:[%s7249_s30 + $0x674] sm:$0xf0]  ;;  %v5104_v45 = vor.u32 %v6634_v63, %v5103_v59 }
 0x167   : > { %3865 = vmatpush.bf16.msrb.mxu0 %v5024_v19  ;;  %v5359_v0 = vld [vmem:[%s7249_s30 + $0x768] sm:$0xf]  ;;  %v6698_v5 = vld [vmem:[%s7249_s30 + $0x774] sm:$0xf0]  ;;  %v5232_v8 = vor.u32 %v6666_v50, %v5231_v62 }
 0x168   : > { %3879 = vmatpush.bf16.msrb.mxu1 %v5152_v22  ;;  %v4959_v9 = vld [vmem:[%s7249_s30 + $0x448] sm:$0xf]  ;;  %v6598_v57 = vld [vmem:[%s7249_s30 + $0x454] sm:$0xf0]  ;;  %v5360_v13 = vor.u32 %v6698_v5, %v5359_v0 }
 0x169   : > { %3893 = vmatpush.bf16.msrb.mxu2 %v5280_v20  ;;  %v5087_v11 = vld [vmem:[%s7249_s30 + $0x548] sm:$0xf]  ;;  %v6630_v14 = vld [vmem:[%s7249_s30 + $0x554] sm:$0xf0]  ;;  %v4960_v19 = vor.u32 %v6598_v57, %v4959_v9 }
 0x16a   : > { %3907 = vmatpush.bf16.msrb.mxu3 %v5408_v24  ;;  %v5215_v15 = vld [vmem:[%s7249_s30 + $0x648] sm:$0xf]  ;;  %v6662_v25 = vld [vmem:[%s7249_s30 + $0x654] sm:$0xf0]  ;;  %v5088_v22 = vor.u32 %v6630_v14, %v5087_v11 }
 0x16b   : > { %3866 = vmatpush.bf16.msrb.mxu0 %v5008_v30  ;;  %v5343_v16 = vld [vmem:[%s7249_s30 + $0x748] sm:$0xf]  ;;  %v6694_v18 = vld [vmem:[%s7249_s30 + $0x754] sm:$0xf0]  ;;  %v5216_v20 = vor.u32 %v6662_v25, %v5215_v15 }
 0x16c   : > { %3880 = vmatpush.bf16.msrb.mxu1 %v5136_v33  ;;  %v4943_v4 = vld [vmem:[%s7249_s30 + $0x428] sm:$0xf]  ;;  %v6594_v21 = vld [vmem:[%s7249_s30 + $0x434] sm:$0xf0]  ;;  %v5344_v24 = vor.u32 %v6694_v18, %v5343_v16 }
 0x16d   : > { %3894 = vmatpush.bf16.msrb.mxu2 %v5264_v34  ;;  %v5071_v23 = vld [vmem:[%s7249_s30 + $0x528] sm:$0xf]  ;;  %v6626_v26 = vld [vmem:[%s7249_s30 + $0x534] sm:$0xf0]  ;;  %v4944_v30 = vor.u32 %v6594_v21, %v4943_v4 }
 0x16e   : > { %3908 = vmatpush.bf16.msrb.mxu3 %v5392_v49  ;;  %v5199_v27 = vld [vmem:[%s7249_s30 + $0x628] sm:$0xf]  ;;  %v6658_v28 = vld [vmem:[%s7249_s30 + $0x634] sm:$0xf0]  ;;  %v5072_v37 = vor.u32 %v6626_v26, %v5071_v23 }
 0x16f   : > { %3867 = vmatpush.bf16.msrb.mxu0 %v4992_v53  ;;  %v5327_v29 = vld [vmem:[%s7249_s30 + $0x728] sm:$0xf]  ;;  %v6690_v51 = vld [vmem:[%s7249_s30 + $0x734] sm:$0xf0]  ;;  %v5200_v12 = vor.u32 %v6658_v28, %v5199_v27 }
 0x170   : > { %3881 = vmatpush.bf16.msrb.mxu1 %v5120_v54  ;;  %v4927_v33 = vld [vmem:[%s7249_s30 + $0x408] sm:$0xf]  ;;  %v6590_v34 = vld [vmem:[%s7249_s30 + $0x414] sm:$0xf0]  ;;  %v5328_v42 = vor.u32 %v6690_v51, %v5327_v29 }
 0x171   : > { %3895 = vmatpush.bf16.msrb.mxu2 %v5248_v61  ;;  %v5055_v48 = vld [vmem:[%s7249_s30 + $0x508] sm:$0xf]  ;;  %v6622_v49 = vld [vmem:[%s7249_s30 + $0x514] sm:$0xf0]  ;;  %v4928_v55 = vor.u32 %v6590_v34, %v4927_v33 }
 0x172   : > { %3909 = vmatpush.bf16.msrb.mxu3 %v5376_v60  ;;  %v5183_v2 = vld [vmem:[%s7249_s30 + $0x608] sm:$0xf]  ;;  %v6654_v52 = vld [vmem:[%s7249_s30 + $0x614] sm:$0xf0]  ;;  %v5056_v63 = vor.u32 %v6622_v49, %v5055_v48 }
 0x173   : > { %3868 = vmatpush.bf16.msrb.mxu0 %v4976_v6  ;;  %v5311_v3 = vld [vmem:[%s7249_s30 + $0x708] sm:$0xf]  ;;  %v6686_v7 = vld [vmem:[%s7249_s30 + $0x714] sm:$0xf0]  ;;  %v5184_v62 = vor.u32 %v6654_v52, %v5183_v2 }
 0x174   : > { %3882 = vmatpush.bf16.msrb.mxu1 %v5104_v45  ;;  %v5551_v53 = vld [vmem:[%s7249_s30 + $0x8e8] sm:$0xf]  ;;  %v6746_v54 = vld [vmem:[%s7249_s30 + $0x8f4] sm:$0xf0]  ;;  %v5312_v5 = vor.u32 %v6686_v7, %v5311_v3 }
 0x175   : > { %3896 = vmatpush.bf16.msrb.mxu2 %v5232_v8  ;;  %v5679_v61 = vld [vmem:[%s7249_s30 + $0x9e8] sm:$0xf]  ;;  %v6778_v56 = vld [vmem:[%s7249_s30 + $0x9f4] sm:$0xf0]  ;;  %v5552_v6 = vor.u32 %v6746_v54, %v5551_v53 }
 0x176   : > { %3910 = vmatpush.bf16.msrb.mxu3 %v5360_v13  ;;  %v5807_v59 = vld [vmem:[%s7249_s30 + $0xae8] sm:$0xf]  ;;  %v6810_v60 = vld [vmem:[%s7249_s30 + $0xaf4] sm:$0xf0]  ;;  %v5680_v45 = vor.u32 %v6778_v56, %v5679_v61 }
 0x177   : > { %3869 = vmatpush.bf16.msrb.mxu0 %v4960_v19  ;;  %v5935_v50 = vld [vmem:[%s7249_s30 + $0xbe8] sm:$0xf]  ;;  %v6842_v0 = vld [vmem:[%s7249_s30 + $0xbf4] sm:$0xf0]  ;;  %v5808_v8 = vor.u32 %v6810_v60, %v5807_v59 }
 0x178   : > { %3883 = vmatpush.bf16.msrb.mxu1 %v5088_v22  ;;  %v5535_v9 = vld [vmem:[%s7249_s30 + $0x8c8] sm:$0xf]  ;;  %v6742_v57 = vld [vmem:[%s7249_s30 + $0x8d4] sm:$0xf0]  ;;  %v5936_v13 = vor.u32 %v6842_v0, %v5935_v50  ;;  %v8163_v0 = vpop.f32.mrf.mxu0 }
 0x179   : > { %3897 = vmatpush.bf16.msrb.mxu2 %v5216_v20  ;;  %v5663_v11 = vld [vmem:[%s7249_s30 + $0x9c8] sm:$0xf]  ;;  %v6774_v14 = vld [vmem:[%s7249_s30 + $0x9d4] sm:$0xf0]  ;;  %v5536_v19 = vor.u32 %v6742_v57, %v5535_v9 }
 0x17a   : > { %3911 = vmatpush.bf16.msrb.mxu3 %v5344_v24  ;;  %v5791_v15 = vld [vmem:[%s7249_s30 + $0xac8] sm:$0xf]  ;;  %v6806_v25 = vld [vmem:[%s7249_s30 + $0xad4] sm:$0xf0]  ;;  %v5664_v22 = vor.u32 %v6774_v14, %v5663_v11 }
 0x17b   : > { %3870 = vmatpush.bf16.msrb.mxu0 %v4944_v30  ;;  %v5919_v16 = vld [vmem:[%s7249_s30 + $0xbc8] sm:$0xf]  ;;  %v6838_v18 = vld [vmem:[%s7249_s30 + $0xbd4] sm:$0xf0]  ;;  %v5792_v20 = vor.u32 %v6806_v25, %v5791_v15 }
 0x17c   : > { %3884 = vmatpush.bf16.msrb.mxu1 %v5072_v37  ;;  %v5519_v4 = vld [vmem:[%s7249_s30 + $0x8a8] sm:$0xf]  ;;  %v6738_v21 = vld [vmem:[%s7249_s30 + $0x8b4] sm:$0xf0]  ;;  %v5920_v24 = vor.u32 %v6838_v18, %v5919_v16 }
 0x17d   : > { %3898 = vmatpush.bf16.msrb.mxu2 %v5200_v12  ;;  %v5647_v23 = vld [vmem:[%s7249_s30 + $0x9a8] sm:$0xf]  ;;  %v6770_v26 = vld [vmem:[%s7249_s30 + $0x9b4] sm:$0xf0]  ;;  %v5520_v30 = vor.u32 %v6738_v21, %v5519_v4 }
 0x17e   : > { %3912 = vmatpush.bf16.msrb.mxu3 %v5328_v42  ;;  %v5775_v27 = vld [vmem:[%s7249_s30 + $0xaa8] sm:$0xf]  ;;  %v6802_v28 = vld [vmem:[%s7249_s30 + $0xab4] sm:$0xf0]  ;;  %v5648_v33 = vor.u32 %v6770_v26, %v5647_v23 }
 0x17f   : > { %3871 = vmatpush.bf16.msrb.mxu0 %v4928_v55  ;;  %v5903_v29 = vld [vmem:[%s7249_s30 + $0xba8] sm:$0xf]  ;;  %v6834_v51 = vld [vmem:[%s7249_s30 + $0xbb4] sm:$0xf0]  ;;  %v5776_v34 = vor.u32 %v6802_v28, %v5775_v27  ;;  %v8180_v27 = vpop.f32.mrf.mxu2 }
 0x180   : > { %3885 = vmatpush.bf16.msrb.mxu1 %v5056_v63  ;;  %v5503_v37 = vld [vmem:[%s7249_s30 + $0x888] sm:$0xf]  ;;  %v6734_v12 = vld [vmem:[%s7249_s30 + $0x894] sm:$0xf0]  ;;  %v5904_v49 = vor.u32 %v6834_v51, %v5903_v29 }
 0x181   : > { %3899 = vmatpush.bf16.msrb.mxu2 %v5184_v62  ;;  %v5631_v48 = vld [vmem:[%s7249_s30 + $0x988] sm:$0xf]  ;;  %v6766_v2 = vld [vmem:[%s7249_s30 + $0x994] sm:$0xf0]  ;;  %v5504_v53 = vor.u32 %v6734_v12, %v5503_v37  ;;  %v8190_v12 = vld [vmem:[%s7257_s5] sm:$0xf] }
 0x182   : > { %3913 = vmatpush.bf16.msrb.mxu3 %v5312_v5  ;;  %3872 = vmatmul.bf16.vlgmr.msrb.gmra.mxu0 %v7462_v39  ;;  %v5759_v42 = vld [vmem:[%s7249_s30 + $0xa88] sm:$0xf]  ;;  %v6798_v52 = vld [vmem:[%s7249_s30 + $0xa94] sm:$0xf0]  ;;  %v5632_v54 = vor.u32 %v6766_v2, %v5631_v48  ;;  %v793_v48 = vperm.slane %v8190_v12, 1 }
 0x183   : > { %3920 = vmatpush.bf16.msra.mxu0 %v5552_v6  ;;  %3886 = vmatmul.bf16.vlgmr.msrb.gmra.mxu1 %v7469_v44  ;;  %v5887_v3 = vld [vmem:[%s7249_s30 + $0xb88] sm:$0xf]  ;;  %v6830_v7 = vld [vmem:[%s7249_s30 + $0xb94] sm:$0xf0]  ;;  %v5760_v61 = vor.u32 %v6798_v52, %v5759_v42  ;;  %v8195_v52 = vpop.f32.mrf.mxu0 }
 0x184   : > { %3934 = vmatpush.bf16.msra.mxu1 %v5680_v45  ;;  %3900 = vmatmul.bf16.vlgmr.msrb.gmra.mxu2 %v7467_v43  ;;  %v5487_v55 = vld [vmem:[%s7249_s30 + $0x868] sm:$0xf]  ;;  %v6730_v56 = vld [vmem:[%s7249_s30 + $0x874] sm:$0xf0]  ;;  %v5888_v60 = vor.u32 %v6830_v7, %v5887_v3  ;;  %v8167_v45 = vpop.f32.mrf.mxu1 }
 0x185   : > { %3948 = vmatpush.bf16.msra.mxu2 %v5808_v8  ;;  %3914 = vmatmul.bf16.vlgmr.msrb.gmra.mxu3 %v7473_v47  ;;  %v5615_v59 = vld [vmem:[%s7249_s30 + $0x968] sm:$0xf]  ;;  %v6762_v63 = vld [vmem:[%s7249_s30 + $0x974] sm:$0xf0]  ;;  %v5488_v8 = vor.u32 %v6730_v56, %v5487_v55 }
 0x186   : > { %3962 = vmatpush.bf16.msra.mxu3 %v5936_v13  ;;  %v5743_v62 = vld [vmem:[%s7249_s30 + $0xa68] sm:$0xf]  ;;  %v6794_v50 = vld [vmem:[%s7249_s30 + $0xa74] sm:$0xf0]  ;;  %v5616_v9 = vor.u32 %v6762_v63, %v5615_v59 }
 0x187   : > { %3921 = vmatpush.bf16.msra.mxu0 %v5536_v19  ;;  %v5871_v5 = vld [vmem:[%s7249_s30 + $0xb68] sm:$0xf]  ;;  %v6826_v6 = vld [vmem:[%s7249_s30 + $0xb74] sm:$0xf0]  ;;  %v5744_v57 = vor.u32 %v6794_v50, %v5743_v62 }
 0x188   : > { %3935 = vmatpush.bf16.msra.mxu1 %v5664_v22  ;;  %v5471_v11 = vld [vmem:[%s7249_s30 + $0x848] sm:$0xf]  ;;  %v6726_v13 = vld [vmem:[%s7249_s30 + $0x854] sm:$0xf0]  ;;  %v5872_v15 = vor.u32 %v6826_v6, %v5871_v5 }
 0x189   : > { %3949 = vmatpush.bf16.msra.mxu2 %v5792_v20  ;;  %v5599_v14 = vld [vmem:[%s7249_s30 + $0x948] sm:$0xf]  ;;  %v6758_v25 = vld [vmem:[%s7249_s30 + $0x954] sm:$0xf0]  ;;  %v5472_v20 = vor.u32 %v6726_v13, %v5471_v11 }
 0x18a   : > { %3963 = vmatpush.bf16.msra.mxu3 %v5920_v24  ;;  %v5727_v16 = vld [vmem:[%s7249_s30 + $0xa48] sm:$0xf]  ;;  %v6790_v18 = vld [vmem:[%s7249_s30 + $0xa54] sm:$0xf0]  ;;  %v5600_v4 = vor.u32 %v6758_v25, %v5599_v14 }
 0x18b   : > { %3922 = vmatpush.bf16.msra.mxu0 %v5520_v30  ;;  %v5855_v19 = vld [vmem:[%s7249_s30 + $0xb48] sm:$0xf]  ;;  %v6822_v22 = vld [vmem:[%s7249_s30 + $0xb54] sm:$0xf0]  ;;  %v5728_v21 = vor.u32 %v6790_v18, %v5727_v16  ;;  %v3594_v18 = vadd.f32 %v8163_v0, %v793_v48 }
 0x18c   : > { %3936 = vmatpush.bf16.msra.mxu1 %v5648_v33  ;;  %v5455_v23 = vld [vmem:[%s7249_s30 + $0x828] sm:$0xf]  ;;  %v6722_v24 = vld [vmem:[%s7249_s30 + $0x834] sm:$0xf0]  ;;  %v5856_v28 = vor.u32 %v6822_v22, %v5855_v19  ;;  %v8185_v33 = vpop.f32.mrf.mxu3  ;;  %v8200_v55 = vpop.f32.mrf.mxu1 }
 0x18d   : > { %3950 = vmatpush.bf16.msra.mxu2 %v5776_v34  ;;  %v5583_v26 = vld [vmem:[%s7249_s30 + $0x928] sm:$0xf]  ;;  %v6754_v29 = vld [vmem:[%s7249_s30 + $0x934] sm:$0xf0] }
 0x18e   : > { %3964 = vmatpush.bf16.msra.mxu3 %v5904_v49  ;;  %v5711_v51 = vld [vmem:[%s7249_s30 + $0xa28] sm:$0xf]  ;;  %v6786_v30 = vld [vmem:[%s7249_s30 + $0xa34] sm:$0xf0]  ;;  %v5456_v49 = vor.u32 %v6722_v24, %v5455_v23  ;;  %v5584_v3 = vor.u32 %v6754_v29, %v5583_v26  ;;  %v8219_v23 = vpop.f32.mrf.mxu2 }
 0x18f   : > { %3923 = vmatpush.bf16.msra.mxu0 %v5504_v53  ;;  %v5839_v34 = vld [vmem:[%s7249_s30 + $0xb28] sm:$0xf]  ;;  %v6818_v37 = vld [vmem:[%s7249_s30 + $0xb34] sm:$0xf0]  ;;  %v5712_v7 = vor.u32 %v6786_v30, %v5711_v51 }
 0x190   : > { %3937 = vmatpush.bf16.msra.mxu1 %v5632_v54  ;;  %v5439_v2 = vld [vmem:[%s7249_s30 + $0x808] sm:$0xf]  ;;  %v6718_v42 = vld [vmem:[%s7249_s30 + $0x814] sm:$0xf0]  ;;  %v5840_v56 = vor.u32 %v6818_v37, %v5839_v34  ;;  %v3608_v37 = vadd.f32 %v8167_v45, %v3594_v18 }
 0x191   : > { %3951 = vmatpush.bf16.msra.mxu2 %v5760_v61  ;;  %v5567_v53 = vld [vmem:[%s7249_s30 + $0x908] sm:$0xf]  ;;  %v6750_v54 = vld [vmem:[%s7249_s30 + $0x914] sm:$0xf0]  ;;  %v5440_v6 = vor.u32 %v6718_v42, %v5439_v2 }
 0x192   : > { %3965 = vmatpush.bf16.msra.mxu3 %v5888_v60  ;;  %v5695_v61 = vld [vmem:[%s7249_s30 + $0xa08] sm:$0xf]  ;;  %v6782_v59 = vld [vmem:[%s7249_s30 + $0xa14] sm:$0xf0]  ;;  %v5568_v11 = vor.u32 %v6750_v54, %v5567_v53 }
 0x193   : > { %3924 = vmatpush.bf16.msra.mxu0 %v5488_v8  ;;  %v5823_v60 = vld [vmem:[%s7249_s30 + $0xb08] sm:$0xf]  ;;  %v6814_v63 = vld [vmem:[%s7249_s30 + $0xb14] sm:$0xf0]  ;;  %v5696_v13 = vor.u32 %v6782_v59, %v5695_v61 }
 0x194   : > { %3938 = vmatpush.bf16.msra.mxu1 %v5616_v9  ;;  %v6063_v62 = vld [vmem:[%s7249_s30 + $0xce8] sm:$0xf]  ;;  %v6874_v50 = vld [vmem:[%s7249_s30 + $0xcf4] sm:$0xf0]  ;;  %v5824_v25 = vor.u32 %v6814_v63, %v5823_v60  ;;  %v8224_v51 = vpop.f32.mrf.mxu3  ;;  %v8232_v54 = vpop.f32.mrf.mxu1 }
 0x195   : > { %3952 = vmatpush.bf16.msra.mxu2 %v5744_v57  ;;  %v6191_v5 = vld [vmem:[%s7249_s30 + $0xde8] sm:$0xf]  ;;  %v6906_v8 = vld [vmem:[%s7249_s30 + $0xdf4] sm:$0xf0]  ;;  %v6064_v16 = vor.u32 %v6874_v50, %v6063_v62  ;;  %v3622_v50 = vadd.f32 %v8180_v27, %v3608_v37 }
 0x196   : > { %3966 = vmatpush.bf16.msra.mxu3 %v5872_v15  ;;  %v6319_v9 = vld [vmem:[%s7249_s30 + $0xee8] sm:$0xf]  ;;  %v6938_v57 = vld [vmem:[%s7249_s30 + $0xef4] sm:$0xf0]  ;;  %v6192_v19 = vor.u32 %v6906_v8, %v6191_v5  ;;  %v8255_v18 = vpop.f32.mrf.mxu2 }
 0x197   : > { %3925 = vmatpush.bf16.msra.mxu0 %v5472_v20  ;;  %v6447_v14 = vld [vmem:[%s7249_s30 + $0xfe8] sm:$0xf]  ;;  %v6970_v15 = vld [vmem:[%s7249_s30 + $0xff4] sm:$0xf0]  ;;  %v6320_v22 = vor.u32 %v6938_v57, %v6319_v9 }
 0x198   : > { %3939 = vmatpush.bf16.msra.mxu1 %v5600_v4  ;;  %v6047_v20 = vld [vmem:[%s7249_s30 + $0xcc8] sm:$0xf]  ;;  %v6870_v4 = vld [vmem:[%s7249_s30 + $0xcd4] sm:$0xf0]  ;;  %v6448_v24 = vor.u32 %v6970_v15, %v6447_v14 }
 0x199   : > { %3953 = vmatpush.bf16.msra.mxu2 %v5728_v21  ;;  %v6175_v21 = vld [vmem:[%s7249_s30 + $0xdc8] sm:$0xf]  ;;  %v6902_v26 = vld [vmem:[%s7249_s30 + $0xdd4] sm:$0xf0]  ;;  %v6048_v34 = vor.u32 %v6870_v4, %v6047_v20 }
 0x19a   : > { %3967 = vmatpush.bf16.msra.mxu3 %v5856_v28  ;;  %v6303_v28 = vld [vmem:[%s7249_s30 + $0xec8] sm:$0xf]  ;;  %v6934_v29 = vld [vmem:[%s7249_s30 + $0xed4] sm:$0xf0]  ;;  %v6176_v2 = vor.u32 %v6902_v26, %v6175_v21 }
 0x19b   : > { %3926 = vmatpush.bf16.msra.mxu0 %v5456_v49  ;;  %v6431_v0 = vld [vmem:[%s7249_s30 + $0xfc8] sm:$0xf]  ;;  %v6966_v30 = vld [vmem:[%s7249_s30 + $0xfd4] sm:$0xf0]  ;;  %v3649_v49 = vpop.f32.mrf.mxu0  ;;  %v6304_v42 = vor.u32 %v6934_v29, %v6303_v28 }
 0x19c   : > { %3940 = vmatpush.bf16.msra.mxu1 %v5584_v3  ;;  %v6031_v3 = vld [vmem:[%s7249_s30 + $0xca8] sm:$0xf]  ;;  %v6432_v61 = vor.u32 %v6966_v30, %v6431_v0  ;;  %v6930_v59 = vld [vmem:[%s7249_s30 + $0xeb4] sm:$0xf0]  ;;  %v8258_v20 = vpop.f32.mrf.mxu3  ;;  %v8269_v37 = vpop.f32.mrf.mxu1 }
 0x19d   : > { %3954 = vmatpush.bf16.msra.mxu2 %v5712_v7  ;;  %v6866_v7 = vld [vmem:[%s7249_s30 + $0xcb4] sm:$0xf0]  ;;  %v6159_v53 = vld [vmem:[%s7249_s30 + $0xda8] sm:$0xf] }
 0x19e   : > { %3968 = vmatpush.bf16.msra.mxu3 %v5840_v56  ;;  %v6898_v56 = vld [vmem:[%s7249_s30 + $0xdb4] sm:$0xf0]  ;;  %v6287_v45 = vld [vmem:[%s7249_s30 + $0xea8] sm:$0xf]  ;;  %v6032_v62 = vor.u32 %v6866_v7, %v6031_v3 }
 0x19f   : > { %3927 = vmatpush.bf16.msra.mxu0 %v5440_v6  ;;  %v6415_v60 = vld [vmem:[%s7249_s30 + $0xfa8] sm:$0xf]  ;;  %v6962_v63 = vld [vmem:[%s7249_s30 + $0xfb4] sm:$0xf0]  ;;  %v6160_v5 = vor.u32 %v6898_v56, %v6159_v53  ;;  %v6288_v6 = vor.u32 %v6930_v59, %v6287_v45 }
 0x1a0   : > { %3941 = vmatpush.bf16.msra.mxu1 %v5568_v11  ;;  %v6015_v8 = vld [vmem:[%s7249_s30 + $0xc88] sm:$0xf]  ;;  %v6862_v9 = vld [vmem:[%s7249_s30 + $0xc94] sm:$0xf0]  ;;  %v6416_v11 = vor.u32 %v6962_v63, %v6415_v60 }
 0x1a1   : > { %3955 = vmatpush.bf16.msra.mxu2 %v5696_v13  ;;  %v6143_v57 = vld [vmem:[%s7249_s30 + $0xd88] sm:$0xf]  ;;  %v6894_v13 = vld [vmem:[%s7249_s30 + $0xd94] sm:$0xf0] }
 0x1a2   : > { %3969 = vmatpush.bf16.msra.mxu3 %v5824_v25  ;;  %3928 = vmatmul.bf16.vlgmr.msra.gmra.mxu0 %v7562_v31  ;;  %v6271_v14 = vld [vmem:[%s7249_s30 + $0xe88] sm:$0xf]  ;;  %v6926_v15 = vld [vmem:[%s7249_s30 + $0xe94] sm:$0xf0]  ;;  %v3596_v25 = vadd.f32 %v8195_v52, %v793_v48  ;;  %v6144_v12 = vor.u32 %v6894_v13, %v6143_v57 }
 0x1a3   : > { %3976 = vmatpush.bf16.msrb.mxu0 %v6064_v16  ;;  %3942 = vmatmul.bf16.vlgmr.msra.gmra.mxu1 %v7569_v36  ;;  %v6399_v27 = vld [vmem:[%s7249_s30 + $0xf88] sm:$0xf]  ;;  %v6958_v16 = vld [vmem:[%s7249_s30 + $0xf94] sm:$0xf0]  ;;  %v6272_v4 = vor.u32 %v6926_v15, %v6271_v14  ;;  %v3651_v0 = vpop.f32.mrf.mxu0 }
 0x1a4   : > { %3990 = vmatpush.bf16.msrb.mxu1 %v6192_v19  ;;  %3956 = vmatmul.bf16.vlgmr.msra.gmra.mxu2 %v7567_v35  ;;  %v6016_v19 = vor.u32 %v6862_v9, %v6015_v8  ;;  %v5999_v48 = vld [vmem:[%s7249_s30 + $0xc68] sm:$0xf]  ;;  %v6858_v52 = vld [vmem:[%s7249_s30 + $0xc74] sm:$0xf0] }
 0x1a5   : > { %4004 = vmatpush.bf16.msrb.mxu2 %v6320_v22  ;;  %3970 = vmatmul.bf16.vlgmr.msra.gmra.mxu3 %v7573_v40  ;;  %v3636_v22 = vadd.f32 %v8185_v33, %v3622_v50  ;;  %v6127_v21 = vld [vmem:[%s7249_s30 + $0xd68] sm:$0xf]  ;;  %v6890_v26 = vld [vmem:[%s7249_s30 + $0xd74] sm:$0xf0]  ;;  %v3610_v33 = vadd.f32 %v8200_v55, %v3596_v25 }
 0x1a6   : > { %4018 = vmatpush.bf16.msrb.mxu3 %v6448_v24  ;;  %v6400_v24 = vor.u32 %v6958_v16, %v6399_v27  ;;  %v6255_v28 = vld [vmem:[%s7249_s30 + $0xe68] sm:$0xf]  ;;  %v6922_v29 = vld [vmem:[%s7249_s30 + $0xe74] sm:$0xf0]  ;;  %v6128_v3 = vor.u32 %v6890_v26, %v6127_v21  ;;  %v8288_v27 = vpop.f32.mrf.mxu3 }
 0x1a7   : > { %3977 = vmatpush.bf16.msrb.mxu0 %v6048_v34  ;;  %v6383_v30 = vld [vmem:[%s7249_s30 + $0xf68] sm:$0xf]  ;;  %v6954_v34 = vld [vmem:[%s7249_s30 + $0xf74] sm:$0xf0]  ;;  %v6256_v7 = vor.u32 %v6922_v29, %v6255_v28  ;;  %v3624_v63 = vadd.f32 %v8219_v23, %v3610_v33  ;;  %v3679_v23 = vpop.f32.mrf.mxu2 }
 0x1a8   : > { %3991 = vmatpush.bf16.msrb.mxu1 %v6176_v2  ;;  %v6000_v2 = vor.u32 %v6858_v52, %v5999_v48  ;;  %v5983_v53 = vld [vmem:[%s7249_s30 + $0xc48] sm:$0xf]  ;;  %v6384_v56 = vor.u32 %v6954_v34, %v6383_v30  ;;  %v6886_v45 = vld [vmem:[%s7249_s30 + $0xd54] sm:$0xf0] }
 0x1a9   : > { %4005 = vmatpush.bf16.msrb.mxu2 %v6304_v42  ;;  %v3650_v42 = vadd.f32 %v3649_v49, %v3636_v22  ;;  %v6111_v55 = vld [vmem:[%s7249_s30 + $0xd48] sm:$0xf]  ;;  %v6918_v60 = vld [vmem:[%s7249_s30 + $0xe54] sm:$0xf0] }
 0x1aa   : > { %4019 = vmatpush.bf16.msrb.mxu3 %v6432_v61  ;;  %v6854_v61 = vld [vmem:[%s7249_s30 + $0xc54] sm:$0xf0]  ;;  %v6239_v59 = vld [vmem:[%s7249_s30 + $0xe48] sm:$0xf] }
 0x1ab   : > { %3978 = vmatpush.bf16.msrb.mxu0 %v6032_v62  ;;  %v6367_v62 = vld [vmem:[%s7249_s30 + $0xf48] sm:$0xf]  ;;  %v6950_v49 = vld [vmem:[%s7249_s30 + $0xf54] sm:$0xf0]  ;;  %v5984_v50 = vor.u32 %v6854_v61, %v5983_v53  ;;  %v6240_v8 = vor.u32 %v6918_v60, %v6239_v59  ;;  %v3705_v16 = vpop.f32.mrf.mxu0  ;;  %v4657_v61 = vld [vmem:[%s7249_s30 + $0x1f8] sm:$0xf0] }
 0x1ac   : > { %3992 = vmatpush.bf16.msrb.mxu1 %v6160_v5  ;;  %v3664_v5 = vadd.f32 %v8232_v54, %v3650_v42  ;;  %v5967_v9 = vld [vmem:[%s7249_s30 + $0xc28] sm:$0xf]  ;;  %v6850_v57 = vld [vmem:[%s7249_s30 + $0xc34] sm:$0xf0]  ;;  %v6368_v13 = vor.u32 %v6950_v49, %v6367_v62  ;;  %v3638_v54 = vadd.f32 %v8224_v51, %v3624_v63  ;;  %v6584_v63 = vld [vmem:[%s7249_s30 + $0x3ec] sm:$0xf] }
 0x1ad   : > { %4006 = vmatpush.bf16.msrb.mxu2 %v6288_v6  ;;  %v6112_v6 = vor.u32 %v6886_v45, %v6111_v55  ;;  %v6882_v14 = vld [vmem:[%s7249_s30 + $0xd34] sm:$0xf0]  ;;  %v6223_v15 = vld [vmem:[%s7249_s30 + $0xe28] sm:$0xf]  ;;  %v6552_v55 = vld [vmem:[%s7249_s30 + $0x2ec] sm:$0xf] }
 0x1ae   : > { %4020 = vmatpush.bf16.msrb.mxu3 %v6416_v11  ;;  %v6095_v11 = vld [vmem:[%s7249_s30 + $0xd28] sm:$0xf]  ;;  %v6914_v25 = vld [vmem:[%s7249_s30 + $0xe34] sm:$0xf0]  ;;  %v3678_v21 = vadd.f32 %v8255_v18, %v3664_v5  ;;  %v3652_v42 = vadd.f32 %v3651_v0, %v3638_v54  ;;  %v6488_v18 = vld [vmem:[%s7249_s30 + $0xec] sm:$0xf] }
 0x1af   : > { %3979 = vmatpush.bf16.msrb.mxu0 %v6016_v19  ;;  %v6351_v19 = vld [vmem:[%s7249_s30 + $0xf28] sm:$0xf]  ;;  %v6946_v22 = vld [vmem:[%s7249_s30 + $0xf34] sm:$0xf0]  ;;  %v6096_v51 = vor.u32 %v6882_v14, %v6095_v11  ;;  %v4913_v0 = vld [vmem:[%s7249_s30 + $0x3f8] sm:$0xf0]  ;;  %v3733_v62 = vpop.f32.mrf.mxu2 }
 0x1b0   : > { %3993 = vmatpush.bf16.msrb.mxu1 %v6144_v12  ;;  %v3719_v12 = vpop.f32.mrf.mxu1  ;;  %v5951_v48 = vld [vmem:[%s7249_s30 + $0xc08] sm:$0xf]  ;;  %v6846_v52 = vld [vmem:[%s7249_s30 + $0xc14] sm:$0xf0]  ;;  %v6352_v33 = vor.u32 %v6946_v22, %v6351_v19  ;;  %v3692_v45 = vadd.f32 %v8258_v20, %v3678_v21  ;;  %v3666_v5 = vadd.f32 %v8269_v37, %v3652_v42  ;;  %v3747_v20 = vpop.f32.mrf.mxu3  ;;  %v4513_v11 = vld [vmem:[%s7249_s30 + $0xd8] sm:$0xf0]  ;;  %v4916_v14 = vor.u32 %v6584_v63, %v4913_v0 }
 0x1b1   : > { %4007 = vmatpush.bf16.msrb.mxu2 %v6272_v4  ;;  %v5968_v4 = vor.u32 %v6850_v57, %v5967_v9  ;;  %v6079_v26 = vld [vmem:[%s7249_s30 + $0xd08] sm:$0xf]  ;;  %v6878_v28 = vld [vmem:[%s7249_s30 + $0xd14] sm:$0xf0]  ;;  %v5952_v53 = vor.u32 %v6846_v52, %v5951_v48  ;;  %v6484_v57 = vld [vmem:[%s7249_s30 + $0xcc] sm:$0xf] }
 0x1b2   : > { %4021 = vmatpush.bf16.msrb.mxu3 %v6400_v24  ;;  %v6224_v24 = vor.u32 %v6914_v25, %v6223_v15  ;;  %v6207_v29 = vld [vmem:[%s7249_s30 + $0xe08] sm:$0xf]  ;;  %v6910_v30 = vld [vmem:[%s7249_s30 + $0xe14] sm:$0xf0]  ;;  %v6080_v59 = vor.u32 %v6878_v28, %v6079_v26  ;;  %v4641_v15 = vld [vmem:[%s7249_s30 + $0x1d8] sm:$0xf0]  ;;  %v3680_v19 = vadd.f32 %v3679_v23, %v3666_v5  ;;  %v4516_v48 = vor.u32 %v6484_v57, %v4513_v11 }
 0x1b3   : > { %3980 = vmatpush.bf16.msrb.mxu0 %v6000_v2  ;;  %v6335_v34 = vld [vmem:[%s7249_s30 + $0xf08] sm:$0xf]  ;;  %v6942_v2 = vld [vmem:[%s7249_s30 + $0xf14] sm:$0xf0]  ;;  %v6208_v60 = vor.u32 %v6910_v30, %v6207_v29  ;;  %v6548_v25 = vld [vmem:[%s7249_s30 + $0x2cc] sm:$0xf]  ;;  %v3707_v22 = vpop.f32.mrf.mxu0 }
 0x1b4   : > { %3994 = vmatpush.bf16.msrb.mxu1 %v6128_v3  ;;  %v4529_v3 = vld [vmem:[%s7249_s30 + $0xf8] sm:$0xf0]  ;;  %v6336_v49 = vor.u32 %v6942_v2, %v6335_v34  ;;  %v6580_v37 = vld [vmem:[%s7249_s30 + $0x3cc] sm:$0xf] }
 0x1b5   : > { %4008 = vmatpush.bf16.msrb.mxu2 %v6256_v7  ;;  %v6520_v7 = vld [vmem:[%s7249_s30 + $0x1ec] sm:$0xf]  ;;  %v4769_v54 = vld [vmem:[%s7249_s30 + $0x2d8] sm:$0xf0] }
 0x1b6   : > { %4022 = vmatpush.bf16.msrb.mxu3 %v6384_v56  ;;  %v4785_v56 = vld [vmem:[%s7249_s30 + $0x2f8] sm:$0xf0]  ;;  %v4772_v23 = vor.u32 %v6548_v25, %v4769_v54  ;;  %v6512_v26 = vld [vmem:[%s7249_s30 + $0x1ac] sm:$0xf] }
 0x1b7   : > { %3981 = vmatpush.bf16.msrb.mxu0 %v5984_v50  ;;  %v4532_v50 = vor.u32 %v6488_v18, %v4529_v3  ;;  %v4788_v9 = vor.u32 %v6552_v55, %v4785_v56  ;;  %v4625_v29 = vld [vmem:[%s7249_s30 + $0x1b8] sm:$0xf0]  ;;  %v6576_v2 = vld [vmem:[%s7249_s30 + $0x3ac] sm:$0xf] }
 0x1b8   : > { %3995 = vmatpush.bf16.msrb.mxu1 %v6112_v6  ;;  %v3706_v6 = vadd.f32 %v3705_v16, %v3692_v45  ;;  %v4897_v16 = vld [vmem:[%s7249_s30 + $0x3d8] sm:$0xf0]  ;;  %v6476_v3 = vld [vmem:[%s7249_s30 + $0x8c] sm:$0xf]  ;;  %v3735_v45 = vpop.f32.mrf.mxu2 }
 0x1b9   : > { %4009 = vmatpush.bf16.msrb.mxu2 %v6240_v8  ;;  %v4660_v8 = vor.u32 %v6520_v7, %v4657_v61  ;;  %v4900_v28 = vor.u32 %v6580_v37, %v4897_v16  ;;  %v4753_v30 = vld [vmem:[%s7249_s30 + $0x2b8] sm:$0xf0]  ;;  %v6508_v55 = vld [vmem:[%s7249_s30 + $0x18c] sm:$0xf] }
 0x1ba   : > { %4023 = vmatpush.bf16.msrb.mxu3 %v6368_v13  ;;  %v6516_v13 = vld [vmem:[%s7249_s30 + $0x1cc] sm:$0xf]  ;;  %v3720_v52 = vadd.f32 %v3719_v12, %v3706_v6  ;;  %v3694_v12 = vadd.f32 %v8288_v27, %v3680_v19  ;;  %v4881_v42 = vld [vmem:[%s7249_s30 + $0x3b8] sm:$0xf0]  ;;  %v4628_v27 = vor.u32 %v6512_v26, %v4625_v29 }
 0x1bb   : > { %3982 = vmatpush.bf16.msrb.mxu0 %v5968_v4  ;;  %v3721_v4 = vpop.f32.mrf.mxu1  ;;  %v4644_v21 = vor.u32 %v6516_v13, %v4641_v15  ;;  %v4481_v61 = vld [vmem:[%s7249_s30 + $0x98] sm:$0xf0]  ;;  %v6472_v13 = vld [vmem:[%s7249_s30 + $0x6c] sm:$0xf] }
 0x1bc   : > { %3996 = vmatpush.bf16.msrb.mxu1 %v6096_v51  ;;  %v6480_v51 = vld [vmem:[%s7249_s30 + $0xac] sm:$0xf]  ;;  %v3734_v34 = vadd.f32 %v3733_v62, %v3720_v52  ;;  %v3708_v7 = vadd.f32 %v3707_v22, %v3694_v12  ;;  %v4609_v56 = vld [vmem:[%s7249_s30 + $0x198] sm:$0xf0]  ;;  %v3749_v62 = vpop.f32.mrf.mxu3  ;;  %v4484_v6 = vor.u32 %v6476_v3, %v4481_v61 }
 0x1bd   : > { %4010 = vmatpush.bf16.msrb.mxu2 %v6224_v24  ;;  %v4497_v24 = vld [vmem:[%s7249_s30 + $0xb8] sm:$0xf0]  ;;  %v6504_v15 = vld [vmem:[%s7249_s30 + $0x16c] sm:$0xf] }
 0x1be   : > { %4024 = vmatpush.bf16.msrb.mxu3 %v6352_v33  ;;  %v6544_v33 = vld [vmem:[%s7249_s30 + $0x2ac] sm:$0xf]  ;;  %v4500_v18 = vor.u32 %v6480_v51, %v4497_v24  ;;  %v4737_v63 = vld [vmem:[%s7249_s30 + $0x298] sm:$0xf0]  ;;  %v3748_v0 = vadd.f32 %v3747_v20, %v3734_v34  ;;  %v3722_v57 = vadd.f32 %v3721_v4, %v3708_v7 }
 0x1bf   : > { %3983 = vmatpush.bf16.msrb.mxu0 %v5952_v53  ;;  %v4756_v53 = vor.u32 %v6544_v33, %v4753_v30  ;;  %v4865_v5 = vld [vmem:[%s7249_s30 + $0x398] sm:$0xf0]  ;;  %v6536_v19 = vld [vmem:[%s7249_s30 + $0x26c] sm:$0xf] }
 0x1c0   : > { %3997 = vmatpush.bf16.msrb.mxu1 %v6080_v59  ;;  %v4884_v59 = vor.u32 %v6576_v2, %v4881_v42  ;;  %v4593_v54 = vld [vmem:[%s7249_s30 + $0x178] sm:$0xf0]  ;;  %v3736_v37 = vadd.f32 %v3735_v45, %v3722_v57  ;;  %v6568_v16 = vld [vmem:[%s7249_s30 + $0x36c] sm:$0xf] }
 0x1c1   : > { %4011 = vmatpush.bf16.msrb.mxu2 %v6208_v60  ;;  %v6540_v60 = vld [vmem:[%s7249_s30 + $0x28c] sm:$0xf]  ;;  %v4721_v22 = vld [vmem:[%s7249_s30 + $0x278] sm:$0xf0] }
 0x1c2   : > { %4025 = vmatpush.bf16.msrb.mxu3 %v6336_v49  ;;  %3984 = vmatmul.bf16.vlgmr.msrb.gmra.mxu0 %v7662_v32  ;;  %v3761_v49 = vpop.f32.mrf.mxu0  ;;  %v4740_v20 = vor.u32 %v6540_v60, %v4737_v63  ;;  %v4849_v4 = vld [vmem:[%s7249_s30 + $0x378] sm:$0xf0]  ;;  %v6468_v52 = vld [vmem:[%s7249_s30 + $0x4c] sm:$0xf]  ;;  %v4724_v51 = vor.u32 %v6536_v19, %v4721_v22  ;;  %v3750_v34 = vadd.f32 %v3749_v62, %v3736_v37 }
 0x1c3   : > { %4032 = vmatpush.bf16.msra.mxu0 %v4532_v50  ;;  %3998 = vmatmul.bf16.vlgmr.msrb.gmra.mxu1 %v7669_v41  ;;  %v6572_v50 = vld [vmem:[%s7249_s30 + $0x38c] sm:$0xf]  ;;  %v3762_v11 = vadd.f32 %v3761_v49, %v3748_v0  ;;  %v4449_v24 = vld [vmem:[%s7249_s30 + $0x58] sm:$0xf0]  ;;  %v4852_v29 = vor.u32 %v6568_v16, %v4849_v4 }
 0x1c4   : > { %4046 = vmatpush.bf16.msra.mxu1 %v4660_v8  ;;  %4012 = vmatmul.bf16.vlgmr.msrb.gmra.mxu2 %v7667_v38  ;;  %v4612_v8 = vor.u32 %v6508_v55, %v4609_v56  ;;  %v4868_v25 = vor.u32 %v6572_v50, %v4865_v5  ;;  %v6500_v26 = vld [vmem:[%s7249_s30 + $0x14c] sm:$0xf]  ;;  %v4705_v12 = vld [vmem:[%s7249_s30 + $0x258] sm:$0xf0] }
 0x1c5   : > { %4060 = vmatpush.bf16.msra.mxu2 %v4788_v9  ;;  %4026 = vmatmul.bf16.vlgmr.msrb.gmra.mxu3 %v7673_v46  ;;  %v3775_v9 = vpop.f32.mrf.mxu1  ;;  %v6532_v30 = vld [vmem:[%s7249_s30 + $0x24c] sm:$0xf]  ;;  %v4833_v7 = vld [vmem:[%s7249_s30 + $0x358] sm:$0xf0] }
 0x1c6   : > { %4074 = vmatpush.bf16.msra.mxu3 %v4916_v14  ;;  %v4465_v14 = vld [vmem:[%s7249_s30 + $0x78] sm:$0xf0]  ;;  %v6564_v3 = vld [vmem:[%s7249_s30 + $0x34c] sm:$0xf]  ;;  %v4708_v56 = vor.u32 %v6532_v30, %v4705_v12 }
 0x1c7   : > { %4033 = vmatpush.bf16.msra.mxu0 %v4516_v48  ;;  %v4468_v48 = vor.u32 %v6472_v13, %v4465_v14  ;;  %v3789_v33 = vpop.f32.mrf.mxu2  ;;  %v6464_v45 = vld [vmem:[%s7249_s30 + $0x2c] sm:$0xf]  ;;  %v4836_v63 = vor.u32 %v6564_v3, %v4833_v7  ;;  %v4561_v62 = vld [vmem:[%s7249_s30 + $0x138] sm:$0xf0] }
 0x1c8   : > { %4047 = vmatpush.bf16.msra.mxu1 %v4644_v21  ;;  %v3776_v21 = vadd.f32 %v3775_v9, %v3762_v11  ;;  %v6496_v60 = vld [vmem:[%s7249_s30 + $0x12c] sm:$0xf]  ;;  %v4689_v50 = vld [vmem:[%s7249_s30 + $0x238] sm:$0xf0] }
 0x1c9   : > { %4061 = vmatpush.bf16.msra.mxu2 %v4772_v23  ;;  %v4596_v23 = vor.u32 %v6504_v15, %v4593_v54  ;;  %v6528_v49 = vld [vmem:[%s7249_s30 + $0x22c] sm:$0xf]  ;;  %v4417_v57 = vld [vmem:[%s7249_s30 + $0x18] sm:$0xf0] }
 0x1ca   : > { %4075 = vmatpush.bf16.msra.mxu3 %v4900_v28  ;;  %v4577_v28 = vld [vmem:[%s7249_s30 + $0x158] sm:$0xf0]  ;;  %v3790_v2 = vadd.f32 %v3789_v33, %v3776_v21  ;;  %v3763_v42 = vpop.f32.mrf.mxu0  ;;  %v6560_v5 = vld [vmem:[%s7249_s30 + $0x32c] sm:$0xf]  ;;  %v4692_v13 = vor.u32 %v6528_v49, %v4689_v50 }
 0x1cb   : > { %4034 = vmatpush.bf16.msra.mxu0 %v4500_v18  ;;  %v3803_v18 = vpop.f32.mrf.mxu3  ;;  %v3764_v61 = vadd.f32 %v3763_v42, %v3750_v34  ;;  %v6460_v9 = vld [vmem:[%s7249_s30 + $0xc] sm:$0xf]  ;;  %v4545_v15 = vld [vmem:[%s7249_s30 + $0x118] sm:$0xf0] }
 0x1cc   : > { %4048 = vmatpush.bf16.msra.mxu1 %v4628_v27  ;;  %v4452_v27 = vor.u32 %v6468_v52, %v4449_v24  ;;  %v3804_v55 = vadd.f32 %v3803_v18, %v3790_v2  ;;  %v6492_v14 = vld [vmem:[%s7249_s30 + $0x10c] sm:$0xf]  ;;  %v4673_v22 = vld [vmem:[%s7249_s30 + $0x218] sm:$0xf0] }
 0x1cd   : > { %4062 = vmatpush.bf16.msra.mxu2 %v4756_v53  ;;  %v4580_v53 = vor.u32 %v6500_v26, %v4577_v28  ;;  %v3777_v0 = vpop.f32.mrf.mxu1  ;;  %v6556_v37 = vld [vmem:[%s7249_s30 + $0x30c] sm:$0xf]  ;;  %v4801_v16 = vld [vmem:[%s7249_s30 + $0x318] sm:$0xf0]  ;;  %v4548_v33 = vor.u32 %v6492_v14, %v4545_v15 }
 0x1ce   : > { %4076 = vmatpush.bf16.msra.mxu3 %v4884_v59  ;;  %v4433_v59 = vld [vmem:[%s7249_s30 + $0x38] sm:$0xf0]  ;;  %4257 = vst [vmem:[%s8039_s21 + $0x8] sm:$0xff] %v3804_v55  ;;  %v3778_v11 = vadd.f32 %v3777_v0, %v3764_v61  ;;  %v6616_v52 = vld [vmem:[%s7249_s30 + $0x4ec] sm:$0xf]  ;;  %v4804_v2 = vor.u32 %v6556_v37, %v4801_v16 }
 0x1cf   : > { %4035 = vmatpush.bf16.msra.mxu0 %v4484_v6  ;;  %v4817_v6 = vld [vmem:[%s7249_s30 + $0x338] sm:$0xf0]  ;;  %v3791_v19 = vpop.f32.mrf.mxu2  ;;  %v6680_v26 = vld [vmem:[%s7249_s30 + $0x6ec] sm:$0xf] }
 0x1d0   : > { %4049 = vmatpush.bf16.msra.mxu1 %v4612_v8  ;;  %v4436_v8 = vor.u32 %v6464_v45, %v4433_v59  ;;  %v4820_v54 = vor.u32 %v6560_v5, %v4817_v6  ;;  %v3792_v4 = vadd.f32 %v3791_v19, %v3778_v11  ;;  %v5041_v21 = vld [vmem:[%s7249_s30 + $0x4f8] sm:$0xf0]  ;;  %v6712_v12 = vld [vmem:[%s7249_s30 + $0x7ec] sm:$0xf] }
 0x1d1   : > { %4063 = vmatpush.bf16.msra.mxu2 %v4740_v20  ;;  %v4564_v20 = vor.u32 %v6496_v60, %v4561_v62  ;;  %v5169_v24 = vld [vmem:[%s7249_s30 + $0x5f8] sm:$0xf0]  ;;  %v5044_v42 = vor.u32 %v6616_v52, %v5041_v21  ;;  %v6612_v18 = vld [vmem:[%s7249_s30 + $0x4cc] sm:$0xf] }
 0x1d2   : > { %4077 = vmatpush.bf16.msra.mxu3 %v4868_v25  ;;  %v6524_v25 = vld [vmem:[%s7249_s30 + $0x20c] sm:$0xf]  ;;  %v5297_v28 = vld [vmem:[%s7249_s30 + $0x6f8] sm:$0xf0] }
 0x1d3   : > { %4036 = vmatpush.bf16.msra.mxu0 %v4468_v48  ;;  %v3805_v48 = vpop.f32.mrf.mxu3  ;;  %v4676_v30 = vor.u32 %v6524_v25, %v4673_v22  ;;  %v5425_v34 = vld [vmem:[%s7249_s30 + $0x7f8] sm:$0xf0]  ;;  %v5300_v7 = vor.u32 %v6680_v26, %v5297_v28  ;;  %v6708_v59 = vld [vmem:[%s7249_s30 + $0x7cc] sm:$0xf] }
 0x1d4   : > { %4050 = vmatpush.bf16.msra.mxu1 %v4596_v23  ;;  %v6648_v23 = vld [vmem:[%s7249_s30 + $0x5ec] sm:$0xf]  ;;  %v5428_v61 = vor.u32 %v6712_v12, %v5425_v34  ;;  %v5153_v55 = vld [vmem:[%s7249_s30 + $0x5d8] sm:$0xf0] }
 0x1d5   : > { %4064 = vmatpush.bf16.msra.mxu2 %v4724_v51  ;;  %v4420_v51 = vor.u32 %v6460_v9, %v4417_v57  ;;  %v5172_v3 = vor.u32 %v6648_v23, %v5169_v24  ;;  %v5281_v45 = vld [vmem:[%s7249_s30 + $0x6d8] sm:$0xf0]  ;;  %v6608_v49 = vld [vmem:[%s7249_s30 + $0x4ac] sm:$0xf] }
 0x1d6   : > { %4078 = vmatpush.bf16.msra.mxu3 %v4852_v29  ;;  %v3806_v29 = vadd.f32 %v3805_v48, %v3792_v4  ;;  %v5409_v60 = vld [vmem:[%s7249_s30 + $0x7d8] sm:$0xf0]  ;;  %v6640_v5 = vld [vmem:[%s7249_s30 + $0x5ac] sm:$0xf] }
 0x1d7   : > { %4037 = vmatpush.bf16.msra.mxu0 %v4452_v27  ;;  %v5025_v27 = vld [vmem:[%s7249_s30 + $0x4d8] sm:$0xf0]  ;;  %v5412_v6 = vor.u32 %v6708_v59, %v5409_v60  ;;  %v6672_v9 = vld [vmem:[%s7249_s30 + $0x6ac] sm:$0xf] }
 0x1d8   : > { %4051 = vmatpush.bf16.msra.mxu1 %v4580_v53  ;;  %4261 = vst [vmem:[%s8039_s21 + $0x28] sm:$0xff] %v3806_v29  ;;  %v6644_v53 = vld [vmem:[%s7249_s30 + $0x5cc] sm:$0xf]  ;;  %v5009_v50 = vld [vmem:[%s7249_s30 + $0x4b8] sm:$0xf0] }
 0x1d9   : > { %4065 = vmatpush.bf16.msra.mxu2 %v4708_v56  ;;  %v6676_v56 = vld [vmem:[%s7249_s30 + $0x6cc] sm:$0xf]  ;;  %v5156_v0 = vor.u32 %v6644_v53, %v5153_v55  ;;  %v5265_v57 = vld [vmem:[%s7249_s30 + $0x6b8] sm:$0xf0] }
 0x1da   : > { %4079 = vmatpush.bf16.msra.mxu3 %v4836_v63  ;;  %v5028_v63 = vor.u32 %v6612_v18, %v5025_v27  ;;  %v5284_v62 = vor.u32 %v6676_v56, %v5281_v45  ;;  %v6704_v11 = vld [vmem:[%s7249_s30 + $0x7ac] sm:$0xf]  ;;  %v5268_v15 = vor.u32 %v6672_v9, %v5265_v57  ;;  %v4993_v25 = vld [vmem:[%s7249_s30 + $0x498] sm:$0xf0] }
 0x1db   : > { %4038 = vmatpush.bf16.msra.mxu0 %v4436_v8  ;;  %v5137_v8 = vld [vmem:[%s7249_s30 + $0x5b8] sm:$0xf0]  ;;  %v6700_v37 = vld [vmem:[%s7249_s30 + $0x78c] sm:$0xf] }
 0x1dc   : > { %4052 = vmatpush.bf16.msra.mxu1 %v4564_v20  ;;  %v5393_v20 = vld [vmem:[%s7249_s30 + $0x7b8] sm:$0xf0]  ;;  %v5140_v14 = vor.u32 %v6640_v5, %v5137_v8  ;;  %v6600_v52 = vld [vmem:[%s7249_s30 + $0x46c] sm:$0xf] }
 0x1dd   : > { %4066 = vmatpush.bf16.msra.mxu2 %v4692_v13  ;;  %v5012_v13 = vor.u32 %v6608_v49, %v5009_v50  ;;  %v5121_v19 = vld [vmem:[%s7249_s30 + $0x598] sm:$0xf0]  ;;  %v6632_v23 = vld [vmem:[%s7249_s30 + $0x56c] sm:$0xf] }
 0x1de   : > { %4080 = vmatpush.bf16.msra.mxu3 %v4820_v54  ;;  %v6636_v54 = vld [vmem:[%s7249_s30 + $0x58c] sm:$0xf]  ;;  %v5249_v22 = vld [vmem:[%s7249_s30 + $0x698] sm:$0xf0] }
 0x1df   : > { %4039 = vmatpush.bf16.msra.mxu0 %v4420_v51  ;;  %v5124_v4 = vor.u32 %v6636_v54, %v5121_v19  ;;  %v4977_v21 = vld [vmem:[%s7249_s30 + $0x478] sm:$0xf0]  ;;  %v6664_v26 = vld [vmem:[%s7249_s30 + $0x66c] sm:$0xf] }
 0x1e0   : > { %4053 = vmatpush.bf16.msra.mxu1 %v4548_v33  ;;  %v5105_v24 = vld [vmem:[%s7249_s30 + $0x578] sm:$0xf0]  ;;  %v6696_v29 = vld [vmem:[%s7249_s30 + $0x76c] sm:$0xf] }
 0x1e1   : > { %4067 = vmatpush.bf16.msra.mxu2 %v4676_v30  ;;  %v5233_v28 = vld [vmem:[%s7249_s30 + $0x678] sm:$0xf0]  ;;  %v4980_v30 = vor.u32 %v6600_v52, %v4977_v21  ;;  %v5108_v12 = vor.u32 %v6632_v23, %v5105_v24  ;;  %v6628_v18 = vld [vmem:[%s7249_s30 + $0x54c] sm:$0xf] }
 0x1e2   : > { %4081 = vmatpush.bf16.msra.mxu3 %v4804_v2  ;;  %4040 = vmatmul.bf16.vlgmr.msra.gmra.mxu0 %v7354_v58  ;;  %v6604_v58 = vld [vmem:[%s7249_s30 + $0x48c] sm:$0xf]  ;;  %v5361_v33 = vld [vmem:[%s7249_s30 + $0x778] sm:$0xf0]  ;;  %v5236_v34 = vor.u32 %v6664_v26, %v5233_v28 }
 0x1e3   : > { %4088 = vmatpush.bf16.msrb.mxu0 %v5044_v42  ;;  %4054 = vmatmul.bf16.vlgmr.msra.gmra.mxu1 %v7378_v10  ;;  %v6668_v10 = vld [vmem:[%s7249_s30 + $0x68c] sm:$0xf]  ;;  %v4996_v16 = vor.u32 %v6604_v58, %v4993_v25  ;;  %v4961_v42 = vld [vmem:[%s7249_s30 + $0x458] sm:$0xf0] }
 0x1e4   : > { %4102 = vmatpush.bf16.msrb.mxu1 %v5172_v3  ;;  %4068 = vmatmul.bf16.vlgmr.msra.gmra.mxu2 %v7362_v1  ;;  %v5396_v1 = vor.u32 %v6704_v11, %v5393_v20  ;;  %v5252_v48 = vor.u32 %v6668_v10, %v5249_v22  ;;  %v6596_v2 = vld [vmem:[%s7249_s30 + $0x44c] sm:$0xf]  ;;  %v5364_v3 = vor.u32 %v6696_v29, %v5361_v33  ;;  %v5217_v53 = vld [vmem:[%s7249_s30 + $0x658] sm:$0xf0] }
 0x1e5   : > { %4116 = vmatpush.bf16.msrb.mxu2 %v5300_v7  ;;  %4082 = vmatmul.bf16.vlgmr.msra.gmra.mxu3 %v7386_v17  ;;  %v5377_v17 = vld [vmem:[%s7249_s30 + $0x798] sm:$0xf0]  ;;  %v6660_v27 = vld [vmem:[%s7249_s30 + $0x64c] sm:$0xf]  ;;  %v4964_v56 = vor.u32 %v6596_v2, %v4961_v42 }
 0x1e6   : > { %4130 = vmatpush.bf16.msrb.mxu3 %v5428_v61  ;;  %v5380_v51 = vor.u32 %v6700_v37, %v5377_v17  ;;  %v5089_v7 = vld [vmem:[%s7249_s30 + $0x558] sm:$0xf0]  ;;  %v6692_v61 = vld [vmem:[%s7249_s30 + $0x74c] sm:$0xf]  ;;  %v5220_v59 = vor.u32 %v6660_v27, %v5217_v53 }
 0x1e7   : > { %4089 = vmatpush.bf16.msrb.mxu0 %v5028_v63  ;;  %v5345_v55 = vld [vmem:[%s7249_s30 + $0x758] sm:$0xf0]  ;;  %v5092_v45 = vor.u32 %v6628_v18, %v5089_v7  ;;  %v6592_v60 = vld [vmem:[%s7249_s30 + $0x42c] sm:$0xf] }
 0x1e8   : > { %4103 = vmatpush.bf16.msrb.mxu1 %v5156_v0  ;;  %v4945_v63 = vld [vmem:[%s7249_s30 + $0x438] sm:$0xf0]  ;;  %v6624_v0 = vld [vmem:[%s7249_s30 + $0x52c] sm:$0xf] }
 0x1e9   : > { %4117 = vmatpush.bf16.msrb.mxu2 %v5284_v62  ;;  %v5348_v62 = vor.u32 %v6692_v61, %v5345_v55  ;;  %v5073_v49 = vld [vmem:[%s7249_s30 + $0x538] sm:$0xf0]  ;;  %v6656_v50 = vld [vmem:[%s7249_s30 + $0x62c] sm:$0xf]  ;;  %v4948_v9 = vor.u32 %v6592_v60, %v4945_v63 }
 0x1ea   : > { %4131 = vmatpush.bf16.msrb.mxu3 %v5412_v6  ;;  %v5201_v5 = vld [vmem:[%s7249_s30 + $0x638] sm:$0xf0]  ;;  %v6688_v6 = vld [vmem:[%s7249_s30 + $0x72c] sm:$0xf]  ;;  %v5076_v20 = vor.u32 %v6624_v0, %v5073_v49 }
 0x1eb   : > { %4090 = vmatpush.bf16.msrb.mxu0 %v5012_v13  ;;  %v5329_v8 = vld [vmem:[%s7249_s30 + $0x738] sm:$0xf0]  ;;  %v6588_v57 = vld [vmem:[%s7249_s30 + $0x40c] sm:$0xf]  ;;  %v5204_v13 = vor.u32 %v6656_v50, %v5201_v5 }
 0x1ec   : > { %4104 = vmatpush.bf16.msrb.mxu1 %v5140_v14  ;;  %v4929_v11 = vld [vmem:[%s7249_s30 + $0x418] sm:$0xf0]  ;;  %v6620_v14 = vld [vmem:[%s7249_s30 + $0x50c] sm:$0xf]  ;;  %v5332_v25 = vor.u32 %v6688_v6, %v5329_v8 }
 0x1ed   : > { %4118 = vmatpush.bf16.msrb.mxu2 %v5268_v15  ;;  %v5057_v15 = vld [vmem:[%s7249_s30 + $0x518] sm:$0xf0]  ;;  %v6652_v58 = vld [vmem:[%s7249_s30 + $0x60c] sm:$0xf]  ;;  %v4932_v17 = vor.u32 %v6588_v57, %v4929_v11 }
 0x1ee   : > { %4132 = vmatpush.bf16.msrb.mxu3 %v5396_v1  ;;  %v5185_v54 = vld [vmem:[%s7249_s30 + $0x618] sm:$0xf0]  ;;  %v6684_v1 = vld [vmem:[%s7249_s30 + $0x70c] sm:$0xf]  ;;  %v5060_v52 = vor.u32 %v6620_v14, %v5057_v15 }
 0x1ef   : > { %4091 = vmatpush.bf16.msrb.mxu0 %v4996_v16  ;;  %v5313_v19 = vld [vmem:[%s7249_s30 + $0x718] sm:$0xf0]  ;;  %v6744_v10 = vld [vmem:[%s7249_s30 + $0x8ec] sm:$0xf]  ;;  %v5188_v21 = vor.u32 %v6652_v58, %v5185_v54 }
 0x1f0   : > { %4105 = vmatpush.bf16.msrb.mxu1 %v5124_v4  ;;  %v5553_v22 = vld [vmem:[%s7249_s30 + $0x8f8] sm:$0xf0]  ;;  %v6776_v37 = vld [vmem:[%s7249_s30 + $0x9ec] sm:$0xf]  ;;  %v5316_v24 = vor.u32 %v6684_v1, %v5313_v19 }
 0x1f1   : > { %4119 = vmatpush.bf16.msrb.mxu2 %v5252_v48  ;;  %v5681_v16 = vld [vmem:[%s7249_s30 + $0x9f8] sm:$0xf0]  ;;  %v6808_v4 = vld [vmem:[%s7249_s30 + $0xaec] sm:$0xf]  ;;  %v5556_v26 = vor.u32 %v6744_v10, %v5553_v22 }
 0x1f2   : > { %4133 = vmatpush.bf16.msrb.mxu3 %v5380_v51  ;;  %v5809_v48 = vld [vmem:[%s7249_s30 + $0xaf8] sm:$0xf0]  ;;  %v6840_v23 = vld [vmem:[%s7249_s30 + $0xbec] sm:$0xf]  ;;  %v5684_v28 = vor.u32 %v6776_v37, %v5681_v16  ;;  %v8484_v37 = vpop.f32.mrf.mxu0 }
 0x1f3   : > { %4092 = vmatpush.bf16.msrb.mxu0 %v4980_v30  ;;  %v5937_v51 = vld [vmem:[%s7249_s30 + $0xbf8] sm:$0xf0]  ;;  %v5812_v29 = vor.u32 %v6808_v4, %v5809_v48  ;;  %v6740_v33 = vld [vmem:[%s7249_s30 + $0x8cc] sm:$0xf]  ;;  %v8488_v4 = vpop.f32.mrf.mxu1 }
 0x1f4   : > { %4106 = vmatpush.bf16.msrb.mxu1 %v5108_v12  ;;  %v5537_v30 = vld [vmem:[%s7249_s30 + $0x8d8] sm:$0xf0]  ;;  %v6772_v12 = vld [vmem:[%s7249_s30 + $0x9cc] sm:$0xf] }
 0x1f5   : > { %4120 = vmatpush.bf16.msrb.mxu2 %v5236_v34  ;;  %v5940_v34 = vor.u32 %v6840_v23, %v5937_v51  ;;  %v5665_v2 = vld [vmem:[%s7249_s30 + $0x9d8] sm:$0xf0]  ;;  %v6804_v42 = vld [vmem:[%s7249_s30 + $0xacc] sm:$0xf]  ;;  %v5540_v27 = vor.u32 %v6740_v33, %v5537_v30 }
 0x1f6   : > { %4134 = vmatpush.bf16.msrb.mxu3 %v5364_v3  ;;  %v5793_v18 = vld [vmem:[%s7249_s30 + $0xad8] sm:$0xf0]  ;;  %v6836_v3 = vld [vmem:[%s7249_s30 + $0xbcc] sm:$0xf]  ;;  %v5668_v53 = vor.u32 %v6772_v12, %v5665_v2 }
 0x1f7   : > { %4093 = vmatpush.bf16.msrb.mxu0 %v4964_v56  ;;  %v5921_v7 = vld [vmem:[%s7249_s30 + $0xbd8] sm:$0xf0]  ;;  %v5796_v61 = vor.u32 %v6804_v42, %v5793_v18  ;;  %v6736_v55 = vld [vmem:[%s7249_s30 + $0x8ac] sm:$0xf] }
 0x1f8   : > { %4107 = vmatpush.bf16.msrb.mxu1 %v5092_v45  ;;  %v5521_v56 = vld [vmem:[%s7249_s30 + $0x8b8] sm:$0xf0]  ;;  %v6768_v45 = vld [vmem:[%s7249_s30 + $0x9ac] sm:$0xf] }
 0x1f9   : > { %4121 = vmatpush.bf16.msrb.mxu2 %v5220_v59  ;;  %v5924_v59 = vor.u32 %v6836_v3, %v5921_v7  ;;  %v5649_v60 = vld [vmem:[%s7249_s30 + $0x9b8] sm:$0xf0]  ;;  %v6800_v63 = vld [vmem:[%s7249_s30 + $0xaac] sm:$0xf] }
 0x1fa   : > { %4135 = vmatpush.bf16.msrb.mxu3 %v5348_v62  ;;  %v5777_v0 = vld [vmem:[%s7249_s30 + $0xab8] sm:$0xf0]  ;;  %v6832_v62 = vld [vmem:[%s7249_s30 + $0xbac] sm:$0xf]  ;;  %v5652_v50 = vor.u32 %v6768_v45, %v5649_v60  ;;  %v8506_v45 = vpop.f32.mrf.mxu3 }
 0x1fb   : > { %4094 = vmatpush.bf16.msrb.mxu0 %v4948_v9  ;;  %v5905_v49 = vld [vmem:[%s7249_s30 + $0xbb8] sm:$0xf0]  ;;  %v5780_v5 = vor.u32 %v6800_v63, %v5777_v0  ;;  %v6732_v6 = vld [vmem:[%s7249_s30 + $0x88c] sm:$0xf]  ;;  %v8511_v63 = vld [vmem:[%s7257_s5] sm:$0xf] }
 0x1fc   : > { %4108 = vmatpush.bf16.msrb.mxu1 %v5076_v20  ;;  %v6764_v8 = vld [vmem:[%s7249_s30 + $0x98c] sm:$0xf]  ;;  %v5633_v9 = vld [vmem:[%s7249_s30 + $0x998] sm:$0xf0]  ;;  %v794_v0 = vperm.slane %v8511_v63, 2 }
 0x1fd   : > { %4122 = vmatpush.bf16.msrb.mxu2 %v5204_v13  ;;  %v6796_v57 = vld [vmem:[%s7249_s30 + $0xa8c] sm:$0xf]  ;;  %v5889_v20 = vld [vmem:[%s7249_s30 + $0xb98] sm:$0xf0]  ;;  %v5636_v14 = vor.u32 %v6764_v8, %v5633_v9  ;;  %v8521_v9 = vpop.f32.mrf.mxu1 }
 0x1fe   : > { %4136 = vmatpush.bf16.msrb.mxu3 %v5332_v25  ;;  %v6828_v11 = vld [vmem:[%s7249_s30 + $0xb8c] sm:$0xf]  ;;  %v5489_v25 = vld [vmem:[%s7249_s30 + $0x878] sm:$0xf0] }
 0x1ff   : > { %4095 = vmatpush.bf16.msrb.mxu0 %v4932_v17  ;;  %v6728_v58 = vld [vmem:[%s7249_s30 + $0x86c] sm:$0xf]  ;;  %v5892_v1 = vor.u32 %v6828_v11, %v5889_v20  ;;  %v5617_v19 = vld [vmem:[%s7249_s30 + $0x978] sm:$0xf0] }
 0x200   : > { %4109 = vmatpush.bf16.msrb.mxu1 %v5060_v52  ;;  %v6760_v54 = vld [vmem:[%s7249_s30 + $0x96c] sm:$0xf]  ;;  %v5745_v22 = vld [vmem:[%s7249_s30 + $0xa78] sm:$0xf0]  ;;  %v5492_v48 = vor.u32 %v6728_v58, %v5489_v25 }
 0x201   : > { %4123 = vmatpush.bf16.msrb.mxu2 %v5188_v21  ;;  %v6792_v10 = vld [vmem:[%s7249_s30 + $0xa6c] sm:$0xf]  ;;  %v5873_v16 = vld [vmem:[%s7249_s30 + $0xb78] sm:$0xf0]  ;;  %v5620_v52 = vor.u32 %v6760_v54, %v5617_v19 }
 0x202   : > { %4137 = vmatpush.bf16.msrb.mxu3 %v5316_v24  ;;  %4096 = vmatmul.bf16.vlgmr.msrb.gmra.mxu0 %v7462_v39  ;;  %v5524_v39 = vor.u32 %v6736_v55, %v5521_v56  ;;  %v6824_v17 = vld [vmem:[%s7249_s30 + $0xb6c] sm:$0xf]  ;;  %v5748_v21 = vor.u32 %v6792_v10, %v5745_v22  ;;  %v5473_v51 = vld [vmem:[%s7249_s30 + $0x858] sm:$0xf0] }
 0x203   : > { %4144 = vmatpush.bf16.msra.mxu0 %v5556_v26  ;;  %4110 = vmatmul.bf16.vlgmr.msrb.gmra.mxu1 %v7469_v44  ;;  %v5908_v44 = vor.u32 %v6832_v62, %v5905_v49  ;;  %v6724_v23 = vld [vmem:[%s7249_s30 + $0x84c] sm:$0xf]  ;;  %v5876_v26 = vor.u32 %v6824_v17, %v5873_v16  ;;  %v5729_v33 = vld [vmem:[%s7249_s30 + $0xa58] sm:$0xf0] }
 0x204   : > { %4158 = vmatpush.bf16.msra.mxu1 %v5684_v28  ;;  %4124 = vmatmul.bf16.vlgmr.msrb.gmra.mxu2 %v7467_v43  ;;  %v5505_v43 = vld [vmem:[%s7249_s30 + $0x898] sm:$0xf0]  ;;  %v6756_v24 = vld [vmem:[%s7249_s30 + $0x94c] sm:$0xf] }
 0x205   : > { %4172 = vmatpush.bf16.msra.mxu2 %v5812_v29  ;;  %4138 = vmatmul.bf16.vlgmr.msrb.gmra.mxu3 %v7473_v47  ;;  %v5761_v47 = vld [vmem:[%s7249_s30 + $0xa98] sm:$0xf0]  ;;  %v5508_v13 = vor.u32 %v6732_v6, %v5505_v43  ;;  %v6788_v29 = vld [vmem:[%s7249_s30 + $0xa4c] sm:$0xf] }
 0x206   : > { %4186 = vmatpush.bf16.msra.mxu3 %v5940_v34  ;;  %v5764_v15 = vor.u32 %v6796_v57, %v5761_v47  ;;  %v5601_v28 = vld [vmem:[%s7249_s30 + $0x958] sm:$0xf0]  ;;  %v6820_v30 = vld [vmem:[%s7249_s30 + $0xb4c] sm:$0xf]  ;;  %v5476_v34 = vor.u32 %v6724_v23, %v5473_v51  ;;  %v5732_v42 = vor.u32 %v6788_v29, %v5729_v33 }
 0x207   : > { %4145 = vmatpush.bf16.msra.mxu0 %v5540_v27  ;;  %v5857_v12 = vld [vmem:[%s7249_s30 + $0xb58] sm:$0xf0]  ;;  %v5604_v2 = vor.u32 %v6756_v24, %v5601_v28  ;;  %v6720_v18 = vld [vmem:[%s7249_s30 + $0x82c] sm:$0xf]  ;;  %v8501_v27 = vpop.f32.mrf.mxu2 }
 0x208   : > { %4159 = vmatpush.bf16.msra.mxu1 %v5668_v53  ;;  %v5457_v3 = vld [vmem:[%s7249_s30 + $0x838] sm:$0xf0]  ;;  %v6752_v7 = vld [vmem:[%s7249_s30 + $0x92c] sm:$0xf]  ;;  %v5860_v53 = vor.u32 %v6820_v30, %v5857_v12 }
 0x209   : > { %4173 = vmatpush.bf16.msra.mxu2 %v5796_v61  ;;  %v5585_v61 = vld [vmem:[%s7249_s30 + $0x938] sm:$0xf0]  ;;  %v6784_v55 = vld [vmem:[%s7249_s30 + $0xa2c] sm:$0xf]  ;;  %v5460_v62 = vor.u32 %v6720_v18, %v5457_v3 }
 0x20a   : > { %4187 = vmatpush.bf16.msra.mxu3 %v5924_v59  ;;  %v5713_v56 = vld [vmem:[%s7249_s30 + $0xa38] sm:$0xf0]  ;;  %v6816_v59 = vld [vmem:[%s7249_s30 + $0xb2c] sm:$0xf] }
 0x20b   : > { %4146 = vmatpush.bf16.msra.mxu0 %v5524_v39  ;;  %v5841_v60 = vld [vmem:[%s7249_s30 + $0xb38] sm:$0xf0]  ;;  %v6716_v49 = vld [vmem:[%s7249_s30 + $0x80c] sm:$0xf]  ;;  %v5716_v6 = vor.u32 %v6784_v55, %v5713_v56 }
 0x20c   : > { %4160 = vmatpush.bf16.msra.mxu1 %v5652_v50  ;;  %v5441_v39 = vld [vmem:[%s7249_s30 + $0x818] sm:$0xf0]  ;;  %v8516_v50 = vpop.f32.mrf.mxu0  ;;  %v6748_v43 = vld [vmem:[%s7249_s30 + $0x90c] sm:$0xf]  ;;  %v5844_v57 = vor.u32 %v6816_v59, %v5841_v60  ;;  %v8553_v59 = vpop.f32.mrf.mxu1 }
 0x20d   : > { %4174 = vmatpush.bf16.msra.mxu2 %v5780_v5  ;;  %v5588_v5 = vor.u32 %v6752_v7, %v5585_v61  ;;  %v5569_v8 = vld [vmem:[%s7249_s30 + $0x918] sm:$0xf0]  ;;  %v6812_v11 = vld [vmem:[%s7249_s30 + $0xb0c] sm:$0xf]  ;;  %v5444_v58 = vor.u32 %v6716_v49, %v5441_v39 }
 0x20e   : > { %4188 = vmatpush.bf16.msra.mxu3 %v5908_v44  ;;  %v6780_v44 = vld [vmem:[%s7249_s30 + $0xa0c] sm:$0xf]  ;;  %v5697_v47 = vld [vmem:[%s7249_s30 + $0xa18] sm:$0xf0]  ;;  %v5572_v19 = vor.u32 %v6748_v43, %v5569_v8 }
 0x20f   : > { %4147 = vmatpush.bf16.msra.mxu0 %v5508_v13  ;;  %v5825_v20 = vld [vmem:[%s7249_s30 + $0xb18] sm:$0xf0]  ;;  %v6872_v13 = vld [vmem:[%s7249_s30 + $0xcec] sm:$0xf]  ;;  %v5700_v10 = vor.u32 %v6780_v44, %v5697_v47  ;;  %v8540_v28 = vpop.f32.mrf.mxu2 }
 0x210   : > { %4161 = vmatpush.bf16.msra.mxu1 %v5636_v14  ;;  %v6065_v14 = vld [vmem:[%s7249_s30 + $0xcf8] sm:$0xf0]  ;;  %v6936_v54 = vld [vmem:[%s7249_s30 + $0xeec] sm:$0xf]  ;;  %v5828_v16 = vor.u32 %v6812_v11, %v5825_v20  ;;  %v3820_v20 = vadd.f32 %v8516_v50, %v794_v0 }
 0x211   : > { %4175 = vmatpush.bf16.msra.mxu2 %v5764_v15  ;;  %v6904_v15 = vld [vmem:[%s7249_s30 + $0xdec] sm:$0xf]  ;;  %v6193_v25 = vld [vmem:[%s7249_s30 + $0xdf8] sm:$0xf0] }
 0x212   : > { %4189 = vmatpush.bf16.msra.mxu3 %v5892_v1  ;;  %v6321_v1 = vld [vmem:[%s7249_s30 + $0xef8] sm:$0xf0]  ;;  %v6968_v22 = vld [vmem:[%s7249_s30 + $0xfec] sm:$0xf] }
 0x213   : > { %4148 = vmatpush.bf16.msra.mxu0 %v5492_v48  ;;  %v6449_v17 = vld [vmem:[%s7249_s30 + $0xff8] sm:$0xf0]  ;;  %v6068_v48 = vor.u32 %v6872_v13, %v6065_v14  ;;  %v6324_v23 = vor.u32 %v6936_v54, %v6321_v1  ;;  %v6868_v51 = vld [vmem:[%s7249_s30 + $0xccc] sm:$0xf] }
 0x214   : > { %4162 = vmatpush.bf16.msra.mxu1 %v5620_v52  ;;  %v3818_v52 = vadd.f32 %v8484_v37, %v794_v0  ;;  %v6049_v24 = vld [vmem:[%s7249_s30 + $0xcd8] sm:$0xf0]  ;;  %v6452_v29 = vor.u32 %v6968_v22, %v6449_v17  ;;  %v6932_v30 = vld [vmem:[%s7249_s30 + $0xecc] sm:$0xf]  ;;  %v3873_v3 = vpop.f32.mrf.mxu0 }
 0x215   : > { %4176 = vmatpush.bf16.msra.mxu2 %v5748_v21  ;;  %v6196_v21 = vor.u32 %v6904_v15, %v6193_v25  ;;  %v6177_v33 = vld [vmem:[%s7249_s30 + $0xdd8] sm:$0xf0]  ;;  %v6964_v37 = vld [vmem:[%s7249_s30 + $0xfcc] sm:$0xf] }
 0x216   : > { %4190 = vmatpush.bf16.msra.mxu3 %v5876_v26  ;;  %v6900_v26 = vld [vmem:[%s7249_s30 + $0xdcc] sm:$0xf]  ;;  %v6305_v12 = vld [vmem:[%s7249_s30 + $0xed8] sm:$0xf0]  ;;  %v3832_v18 = vadd.f32 %v8488_v4, %v3818_v52 }
 0x217   : > { %4149 = vmatpush.bf16.msra.mxu0 %v5476_v34  ;;  %v8545_v34 = vpop.f32.mrf.mxu3  ;;  %v6180_v7 = vor.u32 %v6900_v26, %v6177_v33  ;;  %v6864_v61 = vld [vmem:[%s7249_s30 + $0xcac] sm:$0xf]  ;;  %v6033_v55 = vld [vmem:[%s7249_s30 + $0xcb8] sm:$0xf0]  ;;  %v8576_v14 = vpop.f32.mrf.mxu2 }
 0x218   : > { %4163 = vmatpush.bf16.msra.mxu1 %v5604_v2  ;;  %v6433_v2 = vld [vmem:[%s7249_s30 + $0xfd8] sm:$0xf0]  ;;  %v6896_v56 = vld [vmem:[%s7249_s30 + $0xdac] sm:$0xf] }
 0x219   : > { %4177 = vmatpush.bf16.msra.mxu2 %v5732_v42  ;;  %v6052_v42 = vor.u32 %v6868_v51, %v6049_v24  ;;  %v6436_v60 = vor.u32 %v6964_v37, %v6433_v2  ;;  %v6928_v4 = vld [vmem:[%s7249_s30 + $0xeac] sm:$0xf]  ;;  %v6289_v49 = vld [vmem:[%s7249_s30 + $0xeb8] sm:$0xf0] }
 0x21a   : > { %4191 = vmatpush.bf16.msra.mxu3 %v5860_v53  ;;  %v6308_v53 = vor.u32 %v6932_v30, %v6305_v12  ;;  %v6960_v39 = vld [vmem:[%s7249_s30 + $0xfac] sm:$0xf]  ;;  %v6292_v8 = vor.u32 %v6928_v4, %v6289_v49  ;;  %v6017_v44 = vld [vmem:[%s7249_s30 + $0xc98] sm:$0xf0] }
 0x21b   : > { %4150 = vmatpush.bf16.msra.mxu0 %v5460_v62  ;;  %v6161_v62 = vld [vmem:[%s7249_s30 + $0xdb8] sm:$0xf0]  ;;  %v6924_v11 = vld [vmem:[%s7249_s30 + $0xe8c] sm:$0xf] }
 0x21c   : > { %4164 = vmatpush.bf16.msra.mxu1 %v5588_v5  ;;  %v6417_v5 = vld [vmem:[%s7249_s30 + $0xfb8] sm:$0xf0]  ;;  %v6164_v43 = vor.u32 %v6896_v56, %v6161_v62  ;;  %v6856_v0 = vld [vmem:[%s7249_s30 + $0xc6c] sm:$0xf] }
 0x21d   : > { %4178 = vmatpush.bf16.msra.mxu2 %v5716_v6  ;;  %v3846_v6 = vadd.f32 %v8501_v27, %v3832_v18  ;;  %v6145_v47 = vld [vmem:[%s7249_s30 + $0xd98] sm:$0xf0]  ;;  %v6956_v27 = vld [vmem:[%s7249_s30 + $0xf8c] sm:$0xf] }
 0x21e   : > { %4192 = vmatpush.bf16.msra.mxu3 %v5844_v57  ;;  %v6420_v57 = vor.u32 %v6960_v39, %v6417_v5  ;;  %v6401_v13 = vld [vmem:[%s7249_s30 + $0xf98] sm:$0xf0]  ;;  %v6920_v17 = vld [vmem:[%s7249_s30 + $0xe6c] sm:$0xf] }
 0x21f   : > { %4151 = vmatpush.bf16.msra.mxu0 %v5444_v58  ;;  %v3860_v58 = vadd.f32 %v8506_v45, %v3846_v6  ;;  %v8579_v25 = vpop.f32.mrf.mxu3  ;;  %v6001_v50 = vld [vmem:[%s7249_s30 + $0xc78] sm:$0xf0]  ;;  %v3834_v45 = vadd.f32 %v8521_v9, %v3820_v20  ;;  %v6952_v52 = vld [vmem:[%s7249_s30 + $0xf6c] sm:$0xf]  ;;  %v3903_v49 = vpop.f32.mrf.mxu2 }
 0x220   : > { %4165 = vmatpush.bf16.msra.mxu1 %v5572_v19  ;;  %v6888_v19 = vld [vmem:[%s7249_s30 + $0xd6c] sm:$0xf]  ;;  %v6129_v22 = vld [vmem:[%s7249_s30 + $0xd78] sm:$0xf0]  ;;  %v6004_v51 = vor.u32 %v6856_v0, %v6001_v50 }
 0x221   : > { %4179 = vmatpush.bf16.msra.mxu2 %v5700_v10  ;;  %v6404_v10 = vor.u32 %v6956_v27, %v6401_v13  ;;  %v3874_v24 = vadd.f32 %v3873_v3, %v3860_v58  ;;  %v6132_v26 = vor.u32 %v6888_v19, %v6129_v22  ;;  %v6852_v33 = vld [vmem:[%s7249_s30 + $0xc4c] sm:$0xf]  ;;  %v5985_v30 = vld [vmem:[%s7249_s30 + $0xc58] sm:$0xf0]  ;;  %v3848_v18 = vadd.f32 %v8540_v28, %v3834_v45 }
 0x222   : > { %4193 = vmatpush.bf16.msra.mxu3 %v5828_v16  ;;  %4152 = vmatmul.bf16.vlgmr.msra.gmra.mxu0 %v7562_v31  ;;  %v6036_v31 = vor.u32 %v6864_v61, %v6033_v55  ;;  %v6257_v16 = vld [vmem:[%s7249_s30 + $0xe78] sm:$0xf0]  ;;  %v6884_v9 = vld [vmem:[%s7249_s30 + $0xd4c] sm:$0xf] }
 0x223   : > { %4200 = vmatpush.bf16.msrb.mxu0 %v6068_v48  ;;  %4166 = vmatmul.bf16.vlgmr.msra.gmra.mxu1 %v7569_v36  ;;  %v6892_v36 = vld [vmem:[%s7249_s30 + $0xd8c] sm:$0xf]  ;;  %v3875_v48 = vpop.f32.mrf.mxu0  ;;  %v6113_v37 = vld [vmem:[%s7249_s30 + $0xd58] sm:$0xf0]  ;;  %v3888_v61 = vadd.f32 %v8553_v59, %v3874_v24  ;;  %v3862_v59 = vadd.f32 %v8545_v34, %v3848_v18 }
 0x224   : > { %4214 = vmatpush.bf16.msrb.mxu1 %v6196_v21  ;;  %4180 = vmatmul.bf16.vlgmr.msra.gmra.mxu2 %v7567_v35  ;;  %v6860_v35 = vld [vmem:[%s7249_s30 + $0xc8c] sm:$0xf]  ;;  %v6148_v54 = vor.u32 %v6892_v36, %v6145_v47  ;;  %v6385_v21 = vld [vmem:[%s7249_s30 + $0xf78] sm:$0xf0]  ;;  %v6116_v55 = vor.u32 %v6884_v9, %v6113_v37 }
 0x225   : > { %4228 = vmatpush.bf16.msrb.mxu2 %v6324_v23  ;;  %4194 = vmatmul.bf16.vlgmr.msra.gmra.mxu3 %v7573_v40  ;;  %v6273_v40 = vld [vmem:[%s7249_s30 + $0xe98] sm:$0xf0]  ;;  %v6020_v15 = vor.u32 %v6860_v35, %v6017_v44  ;;  %v8590_v23 = vpop.f32.mrf.mxu1  ;;  %v6388_v12 = vor.u32 %v6952_v52, %v6385_v21  ;;  %v6916_v2 = vld [vmem:[%s7249_s30 + $0xe4c] sm:$0xf] }
 0x226   : > { %4242 = vmatpush.bf16.msrb.mxu3 %v6452_v29  ;;  %v6276_v1 = vor.u32 %v6924_v11, %v6273_v40  ;;  %v6260_v29 = vor.u32 %v6920_v17, %v6257_v16  ;;  %v6369_v3 = vld [vmem:[%s7249_s30 + $0xf58] sm:$0xf0]  ;;  %v6880_v4 = vld [vmem:[%s7249_s30 + $0xd2c] sm:$0xf] }
 0x227   : > { %4201 = vmatpush.bf16.msrb.mxu0 %v6052_v42  ;;  %v6241_v42 = vld [vmem:[%s7249_s30 + $0xe58] sm:$0xf0]  ;;  %v6912_v5 = vld [vmem:[%s7249_s30 + $0xe2c] sm:$0xf]  ;;  %v3917_v6 = vpop.f32.mrf.mxu3  ;;  %v3957_v22 = vpop.f32.mrf.mxu2 }
 0x228   : > { %4215 = vmatpush.bf16.msrb.mxu1 %v6180_v7  ;;  %v6948_v7 = vld [vmem:[%s7249_s30 + $0xf4c] sm:$0xf]  ;;  %v6244_v56 = vor.u32 %v6916_v2, %v6241_v42  ;;  %v5969_v62 = vld [vmem:[%s7249_s30 + $0xc38] sm:$0xf0] }
 0x229   : > { %4229 = vmatpush.bf16.msrb.mxu2 %v6308_v53  ;;  %v5988_v53 = vor.u32 %v6852_v33, %v5985_v30  ;;  %v6372_v28 = vor.u32 %v6948_v7, %v6369_v3  ;;  %v6097_v39 = vld [vmem:[%s7249_s30 + $0xd38] sm:$0xf0]  ;;  %v6844_v40 = vld [vmem:[%s7249_s30 + $0xc0c] sm:$0xf] }
 0x22a   : > { %4243 = vmatpush.bf16.msrb.mxu3 %v6436_v60  ;;  %v6848_v60 = vld [vmem:[%s7249_s30 + $0xc2c] sm:$0xf]  ;;  %v6353_v35 = vld [vmem:[%s7249_s30 + $0xf38] sm:$0xf0]  ;;  %v6100_v47 = vor.u32 %v6880_v4, %v6097_v39 }
 0x22b   : > { %4202 = vmatpush.bf16.msrb.mxu0 %v6036_v31  ;;  %v6225_v31 = vld [vmem:[%s7249_s30 + $0xe38] sm:$0xf0]  ;;  %v5972_v36 = vor.u32 %v6848_v60, %v5969_v62  ;;  %v6876_v20 = vld [vmem:[%s7249_s30 + $0xd0c] sm:$0xf] }
 0x22c   : > { %4216 = vmatpush.bf16.msrb.mxu1 %v6164_v43  ;;  %v3929_v43 = vpop.f32.mrf.mxu0  ;;  %v6228_v11 = vor.u32 %v6912_v5, %v6225_v31  ;;  %v5953_v34 = vld [vmem:[%s7249_s30 + $0xc18] sm:$0xf0] }
 0x22d   : > { %4230 = vmatpush.bf16.msrb.mxu2 %v6292_v8  ;;  %v6944_v8 = vld [vmem:[%s7249_s30 + $0xf2c] sm:$0xf]  ;;  %v3943_v44 = vpop.f32.mrf.mxu1  ;;  %v6081_v13 = vld [vmem:[%s7249_s30 + $0xd18] sm:$0xf0]  ;;  %v5956_v50 = vor.u32 %v6844_v40, %v5953_v34 }
 0x22e   : > { %4244 = vmatpush.bf16.msrb.mxu3 %v6420_v57  ;;  %v3902_v57 = vadd.f32 %v8576_v14, %v3888_v61  ;;  %v6356_v27 = vor.u32 %v6944_v8, %v6353_v35  ;;  %v6209_v58 = vld [vmem:[%s7249_s30 + $0xe18] sm:$0xf0]  ;;  %v6084_v14 = vor.u32 %v6876_v20, %v6081_v13 }
 0x22f   : > { %4203 = vmatpush.bf16.msrb.mxu0 %v6020_v15  ;;  %v6908_v15 = vld [vmem:[%s7249_s30 + $0xe0c] sm:$0xf]  ;;  %v6337_v0 = vld [vmem:[%s7249_s30 + $0xf18] sm:$0xf0]  ;;  %v3971_v52 = vpop.f32.mrf.mxu3 }
 0x230   : > { %4217 = vmatpush.bf16.msrb.mxu1 %v6148_v54  ;;  %v3876_v54 = vadd.f32 %v3875_v48, %v3862_v59  ;;  %v3916_v19 = vadd.f32 %v8579_v25, %v3902_v57  ;;  %v795_v59 = vperm.slane %v8511_v63, 3 }
 0x231   : > { %4231 = vmatpush.bf16.msrb.mxu2 %v6276_v1  ;;  %v6940_v1 = vld [vmem:[%s7249_s30 + $0xf0c] sm:$0xf] }
 0x232   : > { %4245 = vmatpush.bf16.msrb.mxu3 %v6404_v10  ;;  %v6212_v10 = vor.u32 %v6908_v15, %v6209_v58  ;;  %v6340_v17 = vor.u32 %v6940_v1, %v6337_v0  ;;  %v3890_v16 = vadd.f32 %v8590_v23, %v3876_v54  ;;  %v3930_v45 = vadd.f32 %v3929_v43, %v3916_v19 }
 0x233   : > { %4204 = vmatpush.bf16.msrb.mxu0 %v6004_v51 }
 0x234   : > { %4218 = vmatpush.bf16.msrb.mxu1 %v6132_v26  ;;  %v3904_v21 = vadd.f32 %v3903_v49, %v3890_v16  ;;  %v3931_v48 = vpop.f32.mrf.mxu0  ;;  %v3944_v24 = vadd.f32 %v3943_v44, %v3930_v45 }
 0x235   : > { %4232 = vmatpush.bf16.msrb.mxu2 %v6260_v29  ;;  %v3945_v51 = vpop.f32.mrf.mxu1  ;;  %v3959_v29 = vpop.f32.mrf.mxu2 }
 0x236   : > { %4246 = vmatpush.bf16.msrb.mxu3 %v6388_v12  ;;  %v3918_v25 = vadd.f32 %v3917_v6, %v3904_v21  ;;  %v3958_v26 = vadd.f32 %v3957_v22, %v3944_v24 }
 0x237   : > { %4205 = vmatpush.bf16.msrb.mxu0 %v5988_v53  ;;  %v3973_v30 = vpop.f32.mrf.mxu3 }
 0x238   : > { %4219 = vmatpush.bf16.msrb.mxu1 %v6116_v55  ;;  %v3932_v23 = vadd.f32 %v3931_v48, %v3918_v25  ;;  %v3972_v33 = vadd.f32 %v3971_v52, %v3958_v26 }
 0x239   : > { %4233 = vmatpush.bf16.msrb.mxu2 %v6244_v56 }
 0x23a   : > { %4247 = vmatpush.bf16.msrb.mxu3 %v6372_v28  ;;  %v3946_v37 = vadd.f32 %v3945_v51, %v3932_v23 }
 0x23b   : > { %4206 = vmatpush.bf16.msrb.mxu0 %v5972_v36 }
 0x23c   : > { %4220 = vmatpush.bf16.msrb.mxu1 %v6100_v47  ;;  %v3960_v42 = vadd.f32 %v3959_v29, %v3946_v37 }
 0x23d   : > { %4234 = vmatpush.bf16.msrb.mxu2 %v6228_v11 }
 0x23e   : > { %4248 = vmatpush.bf16.msrb.mxu3 %v6356_v27 }
 0x23f   : > { %4207 = vmatpush.bf16.msrb.mxu0 %v5956_v50  ;;  %v3985_v9 = vpop.f32.mrf.mxu0 }
 0x240   : > { %4221 = vmatpush.bf16.msrb.mxu1 %v6084_v14  ;;  %v3999_v12 = vpop.f32.mrf.mxu1  ;;  %v3986_v2 = vadd.f32 %v3985_v9, %v3972_v33 }
 0x241   : > { %4235 = vmatpush.bf16.msrb.mxu2 %v6212_v10 }
 0x242   : > { %4249 = vmatpush.bf16.msrb.mxu3 %v6340_v17  ;;  %4208 = vmatmul.bf16.vlgmr.msrb.gmra.mxu0 %v7662_v32  ;;  %v4000_v32 = vadd.f32 %v3999_v12, %v3986_v2 }
 0x243   : > { %4222 = vmatmul.bf16.vlgmr.msrb.gmra.mxu1 %v7669_v41  ;;  %v3974_v41 = vadd.f32 %v3973_v30, %v3960_v42 }
 0x244   : > { %4236 = vmatmul.bf16.vlgmr.msrb.gmra.mxu2 %v7667_v38 }
 0x245   : > { %4250 = vmatmul.bf16.vlgmr.msrb.gmra.mxu3 %v7673_v46 }
 0x247   : > { %v4013_v18 = vpop.f32.mrf.mxu2  ;;  %v3987_v38 = vpop.f32.mrf.mxu0 }
 0x248   : > { %v4014_v7 = vadd.f32 %v4013_v18, %v4000_v32  ;;  %v4027_v3 = vpop.f32.mrf.mxu3  ;;  %v3988_v53 = vadd.f32 %v3987_v38, %v3974_v41  ;;  %v4001_v46 = vpop.f32.mrf.mxu1 }
 0x24a   : > { %v4028_v61 = vadd.f32 %v4027_v3, %v4014_v7  ;;  %v4002_v55 = vadd.f32 %v4001_v46, %v3988_v53 }
 0x24c   : > { %4258 = vst [vmem:[%s8039_s21 + $0x10] sm:$0xff] %v4028_v61 }
 0x24f   : > { %v4015_v56 = vpop.f32.mrf.mxu2 }
 0x250   : > { %v4016_v60 = vadd.f32 %v4015_v56, %v4002_v55  ;;  %v4029_v62 = vpop.f32.mrf.mxu3 }
 0x252   : > { %v4030_v4 = vadd.f32 %v4029_v62, %v4016_v60 }
 0x254   : > { %4262 = vst [vmem:[%s8039_s21 + $0x30] sm:$0xff] %v4030_v4 }
 0x25f   : > { %v4041_v49 = vpop.f32.mrf.mxu0 }
 0x260   : > { %v4055_v28 = vpop.f32.mrf.mxu1  ;;  %v4042_v43 = vadd.f32 %v4041_v49, %v795_v59 }
 0x262   : > { %v4056_v44 = vadd.f32 %v4055_v28, %v4042_v43  ;;  %v4286_v28 = vld [vmem:[%s8039_s21] sm:$0xff] (%p7187_p9)  ;;  %v4298_v43 = vld [vmem:[%s8039_s21 + $0x30] sm:$0xff] (%p7187_p9) }
 0x263   : > { %4287 = vst [vmem:[%s4273_s25] sm:$0xff] (%p7187_p9), %v4286_v28 }
 0x264   : > { %4299 = vst [vmem:[%s4273_s25 + $0x90] sm:$0xff] (%p7187_p9), %v4298_v43 }
 0x267   : > { %v4069_v39 = vpop.f32.mrf.mxu2  ;;  %v4043_v31 = vpop.f32.mrf.mxu0 }
 0x268   : > { %v4083_v5 = vpop.f32.mrf.mxu3  ;;  %v4057_v6 = vpop.f32.mrf.mxu1  ;;  %v4070_v47 = vadd.f32 %v4069_v39, %v4056_v44  ;;  %v4044_v11 = vadd.f32 %v4043_v31, %v795_v59  ;;  %v4288_v39 = vld [vmem:[%s8039_s21 + $0x8] sm:$0xff] (%p7187_p9)  ;;  %v4294_v59 = vld [vmem:[%s8039_s21 + $0x20] sm:$0xff] (%p7187_p9) }
 0x269   : > { %4289 = vst [vmem:[%s4273_s25 + $0x8] sm:$0xff] (%p7187_p9), %v4288_v39 }
 0x26a   : > { %v4084_v34 = vadd.f32 %v4083_v5, %v4070_v47  ;;  %v4058_v27 = vadd.f32 %v4057_v6, %v4044_v11  ;;  %v4290_v5 = vld [vmem:[%s8039_s21 + $0x10] sm:$0xff] (%p7187_p9)  ;;  %v4296_v6 = vld [vmem:[%s8039_s21 + $0x28] sm:$0xff] (%p7187_p9)  ;;  %4295 = vst [vmem:[%s4273_s25 + $0x80] sm:$0xff] (%p7187_p9), %v4294_v59 }
 0x26b   : > { %4291 = vst [vmem:[%s4273_s25 + $0x10] sm:$0xff] (%p7187_p9), %v4290_v5 }
 0x26c   : > { %4297 = vst [vmem:[%s4273_s25 + $0x88] sm:$0xff] (%p7187_p9), %v4296_v6 }
 0x26f   : > { %v4071_v8 = vpop.f32.mrf.mxu2 }
 0x270   : > { %v4085_v35 = vpop.f32.mrf.mxu3  ;;  %v4072_v54 = vadd.f32 %v4071_v8, %v4058_v27 }
 0x272   : > { %v4086_v63 = vadd.f32 %v4085_v35, %v4072_v54 }
 0x27f   : > { %v4097_v36 = vpop.f32.mrf.mxu0 }
 0x280   : > { %v4111_v57 = vpop.f32.mrf.mxu1  ;;  %v4098_v15 = vadd.f32 %v4097_v36, %v4084_v34 }
 0x282   : > { %v4112_v1 = vadd.f32 %v4111_v57, %v4098_v15 }
 0x287   : > { %v4125_v40 = vpop.f32.mrf.mxu2  ;;  %v4099_v13 = vpop.f32.mrf.mxu0 }
 0x288   : > { %v4139_v20 = vpop.f32.mrf.mxu3  ;;  %v4113_v58 = vpop.f32.mrf.mxu1  ;;  %v4126_v14 = vadd.f32 %v4125_v40, %v4112_v1  ;;  %v4100_v22 = vadd.f32 %v4099_v13, %v4086_v63 }
 0x28a   : > { %v4140_v17 = vadd.f32 %v4139_v20, %v4126_v14  ;;  %v4114_v45 = vadd.f32 %v4113_v58, %v4100_v22 }
 0x28f   : > { %v4127_v0 = vpop.f32.mrf.mxu2 }
 0x290   : > { %v4141_v50 = vpop.f32.mrf.mxu3  ;;  %v4128_v48 = vadd.f32 %v4127_v0, %v4114_v45 }
 0x292   : > { %v4142_v26 = vadd.f32 %v4141_v50, %v4128_v48 }
 0x29f   : > { %v4153_v19 = vpop.f32.mrf.mxu0 }
 0x2a0   : > { %v4167_v10 = vpop.f32.mrf.mxu1  ;;  %v4154_v52 = vadd.f32 %v4153_v19, %v4140_v17 }
 0x2a2   : > { %v4168_v24 = vadd.f32 %v4167_v10, %v4154_v52 }
 0x2a7   : > { %v4181_v16 = vpop.f32.mrf.mxu2  ;;  %v4155_v51 = vpop.f32.mrf.mxu0 }
 0x2a8   : > { %v4195_v21 = vpop.f32.mrf.mxu3  ;;  %v4169_v25 = vpop.f32.mrf.mxu1  ;;  %v4182_v23 = vadd.f32 %v4181_v16, %v4168_v24  ;;  %v4156_v29 = vadd.f32 %v4155_v51, %v4142_v26 }
 0x2aa   : > { %v4196_v30 = vadd.f32 %v4195_v21, %v4182_v23  ;;  %v4170_v37 = vadd.f32 %v4169_v25, %v4156_v29 }
 0x2af   : > { %v4183_v33 = vpop.f32.mrf.mxu2 }
 0x2b0   : > { %v4197_v9 = vpop.f32.mrf.mxu3  ;;  %v4184_v32 = vadd.f32 %v4183_v33, %v4170_v37 }
 0x2b2   : > { %v4198_v7 = vadd.f32 %v4197_v9, %v4184_v32 }
 0x2bf   : > { %v4209_v12 = vpop.f32.mrf.mxu0 }
 0x2c0   : > { %v4210_v2 = vadd.f32 %v4209_v12, %v4196_v30  ;;  %v4223_v42 = vpop.f32.mrf.mxu1 }
 0x2c2   : > { %v4224_v18 = vadd.f32 %v4223_v42, %v4210_v2 }
 0x2c7   : > { %v4237_v41 = vpop.f32.mrf.mxu2  ;;  %v4211_v53 = vpop.f32.mrf.mxu0 }
 0x2c8   : > { %v4238_v38 = vadd.f32 %v4237_v41, %v4224_v18  ;;  %v4251_v3 = vpop.f32.mrf.mxu3  ;;  %v4212_v46 = vadd.f32 %v4211_v53, %v4198_v7  ;;  %v4225_v55 = vpop.f32.mrf.mxu1 }
 0x2ca   : > { %v4252_v61 = vadd.f32 %v4251_v3, %v4238_v38  ;;  %v4226_v56 = vadd.f32 %v4225_v55, %v4212_v46 }
 0x2cc   : > { %4259 = vst [vmem:[%s8039_s21 + $0x18] sm:$0xff] %v4252_v61 }
 0x2cf   : > { %v4239_v60 = vpop.f32.mrf.mxu2 }
 0x2d0   : > { %v4240_v62 = vadd.f32 %v4239_v60, %v4226_v56  ;;  %v4253_v4 = vpop.f32.mrf.mxu3  ;;  %4270 = sbr.rel (!%p7187_p9) target bundleno = 733 (0x2dd), region = 44 }
 0x2d2   : > { %v4254_v49 = vadd.f32 %v4253_v4, %v4240_v62 }
 0x2d3   : > { %v4292_v31 = vld [vmem:[%s8039_s21 + $0x18] sm:$0xff] (%p7187_p9) }
 0x2d4   : > { %4263 = vst [vmem:[%s8039_s21 + $0x38] sm:$0xff] %v4254_v49 }
 0x2d5   : > { %4293 = vst [vmem:[%s4273_s25 + $0x18] sm:$0xff] %v4292_v31 }
 0x2db   : > { %v4300_v8 = vld [vmem:[%s8039_s21 + $0x38] sm:$0xff] }
 0x2dc   : > { %4301 = vst [vmem:[%s4273_s25 + $0x98] sm:$0xff] %v4300_v8 }
 0x2dd PF: > { %p16_p7 = scmp.ge.s32.totalorder %s7164_s17, 6   ;;  %s8667_s12 = smov %s7110_s13 }
 0x2de   : > { %s8668_s13 = smov %s7114_s14  ;;  %s8669_s14 = smov %s7174_s20 }
 0x2df   : > { %s8670_s15 = smov %s7164_s17  ;;  %18 = sbr.rel (!%p16_p7) target bundleno = 5 (0x5), region = 108 }
 0x2e4   :  { %4317 = vsyncpa [#allocation3], 1 }
 0x2e5   :  { %4319 = vsyncpa [#allocation3 + $0x1], 1 }
 0x2e6   :  { %4320 = vsyncpa [#allocation5], 1 }
 0x2e7   :  { %4322 = vsyncpa [#allocation5 + $0x1], 1 }

// kernel: get_derivatives_forward.4
= control target key start
LH: loop header
LB: loop body
LE: loop exit
PB: predicated region body
PF: predicated region fallthrough
CT: control target
= control target key end

     0   :  { %8 = vsyncpa [#allocation3], 0  ;;  %s8682_s0 = inlined_call_operand.vmem [shape: f32[16,2048], index: 0, kind: input, shape index: {}]   ;;  %s8683_s1 = inlined_call_operand.hbm [shape: bf16[3,4,2048,512], index: 1, kind: input, shape index: {}]   ;;  %s8684_s2 = inlined_call_operand.hbm [shape: f32[3,1,2048], index: 2, kind: input, shape index: {}]   ;;  %s8685_s3 = inlined_call_operand.vmem [shape: f32[16,2048], index: 3, kind: output, shape index: {}]  }
   0x1   :  { %10 = vsyncpa [#allocation3 + $0x1], 0 }
   0x2   :  { %11 = vsyncpa [#allocation5], 0 }
   0x3   :  { %13 = vsyncpa [#allocation5 + $0x1], 0  ;;  %s7166_s12 = smov 0   ;;  %s7168_s13 = smov 0  }
   0x4   :  { %s7170_s14 = smov 0   ;;  %s7172_s15 = smov 0  }
   0x5 LB: > { %s7185_s16 = sadd.s32 4294967295, %s7142_s15   ;;  %s7188_s17 = sadd.s32 1, %s7142_s15   ;;  %s7142_s15 = sphi %s7172_s15, %s8694_s15   ;;  %s7138_s14 = sphi %s7170_s14, %s8693_s14   ;;  %s7134_s13 = sphi %s7168_s13, %s8692_s13   ;;  %s7130_s12 = sphi %s7166_s12, %s8691_s12  }
   0x6   : > { %s44_s18 = ssub.s32 %s7142_s15, %s7188_s17  ;;  %s47_s19 = sadd.s32 1, %s7138_s14 }
   0x7   : > { %p45_p0 = scmp.eq.s32.totalorder %s44_s18, 0  ;;  %p54_p1 = scmp.ne.s32.totalorder %s7138_s14, %s7134_s13 }
   0x8   : > { %p55_p2 = scmp.eq.s32.totalorder %s7142_s15, 0  ;;  %p60_p3 = scmp.ne.s32.totalorder %s7134_s13, %s7130_s12 }
   0x9   : > { %s7198_s20 = scalar_select %p45_p0, %s7138_s14, %s47_s19  }
   0xa   : > { %p7200_p4 = por %p55_p2, %p54_p1  ;;  %p61_p5 = scmp.eq.s32.totalorder %s7185_s16, 0 }
   0xb   : > { %p110_p6 = scmp.eq.s32.totalorder %s7185_s16, 3  ;;  %p6991_p8 = scmp.lt.s32.totalorder %s7142_s15, 4 }
   0xc   : > { %p7206_p7 = por %p61_p5, %p60_p3  ;;  %s7216_s24 = sand.u32 1, %s7138_s14  }
   0xd   : > { %p7211_p9 = por %p110_p6, %p54_p1  ;;  %s4404_s25 = sshll.u32 %s7216_s24, 12 }
   0xe   : > { %s6466_s26 = sshll.u32 %s7142_s15, 12  ;;  %s143_s30 = scalar_lea.vmem [#allocation2], %s4404_s25 }
   0xf   : > { %s4336_s29 = scalar_lea.hbm %s8683_s1, %s6466_s26  ;;  %s152_s4 = sshll.u32 %s143_s30, 4  ;;  %s153_s4 = int_to_ptr.vmem [resolvable:$true] %s152_s4 }
  0x10   : > { %s4337_s5 = scalar_lea.hbm %s4336_s29, 16384  ;;  %p7225_p10 = pnand %p6991_p8, %p7200_p4 }
  0x11   : > { %s150_s6 = sshll.u32 %s4337_s5, 4  ;;  %s140_s8 = scalar_lea.sflag [#allocation3], %s7216_s24  ;;  %s151_s6 = int_to_ptr.hbm [resolvable:$true] %s150_s6 }
  0x12   : > { %s7044_s9 = sshra.s32 %s151_s6, 4  ;;  %p7048_p12 = pneg %p7225_p10  ;;  %s7045_s9 = int_to_ptr.hbm [resolvable:$true] %s7044_s9 }
  0x13   : > { %s7046_s10 = scalar_lea.hbm %s7045_s9, 4096  ;;  %s7051_s18 = scalar_lea.hbm %s8683_s1, 49152 }
  0x14   : > { %p7047_p11 = scmp.ne.s32.totalorder %s7045_s9, %s7046_s10  ;;  %p7052_p1 = scmp.lt.s32.totalorder %s7045_s9, %s8683_s1 }
  0x15   : > { %p7053_p2 = scmp.lt.s32.totalorder %s7051_s18, %s7046_s10 }
  0x16   : > { %p7049_p13 = pnand %p7048_p12, %p7047_p11 }
  0x17   : > { %p7054_p3 = por %p7053_p2, %p7052_p1 }
  0x18   : > { %p7050_p0 = pneg %p7049_p13 }
  0x1a   : > { %p7055_p4 = pnand %p7054_p3, %p7050_p0 }
  0x1c   : > { %7058 = shalt.err (!%p7055_p4)
}
  0x1d   : > { %s7144_s25 = smov 256   ;;  %s7145_s26 = smov 16  }
  0x1e   : > { %6987 = dma.hbm_to_vmem [thread:$0]  (!%p7225_p10), %s151_s6, 65536, %s153_s4, %s140_s8, %s7144_s25, %s7144_s25, %s7145_s26  }
  0x1f   : > { %p4409_p5 = scmp.ge.s32.totalorder %s7142_s15, 1  ;;  %p180_p6 = scmp.lt.s32.totalorder %s7142_s15, 5 }
  0x20   : > { %s4407_s27 = sshll.u32 %s7216_s24, 2  ;;  %s4408_s29 = sshll.u32 %s7142_s15, 2 }
  0x21   : > { %p7246_p8 = pnand %p4409_p5, %p180_p6  ;;  %s166_s30 = scalar_lea.vmem [#allocation4], %s4407_s27 }
  0x22   : > { %s175_s5 = sshll.u32 %s166_s30, 4  ;;  %s4342_s11 = scalar_lea.hbm %s8684_s2, %s4408_s29  ;;  %s176_s5 = int_to_ptr.vmem [resolvable:$true] %s175_s5 }
  0x23   : > { %s4343_s12 = scalar_lea.hbm %s4342_s11, 16  ;;  %s163_s4 = scalar_lea.sflag [#allocation5], %s7216_s24 }
  0x24   : > { %s173_s18 = sshll.u32 %s4343_s12, 4  ;;  %s7081_s21 = scalar_lea.hbm %s8684_s2, 48  ;;  %s174_s18 = int_to_ptr.hbm [resolvable:$true] %s173_s18 }
  0x25   : > { %s7074_s6 = sshra.s32 %s174_s18, 4  ;;  %s7075_s6 = int_to_ptr.hbm [resolvable:$true] %s7074_s6 }
  0x26   : > { %s7076_s8 = scalar_lea.hbm %s7075_s6, 4  ;;  %p7082_p1 = scmp.lt.s32.totalorder %s7075_s6, %s8684_s2 }
  0x27   : > { %p7077_p11 = scmp.ne.s32.totalorder %s7075_s6, %s7076_s8  ;;  %p7083_p2 = scmp.lt.s32.totalorder %s7081_s21, %s7076_s8 }
  0x29   : > { %p7079_p13 = pnand %p7077_p11, %p7048_p12  ;;  %p7084_p3 = por %p7083_p2, %p7082_p1 }
  0x2b   : > { %p7080_p0 = pneg %p7079_p13 }
  0x2d   : > { %p7085_p4 = pnand %p7084_p3, %p7080_p0 }
  0x2f   : > { %7088 = shalt.err (!%p7085_p4)
}
  0x30   : > { %6990 = dma.hbm_to_vmem [thread:$0]  (!%p7225_p10), %s174_s18, 64, %s176_s5, %s163_s4  }
  0x31   : > { %184 = sbr.rel (%p7246_p8) target bundleno = 740 (0x2e4), region = 32  ;;  %s7269_s24 = sand.u32 (!%p7246_p8), 1, %s7134_s13  }
  0x32   : > { %s4410_s27 = sshll.u32 (!%p7246_p8), %s7269_s24, 12  ;;  %s187_s29 = scalar_lea.sflag (!%p7246_p8), [#allocation3], %s7269_s24 }
  0x33   : > { %s7273_s30 = scalar_lea.vmem (!%p7246_p8), [#allocation2], %s4410_s27 }
  0x36   : > { %7121 = dma.done.wait (%p7206_p7), %s187_s29, 65536  }
  0x37   : > { %7123 = vsyncadd (%p7206_p7), %s187_s29, 4294901760  ;;  %s4411_s7 = sshll.u32 %s7269_s24, 2  ;;  %s197_s28 = scalar_lea.sflag [#allocation5], %s7269_s24 }
  0x38   : > { %s7281_s5 = scalar_lea.vmem [#allocation4], %s4411_s7 }
  0x39   : > { %7125 = dma.done.wait (%p7206_p7), %s197_s28, 64  }
  0x3a   : > { %7127 = vsyncadd (%p7206_p7), %s197_s28, 4294967232  ;;  %v4527_v0 = vld [vmem:[%s7273_s30 + $0xe0] sm:$0xf]  ;;  %v6497_v1 = vld [vmem:[%s7273_s30 + $0xec] sm:$0xf0]  ;;  %s4412_s19 = sshll.u32 %s7269_s24, 6 }
  0x3b   : > { %v4655_v2 = vld [vmem:[%s7273_s30 + $0x1e0] sm:$0xf]  ;;  %v4528_v3 = vor.u32 %v6497_v1, %v4527_v0  ;;  %v6529_v4 = vld [vmem:[%s7273_s30 + $0x1ec] sm:$0xf0]  ;;  %s8081_s21 = scalar_lea.vmem [#allocation6], %s4412_s19  ;;  %s6979_s24 = sshll.u32 (%p7211_p9), %s7185_s16, 5 }
  0x3c   : > { %v4783_v5 = vld [vmem:[%s7273_s30 + $0x2e0] sm:$0xf]  ;;  %v6561_v6 = vld [vmem:[%s7273_s30 + $0x2ec] sm:$0xf0]  ;;  %v4656_v7 = vor.u32 %v6529_v4, %v4655_v2  ;;  %s4281_s25 = scalar_lea.vmem (%p7211_p9), %s8685_s3, %s6979_s24 }
  0x3d   : > { %v4784_v8 = vor.u32 %v6561_v6, %v4783_v5  ;;  %v4911_v9 = vld [vmem:[%s7273_s30 + $0x3e0] sm:$0xf]  ;;  %v6593_v10 = vld [vmem:[%s7273_s30 + $0x3ec] sm:$0xf0]  ;;  %3360 = vmatpush.bf16.msra.mxu0 %v4528_v3 }
  0x3e   : > { %v4511_v11 = vld [vmem:[%s7273_s30 + $0xc0] sm:$0xf]  ;;  %v4912_v12 = vor.u32 %v6593_v10, %v4911_v9  ;;  %v6493_v13 = vld [vmem:[%s7273_s30 + $0xcc] sm:$0xf0]  ;;  %3374 = vmatpush.bf16.msra.mxu1 %v4656_v7 }
  0x3f   : > { %v4639_v14 = vld [vmem:[%s7273_s30 + $0x1c0] sm:$0xf]  ;;  %v6525_v15 = vld [vmem:[%s7273_s30 + $0x1cc] sm:$0xf0]  ;;  %3388 = vmatpush.bf16.msra.mxu2 %v4784_v8  ;;  %v4512_v16 = vor.u32 %v6493_v13, %v4511_v11 }
  0x40   : > { %v4640_v17 = vor.u32 %v6525_v15, %v4639_v14  ;;  %v4767_v18 = vld [vmem:[%s7273_s30 + $0x2c0] sm:$0xf]  ;;  %v6557_v19 = vld [vmem:[%s7273_s30 + $0x2cc] sm:$0xf0]  ;;  %3402 = vmatpush.bf16.msra.mxu3 %v4912_v12 }
  0x41   : > { %v4895_v20 = vld [vmem:[%s7273_s30 + $0x3c0] sm:$0xf]  ;;  %v4768_v21 = vor.u32 %v6557_v19, %v4767_v18  ;;  %v6589_v22 = vld [vmem:[%s7273_s30 + $0x3cc] sm:$0xf0]  ;;  %3361 = vmatpush.bf16.msra.mxu0 %v4512_v16 }
  0x42   : > { %v4495_v23 = vld [vmem:[%s7273_s30 + $0xa0] sm:$0xf]  ;;  %v6489_v24 = vld [vmem:[%s7273_s30 + $0xac] sm:$0xf0]  ;;  %v4896_v25 = vor.u32 %v6589_v22, %v4895_v20  ;;  %3375 = vmatpush.bf16.msra.mxu1 %v4640_v17 }
  0x43   : > { %v4623_v26 = vld [vmem:[%s7273_s30 + $0x1a0] sm:$0xf]  ;;  %v6521_v27 = vld [vmem:[%s7273_s30 + $0x1ac] sm:$0xf0]  ;;  %v4496_v29 = vor.u32 %v6489_v24, %v4495_v23  ;;  %3389 = vmatpush.bf16.msra.mxu2 %v4768_v21 }
  0x44   : > { %v4751_v28 = vld [vmem:[%s7273_s30 + $0x2a0] sm:$0xf]  ;;  %v6553_v30 = vld [vmem:[%s7273_s30 + $0x2ac] sm:$0xf0]  ;;  %v4624_v33 = vor.u32 %v6521_v27, %v4623_v26  ;;  %3403 = vmatpush.bf16.msra.mxu3 %v4896_v25 }
  0x45   : > { %v4879_v31 = vld [vmem:[%s7273_s30 + $0x3a0] sm:$0xf]  ;;  %v6585_v32 = vld [vmem:[%s7273_s30 + $0x3ac] sm:$0xf0]  ;;  %v4752_v34 = vor.u32 %v6553_v30, %v4751_v28  ;;  %3362 = vmatpush.bf16.msra.mxu0 %v4496_v29 }
  0x46   : > { %v4479_v35 = vld [vmem:[%s7273_s30 + $0x80] sm:$0xf]  ;;  %v6485_v36 = vld [vmem:[%s7273_s30 + $0x8c] sm:$0xf0]  ;;  %v4880_v38 = vor.u32 %v6585_v32, %v4879_v31  ;;  %3376 = vmatpush.bf16.msra.mxu1 %v4624_v33 }
  0x47   : > { %v4607_v37 = vld [vmem:[%s7273_s30 + $0x180] sm:$0xf]  ;;  %v6517_v39 = vld [vmem:[%s7273_s30 + $0x18c] sm:$0xf0]  ;;  %v4480_v44 = vor.u32 %v6485_v36, %v4479_v35  ;;  %3390 = vmatpush.bf16.msra.mxu2 %v4752_v34 }
  0x48   : > { %v4735_v40 = vld [vmem:[%s7273_s30 + $0x280] sm:$0xf]  ;;  %v6549_v41 = vld [vmem:[%s7273_s30 + $0x28c] sm:$0xf0]  ;;  %v4608_v45 = vor.u32 %v6517_v39, %v4607_v37  ;;  %3404 = vmatpush.bf16.msra.mxu3 %v4880_v38 }
  0x49   : > { %v4863_v42 = vld [vmem:[%s7273_s30 + $0x380] sm:$0xf]  ;;  %v6581_v43 = vld [vmem:[%s7273_s30 + $0x38c] sm:$0xf0]  ;;  %v4736_v46 = vor.u32 %v6549_v41, %v4735_v40  ;;  %3363 = vmatpush.bf16.msra.mxu0 %v4480_v44 }
  0x4a   : > { %v4463_v47 = vld [vmem:[%s7273_s30 + $0x60] sm:$0xf]  ;;  %v6481_v48 = vld [vmem:[%s7273_s30 + $0x6c] sm:$0xf0]  ;;  %v4864_v50 = vor.u32 %v6581_v43, %v4863_v42  ;;  %3377 = vmatpush.bf16.msra.mxu1 %v4608_v45 }
  0x4b   : > { %v4591_v49 = vld [vmem:[%s7273_s30 + $0x160] sm:$0xf]  ;;  %v6513_v51 = vld [vmem:[%s7273_s30 + $0x16c] sm:$0xf0]  ;;  %v4464_v56 = vor.u32 %v6481_v48, %v4463_v47  ;;  %3391 = vmatpush.bf16.msra.mxu2 %v4736_v46 }
  0x4c   : > { %v4719_v52 = vld [vmem:[%s7273_s30 + $0x260] sm:$0xf]  ;;  %v6545_v53 = vld [vmem:[%s7273_s30 + $0x26c] sm:$0xf0]  ;;  %v4592_v57 = vor.u32 %v6513_v51, %v4591_v49  ;;  %3405 = vmatpush.bf16.msra.mxu3 %v4864_v50 }
  0x4d   : > { %v4847_v54 = vld [vmem:[%s7273_s30 + $0x360] sm:$0xf]  ;;  %v6577_v55 = vld [vmem:[%s7273_s30 + $0x36c] sm:$0xf0]  ;;  %v4720_v58 = vor.u32 %v6545_v53, %v4719_v52  ;;  %3364 = vmatpush.bf16.msra.mxu0 %v4464_v56 }
  0x4e   : > { %v4447_v59 = vld [vmem:[%s7273_s30 + $0x40] sm:$0xf]  ;;  %v6477_v60 = vld [vmem:[%s7273_s30 + $0x4c] sm:$0xf0]  ;;  %v4848_v62 = vor.u32 %v6577_v55, %v4847_v54  ;;  %3378 = vmatpush.bf16.msra.mxu1 %v4592_v57 }
  0x4f   : > { %v4575_v61 = vld [vmem:[%s7273_s30 + $0x140] sm:$0xf]  ;;  %v6509_v63 = vld [vmem:[%s7273_s30 + $0x14c] sm:$0xf0]  ;;  %v4448_v4 = vor.u32 %v6477_v60, %v4447_v59  ;;  %3392 = vmatpush.bf16.msra.mxu2 %v4720_v58 }
  0x50   : > { %v4703_v0 = vld [vmem:[%s7273_s30 + $0x240] sm:$0xf]  ;;  %v6541_v1 = vld [vmem:[%s7273_s30 + $0x24c] sm:$0xf0]  ;;  %v4576_v5 = vor.u32 %v6509_v63, %v4575_v61  ;;  %3406 = vmatpush.bf16.msra.mxu3 %v4848_v62 }
  0x51   : > { %v4831_v2 = vld [vmem:[%s7273_s30 + $0x340] sm:$0xf]  ;;  %v6573_v3 = vld [vmem:[%s7273_s30 + $0x34c] sm:$0xf0]  ;;  %v4704_v6 = vor.u32 %v6541_v1, %v4703_v0  ;;  %3365 = vmatpush.bf16.msra.mxu0 %v4448_v4 }
  0x52   : > { %v4431_v7 = vld [vmem:[%s7273_s30 + $0x20] sm:$0xf]  ;;  %v6473_v8 = vld [vmem:[%s7273_s30 + $0x2c] sm:$0xf0]  ;;  %v4832_v10 = vor.u32 %v6573_v3, %v4831_v2  ;;  %3379 = vmatpush.bf16.msra.mxu1 %v4576_v5 }
  0x53   : > { %v4559_v9 = vld [vmem:[%s7273_s30 + $0x120] sm:$0xf]  ;;  %v6505_v11 = vld [vmem:[%s7273_s30 + $0x12c] sm:$0xf0]  ;;  %v4432_v16 = vor.u32 %v6473_v8, %v4431_v7  ;;  %3393 = vmatpush.bf16.msra.mxu2 %v4704_v6  ;;  %v231_v6 = vld [vmem:[%s8682_s0 + $0x8] sm:$0xff] }
  0x54   : > { %v4687_v12 = vld [vmem:[%s7273_s30 + $0x220] sm:$0xf]  ;;  %v6537_v13 = vld [vmem:[%s7273_s30 + $0x22c] sm:$0xf0]  ;;  %v4560_v19 = vor.u32 %v6505_v11, %v4559_v9  ;;  %3407 = vmatpush.bf16.msra.mxu3 %v4832_v10  ;;  %v247_v7 = vld [vmem:[%s8682_s0 + $0x88] sm:$0xff] }
  0x55   : > { %v4815_v14 = vld [vmem:[%s7273_s30 + $0x320] sm:$0xf]  ;;  %v6569_v15 = vld [vmem:[%s7273_s30 + $0x32c] sm:$0xf0]  ;;  %v4688_v20 = vor.u32 %v6537_v13, %v4687_v12  ;;  %3366 = vmatpush.bf16.msra.mxu0 %v4432_v16  ;;  %v233_v8 = vld [vmem:[%s8682_s0 + $0x18] sm:$0xff]  ;;  %v7402_v10 = vpack.c.bf16 %v247_v7, %v231_v6 }
  0x56   : > { %v4415_v17 = vld [vmem:[%s7273_s30] sm:$0xf]  ;;  %v6469_v18 = vld [vmem:[%s7273_s30 + $0xc] sm:$0xf0]  ;;  %v4816_v24 = vor.u32 %v6569_v15, %v4815_v14  ;;  %3380 = vmatpush.bf16.msra.mxu1 %v4560_v19  ;;  %v249_v11 = vld [vmem:[%s8682_s0 + $0x98] sm:$0xff] }
  0x57   : > { %v4543_v21 = vld [vmem:[%s7273_s30 + $0x100] sm:$0xf]  ;;  %v6501_v22 = vld [vmem:[%s7273_s30 + $0x10c] sm:$0xf0]  ;;  %v4416_v31 = vor.u32 %v6469_v18, %v4415_v17  ;;  %3394 = vmatpush.bf16.msra.mxu2 %v4688_v20  ;;  %v7410_v17 = vpack.c.bf16 %v249_v11, %v233_v8 }
  0x58   : > { %v4671_v23 = vld [vmem:[%s7273_s30 + $0x200] sm:$0xf]  ;;  %v6533_v25 = vld [vmem:[%s7273_s30 + $0x20c] sm:$0xf0]  ;;  %v4544_v35 = vor.u32 %v6501_v22, %v4543_v21  ;;  %3408 = vmatpush.bf16.msra.mxu3 %v4816_v24 }
  0x59   : > { %v4799_v26 = vld [vmem:[%s7273_s30 + $0x300] sm:$0xf]  ;;  %v6565_v27 = vld [vmem:[%s7273_s30 + $0x30c] sm:$0xf0]  ;;  %v4672_v36 = vor.u32 %v6533_v25, %v4671_v23  ;;  %3367 = vmatpush.bf16.msra.mxu0 %v4416_v31 }
  0x5a   : > { %v5039_v28 = vld [vmem:[%s7273_s30 + $0x4e0] sm:$0xf]  ;;  %v6625_v29 = vld [vmem:[%s7273_s30 + $0x4ec] sm:$0xf0]  ;;  %v4800_v39 = vor.u32 %v6565_v27, %v4799_v26  ;;  %3381 = vmatpush.bf16.msra.mxu1 %v4544_v35 }
  0x5b   : > { %v5167_v30 = vld [vmem:[%s7273_s30 + $0x5e0] sm:$0xf]  ;;  %v6657_v32 = vld [vmem:[%s7273_s30 + $0x5ec] sm:$0xf0]  ;;  %v5040_v40 = vor.u32 %v6625_v29, %v5039_v28  ;;  %3395 = vmatpush.bf16.msra.mxu2 %v4672_v36 }
  0x5c   : > { %v5295_v33 = vld [vmem:[%s7273_s30 + $0x6e0] sm:$0xf]  ;;  %v6689_v34 = vld [vmem:[%s7273_s30 + $0x6ec] sm:$0xf0]  ;;  %v5168_v43 = vor.u32 %v6657_v32, %v5167_v30  ;;  %3409 = vmatpush.bf16.msra.mxu3 %v4800_v39 }
  0x5d   : > { %v5423_v37 = vld [vmem:[%s7273_s30 + $0x7e0] sm:$0xf]  ;;  %v6721_v38 = vld [vmem:[%s7273_s30 + $0x7ec] sm:$0xf0]  ;;  %v5296_v44 = vor.u32 %v6689_v34, %v5295_v33  ;;  %3416 = vmatpush.bf16.msrb.mxu0 %v5040_v40  ;;  %3382 = vmatmul.bf16.vlgmr.msra.gmra.mxu1 %v7402_v10 }
  0x5e   : > { %v5023_v41 = vld [vmem:[%s7273_s30 + $0x4c0] sm:$0xf]  ;;  %v6621_v42 = vld [vmem:[%s7273_s30 + $0x4cc] sm:$0xf0]  ;;  %v5424_v48 = vor.u32 %v6721_v38, %v5423_v37  ;;  %3430 = vmatpush.bf16.msrb.mxu1 %v5168_v43 }
  0x5f   : > { %v5151_v45 = vld [vmem:[%s7273_s30 + $0x5c0] sm:$0xf]  ;;  %v6653_v46 = vld [vmem:[%s7273_s30 + $0x5cc] sm:$0xf0]  ;;  %v5024_v55 = vor.u32 %v6621_v42, %v5023_v41  ;;  %3444 = vmatpush.bf16.msrb.mxu2 %v5296_v44  ;;  %3410 = vmatmul.bf16.vlgmr.msra.gmra.mxu3 %v7410_v17 }
  0x60   : > { %v5279_v47 = vld [vmem:[%s7273_s30 + $0x6c0] sm:$0xf]  ;;  %v6685_v49 = vld [vmem:[%s7273_s30 + $0x6cc] sm:$0xf0]  ;;  %v5152_v60 = vor.u32 %v6653_v46, %v5151_v45  ;;  %3458 = vmatpush.bf16.msrb.mxu3 %v5424_v48 }
  0x61   : > { %v5407_v50 = vld [vmem:[%s7273_s30 + $0x7c0] sm:$0xf]  ;;  %v6717_v51 = vld [vmem:[%s7273_s30 + $0x7cc] sm:$0xf0]  ;;  %v5280_v61 = vor.u32 %v6685_v49, %v5279_v47  ;;  %3417 = vmatpush.bf16.msrb.mxu0 %v5024_v55 }
  0x62   : > { %v230_v52 = vld [vmem:[%s8682_s0] sm:$0xff]  ;;  %v232_v54 = vld [vmem:[%s8682_s0 + $0x10] sm:$0xff]  ;;  %v5408_v2 = vor.u32 %v6717_v51, %v5407_v50  ;;  %3431 = vmatpush.bf16.msrb.mxu1 %v5152_v60 }
  0x63   : > { %v246_v53 = vld [vmem:[%s8682_s0 + $0x80] sm:$0xff]  ;;  %v6617_v57 = vld [vmem:[%s7273_s30 + $0x4ac] sm:$0xf0]  ;;  %3445 = vmatpush.bf16.msrb.mxu2 %v5280_v61 }
  0x64   : > { %v5007_v56 = vld [vmem:[%s7273_s30 + $0x4a0] sm:$0xf]  ;;  %v7378_v58 = vpack.c.bf16 %v246_v53, %v230_v52  ;;  %v248_v59 = vld [vmem:[%s8682_s0 + $0x90] sm:$0xff]  ;;  %3459 = vmatpush.bf16.msrb.mxu3 %v5408_v2 }
  0x65   : > { %v5135_v62 = vld [vmem:[%s7273_s30 + $0x5a0] sm:$0xf]  ;;  %v6649_v63 = vld [vmem:[%s7273_s30 + $0x5ac] sm:$0xf0]  ;;  %v7386_v1 = vpack.c.bf16 %v248_v59, %v232_v54  ;;  %v5008_v9 = vor.u32 %v6617_v57, %v5007_v56 }
  0x66   : > { %v5263_v0 = vld [vmem:[%s7273_s30 + $0x6a0] sm:$0xf]  ;;  %v6681_v3 = vld [vmem:[%s7273_s30 + $0x6ac] sm:$0xf0]  ;;  %3368 = vmatmul.bf16.vlgmr.msra.gmra.mxu0 %v7378_v58  ;;  %v5136_v12 = vor.u32 %v6649_v63, %v5135_v62 }
  0x67   : > { %v5391_v4 = vld [vmem:[%s7273_s30 + $0x7a0] sm:$0xf]  ;;  %v6713_v5 = vld [vmem:[%s7273_s30 + $0x7ac] sm:$0xf0]  ;;  %3396 = vmatmul.bf16.vlgmr.msra.gmra.mxu2 %v7386_v1  ;;  %v5264_v13 = vor.u32 %v6681_v3, %v5263_v0  ;;  %3418 = vmatpush.bf16.msrb.mxu0 %v5008_v9 }
  0x68   : > { %v4991_v14 = vld [vmem:[%s7273_s30 + $0x480] sm:$0xf]  ;;  %v6613_v15 = vld [vmem:[%s7273_s30 + $0x48c] sm:$0xf0]  ;;  %v5392_v18 = vor.u32 %v6713_v5, %v5391_v4  ;;  %3432 = vmatpush.bf16.msrb.mxu1 %v5136_v12 }
  0x69   : > { %v5119_v16 = vld [vmem:[%s7273_s30 + $0x580] sm:$0xf]  ;;  %v6645_v19 = vld [vmem:[%s7273_s30 + $0x58c] sm:$0xf0]  ;;  %v4992_v24 = vor.u32 %v6613_v15, %v4991_v14  ;;  %3446 = vmatpush.bf16.msrb.mxu2 %v5264_v13 }
  0x6a   : > { %v5247_v20 = vld [vmem:[%s7273_s30 + $0x680] sm:$0xf]  ;;  %v6677_v21 = vld [vmem:[%s7273_s30 + $0x68c] sm:$0xf0]  ;;  %v5120_v25 = vor.u32 %v6645_v19, %v5119_v16  ;;  %3460 = vmatpush.bf16.msrb.mxu3 %v5392_v18 }
  0x6b   : > { %v5375_v22 = vld [vmem:[%s7273_s30 + $0x780] sm:$0xf]  ;;  %v6709_v23 = vld [vmem:[%s7273_s30 + $0x78c] sm:$0xf0]  ;;  %v5248_v26 = vor.u32 %v6677_v21, %v5247_v20  ;;  %3419 = vmatpush.bf16.msrb.mxu0 %v4992_v24 }
  0x6c   : > { %v4975_v27 = vld [vmem:[%s7273_s30 + $0x460] sm:$0xf]  ;;  %v6609_v28 = vld [vmem:[%s7273_s30 + $0x46c] sm:$0xf0]  ;;  %v5376_v30 = vor.u32 %v6709_v23, %v5375_v22  ;;  %3433 = vmatpush.bf16.msrb.mxu1 %v5120_v25 }
  0x6d   : > { %v5103_v29 = vld [vmem:[%s7273_s30 + $0x560] sm:$0xf]  ;;  %v6641_v31 = vld [vmem:[%s7273_s30 + $0x56c] sm:$0xf0]  ;;  %v4976_v36 = vor.u32 %v6609_v28, %v4975_v27  ;;  %3447 = vmatpush.bf16.msrb.mxu2 %v5248_v26  ;;  %v235_v27 = vld [vmem:[%s8682_s0 + $0x28] sm:$0xff] }
  0x6e   : > { %v5231_v32 = vld [vmem:[%s7273_s30 + $0x660] sm:$0xf]  ;;  %v6673_v33 = vld [vmem:[%s7273_s30 + $0x66c] sm:$0xf0]  ;;  %v5104_v37 = vor.u32 %v6641_v31, %v5103_v29  ;;  %3461 = vmatpush.bf16.msrb.mxu3 %v5376_v30  ;;  %v251_v30 = vld [vmem:[%s8682_s0 + $0xa8] sm:$0xff] }
  0x6f   : > { %v5359_v34 = vld [vmem:[%s7273_s30 + $0x760] sm:$0xf]  ;;  %v6705_v35 = vld [vmem:[%s7273_s30 + $0x76c] sm:$0xf0]  ;;  %v5232_v38 = vor.u32 %v6673_v33, %v5231_v32  ;;  %3420 = vmatpush.bf16.msrb.mxu0 %v4976_v36  ;;  %v237_v31 = vld [vmem:[%s8682_s0 + $0x38] sm:$0xff] }
  0x70   : > { %v4959_v39 = vld [vmem:[%s7273_s30 + $0x440] sm:$0xf]  ;;  %v6605_v40 = vld [vmem:[%s7273_s30 + $0x44c] sm:$0xf0]  ;;  %v5360_v42 = vor.u32 %v6705_v35, %v5359_v34  ;;  %3434 = vmatpush.bf16.msrb.mxu1 %v5104_v37  ;;  %v253_v32 = vld [vmem:[%s8682_s0 + $0xb8] sm:$0xff] }
  0x71   : > { %v5087_v41 = vld [vmem:[%s7273_s30 + $0x540] sm:$0xf]  ;;  %v6637_v43 = vld [vmem:[%s7273_s30 + $0x54c] sm:$0xf0]  ;;  %v4960_v48 = vor.u32 %v6605_v40, %v4959_v39  ;;  %3448 = vmatpush.bf16.msrb.mxu2 %v5232_v38 }
  0x72   : > { %v5215_v44 = vld [vmem:[%s7273_s30 + $0x640] sm:$0xf]  ;;  %v6669_v45 = vld [vmem:[%s7273_s30 + $0x64c] sm:$0xf0]  ;;  %v5088_v50 = vor.u32 %v6637_v43, %v5087_v41  ;;  %3462 = vmatpush.bf16.msrb.mxu3 %v5360_v42 }
  0x73   : > { %v5343_v46 = vld [vmem:[%s7273_s30 + $0x740] sm:$0xf]  ;;  %v6701_v47 = vld [vmem:[%s7273_s30 + $0x74c] sm:$0xf0]  ;;  %v5216_v51 = vor.u32 %v6669_v45, %v5215_v44  ;;  %3421 = vmatpush.bf16.msrb.mxu0 %v4960_v48  ;;  %v7493_v44 = vpack.c.bf16 %v251_v30, %v235_v27 }
  0x74   : > { %v4943_v49 = vld [vmem:[%s7273_s30 + $0x420] sm:$0xf]  ;;  %v6601_v52 = vld [vmem:[%s7273_s30 + $0x42c] sm:$0xf0]  ;;  %v5344_v55 = vor.u32 %v6701_v47, %v5343_v46  ;;  %3435 = vmatpush.bf16.msrb.mxu1 %v5088_v50  ;;  %v7497_v47 = vpack.c.bf16 %v253_v32, %v237_v31 }
  0x75   : > { %v5071_v53 = vld [vmem:[%s7273_s30 + $0x520] sm:$0xf]  ;;  %v6633_v54 = vld [vmem:[%s7273_s30 + $0x52c] sm:$0xf0]  ;;  %v4944_v63 = vor.u32 %v6601_v52, %v4943_v49  ;;  %3449 = vmatpush.bf16.msrb.mxu2 %v5216_v51 }
  0x76   : > { %v5199_v56 = vld [vmem:[%s7273_s30 + $0x620] sm:$0xf]  ;;  %v6665_v57 = vld [vmem:[%s7273_s30 + $0x62c] sm:$0xf0]  ;;  %v5072_v5 = vor.u32 %v6633_v54, %v5071_v53  ;;  %3463 = vmatpush.bf16.msrb.mxu3 %v5344_v55 }
  0x77   : > { %v5327_v59 = vld [vmem:[%s7273_s30 + $0x720] sm:$0xf]  ;;  %v6697_v60 = vld [vmem:[%s7273_s30 + $0x72c] sm:$0xf0]  ;;  %v5200_v6 = vor.u32 %v6665_v57, %v5199_v56  ;;  %3422 = vmatpush.bf16.msrb.mxu0 %v4944_v63 }
  0x78   : > { %v4927_v61 = vld [vmem:[%s7273_s30 + $0x400] sm:$0xf]  ;;  %v6597_v62 = vld [vmem:[%s7273_s30 + $0x40c] sm:$0xf0]  ;;  %v5328_v11 = vor.u32 %v6697_v60, %v5327_v59  ;;  %3436 = vmatpush.bf16.msrb.mxu1 %v5072_v5 }
  0x79   : > { %v5055_v0 = vld [vmem:[%s7273_s30 + $0x500] sm:$0xf]  ;;  %v6629_v2 = vld [vmem:[%s7273_s30 + $0x50c] sm:$0xf0]  ;;  %v4928_v19 = vor.u32 %v6597_v62, %v4927_v61  ;;  %3450 = vmatpush.bf16.msrb.mxu2 %v5200_v6 }
  0x7a   : > { %v5183_v3 = vld [vmem:[%s7273_s30 + $0x600] sm:$0xf]  ;;  %v6661_v4 = vld [vmem:[%s7273_s30 + $0x60c] sm:$0xf0]  ;;  %v5056_v23 = vor.u32 %v6629_v2, %v5055_v0  ;;  %3464 = vmatpush.bf16.msrb.mxu3 %v5328_v11 }
  0x7b   : > { %v5311_v7 = vld [vmem:[%s7273_s30 + $0x700] sm:$0xf]  ;;  %v6693_v8 = vld [vmem:[%s7273_s30 + $0x70c] sm:$0xf0]  ;;  %v5184_v24 = vor.u32 %v6661_v4, %v5183_v3  ;;  %3423 = vmatpush.bf16.msrb.mxu0 %v4928_v19 }
  0x7c   : > { %v5551_v9 = vld [vmem:[%s7273_s30 + $0x8e0] sm:$0xf]  ;;  %v6753_v12 = vld [vmem:[%s7273_s30 + $0x8ec] sm:$0xf0]  ;;  %v5312_v28 = vor.u32 %v6693_v8, %v5311_v7  ;;  %3437 = vmatpush.bf16.msrb.mxu1 %v5056_v23 }
  0x7d   : > { %v5679_v13 = vld [vmem:[%s7273_s30 + $0x9e0] sm:$0xf]  ;;  %v6785_v14 = vld [vmem:[%s7273_s30 + $0x9ec] sm:$0xf0]  ;;  %v5552_v29 = vor.u32 %v6753_v12, %v5551_v9  ;;  %3451 = vmatpush.bf16.msrb.mxu2 %v5184_v24 }
  0x7e   : > { %v5807_v15 = vld [vmem:[%s7273_s30 + $0xae0] sm:$0xf]  ;;  %v6817_v16 = vld [vmem:[%s7273_s30 + $0xaec] sm:$0xf0]  ;;  %v5680_v33 = vor.u32 %v6785_v14, %v5679_v13  ;;  %3465 = vmatpush.bf16.msrb.mxu3 %v5312_v28 }
  0x7f   : > { %v5935_v18 = vld [vmem:[%s7273_s30 + $0xbe0] sm:$0xf]  ;;  %v6849_v20 = vld [vmem:[%s7273_s30 + $0xbec] sm:$0xf0]  ;;  %v5808_v34 = vor.u32 %v6817_v16, %v5807_v15  ;;  %3472 = vmatpush.bf16.msra.mxu0 %v5552_v29  ;;  %3438 = vmatmul.bf16.vlgmr.msrb.gmra.mxu1 %v7493_v44 }
  0x80   : > { %v234_v21 = vld [vmem:[%s8682_s0 + $0x20] sm:$0xff]  ;;  %v236_v25 = vld [vmem:[%s8682_s0 + $0x30] sm:$0xff]  ;;  %v5936_v38 = vor.u32 %v6849_v20, %v5935_v18  ;;  %3486 = vmatpush.bf16.msra.mxu1 %v5680_v33 }
  0x81   : > { %v250_v22 = vld [vmem:[%s8682_s0 + $0xa0] sm:$0xff]  ;;  %v252_v26 = vld [vmem:[%s8682_s0 + $0xb0] sm:$0xff]  ;;  %3500 = vmatpush.bf16.msra.mxu2 %v5808_v34  ;;  %3466 = vmatmul.bf16.vlgmr.msrb.gmra.mxu3 %v7497_v47 }
  0x82   : > { %v5535_v35 = vld [vmem:[%s7273_s30 + $0x8c0] sm:$0xf]  ;;  %v6749_v36 = vld [vmem:[%s7273_s30 + $0x8cc] sm:$0xf0]  ;;  %v7486_v39 = vpack.c.bf16 %v250_v22, %v234_v21  ;;  %v7491_v43 = vpack.c.bf16 %v252_v26, %v236_v25  ;;  %3514 = vmatpush.bf16.msra.mxu3 %v5936_v38 }
  0x83   : > { %v5663_v37 = vld [vmem:[%s7273_s30 + $0x9c0] sm:$0xf]  ;;  %v6781_v40 = vld [vmem:[%s7273_s30 + $0x9cc] sm:$0xf0]  ;;  %v5536_v48 = vor.u32 %v6749_v36, %v5535_v35 }
  0x84   : > { %v5791_v41 = vld [vmem:[%s7273_s30 + $0xac0] sm:$0xf]  ;;  %v6813_v42 = vld [vmem:[%s7273_s30 + $0xacc] sm:$0xf0]  ;;  %v5664_v49 = vor.u32 %v6781_v40, %v5663_v37  ;;  %3424 = vmatmul.bf16.vlgmr.msrb.gmra.mxu0 %v7486_v39  ;;  %3452 = vmatmul.bf16.vlgmr.msrb.gmra.mxu2 %v7491_v43 }
  0x85   : > { %v5919_v45 = vld [vmem:[%s7273_s30 + $0xbc0] sm:$0xf]  ;;  %v6845_v46 = vld [vmem:[%s7273_s30 + $0xbcc] sm:$0xf0]  ;;  %v5792_v50 = vor.u32 %v6813_v42, %v5791_v41  ;;  %3473 = vmatpush.bf16.msra.mxu0 %v5536_v48 }
  0x86   : > { %v5519_v51 = vld [vmem:[%s7273_s30 + $0x8a0] sm:$0xf]  ;;  %v6745_v52 = vld [vmem:[%s7273_s30 + $0x8ac] sm:$0xf0]  ;;  %v5920_v54 = vor.u32 %v6845_v46, %v5919_v45  ;;  %3487 = vmatpush.bf16.msra.mxu1 %v5664_v49 }
  0x87   : > { %v5647_v53 = vld [vmem:[%s7273_s30 + $0x9a0] sm:$0xf]  ;;  %v6777_v55 = vld [vmem:[%s7273_s30 + $0x9ac] sm:$0xf0]  ;;  %v5520_v61 = vor.u32 %v6745_v52, %v5519_v51  ;;  %3501 = vmatpush.bf16.msra.mxu2 %v5792_v50 }
  0x88   : > { %v5775_v56 = vld [vmem:[%s7273_s30 + $0xaa0] sm:$0xf]  ;;  %v6809_v57 = vld [vmem:[%s7273_s30 + $0xaac] sm:$0xf0]  ;;  %v5648_v62 = vor.u32 %v6777_v55, %v5647_v53  ;;  %3515 = vmatpush.bf16.msra.mxu3 %v5920_v54 }
  0x89   : > { %v5903_v59 = vld [vmem:[%s7273_s30 + $0xba0] sm:$0xf]  ;;  %v6841_v60 = vld [vmem:[%s7273_s30 + $0xbac] sm:$0xf0]  ;;  %v5776_v63 = vor.u32 %v6809_v57, %v5775_v56  ;;  %3474 = vmatpush.bf16.msra.mxu0 %v5520_v61 }
  0x8a   : > { %v5503_v0 = vld [vmem:[%s7273_s30 + $0x880] sm:$0xf]  ;;  %v6741_v2 = vld [vmem:[%s7273_s30 + $0x88c] sm:$0xf0]  ;;  %v5904_v4 = vor.u32 %v6841_v60, %v5903_v59  ;;  %3488 = vmatpush.bf16.msra.mxu1 %v5648_v62 }
  0x8b   : > { %v5631_v3 = vld [vmem:[%s7273_s30 + $0x980] sm:$0xf]  ;;  %v6773_v5 = vld [vmem:[%s7273_s30 + $0x98c] sm:$0xf0]  ;;  %v5504_v11 = vor.u32 %v6741_v2, %v5503_v0  ;;  %3502 = vmatpush.bf16.msra.mxu2 %v5776_v63 }
  0x8c   : > { %v5759_v6 = vld [vmem:[%s7273_s30 + $0xa80] sm:$0xf]  ;;  %v6805_v7 = vld [vmem:[%s7273_s30 + $0xa8c] sm:$0xf0]  ;;  %v5632_v12 = vor.u32 %v6773_v5, %v5631_v3  ;;  %3516 = vmatpush.bf16.msra.mxu3 %v5904_v4 }
  0x8d   : > { %v5887_v8 = vld [vmem:[%s7273_s30 + $0xb80] sm:$0xf]  ;;  %v6837_v9 = vld [vmem:[%s7273_s30 + $0xb8c] sm:$0xf0]  ;;  %v5760_v13 = vor.u32 %v6805_v7, %v5759_v6  ;;  %3475 = vmatpush.bf16.msra.mxu0 %v5504_v11 }
  0x8e   : > { %v5487_v14 = vld [vmem:[%s7273_s30 + $0x860] sm:$0xf]  ;;  %v6737_v15 = vld [vmem:[%s7273_s30 + $0x86c] sm:$0xf0]  ;;  %v5888_v18 = vor.u32 %v6837_v9, %v5887_v8  ;;  %3489 = vmatpush.bf16.msra.mxu1 %v5632_v12 }
  0x8f   : > { %v5615_v16 = vld [vmem:[%s7273_s30 + $0x960] sm:$0xf]  ;;  %v6769_v19 = vld [vmem:[%s7273_s30 + $0x96c] sm:$0xf0]  ;;  %v5488_v24 = vor.u32 %v6737_v15, %v5487_v14  ;;  %3503 = vmatpush.bf16.msra.mxu2 %v5760_v13 }
  0x90   : > { %v5743_v20 = vld [vmem:[%s7273_s30 + $0xa60] sm:$0xf]  ;;  %v6801_v21 = vld [vmem:[%s7273_s30 + $0xa6c] sm:$0xf0]  ;;  %v5616_v25 = vor.u32 %v6769_v19, %v5615_v16  ;;  %3517 = vmatpush.bf16.msra.mxu3 %v5888_v18  ;;  %v239_v19 = vld [vmem:[%s8682_s0 + $0x48] sm:$0xff] }
  0x91   : > { %v5871_v22 = vld [vmem:[%s7273_s30 + $0xb60] sm:$0xf]  ;;  %v6833_v23 = vld [vmem:[%s7273_s30 + $0xb6c] sm:$0xf0]  ;;  %v5744_v26 = vor.u32 %v6801_v21, %v5743_v20  ;;  %3476 = vmatpush.bf16.msra.mxu0 %v5488_v24  ;;  %v257_v24 = vld [vmem:[%s8682_s0 + $0xd8] sm:$0xff] }
  0x92   : > { %v5471_v27 = vld [vmem:[%s7273_s30 + $0x840] sm:$0xf]  ;;  %v6733_v28 = vld [vmem:[%s7273_s30 + $0x84c] sm:$0xf0]  ;;  %v5872_v30 = vor.u32 %v6833_v23, %v5871_v22  ;;  %3490 = vmatpush.bf16.msra.mxu1 %v5616_v25  ;;  %v255_v22 = vld [vmem:[%s8682_s0 + $0xc8] sm:$0xff] }
  0x93   : > { %v5599_v29 = vld [vmem:[%s7273_s30 + $0x940] sm:$0xf]  ;;  %v6765_v31 = vld [vmem:[%s7273_s30 + $0x94c] sm:$0xf0]  ;;  %v5472_v36 = vor.u32 %v6733_v28, %v5471_v27  ;;  %3504 = vmatpush.bf16.msra.mxu2 %v5744_v26  ;;  %v241_v23 = vld [vmem:[%s8682_s0 + $0x58] sm:$0xff] }
  0x94   : > { %v5727_v32 = vld [vmem:[%s7273_s30 + $0xa40] sm:$0xf]  ;;  %v6797_v33 = vld [vmem:[%s7273_s30 + $0xa4c] sm:$0xf0]  ;;  %v5600_v38 = vor.u32 %v6765_v31, %v5599_v29  ;;  %3518 = vmatpush.bf16.msra.mxu3 %v5872_v30 }
  0x95   : > { %v5855_v34 = vld [vmem:[%s7273_s30 + $0xb40] sm:$0xf]  ;;  %v6829_v35 = vld [vmem:[%s7273_s30 + $0xb4c] sm:$0xf0]  ;;  %v5728_v40 = vor.u32 %v6797_v33, %v5727_v32  ;;  %3477 = vmatpush.bf16.msra.mxu0 %v5472_v36  ;;  %v7593_v36 = vpack.c.bf16 %v255_v22, %v239_v19 }
  0x96   : > { %v5455_v37 = vld [vmem:[%s7273_s30 + $0x820] sm:$0xf]  ;;  %v6729_v41 = vld [vmem:[%s7273_s30 + $0x82c] sm:$0xf0]  ;;  %v5856_v46 = vor.u32 %v6829_v35, %v5855_v34  ;;  %3491 = vmatpush.bf16.msra.mxu1 %v5600_v38 }
  0x97   : > { %v5583_v42 = vld [vmem:[%s7273_s30 + $0x920] sm:$0xf]  ;;  %v6761_v45 = vld [vmem:[%s7273_s30 + $0x92c] sm:$0xf0]  ;;  %v5456_v54 = vor.u32 %v6729_v41, %v5455_v37  ;;  %3505 = vmatpush.bf16.msra.mxu2 %v5728_v40  ;;  %v7597_v40 = vpack.c.bf16 %v257_v24, %v241_v23 }
  0x98   : > { %v5711_v48 = vld [vmem:[%s7273_s30 + $0xa20] sm:$0xf]  ;;  %v6793_v49 = vld [vmem:[%s7273_s30 + $0xa2c] sm:$0xf0]  ;;  %v5584_v60 = vor.u32 %v6761_v45, %v5583_v42  ;;  %3519 = vmatpush.bf16.msra.mxu3 %v5856_v46 }
  0x99   : > { %v5839_v50 = vld [vmem:[%s7273_s30 + $0xb20] sm:$0xf]  ;;  %v6825_v51 = vld [vmem:[%s7273_s30 + $0xb2c] sm:$0xf0]  ;;  %v5712_v61 = vor.u32 %v6793_v49, %v5711_v48  ;;  %3478 = vmatpush.bf16.msra.mxu0 %v5456_v54 }
  0x9a   : > { %v5439_v52 = vld [vmem:[%s7273_s30 + $0x800] sm:$0xf]  ;;  %v6725_v53 = vld [vmem:[%s7273_s30 + $0x80c] sm:$0xf0]  ;;  %v5840_v2 = vor.u32 %v6825_v51, %v5839_v50  ;;  %3492 = vmatpush.bf16.msra.mxu1 %v5584_v60 }
  0x9b   : > { %v5567_v55 = vld [vmem:[%s7273_s30 + $0x900] sm:$0xf]  ;;  %v6757_v56 = vld [vmem:[%s7273_s30 + $0x90c] sm:$0xf0]  ;;  %v5440_v9 = vor.u32 %v6725_v53, %v5439_v52  ;;  %3506 = vmatpush.bf16.msra.mxu2 %v5712_v61 }
  0x9c   : > { %v5695_v57 = vld [vmem:[%s7273_s30 + $0xa00] sm:$0xf]  ;;  %v6789_v59 = vld [vmem:[%s7273_s30 + $0xa0c] sm:$0xf0]  ;;  %v5568_v14 = vor.u32 %v6757_v56, %v5567_v55  ;;  %3520 = vmatpush.bf16.msra.mxu3 %v5840_v2 }
  0x9d   : > { %v5823_v62 = vld [vmem:[%s7273_s30 + $0xb00] sm:$0xf]  ;;  %v6821_v63 = vld [vmem:[%s7273_s30 + $0xb0c] sm:$0xf0]  ;;  %v5696_v15 = vor.u32 %v6789_v59, %v5695_v57  ;;  %3479 = vmatpush.bf16.msra.mxu0 %v5440_v9 }
  0x9e   : > { %v6063_v0 = vld [vmem:[%s7273_s30 + $0xce0] sm:$0xf]  ;;  %v6881_v3 = vld [vmem:[%s7273_s30 + $0xcec] sm:$0xf0]  ;;  %v5824_v20 = vor.u32 %v6821_v63, %v5823_v62  ;;  %3493 = vmatpush.bf16.msra.mxu1 %v5568_v14 }
  0x9f   : > { %v6191_v4 = vld [vmem:[%s7273_s30 + $0xde0] sm:$0xf]  ;;  %v6913_v5 = vld [vmem:[%s7273_s30 + $0xdec] sm:$0xf0]  ;;  %v6064_v21 = vor.u32 %v6881_v3, %v6063_v0  ;;  %3507 = vmatpush.bf16.msra.mxu2 %v5696_v15 }
  0xa0   : > { %v6319_v6 = vld [vmem:[%s7273_s30 + $0xee0] sm:$0xf]  ;;  %v6945_v7 = vld [vmem:[%s7273_s30 + $0xeec] sm:$0xf0]  ;;  %v6192_v25 = vor.u32 %v6913_v5, %v6191_v4  ;;  %3521 = vmatpush.bf16.msra.mxu3 %v5824_v20 }
  0xa1   : > { %v6447_v8 = vld [vmem:[%s7273_s30 + $0xfe0] sm:$0xf]  ;;  %v6977_v11 = vld [vmem:[%s7273_s30 + $0xfec] sm:$0xf0]  ;;  %v6320_v26 = vor.u32 %v6945_v7, %v6319_v6  ;;  %3528 = vmatpush.bf16.msrb.mxu0 %v6064_v21  ;;  %3494 = vmatmul.bf16.vlgmr.msra.gmra.mxu1 %v7593_v36 }
  0xa2   : > { %v238_v12 = vld [vmem:[%s8682_s0 + $0x40] sm:$0xff]  ;;  %v240_v16 = vld [vmem:[%s8682_s0 + $0x50] sm:$0xff]  ;;  %v6448_v30 = vor.u32 %v6977_v11, %v6447_v8  ;;  %3542 = vmatpush.bf16.msrb.mxu1 %v6192_v25 }
  0xa3   : > { %v254_v13 = vld [vmem:[%s8682_s0 + $0xc0] sm:$0xff]  ;;  %v256_v18 = vld [vmem:[%s8682_s0 + $0xd0] sm:$0xff]  ;;  %3556 = vmatpush.bf16.msrb.mxu2 %v6320_v26  ;;  %3522 = vmatmul.bf16.vlgmr.msra.gmra.mxu3 %v7597_v40 }
  0xa4   : > { %v6047_v27 = vld [vmem:[%s7273_s30 + $0xcc0] sm:$0xf]  ;;  %v6877_v28 = vld [vmem:[%s7273_s30 + $0xccc] sm:$0xf0]  ;;  %v7586_v31 = vpack.c.bf16 %v254_v13, %v238_v12  ;;  %v7591_v35 = vpack.c.bf16 %v256_v18, %v240_v16  ;;  %3570 = vmatpush.bf16.msrb.mxu3 %v6448_v30 }
  0xa5   : > { %v6175_v29 = vld [vmem:[%s7273_s30 + $0xdc0] sm:$0xf]  ;;  %v6909_v32 = vld [vmem:[%s7273_s30 + $0xdcc] sm:$0xf0]  ;;  %v6048_v41 = vor.u32 %v6877_v28, %v6047_v27 }
  0xa6   : > { %v6303_v33 = vld [vmem:[%s7273_s30 + $0xec0] sm:$0xf]  ;;  %v6941_v34 = vld [vmem:[%s7273_s30 + $0xecc] sm:$0xf0]  ;;  %v6176_v42 = vor.u32 %v6909_v32, %v6175_v29  ;;  %3480 = vmatmul.bf16.vlgmr.msra.gmra.mxu0 %v7586_v31  ;;  %3508 = vmatmul.bf16.vlgmr.msra.gmra.mxu2 %v7591_v35 }
  0xa7   : > { %v6431_v37 = vld [vmem:[%s7273_s30 + $0xfc0] sm:$0xf]  ;;  %v6973_v38 = vld [vmem:[%s7273_s30 + $0xfcc] sm:$0xf0]  ;;  %v6304_v45 = vor.u32 %v6941_v34, %v6303_v33  ;;  %3529 = vmatpush.bf16.msrb.mxu0 %v6048_v41 }
  0xa8   : > { %v6031_v46 = vld [vmem:[%s7273_s30 + $0xca0] sm:$0xf]  ;;  %v6873_v48 = vld [vmem:[%s7273_s30 + $0xcac] sm:$0xf0]  ;;  %v6432_v50 = vor.u32 %v6973_v38, %v6431_v37  ;;  %3543 = vmatpush.bf16.msrb.mxu1 %v6176_v42 }
  0xa9   : > { %v6159_v49 = vld [vmem:[%s7273_s30 + $0xda0] sm:$0xf]  ;;  %v6905_v51 = vld [vmem:[%s7273_s30 + $0xdac] sm:$0xf0]  ;;  %v6032_v56 = vor.u32 %v6873_v48, %v6031_v46  ;;  %3557 = vmatpush.bf16.msrb.mxu2 %v6304_v45 }
  0xaa   : > { %v6287_v52 = vld [vmem:[%s7273_s30 + $0xea0] sm:$0xf]  ;;  %v6937_v53 = vld [vmem:[%s7273_s30 + $0xeac] sm:$0xf0]  ;;  %v6160_v57 = vor.u32 %v6905_v51, %v6159_v49  ;;  %3571 = vmatpush.bf16.msrb.mxu3 %v6432_v50 }
  0xab   : > { %v6415_v54 = vld [vmem:[%s7273_s30 + $0xfa0] sm:$0xf]  ;;  %v6969_v55 = vld [vmem:[%s7273_s30 + $0xfac] sm:$0xf0]  ;;  %v6288_v59 = vor.u32 %v6937_v53, %v6287_v52  ;;  %3530 = vmatpush.bf16.msrb.mxu0 %v6032_v56 }
  0xac   : > { %v6015_v60 = vld [vmem:[%s7273_s30 + $0xc80] sm:$0xf]  ;;  %v6869_v61 = vld [vmem:[%s7273_s30 + $0xc8c] sm:$0xf0]  ;;  %v6416_v63 = vor.u32 %v6969_v55, %v6415_v54  ;;  %3544 = vmatpush.bf16.msrb.mxu1 %v6160_v57 }
  0xad   : > { %v6143_v62 = vld [vmem:[%s7273_s30 + $0xd80] sm:$0xf]  ;;  %v6901_v0 = vld [vmem:[%s7273_s30 + $0xd8c] sm:$0xf0]  ;;  %v6016_v6 = vor.u32 %v6869_v61, %v6015_v60  ;;  %3558 = vmatpush.bf16.msrb.mxu2 %v6288_v59 }
  0xae   : > { %v6271_v2 = vld [vmem:[%s7273_s30 + $0xe80] sm:$0xf]  ;;  %v6933_v3 = vld [vmem:[%s7273_s30 + $0xe8c] sm:$0xf0]  ;;  %v6144_v7 = vor.u32 %v6901_v0, %v6143_v62  ;;  %3572 = vmatpush.bf16.msrb.mxu3 %v6416_v63  ;;  %v6495_v0 = vld [vmem:[%s7273_s30 + $0xe4] sm:$0xf] }
  0xaf   : > { %v6399_v4 = vld [vmem:[%s7273_s30 + $0xf80] sm:$0xf]  ;;  %v6965_v5 = vld [vmem:[%s7273_s30 + $0xf8c] sm:$0xf0]  ;;  %v6272_v8 = vor.u32 %v6933_v3, %v6271_v2  ;;  %3531 = vmatpush.bf16.msrb.mxu0 %v6016_v6  ;;  %v4529_v3 = vld [vmem:[%s7273_s30 + $0xf0] sm:$0xf0] }
  0xb0   : > { %v5999_v9 = vld [vmem:[%s7273_s30 + $0xc60] sm:$0xf]  ;;  %v6865_v11 = vld [vmem:[%s7273_s30 + $0xc6c] sm:$0xf0]  ;;  %v6400_v13 = vor.u32 %v6965_v5, %v6399_v4  ;;  %3545 = vmatpush.bf16.msrb.mxu1 %v6144_v7  ;;  %v6527_v4 = vld [vmem:[%s7273_s30 + $0x1e4] sm:$0xf] }
  0xb1   : > { %v6127_v12 = vld [vmem:[%s7273_s30 + $0xd60] sm:$0xf]  ;;  %v6897_v14 = vld [vmem:[%s7273_s30 + $0xd6c] sm:$0xf0]  ;;  %v6000_v20 = vor.u32 %v6865_v11, %v5999_v9  ;;  %3559 = vmatpush.bf16.msrb.mxu2 %v6272_v8  ;;  %v4657_v5 = vld [vmem:[%s7273_s30 + $0x1f0] sm:$0xf0] }
  0xb2   : > { %v6255_v15 = vld [vmem:[%s7273_s30 + $0xe60] sm:$0xf]  ;;  %v6929_v16 = vld [vmem:[%s7273_s30 + $0xe6c] sm:$0xf0]  ;;  %v6128_v21 = vor.u32 %v6897_v14, %v6127_v12  ;;  %3573 = vmatpush.bf16.msrb.mxu3 %v6400_v13  ;;  %v6559_v6 = vld [vmem:[%s7273_s30 + $0x2e4] sm:$0xf] }
  0xb3   : > { %v6383_v18 = vld [vmem:[%s7273_s30 + $0xf60] sm:$0xf]  ;;  %v6961_v19 = vld [vmem:[%s7273_s30 + $0xf6c] sm:$0xf0]  ;;  %v6256_v22 = vor.u32 %v6929_v16, %v6255_v15  ;;  %3532 = vmatpush.bf16.msrb.mxu0 %v6000_v20  ;;  %v4785_v7 = vld [vmem:[%s7273_s30 + $0x2f0] sm:$0xf0] }
  0xb4   : > { %v5983_v23 = vld [vmem:[%s7273_s30 + $0xc40] sm:$0xf]  ;;  %v6861_v24 = vld [vmem:[%s7273_s30 + $0xc4c] sm:$0xf0]  ;;  %v6384_v26 = vor.u32 %v6961_v19, %v6383_v18  ;;  %3546 = vmatpush.bf16.msrb.mxu1 %v6128_v21  ;;  %v6591_v8 = vld [vmem:[%s7273_s30 + $0x3e4] sm:$0xf]  ;;  %v4532_v21 = vor.u32 %v6495_v0, %v4529_v3 }
  0xb5   : > { %v6111_v25 = vld [vmem:[%s7273_s30 + $0xd40] sm:$0xf]  ;;  %v6893_v27 = vld [vmem:[%s7273_s30 + $0xd4c] sm:$0xf0]  ;;  %v5984_v33 = vor.u32 %v6861_v24, %v5983_v23  ;;  %3560 = vmatpush.bf16.msrb.mxu2 %v6256_v22  ;;  %v4913_v11 = vld [vmem:[%s7273_s30 + $0x3f0] sm:$0xf0] }
  0xb6   : > { %v6239_v28 = vld [vmem:[%s7273_s30 + $0xe40] sm:$0xf]  ;;  %v6925_v29 = vld [vmem:[%s7273_s30 + $0xe4c] sm:$0xf0]  ;;  %v6112_v37 = vor.u32 %v6893_v27, %v6111_v25  ;;  %3574 = vmatpush.bf16.msrb.mxu3 %v6384_v26  ;;  %v243_v19 = vld [vmem:[%s8682_s0 + $0x68] sm:$0xff]  ;;  %v4660_v25 = vor.u32 %v6527_v4, %v4657_v5  ;;  %v4788_v26 = vor.u32 %v6559_v6, %v4785_v7 }
  0xb7   : > { %v6367_v30 = vld [vmem:[%s7273_s30 + $0xf40] sm:$0xf]  ;;  %v6957_v32 = vld [vmem:[%s7273_s30 + $0xf4c] sm:$0xf0]  ;;  %v6240_v38 = vor.u32 %v6925_v29, %v6239_v28  ;;  %3533 = vmatpush.bf16.msrb.mxu0 %v5984_v33  ;;  %v259_v22 = vld [vmem:[%s8682_s0 + $0xe8] sm:$0xff] }
  0xb8   : > { %v5967_v34 = vld [vmem:[%s7273_s30 + $0xc20] sm:$0xf]  ;;  %v6857_v41 = vld [vmem:[%s7273_s30 + $0xc2c] sm:$0xf0]  ;;  %v6368_v46 = vor.u32 %v6957_v32, %v6367_v30  ;;  %3547 = vmatpush.bf16.msrb.mxu1 %v6112_v37  ;;  %v245_v23 = vld [vmem:[%s8682_s0 + $0x78] sm:$0xff]  ;;  %v4916_v30 = vor.u32 %v6591_v8, %v4913_v11 }
  0xb9   : > { %v6095_v42 = vld [vmem:[%s7273_s30 + $0xd20] sm:$0xf]  ;;  %v6889_v45 = vld [vmem:[%s7273_s30 + $0xd2c] sm:$0xf0]  ;;  %v5968_v54 = vor.u32 %v6857_v41, %v5967_v34  ;;  %3561 = vmatpush.bf16.msrb.mxu2 %v6240_v38  ;;  %v261_v24 = vld [vmem:[%s8682_s0 + $0xf8] sm:$0xff]  ;;  %v7693_v41 = vpack.c.bf16 %v259_v22, %v243_v19 }
  0xba   : > { %v6223_v48 = vld [vmem:[%s7273_s30 + $0xe20] sm:$0xf]  ;;  %v6921_v49 = vld [vmem:[%s7273_s30 + $0xe2c] sm:$0xf0]  ;;  %v6096_v60 = vor.u32 %v6889_v45, %v6095_v42  ;;  %3575 = vmatpush.bf16.msrb.mxu3 %v6368_v46  ;;  %v6491_v27 = vld [vmem:[%s7273_s30 + $0xc4] sm:$0xf]  ;;  %v7697_v46 = vpack.c.bf16 %v261_v24, %v245_v23 }
  0xbb   : > { %v6351_v50 = vld [vmem:[%s7273_s30 + $0xf20] sm:$0xf]  ;;  %v6953_v51 = vld [vmem:[%s7273_s30 + $0xf2c] sm:$0xf0]  ;;  %v6224_v61 = vor.u32 %v6921_v49, %v6223_v48  ;;  %3534 = vmatpush.bf16.msrb.mxu0 %v5968_v54  ;;  %v4513_v28 = vld [vmem:[%s7273_s30 + $0xd0] sm:$0xf0] }
  0xbc   : > { %v5951_v52 = vld [vmem:[%s7273_s30 + $0xc00] sm:$0xf]  ;;  %v6853_v53 = vld [vmem:[%s7273_s30 + $0xc0c] sm:$0xf0]  ;;  %v6352_v2 = vor.u32 %v6953_v51, %v6351_v50  ;;  %3548 = vmatpush.bf16.msrb.mxu1 %v6096_v60  ;;  %v6523_v29 = vld [vmem:[%s7273_s30 + $0x1c4] sm:$0xf]  ;;  %v4516_v48 = vor.u32 %v6491_v27, %v4513_v28 }
  0xbd   : > { %v6079_v55 = vld [vmem:[%s7273_s30 + $0xd00] sm:$0xf]  ;;  %v6885_v56 = vld [vmem:[%s7273_s30 + $0xd0c] sm:$0xf0]  ;;  %v5952_v9 = vor.u32 %v6853_v53, %v5951_v52  ;;  %3562 = vmatpush.bf16.msrb.mxu2 %v6224_v61  ;;  %v4641_v33 = vld [vmem:[%s7273_s30 + $0x1d0] sm:$0xf0] }
  0xbe   : > { %v6207_v57 = vld [vmem:[%s7273_s30 + $0xe00] sm:$0xf]  ;;  %v6917_v59 = vld [vmem:[%s7273_s30 + $0xe0c] sm:$0xf0]  ;;  %v6080_v14 = vor.u32 %v6885_v56, %v6079_v55  ;;  %3576 = vmatpush.bf16.msrb.mxu3 %v6352_v2  ;;  %v6555_v34 = vld [vmem:[%s7273_s30 + $0x2c4] sm:$0xf]  ;;  %v4644_v49 = vor.u32 %v6523_v29, %v4641_v33 }
  0xbf   : > { %v6335_v62 = vld [vmem:[%s7273_s30 + $0xf00] sm:$0xf]  ;;  %v6949_v63 = vld [vmem:[%s7273_s30 + $0xf0c] sm:$0xf0]  ;;  %v6208_v15 = vor.u32 %v6917_v59, %v6207_v57  ;;  %3535 = vmatpush.bf16.msrb.mxu0 %v5952_v9  ;;  %v4769_v37 = vld [vmem:[%s7273_s30 + $0x2d0] sm:$0xf0] }
  0xc0   : > { %v242_v12 = vld [vmem:[%s8682_s0 + $0x60] sm:$0xff]  ;;  %v244_v16 = vld [vmem:[%s8682_s0 + $0x70] sm:$0xff]  ;;  %v6336_v20 = vor.u32 %v6949_v63, %v6335_v62  ;;  %3549 = vmatpush.bf16.msrb.mxu1 %v6080_v14  ;;  %v4772_v50 = vor.u32 %v6555_v34, %v4769_v37 }
  0xc1   : > { %v258_v13 = vld [vmem:[%s8682_s0 + $0xe0] sm:$0xff]  ;;  %v260_v18 = vld [vmem:[%s8682_s0 + $0xf0] sm:$0xff]  ;;  %3563 = vmatpush.bf16.msrb.mxu2 %v6208_v15 }
  0xc2   : > { %v7686_v32 = vpack.c.bf16 %v258_v13, %v242_v12  ;;  %v7691_v38 = vpack.c.bf16 %v260_v18, %v244_v16  ;;  %v6587_v42 = vld [vmem:[%s7273_s30 + $0x3c4] sm:$0xf]  ;;  %v4897_v45 = vld [vmem:[%s7273_s30 + $0x3d0] sm:$0xf0]  ;;  %3577 = vmatpush.bf16.msrb.mxu3 %v6336_v20 }
  0xc3   : > { %3584 = vmatpush.bf16.msra.mxu0 %v4532_v21  ;;  %v6487_v51 = vld [vmem:[%s7273_s30 + $0xa4] sm:$0xf]  ;;  %v4497_v52 = vld [vmem:[%s7273_s30 + $0xb0] sm:$0xf0]  ;;  %v4900_v54 = vor.u32 %v6587_v42, %v4897_v45  ;;  %3550 = vmatmul.bf16.vlgmr.msrb.gmra.mxu1 %v7693_v41 }
  0xc4   : > { %3598 = vmatpush.bf16.msra.mxu1 %v4660_v25  ;;  %v6519_v53 = vld [vmem:[%s7273_s30 + $0x1a4] sm:$0xf]  ;;  %3536 = vmatmul.bf16.vlgmr.msrb.gmra.mxu0 %v7686_v32  ;;  %v4625_v55 = vld [vmem:[%s7273_s30 + $0x1b0] sm:$0xf0]  ;;  %v4500_v61 = vor.u32 %v6487_v51, %v4497_v52 }
  0xc5   : > { %3612 = vmatpush.bf16.msra.mxu2 %v4788_v26  ;;  %v6551_v56 = vld [vmem:[%s7273_s30 + $0x2a4] sm:$0xf]  ;;  %v4753_v57 = vld [vmem:[%s7273_s30 + $0x2b0] sm:$0xf0]  ;;  %3578 = vmatmul.bf16.vlgmr.msrb.gmra.mxu3 %v7697_v46  ;;  %v4628_v62 = vor.u32 %v6519_v53, %v4625_v55 }
  0xc6   : > { %3626 = vmatpush.bf16.msra.mxu3 %v4916_v30  ;;  %3564 = vmatmul.bf16.vlgmr.msrb.gmra.mxu2 %v7691_v38  ;;  %v6583_v59 = vld [vmem:[%s7273_s30 + $0x3a4] sm:$0xf]  ;;  %v4881_v60 = vld [vmem:[%s7273_s30 + $0x3b0] sm:$0xf0]  ;;  %v4756_v63 = vor.u32 %v6551_v56, %v4753_v57 }
  0xc7   : > { %3585 = vmatpush.bf16.msra.mxu0 %v4516_v48  ;;  %v6483_v0 = vld [vmem:[%s7273_s30 + $0x84] sm:$0xf]  ;;  %v4481_v2 = vld [vmem:[%s7273_s30 + $0x90] sm:$0xf0]  ;;  %v4884_v4 = vor.u32 %v6583_v59, %v4881_v60 }
  0xc8   : > { %3599 = vmatpush.bf16.msra.mxu1 %v4644_v49  ;;  %v6515_v3 = vld [vmem:[%s7273_s30 + $0x184] sm:$0xf]  ;;  %v4609_v5 = vld [vmem:[%s7273_s30 + $0x190] sm:$0xf0]  ;;  %v4484_v11 = vor.u32 %v6483_v0, %v4481_v2 }
  0xc9   : > { %3613 = vmatpush.bf16.msra.mxu2 %v4772_v50  ;;  %v6547_v6 = vld [vmem:[%s7273_s30 + $0x284] sm:$0xf]  ;;  %v4737_v7 = vld [vmem:[%s7273_s30 + $0x290] sm:$0xf0]  ;;  %v4612_v12 = vor.u32 %v6515_v3, %v4609_v5 }
  0xca   : > { %3627 = vmatpush.bf16.msra.mxu3 %v4900_v54  ;;  %v6579_v8 = vld [vmem:[%s7273_s30 + $0x384] sm:$0xf]  ;;  %v4865_v9 = vld [vmem:[%s7273_s30 + $0x390] sm:$0xf0]  ;;  %v4740_v13 = vor.u32 %v6547_v6, %v4737_v7 }
  0xcb   : > { %3586 = vmatpush.bf16.msra.mxu0 %v4500_v61  ;;  %v6479_v14 = vld [vmem:[%s7273_s30 + $0x64] sm:$0xf]  ;;  %v4465_v15 = vld [vmem:[%s7273_s30 + $0x70] sm:$0xf0]  ;;  %v4868_v18 = vor.u32 %v6579_v8, %v4865_v9 }
  0xcc   : > { %3600 = vmatpush.bf16.msra.mxu1 %v4628_v62  ;;  %v6511_v16 = vld [vmem:[%s7273_s30 + $0x164] sm:$0xf]  ;;  %v4593_v19 = vld [vmem:[%s7273_s30 + $0x170] sm:$0xf0]  ;;  %v4468_v24 = vor.u32 %v6479_v14, %v4465_v15 }
  0xcd   : > { %3614 = vmatpush.bf16.msra.mxu2 %v4756_v63  ;;  %v6543_v20 = vld [vmem:[%s7273_s30 + $0x264] sm:$0xf]  ;;  %v4721_v21 = vld [vmem:[%s7273_s30 + $0x270] sm:$0xf0]  ;;  %v4596_v25 = vor.u32 %v6511_v16, %v4593_v19 }
  0xce   : > { %3628 = vmatpush.bf16.msra.mxu3 %v4884_v4  ;;  %v6575_v22 = vld [vmem:[%s7273_s30 + $0x364] sm:$0xf]  ;;  %v4849_v23 = vld [vmem:[%s7273_s30 + $0x370] sm:$0xf0]  ;;  %v4724_v26 = vor.u32 %v6543_v20, %v4721_v21 }
  0xcf   : > { %3587 = vmatpush.bf16.msra.mxu0 %v4484_v11  ;;  %v6475_v27 = vld [vmem:[%s7273_s30 + $0x44] sm:$0xf]  ;;  %v4449_v28 = vld [vmem:[%s7273_s30 + $0x50] sm:$0xf0]  ;;  %v4852_v30 = vor.u32 %v6575_v22, %v4849_v23 }
  0xd0   : > { %3601 = vmatpush.bf16.msra.mxu1 %v4612_v12  ;;  %v6507_v29 = vld [vmem:[%s7273_s30 + $0x144] sm:$0xf]  ;;  %v4577_v33 = vld [vmem:[%s7273_s30 + $0x150] sm:$0xf0]  ;;  %v4452_v48 = vor.u32 %v6475_v27, %v4449_v28 }
  0xd1   : > { %3615 = vmatpush.bf16.msra.mxu2 %v4740_v13  ;;  %v6539_v34 = vld [vmem:[%s7273_s30 + $0x244] sm:$0xf]  ;;  %v4705_v37 = vld [vmem:[%s7273_s30 + $0x250] sm:$0xf0]  ;;  %v4580_v49 = vor.u32 %v6507_v29, %v4577_v33 }
  0xd2   : > { %3629 = vmatpush.bf16.msra.mxu3 %v4868_v18  ;;  %v6571_v42 = vld [vmem:[%s7273_s30 + $0x344] sm:$0xf]  ;;  %v4833_v45 = vld [vmem:[%s7273_s30 + $0x350] sm:$0xf0]  ;;  %v4708_v50 = vor.u32 %v6539_v34, %v4705_v37 }
  0xd3   : > { %3588 = vmatpush.bf16.msra.mxu0 %v4468_v24  ;;  %v6471_v51 = vld [vmem:[%s7273_s30 + $0x24] sm:$0xf]  ;;  %v4433_v52 = vld [vmem:[%s7273_s30 + $0x30] sm:$0xf0]  ;;  %v4836_v54 = vor.u32 %v6571_v42, %v4833_v45 }
  0xd4   : > { %3602 = vmatpush.bf16.msra.mxu1 %v4596_v25  ;;  %v6503_v53 = vld [vmem:[%s7273_s30 + $0x124] sm:$0xf]  ;;  %v4561_v55 = vld [vmem:[%s7273_s30 + $0x130] sm:$0xf0]  ;;  %v4436_v61 = vor.u32 %v6471_v51, %v4433_v52 }
  0xd5   : > { %3616 = vmatpush.bf16.msra.mxu2 %v4724_v26  ;;  %v6535_v56 = vld [vmem:[%s7273_s30 + $0x224] sm:$0xf]  ;;  %v4689_v57 = vld [vmem:[%s7273_s30 + $0x230] sm:$0xf0]  ;;  %v4564_v0 = vor.u32 %v6503_v53, %v4561_v55 }
  0xd6   : > { %3630 = vmatpush.bf16.msra.mxu3 %v4852_v30  ;;  %v6567_v59 = vld [vmem:[%s7273_s30 + $0x324] sm:$0xf]  ;;  %v4817_v60 = vld [vmem:[%s7273_s30 + $0x330] sm:$0xf0]  ;;  %v4692_v2 = vor.u32 %v6535_v56, %v4689_v57 }
  0xd7   : > { %3589 = vmatpush.bf16.msra.mxu0 %v4452_v48  ;;  %v6467_v62 = vld [vmem:[%s7273_s30 + $0x4] sm:$0xf]  ;;  %v4417_v63 = vld [vmem:[%s7273_s30 + $0x10] sm:$0xf0]  ;;  %v4820_v6 = vor.u32 %v6567_v59, %v4817_v60 }
  0xd8   : > { %3603 = vmatpush.bf16.msra.mxu1 %v4580_v49  ;;  %v6499_v3 = vld [vmem:[%s7273_s30 + $0x104] sm:$0xf]  ;;  %v4545_v4 = vld [vmem:[%s7273_s30 + $0x110] sm:$0xf0]  ;;  %v4420_v14 = vor.u32 %v6467_v62, %v4417_v63 }
  0xd9   : > { %3617 = vmatpush.bf16.msra.mxu2 %v4708_v50  ;;  %v6531_v5 = vld [vmem:[%s7273_s30 + $0x204] sm:$0xf]  ;;  %v4673_v7 = vld [vmem:[%s7273_s30 + $0x210] sm:$0xf0]  ;;  %v4548_v19 = vor.u32 %v6499_v3, %v4545_v4 }
  0xda   : > { %3631 = vmatpush.bf16.msra.mxu3 %v4836_v54  ;;  %v6563_v8 = vld [vmem:[%s7273_s30 + $0x304] sm:$0xf]  ;;  %v4801_v9 = vld [vmem:[%s7273_s30 + $0x310] sm:$0xf0]  ;;  %v4676_v20 = vor.u32 %v6531_v5, %v4673_v7 }
  0xdb   : > { %v6623_v11 = vld [vmem:[%s7273_s30 + $0x4e4] sm:$0xf]  ;;  %v5041_v12 = vld [vmem:[%s7273_s30 + $0x4f0] sm:$0xf0]  ;;  %3590 = vmatpush.bf16.msra.mxu0 %v4436_v61  ;;  %v4804_v23 = vor.u32 %v6563_v8, %v4801_v9 }
  0xdc   : > { %v6655_v13 = vld [vmem:[%s7273_s30 + $0x5e4] sm:$0xf]  ;;  %v5169_v15 = vld [vmem:[%s7273_s30 + $0x5f0] sm:$0xf0]  ;;  %3604 = vmatpush.bf16.msra.mxu1 %v4564_v0  ;;  %v5044_v24 = vor.u32 %v6623_v11, %v5041_v12 }
  0xdd   : > { %v6687_v16 = vld [vmem:[%s7273_s30 + $0x6e4] sm:$0xf]  ;;  %v5297_v18 = vld [vmem:[%s7273_s30 + $0x6f0] sm:$0xf0]  ;;  %3618 = vmatpush.bf16.msra.mxu2 %v4692_v2  ;;  %v5172_v25 = vor.u32 %v6655_v13, %v5169_v15 }
  0xde   : > { %v6719_v21 = vld [vmem:[%s7273_s30 + $0x7e4] sm:$0xf]  ;;  %v5425_v22 = vld [vmem:[%s7273_s30 + $0x7f0] sm:$0xf0]  ;;  %3632 = vmatpush.bf16.msra.mxu3 %v4820_v6  ;;  %v5300_v26 = vor.u32 %v6687_v16, %v5297_v18 }
  0xdf   : > { %v6619_v27 = vld [vmem:[%s7273_s30 + $0x4c4] sm:$0xf]  ;;  %v5025_v28 = vld [vmem:[%s7273_s30 + $0x4d0] sm:$0xf0]  ;;  %3591 = vmatpush.bf16.msra.mxu0 %v4420_v14  ;;  %v5428_v30 = vor.u32 %v6719_v21, %v5425_v22 }
  0xe0   : > { %v6651_v29 = vld [vmem:[%s7273_s30 + $0x5c4] sm:$0xf]  ;;  %v5153_v33 = vld [vmem:[%s7273_s30 + $0x5d0] sm:$0xf0]  ;;  %3605 = vmatpush.bf16.msra.mxu1 %v4548_v19  ;;  %v5028_v48 = vor.u32 %v6619_v27, %v5025_v28 }
  0xe1   : > { %v6683_v34 = vld [vmem:[%s7273_s30 + $0x6c4] sm:$0xf]  ;;  %v5281_v37 = vld [vmem:[%s7273_s30 + $0x6d0] sm:$0xf0]  ;;  %3619 = vmatpush.bf16.msra.mxu2 %v4676_v20  ;;  %v5156_v49 = vor.u32 %v6651_v29, %v5153_v33 }
  0xe2   : > { %v6715_v42 = vld [vmem:[%s7273_s30 + $0x7c4] sm:$0xf]  ;;  %v5409_v45 = vld [vmem:[%s7273_s30 + $0x7d0] sm:$0xf0]  ;;  %3633 = vmatpush.bf16.msra.mxu3 %v4804_v23  ;;  %v5284_v50 = vor.u32 %v6683_v34, %v5281_v37  ;;  %3592 = vmatmul.bf16.vlgmr.msra.gmra.mxu0 %v7378_v58 }
  0xe3   : > { %3640 = vmatpush.bf16.msrb.mxu0 %v5044_v24  ;;  %v6615_v51 = vld [vmem:[%s7273_s30 + $0x4a4] sm:$0xf]  ;;  %v5009_v52 = vld [vmem:[%s7273_s30 + $0x4b0] sm:$0xf0]  ;;  %v5412_v54 = vor.u32 %v6715_v42, %v5409_v45  ;;  %3606 = vmatmul.bf16.vlgmr.msra.gmra.mxu1 %v7402_v10 }
  0xe4   : > { %3654 = vmatpush.bf16.msrb.mxu1 %v5172_v25  ;;  %v6647_v53 = vld [vmem:[%s7273_s30 + $0x5a4] sm:$0xf]  ;;  %v5137_v55 = vld [vmem:[%s7273_s30 + $0x5b0] sm:$0xf0]  ;;  %3620 = vmatmul.bf16.vlgmr.msra.gmra.mxu2 %v7386_v1  ;;  %v5012_v61 = vor.u32 %v6615_v51, %v5009_v52 }
  0xe5   : > { %3668 = vmatpush.bf16.msrb.mxu2 %v5300_v26  ;;  %v6679_v56 = vld [vmem:[%s7273_s30 + $0x6a4] sm:$0xf]  ;;  %v5265_v57 = vld [vmem:[%s7273_s30 + $0x6b0] sm:$0xf0]  ;;  %3634 = vmatmul.bf16.vlgmr.msra.gmra.mxu3 %v7410_v17  ;;  %v5140_v62 = vor.u32 %v6647_v53, %v5137_v55 }
  0xe6   : > { %3682 = vmatpush.bf16.msrb.mxu3 %v5428_v30  ;;  %v6711_v59 = vld [vmem:[%s7273_s30 + $0x7a4] sm:$0xf]  ;;  %v5393_v60 = vld [vmem:[%s7273_s30 + $0x7b0] sm:$0xf0]  ;;  %v5268_v63 = vor.u32 %v6679_v56, %v5265_v57 }
  0xe7   : > { %3641 = vmatpush.bf16.msrb.mxu0 %v5028_v48  ;;  %v6611_v0 = vld [vmem:[%s7273_s30 + $0x484] sm:$0xf]  ;;  %v4993_v2 = vld [vmem:[%s7273_s30 + $0x490] sm:$0xf0]  ;;  %v5396_v4 = vor.u32 %v6711_v59, %v5393_v60 }
  0xe8   : > { %3655 = vmatpush.bf16.msrb.mxu1 %v5156_v49  ;;  %v6643_v3 = vld [vmem:[%s7273_s30 + $0x584] sm:$0xf]  ;;  %v5121_v5 = vld [vmem:[%s7273_s30 + $0x590] sm:$0xf0]  ;;  %v4996_v11 = vor.u32 %v6611_v0, %v4993_v2 }
  0xe9   : > { %3669 = vmatpush.bf16.msrb.mxu2 %v5284_v50  ;;  %v6675_v6 = vld [vmem:[%s7273_s30 + $0x684] sm:$0xf]  ;;  %v5249_v7 = vld [vmem:[%s7273_s30 + $0x690] sm:$0xf0]  ;;  %v5124_v12 = vor.u32 %v6643_v3, %v5121_v5 }
  0xea   : > { %3683 = vmatpush.bf16.msrb.mxu3 %v5412_v54  ;;  %v6707_v8 = vld [vmem:[%s7273_s30 + $0x784] sm:$0xf]  ;;  %v5377_v9 = vld [vmem:[%s7273_s30 + $0x790] sm:$0xf0]  ;;  %v5252_v13 = vor.u32 %v6675_v6, %v5249_v7 }
  0xeb   : > { %3642 = vmatpush.bf16.msrb.mxu0 %v5012_v61  ;;  %v6607_v14 = vld [vmem:[%s7273_s30 + $0x464] sm:$0xf]  ;;  %v4977_v15 = vld [vmem:[%s7273_s30 + $0x470] sm:$0xf0]  ;;  %v5380_v18 = vor.u32 %v6707_v8, %v5377_v9 }
  0xec   : > { %3656 = vmatpush.bf16.msrb.mxu1 %v5140_v62  ;;  %v6639_v16 = vld [vmem:[%s7273_s30 + $0x564] sm:$0xf]  ;;  %v5105_v19 = vld [vmem:[%s7273_s30 + $0x570] sm:$0xf0]  ;;  %v4980_v24 = vor.u32 %v6607_v14, %v4977_v15 }
  0xed   : > { %3670 = vmatpush.bf16.msrb.mxu2 %v5268_v63  ;;  %v6671_v20 = vld [vmem:[%s7273_s30 + $0x664] sm:$0xf]  ;;  %v5233_v21 = vld [vmem:[%s7273_s30 + $0x670] sm:$0xf0]  ;;  %v5108_v25 = vor.u32 %v6639_v16, %v5105_v19 }
  0xee   : > { %3684 = vmatpush.bf16.msrb.mxu3 %v5396_v4  ;;  %v6703_v22 = vld [vmem:[%s7273_s30 + $0x764] sm:$0xf]  ;;  %v5361_v23 = vld [vmem:[%s7273_s30 + $0x770] sm:$0xf0]  ;;  %v5236_v26 = vor.u32 %v6671_v20, %v5233_v21 }
  0xef   : > { %3643 = vmatpush.bf16.msrb.mxu0 %v4996_v11  ;;  %v6603_v27 = vld [vmem:[%s7273_s30 + $0x444] sm:$0xf]  ;;  %v4961_v28 = vld [vmem:[%s7273_s30 + $0x450] sm:$0xf0]  ;;  %v5364_v30 = vor.u32 %v6703_v22, %v5361_v23 }
  0xf0   : > { %3657 = vmatpush.bf16.msrb.mxu1 %v5124_v12  ;;  %v6635_v29 = vld [vmem:[%s7273_s30 + $0x544] sm:$0xf]  ;;  %v5089_v33 = vld [vmem:[%s7273_s30 + $0x550] sm:$0xf0]  ;;  %v4964_v48 = vor.u32 %v6603_v27, %v4961_v28 }
  0xf1   : > { %3671 = vmatpush.bf16.msrb.mxu2 %v5252_v13  ;;  %v6667_v34 = vld [vmem:[%s7273_s30 + $0x644] sm:$0xf]  ;;  %v5217_v37 = vld [vmem:[%s7273_s30 + $0x650] sm:$0xf0]  ;;  %v5092_v49 = vor.u32 %v6635_v29, %v5089_v33 }
  0xf2   : > { %3685 = vmatpush.bf16.msrb.mxu3 %v5380_v18  ;;  %v6699_v42 = vld [vmem:[%s7273_s30 + $0x744] sm:$0xf]  ;;  %v5345_v45 = vld [vmem:[%s7273_s30 + $0x750] sm:$0xf0]  ;;  %v5220_v50 = vor.u32 %v6667_v34, %v5217_v37 }
  0xf3   : > { %3644 = vmatpush.bf16.msrb.mxu0 %v4980_v24  ;;  %v6599_v51 = vld [vmem:[%s7273_s30 + $0x424] sm:$0xf]  ;;  %v4945_v52 = vld [vmem:[%s7273_s30 + $0x430] sm:$0xf0]  ;;  %v5348_v54 = vor.u32 %v6699_v42, %v5345_v45 }
  0xf4   : > { %3658 = vmatpush.bf16.msrb.mxu1 %v5108_v25  ;;  %v6631_v53 = vld [vmem:[%s7273_s30 + $0x524] sm:$0xf]  ;;  %v5073_v55 = vld [vmem:[%s7273_s30 + $0x530] sm:$0xf0]  ;;  %v4948_v61 = vor.u32 %v6599_v51, %v4945_v52 }
  0xf5   : > { %3672 = vmatpush.bf16.msrb.mxu2 %v5236_v26  ;;  %v6663_v56 = vld [vmem:[%s7273_s30 + $0x624] sm:$0xf]  ;;  %v5201_v57 = vld [vmem:[%s7273_s30 + $0x630] sm:$0xf0]  ;;  %v5076_v0 = vor.u32 %v6631_v53, %v5073_v55 }
  0xf6   : > { %3686 = vmatpush.bf16.msrb.mxu3 %v5364_v30  ;;  %v6695_v59 = vld [vmem:[%s7273_s30 + $0x724] sm:$0xf]  ;;  %v5329_v60 = vld [vmem:[%s7273_s30 + $0x730] sm:$0xf0]  ;;  %v5204_v2 = vor.u32 %v6663_v56, %v5201_v57 }
  0xf7   : > { %3645 = vmatpush.bf16.msrb.mxu0 %v4964_v48  ;;  %v6595_v62 = vld [vmem:[%s7273_s30 + $0x404] sm:$0xf]  ;;  %v4929_v63 = vld [vmem:[%s7273_s30 + $0x410] sm:$0xf0]  ;;  %v5332_v6 = vor.u32 %v6695_v59, %v5329_v60 }
  0xf8   : > { %3659 = vmatpush.bf16.msrb.mxu1 %v5092_v49  ;;  %v6627_v3 = vld [vmem:[%s7273_s30 + $0x504] sm:$0xf]  ;;  %v5057_v4 = vld [vmem:[%s7273_s30 + $0x510] sm:$0xf0]  ;;  %v4932_v14 = vor.u32 %v6595_v62, %v4929_v63 }
  0xf9   : > { %3673 = vmatpush.bf16.msrb.mxu2 %v5220_v50  ;;  %v6659_v5 = vld [vmem:[%s7273_s30 + $0x604] sm:$0xf]  ;;  %v5185_v7 = vld [vmem:[%s7273_s30 + $0x610] sm:$0xf0]  ;;  %v5060_v19 = vor.u32 %v6627_v3, %v5057_v4 }
  0xfa   : > { %3687 = vmatpush.bf16.msrb.mxu3 %v5348_v54  ;;  %v6691_v8 = vld [vmem:[%s7273_s30 + $0x704] sm:$0xf]  ;;  %v5313_v9 = vld [vmem:[%s7273_s30 + $0x710] sm:$0xf0]  ;;  %v5188_v20 = vor.u32 %v6659_v5, %v5185_v7 }
  0xfb   : > { %v6751_v11 = vld [vmem:[%s7273_s30 + $0x8e4] sm:$0xf]  ;;  %v5553_v12 = vld [vmem:[%s7273_s30 + $0x8f0] sm:$0xf0]  ;;  %3646 = vmatpush.bf16.msrb.mxu0 %v4948_v61  ;;  %v5316_v23 = vor.u32 %v6691_v8, %v5313_v9 }
  0xfc   : > { %v6783_v13 = vld [vmem:[%s7273_s30 + $0x9e4] sm:$0xf]  ;;  %v5681_v15 = vld [vmem:[%s7273_s30 + $0x9f0] sm:$0xf0]  ;;  %3660 = vmatpush.bf16.msrb.mxu1 %v5076_v0  ;;  %v5556_v24 = vor.u32 %v6751_v11, %v5553_v12 }
  0xfd   : > { %v6815_v16 = vld [vmem:[%s7273_s30 + $0xae4] sm:$0xf]  ;;  %v5809_v18 = vld [vmem:[%s7273_s30 + $0xaf0] sm:$0xf0]  ;;  %3674 = vmatpush.bf16.msrb.mxu2 %v5204_v2  ;;  %v5684_v25 = vor.u32 %v6783_v13, %v5681_v15 }
  0xfe   : > { %v6847_v21 = vld [vmem:[%s7273_s30 + $0xbe4] sm:$0xf]  ;;  %v5937_v22 = vld [vmem:[%s7273_s30 + $0xbf0] sm:$0xf0]  ;;  %3688 = vmatpush.bf16.msrb.mxu3 %v5332_v6  ;;  %v5812_v26 = vor.u32 %v6815_v16, %v5809_v18 }
  0xff   : > { %v6747_v27 = vld [vmem:[%s7273_s30 + $0x8c4] sm:$0xf]  ;;  %v5537_v28 = vld [vmem:[%s7273_s30 + $0x8d0] sm:$0xf0]  ;;  %3647 = vmatpush.bf16.msrb.mxu0 %v4932_v14  ;;  %v5940_v30 = vor.u32 %v6847_v21, %v5937_v22  ;;  %v7861_v22 = vpop.f32.mrf.mxu0 }
 0x100   : > { %v6779_v29 = vld [vmem:[%s7273_s30 + $0x9c4] sm:$0xf]  ;;  %v5665_v33 = vld [vmem:[%s7273_s30 + $0x9d0] sm:$0xf0]  ;;  %3661 = vmatpush.bf16.msrb.mxu1 %v5060_v19  ;;  %v5540_v48 = vor.u32 %v6747_v27, %v5537_v28 }
 0x101   : > { %v6811_v34 = vld [vmem:[%s7273_s30 + $0xac4] sm:$0xf]  ;;  %v5793_v37 = vld [vmem:[%s7273_s30 + $0xad0] sm:$0xf0]  ;;  %3675 = vmatpush.bf16.msrb.mxu2 %v5188_v20  ;;  %v5668_v49 = vor.u32 %v6779_v29, %v5665_v33 }
 0x102   : > { %v6843_v42 = vld [vmem:[%s7273_s30 + $0xbc4] sm:$0xf]  ;;  %v5921_v45 = vld [vmem:[%s7273_s30 + $0xbd0] sm:$0xf0]  ;;  %3689 = vmatpush.bf16.msrb.mxu3 %v5316_v23  ;;  %v5796_v50 = vor.u32 %v6811_v34, %v5793_v37  ;;  %3648 = vmatmul.bf16.vlgmr.msrb.gmra.mxu0 %v7486_v39 }
 0x103   : > { %3696 = vmatpush.bf16.msra.mxu0 %v5556_v24  ;;  %v6743_v51 = vld [vmem:[%s7273_s30 + $0x8a4] sm:$0xf]  ;;  %v5521_v52 = vld [vmem:[%s7273_s30 + $0x8b0] sm:$0xf0]  ;;  %v5924_v54 = vor.u32 %v6843_v42, %v5921_v45  ;;  %3662 = vmatmul.bf16.vlgmr.msrb.gmra.mxu1 %v7493_v44 }
 0x104   : > { %3710 = vmatpush.bf16.msra.mxu1 %v5684_v25  ;;  %v6775_v53 = vld [vmem:[%s7273_s30 + $0x9a4] sm:$0xf]  ;;  %v5649_v55 = vld [vmem:[%s7273_s30 + $0x9b0] sm:$0xf0]  ;;  %3676 = vmatmul.bf16.vlgmr.msrb.gmra.mxu2 %v7491_v43  ;;  %v5524_v61 = vor.u32 %v6743_v51, %v5521_v52  ;;  %v7865_v25 = vpop.f32.mrf.mxu1 }
 0x105   : > { %3724 = vmatpush.bf16.msra.mxu2 %v5812_v26  ;;  %v6807_v56 = vld [vmem:[%s7273_s30 + $0xaa4] sm:$0xf]  ;;  %v5777_v57 = vld [vmem:[%s7273_s30 + $0xab0] sm:$0xf0]  ;;  %3690 = vmatmul.bf16.vlgmr.msrb.gmra.mxu3 %v7497_v47  ;;  %v5652_v62 = vor.u32 %v6775_v53, %v5649_v55 }
 0x106   : > { %3738 = vmatpush.bf16.msra.mxu3 %v5940_v30  ;;  %v6839_v59 = vld [vmem:[%s7273_s30 + $0xba4] sm:$0xf]  ;;  %v5905_v60 = vld [vmem:[%s7273_s30 + $0xbb0] sm:$0xf0]  ;;  %v5780_v63 = vor.u32 %v6807_v56, %v5777_v57  ;;  %v7881_v57 = vpop.f32.mrf.mxu2 }
 0x107   : > { %3697 = vmatpush.bf16.msra.mxu0 %v5540_v48  ;;  %v6739_v0 = vld [vmem:[%s7273_s30 + $0x884] sm:$0xf]  ;;  %v5505_v2 = vld [vmem:[%s7273_s30 + $0x890] sm:$0xf0]  ;;  %v5908_v4 = vor.u32 %v6839_v59, %v5905_v60 }
 0x108   : > { %3711 = vmatpush.bf16.msra.mxu1 %v5668_v49  ;;  %v6771_v3 = vld [vmem:[%s7273_s30 + $0x984] sm:$0xf]  ;;  %v5633_v5 = vld [vmem:[%s7273_s30 + $0x990] sm:$0xf0]  ;;  %v5508_v11 = vor.u32 %v6739_v0, %v5505_v2 }
 0x109   : > { %3725 = vmatpush.bf16.msra.mxu2 %v5796_v50  ;;  %v6803_v6 = vld [vmem:[%s7273_s30 + $0xa84] sm:$0xf]  ;;  %v5761_v7 = vld [vmem:[%s7273_s30 + $0xa90] sm:$0xf0]  ;;  %v5636_v12 = vor.u32 %v6771_v3, %v5633_v5 }
 0x10a   : > { %3739 = vmatpush.bf16.msra.mxu3 %v5924_v54  ;;  %v6835_v8 = vld [vmem:[%s7273_s30 + $0xb84] sm:$0xf]  ;;  %v5889_v9 = vld [vmem:[%s7273_s30 + $0xb90] sm:$0xf0]  ;;  %v5764_v13 = vor.u32 %v6803_v6, %v5761_v7  ;;  %v7893_v7 = vpop.f32.mrf.mxu0 }
 0x10b   : > { %3698 = vmatpush.bf16.msra.mxu0 %v5524_v61  ;;  %v6735_v14 = vld [vmem:[%s7273_s30 + $0x864] sm:$0xf]  ;;  %v5489_v15 = vld [vmem:[%s7273_s30 + $0x870] sm:$0xf0]  ;;  %v5892_v18 = vor.u32 %v6835_v8, %v5889_v9 }
 0x10c   : > { %3712 = vmatpush.bf16.msra.mxu1 %v5652_v62  ;;  %v6767_v16 = vld [vmem:[%s7273_s30 + $0x964] sm:$0xf]  ;;  %v5617_v19 = vld [vmem:[%s7273_s30 + $0x970] sm:$0xf0]  ;;  %v5492_v26 = vor.u32 %v6735_v14, %v5489_v15  ;;  %v7898_v14 = vpop.f32.mrf.mxu1 }
 0x10d   : > { %3726 = vmatpush.bf16.msra.mxu2 %v5780_v63  ;;  %v6799_v20 = vld [vmem:[%s7273_s30 + $0xa64] sm:$0xf]  ;;  %v5745_v21 = vld [vmem:[%s7273_s30 + $0xa70] sm:$0xf0]  ;;  %v5620_v27 = vor.u32 %v6767_v16, %v5617_v19  ;;  %v7886_v63 = vpop.f32.mrf.mxu3 }
 0x10e   : > { %3740 = vmatpush.bf16.msra.mxu3 %v5908_v4  ;;  %v6831_v23 = vld [vmem:[%s7273_s30 + $0xb64] sm:$0xf]  ;;  %v5873_v24 = vld [vmem:[%s7273_s30 + $0xb70] sm:$0xf0]  ;;  %v5748_v28 = vor.u32 %v6799_v20, %v5745_v21 }
 0x10f   : > { %3699 = vmatpush.bf16.msra.mxu0 %v5508_v11  ;;  %v6731_v29 = vld [vmem:[%s7273_s30 + $0x844] sm:$0xf]  ;;  %v5473_v30 = vld [vmem:[%s7273_s30 + $0x850] sm:$0xf0]  ;;  %v5876_v34 = vor.u32 %v6831_v23, %v5873_v24 }
 0x110   : > { %3713 = vmatpush.bf16.msra.mxu1 %v5636_v12  ;;  %v6763_v33 = vld [vmem:[%s7273_s30 + $0x944] sm:$0xf]  ;;  %v5601_v37 = vld [vmem:[%s7273_s30 + $0x950] sm:$0xf0]  ;;  %v5476_v51 = vor.u32 %v6731_v29, %v5473_v30 }
 0x111   : > { %3727 = vmatpush.bf16.msra.mxu2 %v5764_v13  ;;  %v6795_v42 = vld [vmem:[%s7273_s30 + $0xa44] sm:$0xf]  ;;  %v5729_v45 = vld [vmem:[%s7273_s30 + $0xa50] sm:$0xf0]  ;;  %v5604_v52 = vor.u32 %v6763_v33, %v5601_v37 }
 0x112   : > { %3741 = vmatpush.bf16.msra.mxu3 %v5892_v18  ;;  %v6827_v48 = vld [vmem:[%s7273_s30 + $0xb44] sm:$0xf]  ;;  %v5857_v49 = vld [vmem:[%s7273_s30 + $0xb50] sm:$0xf0]  ;;  %v5732_v53 = vor.u32 %v6795_v42, %v5729_v45 }
 0x113   : > { %v7876_v50 = vld [vmem:[%s7281_s5] sm:$0xf]  ;;  %3700 = vmatpush.bf16.msra.mxu0 %v5492_v26  ;;  %v5457_v55 = vld [vmem:[%s7273_s30 + $0x830] sm:$0xf0]  ;;  %v5860_v59 = vor.u32 %v6827_v48, %v5857_v49 }
 0x114   : > { %3714 = vmatpush.bf16.msra.mxu1 %v5620_v27  ;;  %v6727_v54 = vld [vmem:[%s7273_s30 + $0x824] sm:$0xf]  ;;  %v5585_v60 = vld [vmem:[%s7273_s30 + $0x930] sm:$0xf0]  ;;  %v792_v3 = vperm.slane %v7876_v50, 0 }
 0x115   : > { %3728 = vmatpush.bf16.msra.mxu2 %v5748_v28  ;;  %v6759_v56 = vld [vmem:[%s7273_s30 + $0x924] sm:$0xf]  ;;  %v5713_v62 = vld [vmem:[%s7273_s30 + $0xa30] sm:$0xf0]  ;;  %v5460_v4 = vor.u32 %v6727_v54, %v5457_v55  ;;  %v7917_v54 = vpop.f32.mrf.mxu2 }
 0x116   : > { %3742 = vmatpush.bf16.msra.mxu3 %v5876_v34  ;;  %v6791_v61 = vld [vmem:[%s7273_s30 + $0xa24] sm:$0xf]  ;;  %v5841_v2 = vld [vmem:[%s7273_s30 + $0xb30] sm:$0xf0]  ;;  %v5588_v8 = vor.u32 %v6759_v56, %v5585_v60  ;;  %v3370_v45 = vadd.f32 %v7861_v22, %v792_v3 }
 0x117   : > { %v6823_v0 = vld [vmem:[%s7273_s30 + $0xb24] sm:$0xf]  ;;  %3701 = vmatpush.bf16.msra.mxu0 %v5476_v51  ;;  %v5441_v6 = vld [vmem:[%s7273_s30 + $0x810] sm:$0xf0]  ;;  %v5716_v9 = vor.u32 %v6791_v61, %v5713_v62  ;;  %v7922_v61 = vpop.f32.mrf.mxu3 }
 0x118   : > { %v6723_v5 = vld [vmem:[%s7273_s30 + $0x804] sm:$0xf]  ;;  %3715 = vmatpush.bf16.msra.mxu1 %v5604_v52  ;;  %v5569_v12 = vld [vmem:[%s7273_s30 + $0x910] sm:$0xf0]  ;;  %v5844_v15 = vor.u32 %v6823_v0, %v5841_v2  ;;  %v3384_v2 = vadd.f32 %v7865_v25, %v3370_v45 }
 0x119   : > { %3729 = vmatpush.bf16.msra.mxu2 %v5732_v53  ;;  %v6755_v11 = vld [vmem:[%s7273_s30 + $0x904] sm:$0xf]  ;;  %v5697_v16 = vld [vmem:[%s7273_s30 + $0xa10] sm:$0xf0]  ;;  %v5444_v24 = vor.u32 %v6723_v5, %v5441_v6 }
 0x11a   : > { %v6787_v13 = vld [vmem:[%s7273_s30 + $0xa04] sm:$0xf]  ;;  %3743 = vmatpush.bf16.msra.mxu3 %v5860_v59  ;;  %v5825_v19 = vld [vmem:[%s7273_s30 + $0xb10] sm:$0xf0]  ;;  %v5572_v29 = vor.u32 %v6755_v11, %v5569_v12  ;;  %v7930_v12 = vpop.f32.mrf.mxu1 }
 0x11b   : > { %v6819_v18 = vld [vmem:[%s7273_s30 + $0xb04] sm:$0xf]  ;;  %v6065_v21 = vld [vmem:[%s7273_s30 + $0xcf0] sm:$0xf0]  ;;  %3702 = vmatpush.bf16.msra.mxu0 %v5460_v4  ;;  %v5700_v30 = vor.u32 %v6787_v13, %v5697_v16  ;;  %v3425_v4 = vpop.f32.mrf.mxu0 }
 0x11c   : > { %v6879_v20 = vld [vmem:[%s7273_s30 + $0xce4] sm:$0xf]  ;;  %v6193_v26 = vld [vmem:[%s7273_s30 + $0xdf0] sm:$0xf0]  ;;  %3716 = vmatpush.bf16.msra.mxu1 %v5588_v8  ;;  %v5828_v37 = vor.u32 %v6819_v18, %v5825_v19 }
 0x11d   : > { %v6911_v23 = vld [vmem:[%s7273_s30 + $0xde4] sm:$0xf]  ;;  %v6321_v28 = vld [vmem:[%s7273_s30 + $0xef0] sm:$0xf0]  ;;  %3730 = vmatpush.bf16.msra.mxu2 %v5716_v9  ;;  %v6068_v42 = vor.u32 %v6879_v20, %v6065_v21  ;;  %v3398_v21 = vadd.f32 %v7881_v57, %v3384_v2  ;;  %v7953_v45 = vpop.f32.mrf.mxu2 }
 0x11e   : > { %v6943_v27 = vld [vmem:[%s7273_s30 + $0xee4] sm:$0xf]  ;;  %v6449_v34 = vld [vmem:[%s7273_s30 + $0xff0] sm:$0xf0]  ;;  %3744 = vmatpush.bf16.msra.mxu3 %v5844_v15  ;;  %v6196_v48 = vor.u32 %v6911_v23, %v6193_v26 }
 0x11f   : > { %v6975_v33 = vld [vmem:[%s7273_s30 + $0xfe4] sm:$0xf]  ;;  %v6324_v49 = vor.u32 %v6943_v27, %v6321_v28  ;;  %v6049_v52 = vld [vmem:[%s7273_s30 + $0xcd0] sm:$0xf0]  ;;  %3703 = vmatpush.bf16.msra.mxu0 %v5444_v24 }
 0x120   : > { %v6875_v51 = vld [vmem:[%s7273_s30 + $0xcc4] sm:$0xf]  ;;  %v6452_v55 = vor.u32 %v6975_v33, %v6449_v34  ;;  %v6177_v56 = vld [vmem:[%s7273_s30 + $0xdd0] sm:$0xf0]  ;;  %3717 = vmatpush.bf16.msra.mxu1 %v5572_v29 }
 0x121   : > { %v6907_v53 = vld [vmem:[%s7273_s30 + $0xdc4] sm:$0xf]  ;;  %v6305_v60 = vld [vmem:[%s7273_s30 + $0xed0] sm:$0xf0]  ;;  %3731 = vmatpush.bf16.msra.mxu2 %v5700_v30  ;;  %v6052_v0 = vor.u32 %v6875_v51, %v6049_v52  ;;  %v7956_v51 = vpop.f32.mrf.mxu3 }
 0x122   : > { %v6939_v59 = vld [vmem:[%s7273_s30 + $0xec4] sm:$0xf]  ;;  %v6433_v62 = vld [vmem:[%s7273_s30 + $0xfd0] sm:$0xf0]  ;;  %3745 = vmatpush.bf16.msra.mxu3 %v5828_v37  ;;  %v6180_v5 = vor.u32 %v6907_v53, %v6177_v56  ;;  %3704 = vmatmul.bf16.vlgmr.msra.gmra.mxu0 %v7586_v31  ;;  %v3372_v37 = vadd.f32 %v7893_v7, %v792_v3  ;;  %v7967_v2 = vpop.f32.mrf.mxu1 }
 0x123   : > { %v6971_v22 = vld [vmem:[%s7273_s30 + $0xfc4] sm:$0xf]  ;;  %3752 = vmatpush.bf16.msrb.mxu0 %v6068_v42  ;;  %v6308_v6 = vor.u32 %v6939_v59, %v6305_v60  ;;  %v6033_v9 = vld [vmem:[%s7273_s30 + $0xcb0] sm:$0xf0]  ;;  %3718 = vmatmul.bf16.vlgmr.msra.gmra.mxu1 %v7593_v36 }
 0x124   : > { %3766 = vmatpush.bf16.msrb.mxu1 %v6196_v48  ;;  %v6871_v8 = vld [vmem:[%s7273_s30 + $0xca4] sm:$0xf]  ;;  %v6436_v13 = vor.u32 %v6971_v22, %v6433_v62  ;;  %v6161_v15 = vld [vmem:[%s7273_s30 + $0xdb0] sm:$0xf0]  ;;  %3732 = vmatmul.bf16.vlgmr.msra.gmra.mxu2 %v7591_v35  ;;  %v3427_v22 = vpop.f32.mrf.mxu0 }
 0x125   : > { %3780 = vmatpush.bf16.msrb.mxu2 %v6324_v49  ;;  %v6903_v11 = vld [vmem:[%s7273_s30 + $0xda4] sm:$0xf]  ;;  %v6289_v16 = vld [vmem:[%s7273_s30 + $0xeb0] sm:$0xf0]  ;;  %3746 = vmatmul.bf16.vlgmr.msra.gmra.mxu3 %v7597_v40  ;;  %v6036_v20 = vor.u32 %v6871_v8, %v6033_v9  ;;  %v3412_v49 = vadd.f32 %v7886_v63, %v3398_v21  ;;  %v3386_v63 = vadd.f32 %v7898_v14, %v3372_v37 }
 0x126   : > { %3794 = vmatpush.bf16.msrb.mxu3 %v6452_v55  ;;  %v6935_v25 = vld [vmem:[%s7273_s30 + $0xea4] sm:$0xf]  ;;  %v6417_v19 = vld [vmem:[%s7273_s30 + $0xfb0] sm:$0xf0]  ;;  %v6164_v23 = vor.u32 %v6903_v11, %v6161_v15 }
 0x127   : > { %v6967_v18 = vld [vmem:[%s7273_s30 + $0xfa4] sm:$0xf]  ;;  %3753 = vmatpush.bf16.msrb.mxu0 %v6052_v0  ;;  %v6292_v24 = vor.u32 %v6935_v25, %v6289_v16  ;;  %v6017_v27 = vld [vmem:[%s7273_s30 + $0xc90] sm:$0xf0] }
 0x128   : > { %3767 = vmatpush.bf16.msrb.mxu1 %v6180_v5  ;;  %v6867_v26 = vld [vmem:[%s7273_s30 + $0xc84] sm:$0xf]  ;;  %v6420_v29 = vor.u32 %v6967_v18, %v6417_v19  ;;  %v6145_v30 = vld [vmem:[%s7273_s30 + $0xd90] sm:$0xf0]  ;;  %v3400_v19 = vadd.f32 %v7917_v54, %v3386_v63  ;;  %v3455_v54 = vpop.f32.mrf.mxu2 }
 0x129   : > { %3781 = vmatpush.bf16.msrb.mxu2 %v6308_v6  ;;  %v6899_v28 = vld [vmem:[%s7273_s30 + $0xd84] sm:$0xf]  ;;  %v6273_v34 = vld [vmem:[%s7273_s30 + $0xe90] sm:$0xf0]  ;;  %v6020_v48 = vor.u32 %v6867_v26, %v6017_v27  ;;  %v3426_v6 = vadd.f32 %v3425_v4, %v3412_v49 }
 0x12a   : > { %3795 = vmatpush.bf16.msrb.mxu3 %v6436_v13  ;;  %v6931_v33 = vld [vmem:[%s7273_s30 + $0xe84] sm:$0xf]  ;;  %v6401_v42 = vld [vmem:[%s7273_s30 + $0xf90] sm:$0xf0]  ;;  %v6148_v50 = vor.u32 %v6899_v28, %v6145_v30 }
 0x12b   : > { %v6963_v57 = vld [vmem:[%s7273_s30 + $0xf84] sm:$0xf]  ;;  %3754 = vmatpush.bf16.msrb.mxu0 %v6036_v20  ;;  %v6276_v52 = vor.u32 %v6931_v33, %v6273_v34  ;;  %v6001_v7 = vld [vmem:[%s7273_s30 + $0xc70] sm:$0xf0] }
 0x12c   : > { %3768 = vmatpush.bf16.msrb.mxu1 %v6164_v23  ;;  %v6863_v3 = vld [vmem:[%s7273_s30 + $0xc64] sm:$0xf]  ;;  %v6404_v55 = vor.u32 %v6963_v57, %v6401_v42  ;;  %v6129_v56 = vld [vmem:[%s7273_s30 + $0xd70] sm:$0xf0]  ;;  %v3440_v23 = vadd.f32 %v7930_v12, %v3426_v6  ;;  %v3414_v12 = vadd.f32 %v7922_v61, %v3400_v19  ;;  %v7986_v57 = vpop.f32.mrf.mxu3  ;;  %v3481_v42 = vpop.f32.mrf.mxu0  ;;  %v4919_v19 = vld [vmem:[%s7273_s30 + $0x3e8] sm:$0xf] }
 0x12d   : > { %3782 = vmatpush.bf16.msrb.mxu2 %v6292_v24  ;;  %v6895_v53 = vld [vmem:[%s7273_s30 + $0xd64] sm:$0xf]  ;;  %v6257_v60 = vld [vmem:[%s7273_s30 + $0xe70] sm:$0xf0]  ;;  %v6004_v5 = vor.u32 %v6863_v3, %v6001_v7 }
 0x12e   : > { %3796 = vmatpush.bf16.msrb.mxu3 %v6420_v29  ;;  %v6927_v59 = vld [vmem:[%s7273_s30 + $0xe64] sm:$0xf]  ;;  %v6385_v0 = vld [vmem:[%s7273_s30 + $0xf70] sm:$0xf0]  ;;  %v6132_v8 = vor.u32 %v6895_v53, %v6129_v56  ;;  %v3454_v53 = vadd.f32 %v7953_v45, %v3440_v23  ;;  %v3428_v6 = vadd.f32 %v3427_v22, %v3414_v12  ;;  %v4535_v45 = vld [vmem:[%s7273_s30 + $0xe8] sm:$0xf] }
 0x12f   : > { %v6959_v62 = vld [vmem:[%s7273_s30 + $0xf64] sm:$0xf]  ;;  %3755 = vmatpush.bf16.msrb.mxu0 %v6020_v48  ;;  %v6260_v9 = vor.u32 %v6927_v59, %v6257_v60  ;;  %v5985_v13 = vld [vmem:[%s7273_s30 + $0xc50] sm:$0xf0]  ;;  %v6594_v22 = vld [vmem:[%s7273_s30 + $0x3f4] sm:$0xf0] }
 0x130   : > { %3769 = vmatpush.bf16.msrb.mxu1 %v6148_v50  ;;  %v6859_v11 = vld [vmem:[%s7273_s30 + $0xc44] sm:$0xf]  ;;  %v6388_v15 = vor.u32 %v6959_v62, %v6385_v0  ;;  %v6113_v25 = vld [vmem:[%s7273_s30 + $0xd50] sm:$0xf0]  ;;  %v3495_v50 = vpop.f32.mrf.mxu1  ;;  %v3442_v23 = vadd.f32 %v7967_v2, %v3428_v6  ;;  %v6558_v12 = vld [vmem:[%s7273_s30 + $0x2d4] sm:$0xf0] }
 0x131   : > { %3783 = vmatpush.bf16.msrb.mxu2 %v6276_v52  ;;  %v6891_v14 = vld [vmem:[%s7273_s30 + $0xd44] sm:$0xf]  ;;  %v6241_v18 = vld [vmem:[%s7273_s30 + $0xe50] sm:$0xf0]  ;;  %v5988_v21 = vor.u32 %v6859_v11, %v5985_v13  ;;  %v6530_v13 = vld [vmem:[%s7273_s30 + $0x1f4] sm:$0xf0] }
 0x132   : > { %3797 = vmatpush.bf16.msrb.mxu3 %v6404_v55  ;;  %v6923_v16 = vld [vmem:[%s7273_s30 + $0xe44] sm:$0xf]  ;;  %v6369_v4 = vld [vmem:[%s7273_s30 + $0xf50] sm:$0xf0]  ;;  %v6116_v24 = vor.u32 %v6891_v14, %v6113_v25  ;;  %v4791_v14 = vld [vmem:[%s7273_s30 + $0x2e8] sm:$0xf]  ;;  %v3468_v25 = vadd.f32 %v7956_v51, %v3454_v53 }
 0x133   : > { %v6955_v20 = vld [vmem:[%s7273_s30 + $0xf44] sm:$0xf]  ;;  %3756 = vmatpush.bf16.msrb.mxu0 %v6004_v5  ;;  %v6244_v26 = vor.u32 %v6923_v16, %v6241_v18  ;;  %v5969_v28 = vld [vmem:[%s7273_s30 + $0xc30] sm:$0xf0]  ;;  %v4903_v2 = vld [vmem:[%s7273_s30 + $0x3c8] sm:$0xf] }
 0x134   : > { %3770 = vmatpush.bf16.msrb.mxu1 %v6132_v8  ;;  %v6855_v27 = vld [vmem:[%s7273_s30 + $0xc24] sm:$0xf]  ;;  %v6372_v30 = vor.u32 %v6955_v20, %v6369_v4  ;;  %v6097_v33 = vld [vmem:[%s7273_s30 + $0xd30] sm:$0xf0]  ;;  %v6498_v8 = vld [vmem:[%s7273_s30 + $0xf4] sm:$0xf0]  ;;  %v3509_v20 = vpop.f32.mrf.mxu2  ;;  %v3523_v51 = vpop.f32.mrf.mxu3 }
 0x135   : > { %3784 = vmatpush.bf16.msrb.mxu2 %v6260_v9  ;;  %v6887_v29 = vld [vmem:[%s7273_s30 + $0xd24] sm:$0xf]  ;;  %v6225_v37 = vld [vmem:[%s7273_s30 + $0xe30] sm:$0xf0]  ;;  %v5972_v52 = vor.u32 %v6855_v27, %v5969_v28  ;;  %v4663_v9 = vld [vmem:[%s7273_s30 + $0x1e8] sm:$0xf] }
 0x136   : > { %3798 = vmatpush.bf16.msrb.mxu3 %v6388_v15  ;;  %v6919_v34 = vld [vmem:[%s7273_s30 + $0xe24] sm:$0xf]  ;;  %v6353_v49 = vld [vmem:[%s7273_s30 + $0xf30] sm:$0xf0]  ;;  %v6100_v61 = vor.u32 %v6887_v29, %v6097_v33  ;;  %v6562_v15 = vld [vmem:[%s7273_s30 + $0x2f4] sm:$0xf0]  ;;  %v4920_v33 = vor.u32 %v6594_v22, %v4919_v19 }
 0x137   : > { %v6951_v48 = vld [vmem:[%s7273_s30 + $0xf24] sm:$0xf]  ;;  %3757 = vmatpush.bf16.msrb.mxu0 %v5988_v21  ;;  %v5953_v7 = vld [vmem:[%s7273_s30 + $0xc10] sm:$0xf0]  ;;  %v6228_v55 = vor.u32 %v6919_v34, %v6225_v37  ;;  %v4536_v21 = vor.u32 %v6498_v8, %v4535_v45  ;;  %v4792_v27 = vor.u32 %v6562_v15, %v4791_v14  ;;  %v4519_v28 = vld [vmem:[%s7273_s30 + $0xc8] sm:$0xf] }
 0x138   : > { %v6851_v3 = vld [vmem:[%s7273_s30 + $0xc04] sm:$0xf]  ;;  %3771 = vmatpush.bf16.msrb.mxu1 %v6116_v24  ;;  %v6081_v59 = vld [vmem:[%s7273_s30 + $0xd10] sm:$0xf0]  ;;  %v6356_v63 = vor.u32 %v6951_v48, %v6353_v49  ;;  %v3482_v24 = vadd.f32 %v3481_v42, %v3468_v25  ;;  %v6494_v29 = vld [vmem:[%s7273_s30 + $0xd4] sm:$0xf0]  ;;  %v3456_v48 = vadd.f32 %v3455_v54, %v3442_v23  ;;  %v3483_v49 = vpop.f32.mrf.mxu0 }
 0x139   : > { %3785 = vmatpush.bf16.msrb.mxu2 %v6244_v26  ;;  %v6883_v56 = vld [vmem:[%s7273_s30 + $0xd04] sm:$0xf]  ;;  %v6209_v62 = vld [vmem:[%s7273_s30 + $0xe10] sm:$0xf0]  ;;  %v5956_v11 = vor.u32 %v6851_v3, %v5953_v7  ;;  %v4664_v26 = vor.u32 %v6530_v13, %v4663_v9  ;;  %v6526_v34 = vld [vmem:[%s7273_s30 + $0x1d4] sm:$0xf0]  ;;  %v4520_v3 = vor.u32 %v6494_v29, %v4519_v28 }
 0x13a   : > { %v6915_v60 = vld [vmem:[%s7273_s30 + $0xe04] sm:$0xf]  ;;  %3799 = vmatpush.bf16.msrb.mxu3 %v6372_v30  ;;  %v6337_v5 = vld [vmem:[%s7273_s30 + $0xf10] sm:$0xf0]  ;;  %v6084_v16 = vor.u32 %v6883_v56, %v6081_v59  ;;  %v4647_v30 = vld [vmem:[%s7273_s30 + $0x1c8] sm:$0xf]  ;;  %v3496_v7 = vadd.f32 %v3495_v50, %v3482_v24  ;;  %v3470_v50 = vadd.f32 %v7986_v57, %v3456_v48 }
 0x13b   : > { %v6947_v0 = vld [vmem:[%s7273_s30 + $0xf04] sm:$0xf]  ;;  %3758 = vmatpush.bf16.msrb.mxu0 %v5972_v52  ;;  %v6212_v18 = vor.u32 %v6915_v60, %v6209_v62  ;;  %v4775_v37 = vld [vmem:[%s7273_s30 + $0x2c8] sm:$0xf]  ;;  %v6590_v42 = vld [vmem:[%s7273_s30 + $0x3d4] sm:$0xf0]  ;;  %v3497_v52 = vpop.f32.mrf.mxu1  ;;  %v4648_v53 = vor.u32 %v6526_v34, %v4647_v30 }
 0x13c   : > { %3772 = vmatpush.bf16.msrb.mxu1 %v6100_v61  ;;  %v6340_v4 = vor.u32 %v6947_v0, %v6337_v5  ;;  %v4776_v54 = vor.u32 %v6558_v12, %v4775_v37  ;;  %v4503_v61 = vld [vmem:[%s7273_s30 + $0xa8] sm:$0xf]  ;;  %v4904_v59 = vor.u32 %v6590_v42, %v4903_v2  ;;  %v6522_v60 = vld [vmem:[%s7273_s30 + $0x1b4] sm:$0xf0]  ;;  %v3510_v0 = vadd.f32 %v3509_v20, %v3496_v7  ;;  %v3511_v25 = vpop.f32.mrf.mxu2  ;;  %v3525_v20 = vpop.f32.mrf.mxu3 }
 0x13d   : > { %3786 = vmatpush.bf16.msrb.mxu2 %v6228_v55  ;;  %v6490_v55 = vld [vmem:[%s7273_s30 + $0xb4] sm:$0xf0]  ;;  %v4631_v56 = vld [vmem:[%s7273_s30 + $0x1a8] sm:$0xf]  ;;  %v3484_v9 = vadd.f32 %v3483_v49, %v3470_v50 }
 0x13e   : > { %3800 = vmatpush.bf16.msrb.mxu3 %v6356_v63  ;;  %v4759_v63 = vld [vmem:[%s7273_s30 + $0x2a8] sm:$0xf]  ;;  %v6554_v62 = vld [vmem:[%s7273_s30 + $0x2b4] sm:$0xf0]  ;;  %v4504_v45 = vor.u32 %v6490_v55, %v4503_v61  ;;  %v4632_v57 = vor.u32 %v6522_v60, %v4631_v56  ;;  %v3524_v22 = vadd.f32 %v3523_v51, %v3510_v0 }
 0x13f   : > { %3759 = vmatpush.bf16.msrb.mxu0 %v5956_v11  ;;  %v4887_v5 = vld [vmem:[%s7273_s30 + $0x3a8] sm:$0xf]  ;;  %v6586_v6 = vld [vmem:[%s7273_s30 + $0x3b4] sm:$0xf0]  ;;  %v4760_v11 = vor.u32 %v6554_v62, %v4759_v63  ;;  %v3498_v28 = vadd.f32 %v3497_v52, %v3484_v9 }
 0x140   : > { %3773 = vmatpush.bf16.msrb.mxu1 %v6084_v16  ;;  %v4487_v8 = vld [vmem:[%s7273_s30 + $0x88] sm:$0xf]  ;;  %v6486_v13 = vld [vmem:[%s7273_s30 + $0x94] sm:$0xf0]  ;;  %v4888_v16 = vor.u32 %v6586_v6, %v4887_v5 }
 0x141   : > { %3787 = vmatpush.bf16.msrb.mxu2 %v6212_v18  ;;  %v4615_v14 = vld [vmem:[%s7273_s30 + $0x188] sm:$0xf]  ;;  %v6518_v15 = vld [vmem:[%s7273_s30 + $0x194] sm:$0xf0]  ;;  %v4488_v24 = vor.u32 %v6486_v13, %v4487_v8  ;;  %v3512_v2 = vadd.f32 %v3511_v25, %v3498_v28 }
 0x142   : > { %3801 = vmatpush.bf16.msrb.mxu3 %v6340_v4  ;;  %3760 = vmatmul.bf16.vlgmr.msrb.gmra.mxu0 %v7686_v32  ;;  %v4743_v18 = vld [vmem:[%s7273_s30 + $0x288] sm:$0xf]  ;;  %v6550_v19 = vld [vmem:[%s7273_s30 + $0x294] sm:$0xf0]  ;;  %v3537_v4 = vpop.f32.mrf.mxu0 }
 0x143   : > { %3808 = vmatpush.bf16.msra.mxu0 %v4536_v21  ;;  %3774 = vmatmul.bf16.vlgmr.msrb.gmra.mxu1 %v7693_v41  ;;  %v4871_v21 = vld [vmem:[%s7273_s30 + $0x388] sm:$0xf]  ;;  %v6582_v23 = vld [vmem:[%s7273_s30 + $0x394] sm:$0xf0]  ;;  %v3538_v29 = vadd.f32 %v3537_v4, %v3524_v22  ;;  %v4744_v51 = vor.u32 %v6550_v19, %v4743_v18  ;;  %v3526_v0 = vadd.f32 %v3525_v20, %v3512_v2 }
 0x144   : > { %3822 = vmatpush.bf16.msra.mxu1 %v4664_v26  ;;  %3788 = vmatmul.bf16.vlgmr.msrb.gmra.mxu2 %v7691_v38  ;;  %v4616_v26 = vor.u32 %v6518_v15, %v4615_v14  ;;  %v4471_v30 = vld [vmem:[%s7273_s30 + $0x68] sm:$0xf]  ;;  %v4872_v37 = vor.u32 %v6582_v23, %v4871_v21  ;;  %v6514_v12 = vld [vmem:[%s7273_s30 + $0x174] sm:$0xf0] }
 0x145   : > { %3836 = vmatpush.bf16.msra.mxu2 %v4792_v27  ;;  %3802 = vmatmul.bf16.vlgmr.msrb.gmra.mxu3 %v7697_v46  ;;  %v3551_v27 = vpop.f32.mrf.mxu1  ;;  %v4599_v34 = vld [vmem:[%s7273_s30 + $0x168] sm:$0xf]  ;;  %v6546_v49 = vld [vmem:[%s7273_s30 + $0x274] sm:$0xf0] }
 0x146   : > { %3850 = vmatpush.bf16.msra.mxu3 %v4920_v33  ;;  %v6482_v33 = vld [vmem:[%s7273_s30 + $0x74] sm:$0xf0]  ;;  %v4727_v48 = vld [vmem:[%s7273_s30 + $0x268] sm:$0xf] }
 0x147   : > { %3809 = vmatpush.bf16.msra.mxu0 %v4520_v3  ;;  %v4855_v42 = vld [vmem:[%s7273_s30 + $0x368] sm:$0xf]  ;;  %v6578_v52 = vld [vmem:[%s7273_s30 + $0x374] sm:$0xf0]  ;;  %v4472_v3 = vor.u32 %v6482_v33, %v4471_v30  ;;  %v4728_v61 = vor.u32 %v6546_v49, %v4727_v48 }
 0x148   : > { %3823 = vmatpush.bf16.msra.mxu1 %v4648_v53  ;;  %v4455_v7 = vld [vmem:[%s7273_s30 + $0x48] sm:$0xf]  ;;  %v3552_v53 = vadd.f32 %v3551_v27, %v3538_v29  ;;  %v6478_v55 = vld [vmem:[%s7273_s30 + $0x54] sm:$0xf0]  ;;  %v4856_v60 = vor.u32 %v6578_v52, %v4855_v42 }
 0x149   : > { %3837 = vmatpush.bf16.msra.mxu2 %v4776_v54  ;;  %v4600_v54 = vor.u32 %v6514_v12, %v4599_v34  ;;  %v4583_v56 = vld [vmem:[%s7273_s30 + $0x148] sm:$0xf]  ;;  %v3565_v63 = vpop.f32.mrf.mxu2  ;;  %v6542_v50 = vld [vmem:[%s7273_s30 + $0x254] sm:$0xf0] }
 0x14a   : > { %3851 = vmatpush.bf16.msra.mxu3 %v4904_v59  ;;  %v6510_v59 = vld [vmem:[%s7273_s30 + $0x154] sm:$0xf0]  ;;  %v4711_v62 = vld [vmem:[%s7273_s30 + $0x248] sm:$0xf]  ;;  %v3566_v5 = vadd.f32 %v3565_v63, %v3552_v53  ;;  %v3539_v6 = vpop.f32.mrf.mxu0 }
 0x14b   : > { %3810 = vmatpush.bf16.msra.mxu0 %v4504_v45  ;;  %v3579_v45 = vpop.f32.mrf.mxu3  ;;  %v4839_v8 = vld [vmem:[%s7273_s30 + $0x348] sm:$0xf]  ;;  %v6574_v9 = vld [vmem:[%s7273_s30 + $0x354] sm:$0xf0]  ;;  %v3540_v13 = vadd.f32 %v3539_v6, %v3526_v0  ;;  %v4712_v15 = vor.u32 %v6542_v50, %v4711_v62 }
 0x14c   : > { %3824 = vmatpush.bf16.msra.mxu1 %v4632_v57  ;;  %v4456_v57 = vor.u32 %v6478_v55, %v4455_v7  ;;  %v3580_v14 = vadd.f32 %v3579_v45, %v3566_v5  ;;  %v4439_v25 = vld [vmem:[%s7273_s30 + $0x28] sm:$0xf]  ;;  %v4840_v19 = vor.u32 %v6574_v9, %v4839_v8  ;;  %v6506_v20 = vld [vmem:[%s7273_s30 + $0x134] sm:$0xf0] }
 0x14d   : > { %3838 = vmatpush.bf16.msra.mxu2 %v4760_v11  ;;  %v4584_v11 = vor.u32 %v6510_v59, %v4583_v56  ;;  %v4567_v18 = vld [vmem:[%s7273_s30 + $0x128] sm:$0xf]  ;;  %v3553_v22 = vpop.f32.mrf.mxu1  ;;  %v6538_v21 = vld [vmem:[%s7273_s30 + $0x234] sm:$0xf0] }
 0x14e   : > { %3852 = vmatpush.bf16.msra.mxu3 %v4888_v16  ;;  %v6474_v16 = vld [vmem:[%s7273_s30 + $0x34] sm:$0xf0]  ;;  %v4695_v4 = vld [vmem:[%s7273_s30 + $0x228] sm:$0xf]  ;;  %7026 = vtanh.f32 %v3580_v14  ;;  %v3554_v29 = vadd.f32 %v3553_v22, %v3540_v13 }
 0x14f   : > { %3811 = vmatpush.bf16.msra.mxu0 %v4488_v24  ;;  %v4823_v23 = vld [vmem:[%s7273_s30 + $0x328] sm:$0xf]  ;;  %v6570_v24 = vld [vmem:[%s7273_s30 + $0x334] sm:$0xf0]  ;;  %v4696_v30 = vor.u32 %v6538_v21, %v4695_v4 }
 0x150   : > { %3825 = vmatpush.bf16.msra.mxu1 %v4616_v26  ;;  %v4440_v26 = vor.u32 %v6474_v16, %v4439_v25  ;;  %v4423_v27 = vld [vmem:[%s7273_s30 + $0x8] sm:$0xf]  ;;  %v6470_v28 = vld [vmem:[%s7273_s30 + $0x14] sm:$0xf0]  ;;  %v4824_v12 = vor.u32 %v6570_v24, %v4823_v23 }
 0x151   : > { %3839 = vmatpush.bf16.msra.mxu2 %v4744_v51  ;;  %v4568_v51 = vor.u32 %v6506_v20, %v4567_v18  ;;  %v4551_v33 = vld [vmem:[%s7273_s30 + $0x108] sm:$0xf]  ;;  %v6502_v34 = vld [vmem:[%s7273_s30 + $0x114] sm:$0xf0]  ;;  %v3567_v48 = vpop.f32.mrf.mxu2 }
 0x152   : > { %3853 = vmatpush.bf16.msra.mxu3 %v4872_v37  ;;  %v4679_v37 = vld [vmem:[%s7273_s30 + $0x208] sm:$0xf]  ;;  %v6534_v49 = vld [vmem:[%s7273_s30 + $0x214] sm:$0xf0]  ;;  %v3568_v52 = vadd.f32 %v3567_v48, %v3554_v29  ;;  %v4552_v62 = vor.u32 %v6502_v34, %v4551_v33 }
 0x153   : > { %3812 = vmatpush.bf16.msra.mxu0 %v4472_v3  ;;  %v4807_v2 = vld [vmem:[%s7273_s30 + $0x308] sm:$0xf]  ;;  %v6566_v42 = vld [vmem:[%s7273_s30 + $0x314] sm:$0xf0]  ;;  %v3581_v3 = vpop.f32.mrf.mxu3  ;;  %v4680_v50 = vor.u32 %v6534_v49, %v4679_v37 }
 0x154   : > { %3826 = vmatpush.bf16.msra.mxu1 %v4600_v54  ;;  %v5047_v7 = vld [vmem:[%s7273_s30 + $0x4e8] sm:$0xf]  ;;  %v6626_v53 = vld [vmem:[%s7273_s30 + $0x4f4] sm:$0xf0]  ;;  %v3582_v63 = vadd.f32 %v3581_v3, %v3568_v52  ;;  %v4808_v6 = vor.u32 %v6566_v42, %v4807_v2 }
 0x155   : > { %3840 = vmatpush.bf16.msra.mxu2 %v4728_v61  ;;  %v5175_v54 = vld [vmem:[%s7273_s30 + $0x5e8] sm:$0xf]  ;;  %v4424_v61 = vor.u32 %v6470_v28, %v4423_v27  ;;  %v6658_v55 = vld [vmem:[%s7273_s30 + $0x5f4] sm:$0xf0]  ;;  %v5048_v45 = vor.u32 %v6626_v53, %v5047_v7 }
 0x156   : > { %3854 = vmatpush.bf16.msra.mxu3 %v4856_v60  ;;  %v5303_v56 = vld [vmem:[%s7273_s30 + $0x6e8] sm:$0xf]  ;;  %v6690_v59 = vld [vmem:[%s7273_s30 + $0x6f4] sm:$0xf0]  ;;  %v7027_v60 = vpop.eup %7026  ;;  %7028 = vtanh.f32 %v3582_v63  ;;  %v5176_v8 = vor.u32 %v6658_v55, %v5175_v54 }
 0x157   : > { %3813 = vmatpush.bf16.msra.mxu0 %v4456_v57  ;;  %v5431_v0 = vld [vmem:[%s7273_s30 + $0x7e8] sm:$0xf]  ;;  %v6722_v5 = vld [vmem:[%s7273_s30 + $0x7f4] sm:$0xf0]  ;;  %4264 = vst [vmem:[%s8081_s21] sm:$0xff] %v7027_v60  ;;  %v5304_v9 = vor.u32 %v6690_v59, %v5303_v56 }
 0x158   : > { %3827 = vmatpush.bf16.msra.mxu1 %v4584_v11  ;;  %v5031_v57 = vld [vmem:[%s7273_s30 + $0x4c8] sm:$0xf]  ;;  %v6622_v11 = vld [vmem:[%s7273_s30 + $0x4d4] sm:$0xf0]  ;;  %v5432_v14 = vor.u32 %v6722_v5, %v5431_v0 }
 0x159   : > { %3841 = vmatpush.bf16.msra.mxu2 %v4712_v15  ;;  %v5159_v13 = vld [vmem:[%s7273_s30 + $0x5c8] sm:$0xf]  ;;  %v6654_v15 = vld [vmem:[%s7273_s30 + $0x5d4] sm:$0xf0]  ;;  %v5032_v22 = vor.u32 %v6622_v11, %v5031_v57 }
 0x15a   : > { %3855 = vmatpush.bf16.msra.mxu3 %v4840_v19  ;;  %v5287_v25 = vld [vmem:[%s7273_s30 + $0x6c8] sm:$0xf]  ;;  %v6686_v16 = vld [vmem:[%s7273_s30 + $0x6d4] sm:$0xf0]  ;;  %v5160_v20 = vor.u32 %v6654_v15, %v5159_v13 }
 0x15b   : > { %3814 = vmatpush.bf16.msra.mxu0 %v4440_v26  ;;  %v5415_v18 = vld [vmem:[%s7273_s30 + $0x7c8] sm:$0xf]  ;;  %v6718_v19 = vld [vmem:[%s7273_s30 + $0x7d4] sm:$0xf0]  ;;  %v5288_v4 = vor.u32 %v6686_v16, %v5287_v25 }
 0x15c   : > { %3828 = vmatpush.bf16.msra.mxu1 %v4568_v51  ;;  %v5015_v21 = vld [vmem:[%s7273_s30 + $0x4a8] sm:$0xf]  ;;  %v6618_v23 = vld [vmem:[%s7273_s30 + $0x4b4] sm:$0xf0]  ;;  %v5416_v26 = vor.u32 %v6718_v19, %v5415_v18  ;;  %v7029_v51 = vpop.eup %7028 }
 0x15d   : > { %3842 = vmatpush.bf16.msra.mxu2 %v4696_v30  ;;  %v5143_v24 = vld [vmem:[%s7273_s30 + $0x5a8] sm:$0xf]  ;;  %v6650_v27 = vld [vmem:[%s7273_s30 + $0x5b4] sm:$0xf0]  ;;  %4268 = vst [vmem:[%s8081_s21 + $0x20] sm:$0xff] %v7029_v51  ;;  %v5016_v34 = vor.u32 %v6618_v23, %v5015_v21 }
 0x15e   : > { %3856 = vmatpush.bf16.msra.mxu3 %v4824_v12  ;;  %v5271_v28 = vld [vmem:[%s7273_s30 + $0x6a8] sm:$0xf]  ;;  %v6682_v29 = vld [vmem:[%s7273_s30 + $0x6b4] sm:$0xf0]  ;;  %v5144_v37 = vor.u32 %v6650_v27, %v5143_v24 }
 0x15f   : > { %3815 = vmatpush.bf16.msra.mxu0 %v4424_v61  ;;  %v5399_v30 = vld [vmem:[%s7273_s30 + $0x7a8] sm:$0xf]  ;;  %v6714_v33 = vld [vmem:[%s7273_s30 + $0x7b4] sm:$0xf0]  ;;  %v5272_v12 = vor.u32 %v6682_v29, %v5271_v28 }
 0x160   : > { %3829 = vmatpush.bf16.msra.mxu1 %v4552_v62  ;;  %v4999_v48 = vld [vmem:[%s7273_s30 + $0x488] sm:$0xf]  ;;  %v6614_v49 = vld [vmem:[%s7273_s30 + $0x494] sm:$0xf0]  ;;  %v5400_v42 = vor.u32 %v6714_v33, %v5399_v30 }
 0x161   : > { %3843 = vmatpush.bf16.msra.mxu2 %v4680_v50  ;;  %v5127_v2 = vld [vmem:[%s7273_s30 + $0x588] sm:$0xf]  ;;  %v6646_v52 = vld [vmem:[%s7273_s30 + $0x594] sm:$0xf0]  ;;  %v5000_v61 = vor.u32 %v6614_v49, %v4999_v48 }
 0x162   : > { %3857 = vmatpush.bf16.msra.mxu3 %v4808_v6  ;;  %3816 = vmatmul.bf16.vlgmr.msra.gmra.mxu0 %v7378_v58  ;;  %v5255_v3 = vld [vmem:[%s7273_s30 + $0x688] sm:$0xf]  ;;  %v6678_v7 = vld [vmem:[%s7273_s30 + $0x694] sm:$0xf0]  ;;  %v5128_v55 = vor.u32 %v6646_v52, %v5127_v2 }
 0x163   : > { %3864 = vmatpush.bf16.msrb.mxu0 %v5048_v45  ;;  %3830 = vmatmul.bf16.vlgmr.msra.gmra.mxu1 %v7402_v10  ;;  %v5383_v53 = vld [vmem:[%s7273_s30 + $0x788] sm:$0xf]  ;;  %v6710_v54 = vld [vmem:[%s7273_s30 + $0x794] sm:$0xf0]  ;;  %v5256_v56 = vor.u32 %v6678_v7, %v5255_v3 }
 0x164   : > { %3878 = vmatpush.bf16.msrb.mxu1 %v5176_v8  ;;  %3844 = vmatmul.bf16.vlgmr.msra.gmra.mxu2 %v7386_v1  ;;  %v4983_v59 = vld [vmem:[%s7273_s30 + $0x468] sm:$0xf]  ;;  %v6610_v60 = vld [vmem:[%s7273_s30 + $0x474] sm:$0xf0]  ;;  %v5384_v62 = vor.u32 %v6710_v54, %v5383_v53 }
 0x165   : > { %3892 = vmatpush.bf16.msrb.mxu2 %v5304_v9  ;;  %3858 = vmatmul.bf16.vlgmr.msra.gmra.mxu3 %v7410_v17  ;;  %v5111_v63 = vld [vmem:[%s7273_s30 + $0x568] sm:$0xf]  ;;  %v6642_v50 = vld [vmem:[%s7273_s30 + $0x574] sm:$0xf0]  ;;  %v4984_v8 = vor.u32 %v6610_v60, %v4983_v59 }
 0x166   : > { %3906 = vmatpush.bf16.msrb.mxu3 %v5432_v14  ;;  %v5239_v0 = vld [vmem:[%s7273_s30 + $0x668] sm:$0xf]  ;;  %v6674_v5 = vld [vmem:[%s7273_s30 + $0x674] sm:$0xf0]  ;;  %v5112_v9 = vor.u32 %v6642_v50, %v5111_v63 }
 0x167   : > { %3865 = vmatpush.bf16.msrb.mxu0 %v5032_v22  ;;  %v5367_v6 = vld [vmem:[%s7273_s30 + $0x768] sm:$0xf]  ;;  %v6706_v45 = vld [vmem:[%s7273_s30 + $0x774] sm:$0xf0]  ;;  %v5240_v57 = vor.u32 %v6674_v5, %v5239_v0 }
 0x168   : > { %3879 = vmatpush.bf16.msrb.mxu1 %v5160_v20  ;;  %v4967_v11 = vld [vmem:[%s7273_s30 + $0x448] sm:$0xf]  ;;  %v6606_v13 = vld [vmem:[%s7273_s30 + $0x454] sm:$0xf0]  ;;  %v5368_v15 = vor.u32 %v6706_v45, %v5367_v6 }
 0x169   : > { %3893 = vmatpush.bf16.msrb.mxu2 %v5288_v4  ;;  %v5095_v14 = vld [vmem:[%s7273_s30 + $0x548] sm:$0xf]  ;;  %v6638_v25 = vld [vmem:[%s7273_s30 + $0x554] sm:$0xf0]  ;;  %v4968_v20 = vor.u32 %v6606_v13, %v4967_v11 }
 0x16a   : > { %3907 = vmatpush.bf16.msrb.mxu3 %v5416_v26  ;;  %v5223_v16 = vld [vmem:[%s7273_s30 + $0x648] sm:$0xf]  ;;  %v6670_v18 = vld [vmem:[%s7273_s30 + $0x654] sm:$0xf0]  ;;  %v5096_v4 = vor.u32 %v6638_v25, %v5095_v14 }
 0x16b   : > { %3866 = vmatpush.bf16.msrb.mxu0 %v5016_v34  ;;  %v5351_v19 = vld [vmem:[%s7273_s30 + $0x748] sm:$0xf]  ;;  %v6702_v22 = vld [vmem:[%s7273_s30 + $0x754] sm:$0xf0]  ;;  %v5224_v21 = vor.u32 %v6670_v18, %v5223_v16 }
 0x16c   : > { %3880 = vmatpush.bf16.msrb.mxu1 %v5144_v37  ;;  %v4951_v23 = vld [vmem:[%s7273_s30 + $0x428] sm:$0xf]  ;;  %v6602_v24 = vld [vmem:[%s7273_s30 + $0x434] sm:$0xf0]  ;;  %v5352_v27 = vor.u32 %v6702_v22, %v5351_v19 }
 0x16d   : > { %3894 = vmatpush.bf16.msrb.mxu2 %v5272_v12  ;;  %v5079_v26 = vld [vmem:[%s7273_s30 + $0x528] sm:$0xf]  ;;  %v6634_v28 = vld [vmem:[%s7273_s30 + $0x534] sm:$0xf0]  ;;  %v4952_v34 = vor.u32 %v6602_v24, %v4951_v23 }
 0x16e   : > { %3908 = vmatpush.bf16.msrb.mxu3 %v5400_v42  ;;  %v5207_v29 = vld [vmem:[%s7273_s30 + $0x628] sm:$0xf]  ;;  %v6666_v51 = vld [vmem:[%s7273_s30 + $0x634] sm:$0xf0]  ;;  %v5080_v48 = vor.u32 %v6634_v28, %v5079_v26 }
 0x16f   : > { %3867 = vmatpush.bf16.msrb.mxu0 %v5000_v61  ;;  %v5335_v30 = vld [vmem:[%s7273_s30 + $0x728] sm:$0xf]  ;;  %v6698_v33 = vld [vmem:[%s7273_s30 + $0x734] sm:$0xf0]  ;;  %v5208_v49 = vor.u32 %v6666_v51, %v5207_v29 }
 0x170   : > { %3881 = vmatpush.bf16.msrb.mxu1 %v5128_v55  ;;  %v4935_v37 = vld [vmem:[%s7273_s30 + $0x408] sm:$0xf]  ;;  %v6598_v12 = vld [vmem:[%s7273_s30 + $0x414] sm:$0xf0]  ;;  %v5336_v3 = vor.u32 %v6698_v33, %v5335_v30 }
 0x171   : > { %3895 = vmatpush.bf16.msrb.mxu2 %v5256_v56  ;;  %v5063_v2 = vld [vmem:[%s7273_s30 + $0x508] sm:$0xf]  ;;  %v6630_v42 = vld [vmem:[%s7273_s30 + $0x514] sm:$0xf0]  ;;  %v4936_v59 = vor.u32 %v6598_v12, %v4935_v37 }
 0x172   : > { %3909 = vmatpush.bf16.msrb.mxu3 %v5384_v62  ;;  %v5191_v52 = vld [vmem:[%s7273_s30 + $0x608] sm:$0xf]  ;;  %v6662_v7 = vld [vmem:[%s7273_s30 + $0x614] sm:$0xf0]  ;;  %v5064_v50 = vor.u32 %v6630_v42, %v5063_v2 }
 0x173   : > { %3868 = vmatpush.bf16.msrb.mxu0 %v4984_v8  ;;  %v5319_v53 = vld [vmem:[%s7273_s30 + $0x708] sm:$0xf]  ;;  %v6694_v54 = vld [vmem:[%s7273_s30 + $0x714] sm:$0xf0]  ;;  %v5192_v0 = vor.u32 %v6662_v7, %v5191_v52 }
 0x174   : > { %3882 = vmatpush.bf16.msrb.mxu1 %v5112_v9  ;;  %v5559_v61 = vld [vmem:[%s7273_s30 + $0x8e8] sm:$0xf]  ;;  %v6754_v55 = vld [vmem:[%s7273_s30 + $0x8f4] sm:$0xf0]  ;;  %v5320_v45 = vor.u32 %v6694_v54, %v5319_v53 }
 0x175   : > { %3896 = vmatpush.bf16.msrb.mxu2 %v5240_v57  ;;  %v5687_v56 = vld [vmem:[%s7273_s30 + $0x9e8] sm:$0xf]  ;;  %v6786_v60 = vld [vmem:[%s7273_s30 + $0x9f4] sm:$0xf0]  ;;  %v5560_v8 = vor.u32 %v6754_v55, %v5559_v61 }
 0x176   : > { %3910 = vmatpush.bf16.msrb.mxu3 %v5368_v15  ;;  %v5815_v63 = vld [vmem:[%s7273_s30 + $0xae8] sm:$0xf]  ;;  %v6818_v62 = vld [vmem:[%s7273_s30 + $0xaf4] sm:$0xf0]  ;;  %v5688_v9 = vor.u32 %v6786_v60, %v5687_v56 }
 0x177   : > { %3869 = vmatpush.bf16.msrb.mxu0 %v4968_v20  ;;  %v5943_v5 = vld [vmem:[%s7273_s30 + $0xbe8] sm:$0xf]  ;;  %v6850_v6 = vld [vmem:[%s7273_s30 + $0xbf4] sm:$0xf0]  ;;  %v5816_v57 = vor.u32 %v6818_v62, %v5815_v63 }
 0x178   : > { %3883 = vmatpush.bf16.msrb.mxu1 %v5096_v4  ;;  %v5543_v11 = vld [vmem:[%s7273_s30 + $0x8c8] sm:$0xf]  ;;  %v6750_v13 = vld [vmem:[%s7273_s30 + $0x8d4] sm:$0xf0]  ;;  %v5944_v15 = vor.u32 %v6850_v6, %v5943_v5  ;;  %v8187_v6 = vpop.f32.mrf.mxu0 }
 0x179   : > { %3897 = vmatpush.bf16.msrb.mxu2 %v5224_v21  ;;  %v5671_v14 = vld [vmem:[%s7273_s30 + $0x9c8] sm:$0xf]  ;;  %v6782_v25 = vld [vmem:[%s7273_s30 + $0x9d4] sm:$0xf0]  ;;  %v5544_v20 = vor.u32 %v6750_v13, %v5543_v11 }
 0x17a   : > { %3911 = vmatpush.bf16.msrb.mxu3 %v5352_v27  ;;  %v5799_v16 = vld [vmem:[%s7273_s30 + $0xac8] sm:$0xf]  ;;  %v6814_v18 = vld [vmem:[%s7273_s30 + $0xad4] sm:$0xf0]  ;;  %v5672_v4 = vor.u32 %v6782_v25, %v5671_v14 }
 0x17b   : > { %3870 = vmatpush.bf16.msrb.mxu0 %v4952_v34  ;;  %v5927_v19 = vld [vmem:[%s7273_s30 + $0xbc8] sm:$0xf]  ;;  %v6846_v22 = vld [vmem:[%s7273_s30 + $0xbd4] sm:$0xf0]  ;;  %v5800_v21 = vor.u32 %v6814_v18, %v5799_v16 }
 0x17c   : > { %3884 = vmatpush.bf16.msrb.mxu1 %v5080_v48  ;;  %v5527_v23 = vld [vmem:[%s7273_s30 + $0x8a8] sm:$0xf]  ;;  %v6746_v24 = vld [vmem:[%s7273_s30 + $0x8b4] sm:$0xf0]  ;;  %v5928_v27 = vor.u32 %v6846_v22, %v5927_v19 }
 0x17d   : > { %3898 = vmatpush.bf16.msrb.mxu2 %v5208_v49  ;;  %v5655_v26 = vld [vmem:[%s7273_s30 + $0x9a8] sm:$0xf]  ;;  %v6778_v28 = vld [vmem:[%s7273_s30 + $0x9b4] sm:$0xf0]  ;;  %v5528_v34 = vor.u32 %v6746_v24, %v5527_v23 }
 0x17e   : > { %3912 = vmatpush.bf16.msrb.mxu3 %v5336_v3  ;;  %v5783_v29 = vld [vmem:[%s7273_s30 + $0xaa8] sm:$0xf]  ;;  %v6810_v51 = vld [vmem:[%s7273_s30 + $0xab4] sm:$0xf0]  ;;  %v5656_v37 = vor.u32 %v6778_v28, %v5655_v26 }
 0x17f   : > { %3871 = vmatpush.bf16.msrb.mxu0 %v4936_v59  ;;  %v5911_v30 = vld [vmem:[%s7273_s30 + $0xba8] sm:$0xf]  ;;  %v6842_v33 = vld [vmem:[%s7273_s30 + $0xbb4] sm:$0xf0]  ;;  %v5784_v12 = vor.u32 %v6810_v51, %v5783_v29  ;;  %v8204_v29 = vpop.f32.mrf.mxu2 }
 0x180   : > { %3885 = vmatpush.bf16.msrb.mxu1 %v5064_v50  ;;  %v5511_v48 = vld [vmem:[%s7273_s30 + $0x888] sm:$0xf]  ;;  %v6742_v49 = vld [vmem:[%s7273_s30 + $0x894] sm:$0xf0]  ;;  %v5912_v42 = vor.u32 %v6842_v33, %v5911_v30 }
 0x181   : > { %3899 = vmatpush.bf16.msrb.mxu2 %v5192_v0  ;;  %v5639_v2 = vld [vmem:[%s7273_s30 + $0x988] sm:$0xf]  ;;  %v6774_v52 = vld [vmem:[%s7273_s30 + $0x994] sm:$0xf0]  ;;  %v5512_v61 = vor.u32 %v6742_v49, %v5511_v48  ;;  %v8214_v49 = vld [vmem:[%s7281_s5] sm:$0xf] }
 0x182   : > { %3913 = vmatpush.bf16.msrb.mxu3 %v5320_v45  ;;  %3872 = vmatmul.bf16.vlgmr.msrb.gmra.mxu0 %v7486_v39  ;;  %v5767_v3 = vld [vmem:[%s7273_s30 + $0xa88] sm:$0xf]  ;;  %v6806_v7 = vld [vmem:[%s7273_s30 + $0xa94] sm:$0xf0]  ;;  %v5640_v55 = vor.u32 %v6774_v52, %v5639_v2  ;;  %v793_v2 = vperm.slane %v8214_v49, 1 }
 0x183   : > { %3920 = vmatpush.bf16.msra.mxu0 %v5560_v8  ;;  %3886 = vmatmul.bf16.vlgmr.msrb.gmra.mxu1 %v7493_v44  ;;  %v5895_v53 = vld [vmem:[%s7273_s30 + $0xb88] sm:$0xf]  ;;  %v6838_v54 = vld [vmem:[%s7273_s30 + $0xb94] sm:$0xf0]  ;;  %v5768_v56 = vor.u32 %v6806_v7, %v5767_v3  ;;  %v8219_v7 = vpop.f32.mrf.mxu0 }
 0x184   : > { %3934 = vmatpush.bf16.msra.mxu1 %v5688_v9  ;;  %3900 = vmatmul.bf16.vlgmr.msrb.gmra.mxu2 %v7491_v43  ;;  %v5495_v59 = vld [vmem:[%s7273_s30 + $0x868] sm:$0xf]  ;;  %v6738_v60 = vld [vmem:[%s7273_s30 + $0x874] sm:$0xf0]  ;;  %v5896_v62 = vor.u32 %v6838_v54, %v5895_v53  ;;  %v8191_v9 = vpop.f32.mrf.mxu1 }
 0x185   : > { %3948 = vmatpush.bf16.msra.mxu2 %v5816_v57  ;;  %3914 = vmatmul.bf16.vlgmr.msrb.gmra.mxu3 %v7497_v47  ;;  %v5623_v63 = vld [vmem:[%s7273_s30 + $0x968] sm:$0xf]  ;;  %v6770_v50 = vld [vmem:[%s7273_s30 + $0x974] sm:$0xf0]  ;;  %v5496_v57 = vor.u32 %v6738_v60, %v5495_v59 }
 0x186   : > { %3962 = vmatpush.bf16.msra.mxu3 %v5944_v15  ;;  %v5751_v0 = vld [vmem:[%s7273_s30 + $0xa68] sm:$0xf]  ;;  %v6802_v5 = vld [vmem:[%s7273_s30 + $0xa74] sm:$0xf0]  ;;  %v5624_v11 = vor.u32 %v6770_v50, %v5623_v63 }
 0x187   : > { %3921 = vmatpush.bf16.msra.mxu0 %v5544_v20  ;;  %v5879_v45 = vld [vmem:[%s7273_s30 + $0xb68] sm:$0xf]  ;;  %v6834_v8 = vld [vmem:[%s7273_s30 + $0xb74] sm:$0xf0]  ;;  %v5752_v13 = vor.u32 %v6802_v5, %v5751_v0 }
 0x188   : > { %3935 = vmatpush.bf16.msra.mxu1 %v5672_v4  ;;  %v5479_v14 = vld [vmem:[%s7273_s30 + $0x848] sm:$0xf]  ;;  %v6734_v15 = vld [vmem:[%s7273_s30 + $0x854] sm:$0xf0]  ;;  %v5880_v16 = vor.u32 %v6834_v8, %v5879_v45 }
 0x189   : > { %3949 = vmatpush.bf16.msra.mxu2 %v5800_v21  ;;  %v5607_v25 = vld [vmem:[%s7273_s30 + $0x948] sm:$0xf]  ;;  %v6766_v18 = vld [vmem:[%s7273_s30 + $0x954] sm:$0xf0]  ;;  %v5480_v21 = vor.u32 %v6734_v15, %v5479_v14 }
 0x18a   : > { %3963 = vmatpush.bf16.msra.mxu3 %v5928_v27  ;;  %v5735_v19 = vld [vmem:[%s7273_s30 + $0xa48] sm:$0xf]  ;;  %v6798_v22 = vld [vmem:[%s7273_s30 + $0xa54] sm:$0xf0]  ;;  %v5608_v23 = vor.u32 %v6766_v18, %v5607_v25 }
 0x18b   : > { %3922 = vmatpush.bf16.msra.mxu0 %v5528_v34  ;;  %v5863_v20 = vld [vmem:[%s7273_s30 + $0xb48] sm:$0xf]  ;;  %v6830_v4 = vld [vmem:[%s7273_s30 + $0xb54] sm:$0xf0]  ;;  %v5736_v24 = vor.u32 %v6798_v22, %v5735_v19  ;;  %v3594_v22 = vadd.f32 %v8187_v6, %v793_v2 }
 0x18c   : > { %3936 = vmatpush.bf16.msra.mxu1 %v5656_v37  ;;  %v5463_v26 = vld [vmem:[%s7273_s30 + $0x828] sm:$0xf]  ;;  %v6730_v27 = vld [vmem:[%s7273_s30 + $0x834] sm:$0xf0]  ;;  %v5864_v51 = vor.u32 %v6830_v4, %v5863_v20  ;;  %v8209_v37 = vpop.f32.mrf.mxu3  ;;  %v8224_v59 = vpop.f32.mrf.mxu1 }
 0x18d   : > { %3950 = vmatpush.bf16.msra.mxu2 %v5784_v12  ;;  %v5591_v28 = vld [vmem:[%s7273_s30 + $0x928] sm:$0xf]  ;;  %v6762_v30 = vld [vmem:[%s7273_s30 + $0x934] sm:$0xf0] }
 0x18e   : > { %3964 = vmatpush.bf16.msra.mxu3 %v5912_v42  ;;  %v5719_v33 = vld [vmem:[%s7273_s30 + $0xa28] sm:$0xf]  ;;  %v6794_v34 = vld [vmem:[%s7273_s30 + $0xa34] sm:$0xf0]  ;;  %v5464_v42 = vor.u32 %v6730_v27, %v5463_v26  ;;  %v5592_v53 = vor.u32 %v6762_v30, %v5591_v28  ;;  %v8243_v26 = vpop.f32.mrf.mxu2 }
 0x18f   : > { %3923 = vmatpush.bf16.msra.mxu0 %v5512_v61  ;;  %v5847_v12 = vld [vmem:[%s7273_s30 + $0xb28] sm:$0xf]  ;;  %v6826_v48 = vld [vmem:[%s7273_s30 + $0xb34] sm:$0xf0]  ;;  %v5720_v54 = vor.u32 %v6794_v34, %v5719_v33 }
 0x190   : > { %3937 = vmatpush.bf16.msra.mxu1 %v5640_v55  ;;  %v5447_v52 = vld [vmem:[%s7273_s30 + $0x808] sm:$0xf]  ;;  %v6726_v3 = vld [vmem:[%s7273_s30 + $0x814] sm:$0xf0]  ;;  %v5848_v60 = vor.u32 %v6826_v48, %v5847_v12  ;;  %v3608_v48 = vadd.f32 %v8191_v9, %v3594_v22 }
 0x191   : > { %3951 = vmatpush.bf16.msra.mxu2 %v5768_v56  ;;  %v5575_v61 = vld [vmem:[%s7273_s30 + $0x908] sm:$0xf]  ;;  %v6758_v55 = vld [vmem:[%s7273_s30 + $0x914] sm:$0xf0]  ;;  %v5448_v8 = vor.u32 %v6726_v3, %v5447_v52 }
 0x192   : > { %3965 = vmatpush.bf16.msra.mxu3 %v5896_v62  ;;  %v5703_v56 = vld [vmem:[%s7273_s30 + $0xa08] sm:$0xf]  ;;  %v6790_v63 = vld [vmem:[%s7273_s30 + $0xa14] sm:$0xf0]  ;;  %v5576_v14 = vor.u32 %v6758_v55, %v5575_v61 }
 0x193   : > { %3924 = vmatpush.bf16.msra.mxu0 %v5496_v57  ;;  %v5831_v62 = vld [vmem:[%s7273_s30 + $0xb08] sm:$0xf]  ;;  %v6822_v50 = vld [vmem:[%s7273_s30 + $0xb14] sm:$0xf0]  ;;  %v5704_v15 = vor.u32 %v6790_v63, %v5703_v56 }
 0x194   : > { %3938 = vmatpush.bf16.msra.mxu1 %v5624_v11  ;;  %v6071_v0 = vld [vmem:[%s7273_s30 + $0xce8] sm:$0xf]  ;;  %v6882_v5 = vld [vmem:[%s7273_s30 + $0xcf4] sm:$0xf0]  ;;  %v5832_v18 = vor.u32 %v6822_v50, %v5831_v62  ;;  %v8248_v33 = vpop.f32.mrf.mxu3  ;;  %v8256_v55 = vpop.f32.mrf.mxu1 }
 0x195   : > { %3952 = vmatpush.bf16.msra.mxu2 %v5752_v13  ;;  %v6199_v45 = vld [vmem:[%s7273_s30 + $0xde8] sm:$0xf]  ;;  %v6914_v57 = vld [vmem:[%s7273_s30 + $0xdf4] sm:$0xf0]  ;;  %v6072_v19 = vor.u32 %v6882_v5, %v6071_v0  ;;  %v3622_v5 = vadd.f32 %v8204_v29, %v3608_v48 }
 0x196   : > { %3966 = vmatpush.bf16.msra.mxu3 %v5880_v16  ;;  %v6327_v11 = vld [vmem:[%s7273_s30 + $0xee8] sm:$0xf]  ;;  %v6946_v13 = vld [vmem:[%s7273_s30 + $0xef4] sm:$0xf0]  ;;  %v6200_v20 = vor.u32 %v6914_v57, %v6199_v45  ;;  %v8279_v22 = vpop.f32.mrf.mxu2 }
 0x197   : > { %3925 = vmatpush.bf16.msra.mxu0 %v5480_v21  ;;  %v6455_v25 = vld [vmem:[%s7273_s30 + $0xfe8] sm:$0xf]  ;;  %v6978_v16 = vld [vmem:[%s7273_s30 + $0xff4] sm:$0xf0]  ;;  %v6328_v4 = vor.u32 %v6946_v13, %v6327_v11 }
 0x198   : > { %3939 = vmatpush.bf16.msra.mxu1 %v5608_v23  ;;  %v6055_v21 = vld [vmem:[%s7273_s30 + $0xcc8] sm:$0xf]  ;;  %v6878_v23 = vld [vmem:[%s7273_s30 + $0xcd4] sm:$0xf0]  ;;  %v6456_v27 = vor.u32 %v6978_v16, %v6455_v25 }
 0x199   : > { %3953 = vmatpush.bf16.msra.mxu2 %v5736_v24  ;;  %v6183_v24 = vld [vmem:[%s7273_s30 + $0xdc8] sm:$0xf]  ;;  %v6910_v28 = vld [vmem:[%s7273_s30 + $0xdd4] sm:$0xf0]  ;;  %v6056_v12 = vor.u32 %v6878_v23, %v6055_v21 }
 0x19a   : > { %3967 = vmatpush.bf16.msra.mxu3 %v5864_v51  ;;  %v6311_v51 = vld [vmem:[%s7273_s30 + $0xec8] sm:$0xf]  ;;  %v6942_v30 = vld [vmem:[%s7273_s30 + $0xed4] sm:$0xf0]  ;;  %v6184_v52 = vor.u32 %v6910_v28, %v6183_v24 }
 0x19b   : > { %3926 = vmatpush.bf16.msra.mxu0 %v5464_v42  ;;  %v6439_v6 = vld [vmem:[%s7273_s30 + $0xfc8] sm:$0xf]  ;;  %v6974_v34 = vld [vmem:[%s7273_s30 + $0xfd4] sm:$0xf0]  ;;  %v3649_v42 = vpop.f32.mrf.mxu0  ;;  %v6312_v3 = vor.u32 %v6942_v30, %v6311_v51 }
 0x19c   : > { %3940 = vmatpush.bf16.msra.mxu1 %v5592_v53  ;;  %v6039_v53 = vld [vmem:[%s7273_s30 + $0xca8] sm:$0xf]  ;;  %v6440_v56 = vor.u32 %v6974_v34, %v6439_v6  ;;  %v6938_v63 = vld [vmem:[%s7273_s30 + $0xeb4] sm:$0xf0]  ;;  %v8282_v21 = vpop.f32.mrf.mxu3  ;;  %v8293_v48 = vpop.f32.mrf.mxu1 }
 0x19d   : > { %3954 = vmatpush.bf16.msra.mxu2 %v5720_v54  ;;  %v6874_v54 = vld [vmem:[%s7273_s30 + $0xcb4] sm:$0xf0]  ;;  %v6167_v61 = vld [vmem:[%s7273_s30 + $0xda8] sm:$0xf] }
 0x19e   : > { %3968 = vmatpush.bf16.msra.mxu3 %v5848_v60  ;;  %v6906_v60 = vld [vmem:[%s7273_s30 + $0xdb4] sm:$0xf0]  ;;  %v6295_v9 = vld [vmem:[%s7273_s30 + $0xea8] sm:$0xf]  ;;  %v6040_v0 = vor.u32 %v6874_v54, %v6039_v53 }
 0x19f   : > { %3927 = vmatpush.bf16.msra.mxu0 %v5448_v8  ;;  %v6423_v62 = vld [vmem:[%s7273_s30 + $0xfa8] sm:$0xf]  ;;  %v6970_v50 = vld [vmem:[%s7273_s30 + $0xfb4] sm:$0xf0]  ;;  %v6168_v45 = vor.u32 %v6906_v60, %v6167_v61  ;;  %v6296_v8 = vor.u32 %v6938_v63, %v6295_v9 }
 0x1a0   : > { %3941 = vmatpush.bf16.msra.mxu1 %v5576_v14  ;;  %v6023_v57 = vld [vmem:[%s7273_s30 + $0xc88] sm:$0xf]  ;;  %v6870_v11 = vld [vmem:[%s7273_s30 + $0xc94] sm:$0xf0]  ;;  %v6424_v14 = vor.u32 %v6970_v50, %v6423_v62 }
 0x1a1   : > { %3955 = vmatpush.bf16.msra.mxu2 %v5704_v15  ;;  %v6151_v13 = vld [vmem:[%s7273_s30 + $0xd88] sm:$0xf]  ;;  %v6902_v15 = vld [vmem:[%s7273_s30 + $0xd94] sm:$0xf0] }
 0x1a2   : > { %3969 = vmatpush.bf16.msra.mxu3 %v5832_v18  ;;  %3928 = vmatmul.bf16.vlgmr.msra.gmra.mxu0 %v7586_v31  ;;  %v6279_v25 = vld [vmem:[%s7273_s30 + $0xe88] sm:$0xf]  ;;  %v6934_v16 = vld [vmem:[%s7273_s30 + $0xe94] sm:$0xf0]  ;;  %v3596_v18 = vadd.f32 %v8219_v7, %v793_v2  ;;  %v6152_v49 = vor.u32 %v6902_v15, %v6151_v13 }
 0x1a3   : > { %3976 = vmatpush.bf16.msrb.mxu0 %v6072_v19  ;;  %3942 = vmatmul.bf16.vlgmr.msra.gmra.mxu1 %v7593_v36  ;;  %v6407_v29 = vld [vmem:[%s7273_s30 + $0xf88] sm:$0xf]  ;;  %v6966_v19 = vld [vmem:[%s7273_s30 + $0xf94] sm:$0xf0]  ;;  %v6280_v23 = vor.u32 %v6934_v16, %v6279_v25  ;;  %v3651_v6 = vpop.f32.mrf.mxu0 }
 0x1a4   : > { %3990 = vmatpush.bf16.msrb.mxu1 %v6200_v20  ;;  %3956 = vmatmul.bf16.vlgmr.msra.gmra.mxu2 %v7591_v35  ;;  %v6024_v20 = vor.u32 %v6870_v11, %v6023_v57  ;;  %v6007_v2 = vld [vmem:[%s7273_s30 + $0xc68] sm:$0xf]  ;;  %v6866_v7 = vld [vmem:[%s7273_s30 + $0xc74] sm:$0xf0] }
 0x1a5   : > { %4004 = vmatpush.bf16.msrb.mxu2 %v6328_v4  ;;  %3970 = vmatmul.bf16.vlgmr.msra.gmra.mxu3 %v7597_v40  ;;  %v3636_v4 = vadd.f32 %v8209_v37, %v3622_v5  ;;  %v6135_v24 = vld [vmem:[%s7273_s30 + $0xd68] sm:$0xf]  ;;  %v6898_v28 = vld [vmem:[%s7273_s30 + $0xd74] sm:$0xf0]  ;;  %v3610_v37 = vadd.f32 %v8224_v59, %v3596_v18 }
 0x1a6   : > { %4018 = vmatpush.bf16.msrb.mxu3 %v6456_v27  ;;  %v6408_v27 = vor.u32 %v6966_v19, %v6407_v29  ;;  %v6263_v51 = vld [vmem:[%s7273_s30 + $0xe68] sm:$0xf]  ;;  %v6930_v30 = vld [vmem:[%s7273_s30 + $0xe74] sm:$0xf0]  ;;  %v6136_v53 = vor.u32 %v6898_v28, %v6135_v24  ;;  %v8312_v29 = vpop.f32.mrf.mxu3 }
 0x1a7   : > { %3977 = vmatpush.bf16.msrb.mxu0 %v6056_v12  ;;  %v6391_v34 = vld [vmem:[%s7273_s30 + $0xf68] sm:$0xf]  ;;  %v6962_v12 = vld [vmem:[%s7273_s30 + $0xf74] sm:$0xf0]  ;;  %v6264_v54 = vor.u32 %v6930_v30, %v6263_v51  ;;  %v3624_v50 = vadd.f32 %v8243_v26, %v3610_v37  ;;  %v3679_v26 = vpop.f32.mrf.mxu2 }
 0x1a8   : > { %3991 = vmatpush.bf16.msrb.mxu1 %v6184_v52  ;;  %v6008_v52 = vor.u32 %v6866_v7, %v6007_v2  ;;  %v5991_v61 = vld [vmem:[%s7273_s30 + $0xc48] sm:$0xf]  ;;  %v6392_v60 = vor.u32 %v6962_v12, %v6391_v34  ;;  %v6894_v9 = vld [vmem:[%s7273_s30 + $0xd54] sm:$0xf0] }
 0x1a9   : > { %4005 = vmatpush.bf16.msrb.mxu2 %v6312_v3  ;;  %v3650_v3 = vadd.f32 %v3649_v42, %v3636_v4  ;;  %v6119_v59 = vld [vmem:[%s7273_s30 + $0xd48] sm:$0xf]  ;;  %v6926_v62 = vld [vmem:[%s7273_s30 + $0xe54] sm:$0xf0] }
 0x1aa   : > { %4019 = vmatpush.bf16.msrb.mxu3 %v6440_v56  ;;  %v6862_v56 = vld [vmem:[%s7273_s30 + $0xc54] sm:$0xf0]  ;;  %v6247_v63 = vld [vmem:[%s7273_s30 + $0xe48] sm:$0xf] }
 0x1ab   : > { %3978 = vmatpush.bf16.msrb.mxu0 %v6040_v0  ;;  %v6375_v0 = vld [vmem:[%s7273_s30 + $0xf48] sm:$0xf]  ;;  %v6958_v42 = vld [vmem:[%s7273_s30 + $0xf54] sm:$0xf0]  ;;  %v5992_v5 = vor.u32 %v6862_v56, %v5991_v61  ;;  %v6248_v57 = vor.u32 %v6926_v62, %v6247_v63  ;;  %v3705_v19 = vpop.f32.mrf.mxu0  ;;  %v4665_v56 = vld [vmem:[%s7273_s30 + $0x1f8] sm:$0xf0] }
 0x1ac   : > { %3992 = vmatpush.bf16.msrb.mxu1 %v6168_v45  ;;  %v3664_v45 = vadd.f32 %v8256_v55, %v3650_v3  ;;  %v5975_v11 = vld [vmem:[%s7273_s30 + $0xc28] sm:$0xf]  ;;  %v6858_v13 = vld [vmem:[%s7273_s30 + $0xc34] sm:$0xf0]  ;;  %v6376_v15 = vor.u32 %v6958_v42, %v6375_v0  ;;  %v3638_v55 = vadd.f32 %v8248_v33, %v3624_v50  ;;  %v6592_v50 = vld [vmem:[%s7273_s30 + $0x3ec] sm:$0xf] }
 0x1ad   : > { %4006 = vmatpush.bf16.msrb.mxu2 %v6296_v8  ;;  %v6120_v8 = vor.u32 %v6894_v9, %v6119_v59  ;;  %v6890_v25 = vld [vmem:[%s7273_s30 + $0xd34] sm:$0xf0]  ;;  %v6231_v16 = vld [vmem:[%s7273_s30 + $0xe28] sm:$0xf]  ;;  %v6560_v59 = vld [vmem:[%s7273_s30 + $0x2ec] sm:$0xf] }
 0x1ae   : > { %4020 = vmatpush.bf16.msrb.mxu3 %v6424_v14  ;;  %v6103_v14 = vld [vmem:[%s7273_s30 + $0xd28] sm:$0xf]  ;;  %v6922_v18 = vld [vmem:[%s7273_s30 + $0xe34] sm:$0xf0]  ;;  %v3678_v24 = vadd.f32 %v8279_v22, %v3664_v45  ;;  %v3652_v3 = vadd.f32 %v3651_v6, %v3638_v55  ;;  %v6496_v22 = vld [vmem:[%s7273_s30 + $0xec] sm:$0xf] }
 0x1af   : > { %3979 = vmatpush.bf16.msrb.mxu0 %v6024_v20  ;;  %v6359_v20 = vld [vmem:[%s7273_s30 + $0xf28] sm:$0xf]  ;;  %v6954_v4 = vld [vmem:[%s7273_s30 + $0xf34] sm:$0xf0]  ;;  %v6104_v33 = vor.u32 %v6890_v25, %v6103_v14  ;;  %v4921_v6 = vld [vmem:[%s7273_s30 + $0x3f8] sm:$0xf0]  ;;  %v3733_v0 = vpop.f32.mrf.mxu2 }
 0x1b0   : > { %3993 = vmatpush.bf16.msrb.mxu1 %v6152_v49  ;;  %v3719_v49 = vpop.f32.mrf.mxu1  ;;  %v5959_v2 = vld [vmem:[%s7273_s30 + $0xc08] sm:$0xf]  ;;  %v6854_v7 = vld [vmem:[%s7273_s30 + $0xc14] sm:$0xf0]  ;;  %v6360_v37 = vor.u32 %v6954_v4, %v6359_v20  ;;  %v3692_v9 = vadd.f32 %v8282_v21, %v3678_v24  ;;  %v3666_v45 = vadd.f32 %v8293_v48, %v3652_v3  ;;  %v3747_v21 = vpop.f32.mrf.mxu3  ;;  %v4521_v14 = vld [vmem:[%s7273_s30 + $0xd8] sm:$0xf0]  ;;  %v4924_v25 = vor.u32 %v6592_v50, %v4921_v6 }
 0x1b1   : > { %4007 = vmatpush.bf16.msrb.mxu2 %v6280_v23  ;;  %v5976_v23 = vor.u32 %v6858_v13, %v5975_v11  ;;  %v6087_v28 = vld [vmem:[%s7273_s30 + $0xd08] sm:$0xf]  ;;  %v6886_v51 = vld [vmem:[%s7273_s30 + $0xd14] sm:$0xf0]  ;;  %v5960_v61 = vor.u32 %v6854_v7, %v5959_v2  ;;  %v6492_v13 = vld [vmem:[%s7273_s30 + $0xcc] sm:$0xf] }
 0x1b2   : > { %4021 = vmatpush.bf16.msrb.mxu3 %v6408_v27  ;;  %v6232_v27 = vor.u32 %v6922_v18, %v6231_v16  ;;  %v6215_v30 = vld [vmem:[%s7273_s30 + $0xe08] sm:$0xf]  ;;  %v6918_v34 = vld [vmem:[%s7273_s30 + $0xe14] sm:$0xf0]  ;;  %v6088_v63 = vor.u32 %v6886_v51, %v6087_v28  ;;  %v4649_v16 = vld [vmem:[%s7273_s30 + $0x1d8] sm:$0xf0]  ;;  %v3680_v20 = vadd.f32 %v3679_v26, %v3666_v45  ;;  %v4524_v2 = vor.u32 %v6492_v13, %v4521_v14 }
 0x1b3   : > { %3980 = vmatpush.bf16.msrb.mxu0 %v6008_v52  ;;  %v6343_v12 = vld [vmem:[%s7273_s30 + $0xf08] sm:$0xf]  ;;  %v6950_v52 = vld [vmem:[%s7273_s30 + $0xf14] sm:$0xf0]  ;;  %v6216_v62 = vor.u32 %v6918_v34, %v6215_v30  ;;  %v6556_v18 = vld [vmem:[%s7273_s30 + $0x2cc] sm:$0xf]  ;;  %v3707_v4 = vpop.f32.mrf.mxu0 }
 0x1b4   : > { %3994 = vmatpush.bf16.msrb.mxu1 %v6136_v53  ;;  %v4537_v53 = vld [vmem:[%s7273_s30 + $0xf8] sm:$0xf0]  ;;  %v6344_v42 = vor.u32 %v6950_v52, %v6343_v12  ;;  %v6588_v48 = vld [vmem:[%s7273_s30 + $0x3cc] sm:$0xf] }
 0x1b5   : > { %4008 = vmatpush.bf16.msrb.mxu2 %v6264_v54  ;;  %v6528_v54 = vld [vmem:[%s7273_s30 + $0x1ec] sm:$0xf]  ;;  %v4777_v55 = vld [vmem:[%s7273_s30 + $0x2d8] sm:$0xf0] }
 0x1b6   : > { %4022 = vmatpush.bf16.msrb.mxu3 %v6392_v60  ;;  %v4793_v60 = vld [vmem:[%s7273_s30 + $0x2f8] sm:$0xf0]  ;;  %v4780_v26 = vor.u32 %v6556_v18, %v4777_v55  ;;  %v6520_v28 = vld [vmem:[%s7273_s30 + $0x1ac] sm:$0xf] }
 0x1b7   : > { %3981 = vmatpush.bf16.msrb.mxu0 %v5992_v5  ;;  %v4540_v5 = vor.u32 %v6496_v22, %v4537_v53  ;;  %v4796_v11 = vor.u32 %v6560_v59, %v4793_v60  ;;  %v4633_v30 = vld [vmem:[%s7273_s30 + $0x1b8] sm:$0xf0]  ;;  %v6584_v52 = vld [vmem:[%s7273_s30 + $0x3ac] sm:$0xf] }
 0x1b8   : > { %3995 = vmatpush.bf16.msrb.mxu1 %v6120_v8  ;;  %v3706_v8 = vadd.f32 %v3705_v19, %v3692_v9  ;;  %v4905_v19 = vld [vmem:[%s7273_s30 + $0x3d8] sm:$0xf0]  ;;  %v6484_v53 = vld [vmem:[%s7273_s30 + $0x8c] sm:$0xf]  ;;  %v3735_v9 = vpop.f32.mrf.mxu2 }
 0x1b9   : > { %4009 = vmatpush.bf16.msrb.mxu2 %v6248_v57  ;;  %v4668_v57 = vor.u32 %v6528_v54, %v4665_v56  ;;  %v4908_v51 = vor.u32 %v6588_v48, %v4905_v19  ;;  %v4761_v34 = vld [vmem:[%s7273_s30 + $0x2b8] sm:$0xf0]  ;;  %v6516_v59 = vld [vmem:[%s7273_s30 + $0x18c] sm:$0xf] }
 0x1ba   : > { %4023 = vmatpush.bf16.msrb.mxu3 %v6376_v15  ;;  %v6524_v15 = vld [vmem:[%s7273_s30 + $0x1cc] sm:$0xf]  ;;  %v3720_v7 = vadd.f32 %v3719_v49, %v3706_v8  ;;  %v3694_v49 = vadd.f32 %v8312_v29, %v3680_v20  ;;  %v4889_v3 = vld [vmem:[%s7273_s30 + $0x3b8] sm:$0xf0]  ;;  %v4636_v29 = vor.u32 %v6520_v28, %v4633_v30 }
 0x1bb   : > { %3982 = vmatpush.bf16.msrb.mxu0 %v5976_v23  ;;  %v3721_v23 = vpop.f32.mrf.mxu1  ;;  %v4652_v24 = vor.u32 %v6524_v15, %v4649_v16  ;;  %v4489_v56 = vld [vmem:[%s7273_s30 + $0x98] sm:$0xf0]  ;;  %v6480_v15 = vld [vmem:[%s7273_s30 + $0x6c] sm:$0xf] }
 0x1bc   : > { %3996 = vmatpush.bf16.msrb.mxu1 %v6104_v33  ;;  %v6488_v33 = vld [vmem:[%s7273_s30 + $0xac] sm:$0xf]  ;;  %v3734_v12 = vadd.f32 %v3733_v0, %v3720_v7  ;;  %v3708_v54 = vadd.f32 %v3707_v4, %v3694_v49  ;;  %v4617_v60 = vld [vmem:[%s7273_s30 + $0x198] sm:$0xf0]  ;;  %v3749_v0 = vpop.f32.mrf.mxu3  ;;  %v4492_v8 = vor.u32 %v6484_v53, %v4489_v56 }
 0x1bd   : > { %4010 = vmatpush.bf16.msrb.mxu2 %v6232_v27  ;;  %v4505_v27 = vld [vmem:[%s7273_s30 + $0xb8] sm:$0xf0]  ;;  %v6512_v16 = vld [vmem:[%s7273_s30 + $0x16c] sm:$0xf] }
 0x1be   : > { %4024 = vmatpush.bf16.msrb.mxu3 %v6360_v37  ;;  %v6552_v37 = vld [vmem:[%s7273_s30 + $0x2ac] sm:$0xf]  ;;  %v4508_v22 = vor.u32 %v6488_v33, %v4505_v27  ;;  %v4745_v50 = vld [vmem:[%s7273_s30 + $0x298] sm:$0xf0]  ;;  %v3748_v6 = vadd.f32 %v3747_v21, %v3734_v12  ;;  %v3722_v13 = vadd.f32 %v3721_v23, %v3708_v54 }
 0x1bf   : > { %3983 = vmatpush.bf16.msrb.mxu0 %v5960_v61  ;;  %v4764_v61 = vor.u32 %v6552_v37, %v4761_v34  ;;  %v4873_v45 = vld [vmem:[%s7273_s30 + $0x398] sm:$0xf0]  ;;  %v6544_v20 = vld [vmem:[%s7273_s30 + $0x26c] sm:$0xf] }
 0x1c0   : > { %3997 = vmatpush.bf16.msrb.mxu1 %v6088_v63  ;;  %v4892_v63 = vor.u32 %v6584_v52, %v4889_v3  ;;  %v4601_v55 = vld [vmem:[%s7273_s30 + $0x178] sm:$0xf0]  ;;  %v3736_v48 = vadd.f32 %v3735_v9, %v3722_v13  ;;  %v6576_v19 = vld [vmem:[%s7273_s30 + $0x36c] sm:$0xf] }
 0x1c1   : > { %4011 = vmatpush.bf16.msrb.mxu2 %v6216_v62  ;;  %v6548_v62 = vld [vmem:[%s7273_s30 + $0x28c] sm:$0xf]  ;;  %v4729_v4 = vld [vmem:[%s7273_s30 + $0x278] sm:$0xf0] }
 0x1c2   : > { %4025 = vmatpush.bf16.msrb.mxu3 %v6344_v42  ;;  %3984 = vmatmul.bf16.vlgmr.msrb.gmra.mxu0 %v7686_v32  ;;  %v3761_v42 = vpop.f32.mrf.mxu0  ;;  %v4748_v21 = vor.u32 %v6548_v62, %v4745_v50  ;;  %v4857_v23 = vld [vmem:[%s7273_s30 + $0x378] sm:$0xf0]  ;;  %v6476_v7 = vld [vmem:[%s7273_s30 + $0x4c] sm:$0xf]  ;;  %v4732_v33 = vor.u32 %v6544_v20, %v4729_v4  ;;  %v3750_v12 = vadd.f32 %v3749_v0, %v3736_v48 }
 0x1c3   : > { %4032 = vmatpush.bf16.msra.mxu0 %v4540_v5  ;;  %3998 = vmatmul.bf16.vlgmr.msrb.gmra.mxu1 %v7693_v41  ;;  %v6580_v5 = vld [vmem:[%s7273_s30 + $0x38c] sm:$0xf]  ;;  %v3762_v14 = vadd.f32 %v3761_v42, %v3748_v6  ;;  %v4457_v27 = vld [vmem:[%s7273_s30 + $0x58] sm:$0xf0]  ;;  %v4860_v30 = vor.u32 %v6576_v19, %v4857_v23 }
 0x1c4   : > { %4046 = vmatpush.bf16.msra.mxu1 %v4668_v57  ;;  %4012 = vmatmul.bf16.vlgmr.msrb.gmra.mxu2 %v7691_v38  ;;  %v4620_v57 = vor.u32 %v6516_v59, %v4617_v60  ;;  %v4876_v18 = vor.u32 %v6580_v5, %v4873_v45  ;;  %v6508_v28 = vld [vmem:[%s7273_s30 + $0x14c] sm:$0xf]  ;;  %v4713_v49 = vld [vmem:[%s7273_s30 + $0x258] sm:$0xf0] }
 0x1c5   : > { %4060 = vmatpush.bf16.msra.mxu2 %v4796_v11  ;;  %4026 = vmatmul.bf16.vlgmr.msrb.gmra.mxu3 %v7697_v46  ;;  %v3775_v11 = vpop.f32.mrf.mxu1  ;;  %v6540_v34 = vld [vmem:[%s7273_s30 + $0x24c] sm:$0xf]  ;;  %v4841_v54 = vld [vmem:[%s7273_s30 + $0x358] sm:$0xf0] }
 0x1c6   : > { %4074 = vmatpush.bf16.msra.mxu3 %v4924_v25  ;;  %v4473_v25 = vld [vmem:[%s7273_s30 + $0x78] sm:$0xf0]  ;;  %v6572_v53 = vld [vmem:[%s7273_s30 + $0x34c] sm:$0xf]  ;;  %v4716_v60 = vor.u32 %v6540_v34, %v4713_v49 }
 0x1c7   : > { %4033 = vmatpush.bf16.msra.mxu0 %v4524_v2  ;;  %v4476_v2 = vor.u32 %v6480_v15, %v4473_v25  ;;  %v3789_v37 = vpop.f32.mrf.mxu2  ;;  %v6472_v9 = vld [vmem:[%s7273_s30 + $0x2c] sm:$0xf]  ;;  %v4844_v50 = vor.u32 %v6572_v53, %v4841_v54  ;;  %v4569_v0 = vld [vmem:[%s7273_s30 + $0x138] sm:$0xf0] }
 0x1c8   : > { %4047 = vmatpush.bf16.msra.mxu1 %v4652_v24  ;;  %v3776_v24 = vadd.f32 %v3775_v11, %v3762_v14  ;;  %v6504_v62 = vld [vmem:[%s7273_s30 + $0x12c] sm:$0xf]  ;;  %v4697_v5 = vld [vmem:[%s7273_s30 + $0x238] sm:$0xf0] }
 0x1c9   : > { %4061 = vmatpush.bf16.msra.mxu2 %v4780_v26  ;;  %v4604_v26 = vor.u32 %v6512_v16, %v4601_v55  ;;  %v6536_v42 = vld [vmem:[%s7273_s30 + $0x22c] sm:$0xf]  ;;  %v4425_v13 = vld [vmem:[%s7273_s30 + $0x18] sm:$0xf0] }
 0x1ca   : > { %4075 = vmatpush.bf16.msra.mxu3 %v4908_v51  ;;  %v4585_v51 = vld [vmem:[%s7273_s30 + $0x158] sm:$0xf0]  ;;  %v3790_v52 = vadd.f32 %v3789_v37, %v3776_v24  ;;  %v3763_v3 = vpop.f32.mrf.mxu0  ;;  %v6568_v45 = vld [vmem:[%s7273_s30 + $0x32c] sm:$0xf]  ;;  %v4700_v15 = vor.u32 %v6536_v42, %v4697_v5 }
 0x1cb   : > { %4034 = vmatpush.bf16.msra.mxu0 %v4508_v22  ;;  %v3803_v22 = vpop.f32.mrf.mxu3  ;;  %v3764_v56 = vadd.f32 %v3763_v3, %v3750_v12  ;;  %v6468_v11 = vld [vmem:[%s7273_s30 + $0xc] sm:$0xf]  ;;  %v4553_v16 = vld [vmem:[%s7273_s30 + $0x118] sm:$0xf0] }
 0x1cc   : > { %4048 = vmatpush.bf16.msra.mxu1 %v4636_v29  ;;  %v4460_v29 = vor.u32 %v6476_v7, %v4457_v27  ;;  %v3804_v59 = vadd.f32 %v3803_v22, %v3790_v52  ;;  %v6500_v25 = vld [vmem:[%s7273_s30 + $0x10c] sm:$0xf]  ;;  %v4681_v4 = vld [vmem:[%s7273_s30 + $0x218] sm:$0xf0] }
 0x1cd   : > { %4062 = vmatpush.bf16.msra.mxu2 %v4764_v61  ;;  %v4588_v61 = vor.u32 %v6508_v28, %v4585_v51  ;;  %v3777_v6 = vpop.f32.mrf.mxu1  ;;  %v6564_v48 = vld [vmem:[%s7273_s30 + $0x30c] sm:$0xf]  ;;  %v4809_v19 = vld [vmem:[%s7273_s30 + $0x318] sm:$0xf0]  ;;  %v4556_v34 = vor.u32 %v6500_v25, %v4553_v16 }
 0x1ce   : > { %4076 = vmatpush.bf16.msra.mxu3 %v4892_v63  ;;  %v4441_v63 = vld [vmem:[%s7273_s30 + $0x38] sm:$0xf0]  ;;  %7030 = vtanh.f32 %v3804_v59  ;;  %v3778_v14 = vadd.f32 %v3777_v6, %v3764_v56  ;;  %v6624_v7 = vld [vmem:[%s7273_s30 + $0x4ec] sm:$0xf]  ;;  %v4812_v3 = vor.u32 %v6564_v48, %v4809_v19 }
 0x1cf   : > { %4035 = vmatpush.bf16.msra.mxu0 %v4492_v8  ;;  %v4825_v8 = vld [vmem:[%s7273_s30 + $0x338] sm:$0xf0]  ;;  %v3791_v20 = vpop.f32.mrf.mxu2  ;;  %v6688_v28 = vld [vmem:[%s7273_s30 + $0x6ec] sm:$0xf] }
 0x1d0   : > { %4049 = vmatpush.bf16.msra.mxu1 %v4620_v57  ;;  %v4444_v57 = vor.u32 %v6472_v9, %v4441_v63  ;;  %v4828_v55 = vor.u32 %v6568_v45, %v4825_v8  ;;  %v3792_v23 = vadd.f32 %v3791_v20, %v3778_v14  ;;  %v5049_v24 = vld [vmem:[%s7273_s30 + $0x4f8] sm:$0xf0]  ;;  %v6720_v12 = vld [vmem:[%s7273_s30 + $0x7ec] sm:$0xf] }
 0x1d1   : > { %4063 = vmatpush.bf16.msra.mxu2 %v4748_v21  ;;  %v4572_v21 = vor.u32 %v6504_v62, %v4569_v0  ;;  %v5177_v27 = vld [vmem:[%s7273_s30 + $0x5f8] sm:$0xf0]  ;;  %v5052_v22 = vor.u32 %v6624_v7, %v5049_v24  ;;  %v6652_v56 = vld [vmem:[%s7273_s30 + $0x5cc] sm:$0xf] }
 0x1d2   : > { %4077 = vmatpush.bf16.msra.mxu3 %v4876_v18  ;;  %v6532_v18 = vld [vmem:[%s7273_s30 + $0x20c] sm:$0xf]  ;;  %v5305_v51 = vld [vmem:[%s7273_s30 + $0x6f8] sm:$0xf0] }
 0x1d3   : > { %4036 = vmatpush.bf16.msra.mxu0 %v4476_v2  ;;  %v3805_v2 = vpop.f32.mrf.mxu3  ;;  %v4684_v49 = vor.u32 %v6532_v18, %v4681_v4  ;;  %v5433_v52 = vld [vmem:[%s7273_s30 + $0x7f8] sm:$0xf0]  ;;  %v5308_v54 = vor.u32 %v6688_v28, %v5305_v51  ;;  %v6684_v9 = vld [vmem:[%s7273_s30 + $0x6cc] sm:$0xf] }
 0x1d4   : > { %4050 = vmatpush.bf16.msra.mxu1 %v4604_v26  ;;  %v6656_v26 = vld [vmem:[%s7273_s30 + $0x5ec] sm:$0xf]  ;;  %v3806_v37 = vadd.f32 %v3805_v2, %v3792_v23  ;;  %v5436_v59 = vor.u32 %v6720_v12, %v5433_v52  ;;  %v5289_v63 = vld [vmem:[%s7273_s30 + $0x6d8] sm:$0xf0] }
 0x1d5   : > { %4064 = vmatpush.bf16.msra.mxu2 %v4732_v33  ;;  %v4428_v33 = vor.u32 %v6468_v11, %v4425_v13  ;;  %v5180_v53 = vor.u32 %v6656_v26, %v5177_v27  ;;  %v6716_v62 = vld [vmem:[%s7273_s30 + $0x7cc] sm:$0xf]  ;;  %v5292_v42 = vor.u32 %v6684_v9, %v5289_v63  ;;  %v5017_v45 = vld [vmem:[%s7273_s30 + $0x4b8] sm:$0xf0] }
 0x1d6   : > { %4078 = vmatpush.bf16.msra.mxu3 %v4860_v30  ;;  %v7031_v30 = vpop.eup %7030  ;;  %7032 = vtanh.f32 %v3806_v37  ;;  %v6616_v5 = vld [vmem:[%s7273_s30 + $0x4ac] sm:$0xf]  ;;  %v5145_v11 = vld [vmem:[%s7273_s30 + $0x5b8] sm:$0xf0] }
 0x1d7   : > { %4037 = vmatpush.bf16.msra.mxu0 %v4460_v29  ;;  %4265 = vst [vmem:[%s8081_s21 + $0x8] sm:$0xff] %v7031_v30  ;;  %v6620_v29 = vld [vmem:[%s7273_s30 + $0x4cc] sm:$0xf]  ;;  %v5273_v14 = vld [vmem:[%s7273_s30 + $0x6b8] sm:$0xf0]  ;;  %v5020_v16 = vor.u32 %v6616_v5, %v5017_v45 }
 0x1d8   : > { %4051 = vmatpush.bf16.msra.mxu1 %v4588_v61  ;;  %v5033_v61 = vld [vmem:[%s7273_s30 + $0x4d8] sm:$0xf0]  ;;  %v6648_v8 = vld [vmem:[%s7273_s30 + $0x5ac] sm:$0xf] }
 0x1d9   : > { %4065 = vmatpush.bf16.msra.mxu2 %v4716_v60  ;;  %v5161_v60 = vld [vmem:[%s7273_s30 + $0x5d8] sm:$0xf0]  ;;  %v5036_v6 = vor.u32 %v6620_v29, %v5033_v61  ;;  %v6680_v13 = vld [vmem:[%s7273_s30 + $0x6ac] sm:$0xf] }
 0x1da   : > { %4079 = vmatpush.bf16.msra.mxu3 %v4844_v50  ;;  %v5417_v50 = vld [vmem:[%s7273_s30 + $0x7d8] sm:$0xf0]  ;;  %v5164_v0 = vor.u32 %v6652_v56, %v5161_v60  ;;  %v5276_v18 = vor.u32 %v6680_v13, %v5273_v14  ;;  %v6676_v48 = vld [vmem:[%s7273_s30 + $0x68c] sm:$0xf] }
 0x1db   : > { %4038 = vmatpush.bf16.msra.mxu0 %v4444_v57  ;;  %v5420_v57 = vor.u32 %v6716_v62, %v5417_v50  ;;  %v5401_v25 = vld [vmem:[%s7273_s30 + $0x7b8] sm:$0xf0]  ;;  %v6708_v23 = vld [vmem:[%s7273_s30 + $0x78c] sm:$0xf] }
 0x1dc   : > { %4052 = vmatpush.bf16.msra.mxu1 %v4572_v21  ;;  %v7033_v21 = vpop.eup %7032  ;;  %v5001_v20 = vld [vmem:[%s7273_s30 + $0x498] sm:$0xf0]  ;;  %v6608_v26 = vld [vmem:[%s7273_s30 + $0x46c] sm:$0xf] }
 0x1dd   : > { %4066 = vmatpush.bf16.msra.mxu2 %v4700_v15  ;;  %v6712_v15 = vld [vmem:[%s7273_s30 + $0x7ac] sm:$0xf]  ;;  %4269 = vst [vmem:[%s8081_s21 + $0x28] sm:$0xff] %v7033_v21  ;;  %v5129_v4 = vld [vmem:[%s7273_s30 + $0x598] sm:$0xf0] }
 0x1de   : > { %4080 = vmatpush.bf16.msra.mxu3 %v4828_v55  ;;  %v6612_v55 = vld [vmem:[%s7273_s30 + $0x48c] sm:$0xf]  ;;  %v5257_v19 = vld [vmem:[%s7273_s30 + $0x698] sm:$0xf0] }
 0x1df   : > { %4039 = vmatpush.bf16.msra.mxu0 %v4428_v33  ;;  %v5004_v2 = vor.u32 %v6612_v55, %v5001_v20  ;;  %v5260_v24 = vor.u32 %v6676_v48, %v5257_v19  ;;  %v4985_v33 = vld [vmem:[%s7273_s30 + $0x478] sm:$0xf0]  ;;  %v6640_v27 = vld [vmem:[%s7273_s30 + $0x56c] sm:$0xf] }
 0x1e0   : > { %4053 = vmatpush.bf16.msra.mxu1 %v4556_v34  ;;  %v5113_v51 = vld [vmem:[%s7273_s30 + $0x578] sm:$0xf0]  ;;  %v6672_v30 = vld [vmem:[%s7273_s30 + $0x66c] sm:$0xf]  ;;  %v4988_v12 = vor.u32 %v6608_v26, %v4985_v33 }
 0x1e1   : > { %4067 = vmatpush.bf16.msra.mxu2 %v4684_v49  ;;  %v5241_v37 = vld [vmem:[%s7273_s30 + $0x678] sm:$0xf0]  ;;  %v6704_v34 = vld [vmem:[%s7273_s30 + $0x76c] sm:$0xf]  ;;  %v5116_v52 = vor.u32 %v6640_v27, %v5113_v51 }
 0x1e2   : > { %4081 = vmatpush.bf16.msra.mxu3 %v4812_v3  ;;  %4040 = vmatmul.bf16.vlgmr.msra.gmra.mxu0 %v7378_v58  ;;  %v5148_v58 = vor.u32 %v6648_v8, %v5145_v11  ;;  %v5369_v49 = vld [vmem:[%s7273_s30 + $0x778] sm:$0xf0]  ;;  %v5244_v3 = vor.u32 %v6672_v30, %v5241_v37  ;;  %v6668_v56 = vld [vmem:[%s7273_s30 + $0x64c] sm:$0xf] }
 0x1e3   : > { %4088 = vmatpush.bf16.msrb.mxu0 %v5052_v22  ;;  %4054 = vmatmul.bf16.vlgmr.msra.gmra.mxu1 %v7402_v10  ;;  %v5404_v10 = vor.u32 %v6712_v15, %v5401_v25  ;;  %v6604_v22 = vld [vmem:[%s7273_s30 + $0x44c] sm:$0xf]  ;;  %v5372_v29 = vor.u32 %v6704_v34, %v5369_v49  ;;  %v5097_v61 = vld [vmem:[%s7273_s30 + $0x558] sm:$0xf0] }
 0x1e4   : > { %4102 = vmatpush.bf16.msrb.mxu1 %v5180_v53  ;;  %4068 = vmatmul.bf16.vlgmr.msra.gmra.mxu2 %v7386_v1  ;;  %v6644_v1 = vld [vmem:[%s7273_s30 + $0x58c] sm:$0xf]  ;;  %v4969_v53 = vld [vmem:[%s7273_s30 + $0x458] sm:$0xf0] }
 0x1e5   : > { %4116 = vmatpush.bf16.msrb.mxu2 %v5308_v54  ;;  %4082 = vmatmul.bf16.vlgmr.msra.gmra.mxu3 %v7410_v17  ;;  %v5385_v17 = vld [vmem:[%s7273_s30 + $0x798] sm:$0xf0]  ;;  %v5132_v7 = vor.u32 %v6644_v1, %v5129_v4  ;;  %v6636_v54 = vld [vmem:[%s7273_s30 + $0x54c] sm:$0xf]  ;;  %v4972_v63 = vor.u32 %v6604_v22, %v4969_v53 }
 0x1e6   : > { %4130 = vmatpush.bf16.msrb.mxu3 %v5436_v59  ;;  %v5388_v28 = vor.u32 %v6708_v23, %v5385_v17  ;;  %v5225_v59 = vld [vmem:[%s7273_s30 + $0x658] sm:$0xf0]  ;;  %v6700_v60 = vld [vmem:[%s7273_s30 + $0x74c] sm:$0xf]  ;;  %v5100_v62 = vor.u32 %v6636_v54, %v5097_v61 }
 0x1e7   : > { %4089 = vmatpush.bf16.msrb.mxu0 %v5036_v6  ;;  %v5353_v9 = vld [vmem:[%s7273_s30 + $0x758] sm:$0xf0]  ;;  %v5228_v50 = vor.u32 %v6668_v56, %v5225_v59  ;;  %v6600_v6 = vld [vmem:[%s7273_s30 + $0x42c] sm:$0xf] }
 0x1e8   : > { %4103 = vmatpush.bf16.msrb.mxu1 %v5164_v0  ;;  %v4953_v0 = vld [vmem:[%s7273_s30 + $0x438] sm:$0xf0]  ;;  %v5356_v5 = vor.u32 %v6700_v60, %v5353_v9  ;;  %v6664_v8 = vld [vmem:[%s7273_s30 + $0x62c] sm:$0xf] }
 0x1e9   : > { %4117 = vmatpush.bf16.msrb.mxu2 %v5292_v42  ;;  %v6632_v42 = vld [vmem:[%s7273_s30 + $0x52c] sm:$0xf]  ;;  %v5081_v45 = vld [vmem:[%s7273_s30 + $0x538] sm:$0xf0]  ;;  %v4956_v14 = vor.u32 %v6600_v6, %v4953_v0 }
 0x1ea   : > { %4131 = vmatpush.bf16.msrb.mxu3 %v5420_v57  ;;  %v5209_v57 = vld [vmem:[%s7273_s30 + $0x638] sm:$0xf0]  ;;  %v6696_v11 = vld [vmem:[%s7273_s30 + $0x72c] sm:$0xf]  ;;  %v5084_v25 = vor.u32 %v6632_v42, %v5081_v45 }
 0x1eb   : > { %4090 = vmatpush.bf16.msrb.mxu0 %v5020_v16  ;;  %v5337_v13 = vld [vmem:[%s7273_s30 + $0x738] sm:$0xf0]  ;;  %v6596_v21 = vld [vmem:[%s7273_s30 + $0x40c] sm:$0xf]  ;;  %v5212_v16 = vor.u32 %v6664_v8, %v5209_v57 }
 0x1ec   : > { %4104 = vmatpush.bf16.msrb.mxu1 %v5148_v58  ;;  %v4937_v15 = vld [vmem:[%s7273_s30 + $0x418] sm:$0xf0]  ;;  %v6628_v58 = vld [vmem:[%s7273_s30 + $0x50c] sm:$0xf]  ;;  %v5340_v20 = vor.u32 %v6696_v11, %v5337_v13 }
 0x1ed   : > { %4118 = vmatpush.bf16.msrb.mxu2 %v5276_v18  ;;  %v5065_v18 = vld [vmem:[%s7273_s30 + $0x518] sm:$0xf0]  ;;  %v6660_v55 = vld [vmem:[%s7273_s30 + $0x60c] sm:$0xf]  ;;  %v4940_v17 = vor.u32 %v6596_v21, %v4937_v15 }
 0x1ee   : > { %4132 = vmatpush.bf16.msrb.mxu3 %v5404_v10  ;;  %v5193_v1 = vld [vmem:[%s7273_s30 + $0x618] sm:$0xf0]  ;;  %v6692_v10 = vld [vmem:[%s7273_s30 + $0x70c] sm:$0xf]  ;;  %v5068_v26 = vor.u32 %v6628_v58, %v5065_v18 }
 0x1ef   : > { %4091 = vmatpush.bf16.msrb.mxu0 %v5004_v2  ;;  %v5321_v4 = vld [vmem:[%s7273_s30 + $0x718] sm:$0xf0]  ;;  %v6752_v48 = vld [vmem:[%s7273_s30 + $0x8ec] sm:$0xf]  ;;  %v5196_v33 = vor.u32 %v6660_v55, %v5193_v1 }
 0x1f0   : > { %4105 = vmatpush.bf16.msrb.mxu1 %v5132_v7  ;;  %v5561_v19 = vld [vmem:[%s7273_s30 + $0x8f8] sm:$0xf0]  ;;  %v6784_v23 = vld [vmem:[%s7273_s30 + $0x9ec] sm:$0xf]  ;;  %v5324_v51 = vor.u32 %v6692_v10, %v5321_v4 }
 0x1f1   : > { %4119 = vmatpush.bf16.msrb.mxu2 %v5260_v24  ;;  %v5689_v2 = vld [vmem:[%s7273_s30 + $0x9f8] sm:$0xf0]  ;;  %v6816_v7 = vld [vmem:[%s7273_s30 + $0xaec] sm:$0xf]  ;;  %v5564_v30 = vor.u32 %v6752_v48, %v5561_v19 }
 0x1f2   : > { %4133 = vmatpush.bf16.msrb.mxu3 %v5388_v28  ;;  %v5817_v24 = vld [vmem:[%s7273_s30 + $0xaf8] sm:$0xf0]  ;;  %v6848_v27 = vld [vmem:[%s7273_s30 + $0xbec] sm:$0xf]  ;;  %v5692_v37 = vor.u32 %v6784_v23, %v5689_v2  ;;  %v8508_v23 = vpop.f32.mrf.mxu0 }
 0x1f3   : > { %4092 = vmatpush.bf16.msrb.mxu0 %v4988_v12  ;;  %v5945_v28 = vld [vmem:[%s7273_s30 + $0xbf8] sm:$0xf0]  ;;  %v5820_v34 = vor.u32 %v6816_v7, %v5817_v24  ;;  %v6748_v49 = vld [vmem:[%s7273_s30 + $0x8cc] sm:$0xf]  ;;  %v8512_v7 = vpop.f32.mrf.mxu1 }
 0x1f4   : > { %4106 = vmatpush.bf16.msrb.mxu1 %v5116_v52  ;;  %v5545_v12 = vld [vmem:[%s7273_s30 + $0x8d8] sm:$0xf0]  ;;  %v6780_v52 = vld [vmem:[%s7273_s30 + $0x9cc] sm:$0xf] }
 0x1f5   : > { %4120 = vmatpush.bf16.msrb.mxu2 %v5244_v3  ;;  %v5948_v3 = vor.u32 %v6848_v27, %v5945_v28  ;;  %v5673_v22 = vld [vmem:[%s7273_s30 + $0x9d8] sm:$0xf0]  ;;  %v6812_v53 = vld [vmem:[%s7273_s30 + $0xacc] sm:$0xf]  ;;  %v5548_v56 = vor.u32 %v6748_v49, %v5545_v12 }
 0x1f6   : > { %4134 = vmatpush.bf16.msrb.mxu3 %v5372_v29  ;;  %v5801_v54 = vld [vmem:[%s7273_s30 + $0xad8] sm:$0xf0]  ;;  %v6844_v29 = vld [vmem:[%s7273_s30 + $0xbcc] sm:$0xf]  ;;  %v5676_v59 = vor.u32 %v6780_v52, %v5673_v22 }
 0x1f7   : > { %4093 = vmatpush.bf16.msrb.mxu0 %v4972_v63  ;;  %v5929_v61 = vld [vmem:[%s7273_s30 + $0xbd8] sm:$0xf0]  ;;  %v5804_v60 = vor.u32 %v6812_v53, %v5801_v54  ;;  %v6744_v9 = vld [vmem:[%s7273_s30 + $0x8ac] sm:$0xf] }
 0x1f8   : > { %4107 = vmatpush.bf16.msrb.mxu1 %v5100_v62  ;;  %v5529_v63 = vld [vmem:[%s7273_s30 + $0x8b8] sm:$0xf0]  ;;  %v6776_v62 = vld [vmem:[%s7273_s30 + $0x9ac] sm:$0xf] }
 0x1f9   : > { %4121 = vmatpush.bf16.msrb.mxu2 %v5228_v50  ;;  %v5932_v50 = vor.u32 %v6844_v29, %v5929_v61  ;;  %v5657_v6 = vld [vmem:[%s7273_s30 + $0x9b8] sm:$0xf0]  ;;  %v6808_v0 = vld [vmem:[%s7273_s30 + $0xaac] sm:$0xf] }
 0x1fa   : > { %4135 = vmatpush.bf16.msrb.mxu3 %v5356_v5  ;;  %v5785_v42 = vld [vmem:[%s7273_s30 + $0xab8] sm:$0xf0]  ;;  %v6840_v5 = vld [vmem:[%s7273_s30 + $0xbac] sm:$0xf]  ;;  %v5660_v8 = vor.u32 %v6776_v62, %v5657_v6  ;;  %v8530_v62 = vpop.f32.mrf.mxu3 }
 0x1fb   : > { %4094 = vmatpush.bf16.msrb.mxu0 %v4956_v14  ;;  %v5913_v45 = vld [vmem:[%s7273_s30 + $0xbb8] sm:$0xf0]  ;;  %v5788_v57 = vor.u32 %v6808_v0, %v5785_v42  ;;  %v6740_v11 = vld [vmem:[%s7273_s30 + $0x88c] sm:$0xf]  ;;  %v8535_v0 = vld [vmem:[%s7281_s5] sm:$0xf] }
 0x1fc   : > { %4108 = vmatpush.bf16.msrb.mxu1 %v5084_v25  ;;  %v6772_v13 = vld [vmem:[%s7273_s30 + $0x98c] sm:$0xf]  ;;  %v5641_v14 = vld [vmem:[%s7273_s30 + $0x998] sm:$0xf0]  ;;  %v794_v42 = vperm.slane %v8535_v0, 2 }
 0x1fd   : > { %4122 = vmatpush.bf16.msrb.mxu2 %v5212_v16  ;;  %v6804_v21 = vld [vmem:[%s7273_s30 + $0xa8c] sm:$0xf]  ;;  %v5897_v25 = vld [vmem:[%s7273_s30 + $0xb98] sm:$0xf0]  ;;  %v5644_v58 = vor.u32 %v6772_v13, %v5641_v14  ;;  %v8545_v14 = vpop.f32.mrf.mxu1 }
 0x1fe   : > { %4136 = vmatpush.bf16.msrb.mxu3 %v5340_v20  ;;  %v6836_v15 = vld [vmem:[%s7273_s30 + $0xb8c] sm:$0xf]  ;;  %v5497_v20 = vld [vmem:[%s7273_s30 + $0x878] sm:$0xf0] }
 0x1ff   : > { %4095 = vmatpush.bf16.msrb.mxu0 %v4940_v17  ;;  %v6736_v55 = vld [vmem:[%s7273_s30 + $0x86c] sm:$0xf]  ;;  %v5900_v10 = vor.u32 %v6836_v15, %v5897_v25  ;;  %v5625_v4 = vld [vmem:[%s7273_s30 + $0x978] sm:$0xf0] }
 0x200   : > { %4109 = vmatpush.bf16.msrb.mxu1 %v5068_v26  ;;  %v6768_v1 = vld [vmem:[%s7273_s30 + $0x96c] sm:$0xf]  ;;  %v5753_v19 = vld [vmem:[%s7273_s30 + $0xa78] sm:$0xf0]  ;;  %v5500_v24 = vor.u32 %v6736_v55, %v5497_v20 }
 0x201   : > { %4123 = vmatpush.bf16.msrb.mxu2 %v5196_v33  ;;  %v6800_v48 = vld [vmem:[%s7273_s30 + $0xa6c] sm:$0xf]  ;;  %v5881_v2 = vld [vmem:[%s7273_s30 + $0xb78] sm:$0xf0]  ;;  %v5628_v26 = vor.u32 %v6768_v1, %v5625_v4 }
 0x202   : > { %4137 = vmatpush.bf16.msrb.mxu3 %v5324_v51  ;;  %4096 = vmatmul.bf16.vlgmr.msrb.gmra.mxu0 %v7486_v39  ;;  %v5532_v39 = vor.u32 %v6744_v9, %v5529_v63  ;;  %v6832_v17 = vld [vmem:[%s7273_s30 + $0xb6c] sm:$0xf]  ;;  %v5756_v33 = vor.u32 %v6800_v48, %v5753_v19  ;;  %v5481_v28 = vld [vmem:[%s7273_s30 + $0x858] sm:$0xf0] }
 0x203   : > { %4144 = vmatpush.bf16.msra.mxu0 %v5564_v30  ;;  %4110 = vmatmul.bf16.vlgmr.msrb.gmra.mxu1 %v7493_v44  ;;  %v5916_v44 = vor.u32 %v6840_v5, %v5913_v45  ;;  %v6732_v27 = vld [vmem:[%s7273_s30 + $0x84c] sm:$0xf]  ;;  %v5884_v30 = vor.u32 %v6832_v17, %v5881_v2  ;;  %v5737_v49 = vld [vmem:[%s7273_s30 + $0xa58] sm:$0xf0] }
 0x204   : > { %4158 = vmatpush.bf16.msra.mxu1 %v5692_v37  ;;  %4124 = vmatmul.bf16.vlgmr.msrb.gmra.mxu2 %v7491_v43  ;;  %v5513_v43 = vld [vmem:[%s7273_s30 + $0x898] sm:$0xf0]  ;;  %v6764_v51 = vld [vmem:[%s7273_s30 + $0x94c] sm:$0xf] }
 0x205   : > { %4172 = vmatpush.bf16.msra.mxu2 %v5820_v34  ;;  %4138 = vmatmul.bf16.vlgmr.msrb.gmra.mxu3 %v7497_v47  ;;  %v5769_v47 = vld [vmem:[%s7273_s30 + $0xa98] sm:$0xf0]  ;;  %v5516_v16 = vor.u32 %v6740_v11, %v5513_v43  ;;  %v6796_v34 = vld [vmem:[%s7273_s30 + $0xa4c] sm:$0xf] }
 0x206   : > { %4186 = vmatpush.bf16.msra.mxu3 %v5948_v3  ;;  %v5772_v18 = vor.u32 %v6804_v21, %v5769_v47  ;;  %v5609_v37 = vld [vmem:[%s7273_s30 + $0x958] sm:$0xf0]  ;;  %v6828_v12 = vld [vmem:[%s7273_s30 + $0xb4c] sm:$0xf]  ;;  %v5484_v3 = vor.u32 %v6732_v27, %v5481_v28  ;;  %v5740_v53 = vor.u32 %v6796_v34, %v5737_v49 }
 0x207   : > { %4145 = vmatpush.bf16.msra.mxu0 %v5548_v56  ;;  %v5865_v52 = vld [vmem:[%s7273_s30 + $0xb58] sm:$0xf0]  ;;  %v5612_v22 = vor.u32 %v6764_v51, %v5609_v37  ;;  %v6728_v54 = vld [vmem:[%s7273_s30 + $0x82c] sm:$0xf]  ;;  %v8525_v56 = vpop.f32.mrf.mxu2 }
 0x208   : > { %4159 = vmatpush.bf16.msra.mxu1 %v5676_v59  ;;  %v5465_v29 = vld [vmem:[%s7273_s30 + $0x838] sm:$0xf0]  ;;  %v6760_v61 = vld [vmem:[%s7273_s30 + $0x92c] sm:$0xf]  ;;  %v5868_v59 = vor.u32 %v6828_v12, %v5865_v52 }
 0x209   : > { %4173 = vmatpush.bf16.msra.mxu2 %v5804_v60  ;;  %v5593_v60 = vld [vmem:[%s7273_s30 + $0x938] sm:$0xf0]  ;;  %v6792_v9 = vld [vmem:[%s7273_s30 + $0xa2c] sm:$0xf]  ;;  %v5468_v5 = vor.u32 %v6728_v54, %v5465_v29 }
 0x20a   : > { %4187 = vmatpush.bf16.msra.mxu3 %v5932_v50  ;;  %v5721_v63 = vld [vmem:[%s7273_s30 + $0xa38] sm:$0xf0]  ;;  %v6824_v50 = vld [vmem:[%s7273_s30 + $0xb2c] sm:$0xf] }
 0x20b   : > { %4146 = vmatpush.bf16.msra.mxu0 %v5532_v39  ;;  %v5849_v6 = vld [vmem:[%s7273_s30 + $0xb38] sm:$0xf0]  ;;  %v6724_v45 = vld [vmem:[%s7273_s30 + $0x80c] sm:$0xf]  ;;  %v5724_v11 = vor.u32 %v6792_v9, %v5721_v63 }
 0x20c   : > { %4160 = vmatpush.bf16.msra.mxu1 %v5660_v8  ;;  %v5449_v39 = vld [vmem:[%s7273_s30 + $0x818] sm:$0xf0]  ;;  %v8540_v8 = vpop.f32.mrf.mxu0  ;;  %v6756_v43 = vld [vmem:[%s7273_s30 + $0x90c] sm:$0xf]  ;;  %v5852_v21 = vor.u32 %v6824_v50, %v5849_v6  ;;  %v8577_v50 = vpop.f32.mrf.mxu1 }
 0x20d   : > { %4174 = vmatpush.bf16.msra.mxu2 %v5788_v57  ;;  %v5596_v57 = vor.u32 %v6760_v61, %v5593_v60  ;;  %v5577_v13 = vld [vmem:[%s7273_s30 + $0x918] sm:$0xf0]  ;;  %v6820_v15 = vld [vmem:[%s7273_s30 + $0xb0c] sm:$0xf]  ;;  %v5452_v55 = vor.u32 %v6724_v45, %v5449_v39 }
 0x20e   : > { %4188 = vmatpush.bf16.msra.mxu3 %v5916_v44  ;;  %v6788_v44 = vld [vmem:[%s7273_s30 + $0xa0c] sm:$0xf]  ;;  %v5705_v47 = vld [vmem:[%s7273_s30 + $0xa18] sm:$0xf0]  ;;  %v5580_v4 = vor.u32 %v6756_v43, %v5577_v13 }
 0x20f   : > { %4147 = vmatpush.bf16.msra.mxu0 %v5516_v16  ;;  %v5833_v25 = vld [vmem:[%s7273_s30 + $0xb18] sm:$0xf0]  ;;  %v6880_v16 = vld [vmem:[%s7273_s30 + $0xcec] sm:$0xf]  ;;  %v5708_v48 = vor.u32 %v6788_v44, %v5705_v47  ;;  %v8564_v37 = vpop.f32.mrf.mxu2 }
 0x210   : > { %4161 = vmatpush.bf16.msra.mxu1 %v5644_v58  ;;  %v6073_v58 = vld [vmem:[%s7273_s30 + $0xcf8] sm:$0xf0]  ;;  %v6944_v1 = vld [vmem:[%s7273_s30 + $0xeec] sm:$0xf]  ;;  %v5836_v2 = vor.u32 %v6820_v15, %v5833_v25  ;;  %v3820_v25 = vadd.f32 %v8540_v8, %v794_v42 }
 0x211   : > { %4175 = vmatpush.bf16.msra.mxu2 %v5772_v18  ;;  %v6912_v18 = vld [vmem:[%s7273_s30 + $0xdec] sm:$0xf]  ;;  %v6201_v20 = vld [vmem:[%s7273_s30 + $0xdf8] sm:$0xf0] }
 0x212   : > { %4189 = vmatpush.bf16.msra.mxu3 %v5900_v10  ;;  %v6329_v10 = vld [vmem:[%s7273_s30 + $0xef8] sm:$0xf0]  ;;  %v6976_v19 = vld [vmem:[%s7273_s30 + $0xfec] sm:$0xf] }
 0x213   : > { %4148 = vmatpush.bf16.msra.mxu0 %v5500_v24  ;;  %v6457_v17 = vld [vmem:[%s7273_s30 + $0xff8] sm:$0xf0]  ;;  %v6076_v24 = vor.u32 %v6880_v16, %v6073_v58  ;;  %v6332_v27 = vor.u32 %v6944_v1, %v6329_v10  ;;  %v6876_v28 = vld [vmem:[%s7273_s30 + $0xccc] sm:$0xf] }
 0x214   : > { %4162 = vmatpush.bf16.msra.mxu1 %v5628_v26  ;;  %v3818_v26 = vadd.f32 %v8508_v23, %v794_v42  ;;  %v6057_v51 = vld [vmem:[%s7273_s30 + $0xcd8] sm:$0xf0]  ;;  %v6460_v34 = vor.u32 %v6976_v19, %v6457_v17  ;;  %v6940_v12 = vld [vmem:[%s7273_s30 + $0xecc] sm:$0xf]  ;;  %v3873_v29 = vpop.f32.mrf.mxu0 }
 0x215   : > { %4176 = vmatpush.bf16.msra.mxu2 %v5756_v33  ;;  %v6204_v33 = vor.u32 %v6912_v18, %v6201_v20  ;;  %v6185_v49 = vld [vmem:[%s7273_s30 + $0xdd8] sm:$0xf0]  ;;  %v6972_v23 = vld [vmem:[%s7273_s30 + $0xfcc] sm:$0xf] }
 0x216   : > { %4190 = vmatpush.bf16.msra.mxu3 %v5884_v30  ;;  %v6908_v30 = vld [vmem:[%s7273_s30 + $0xdcc] sm:$0xf]  ;;  %v6313_v52 = vld [vmem:[%s7273_s30 + $0xed8] sm:$0xf0]  ;;  %v3832_v54 = vadd.f32 %v8512_v7, %v3818_v26 }
 0x217   : > { %4149 = vmatpush.bf16.msra.mxu0 %v5484_v3  ;;  %v8569_v3 = vpop.f32.mrf.mxu3  ;;  %v6188_v61 = vor.u32 %v6908_v30, %v6185_v49  ;;  %v6872_v60 = vld [vmem:[%s7273_s30 + $0xcac] sm:$0xf]  ;;  %v6041_v9 = vld [vmem:[%s7273_s30 + $0xcb8] sm:$0xf0]  ;;  %v8600_v58 = vpop.f32.mrf.mxu2 }
 0x218   : > { %4163 = vmatpush.bf16.msra.mxu1 %v5612_v22  ;;  %v6441_v22 = vld [vmem:[%s7273_s30 + $0xfd8] sm:$0xf0]  ;;  %v6904_v63 = vld [vmem:[%s7273_s30 + $0xdac] sm:$0xf] }
 0x219   : > { %4177 = vmatpush.bf16.msra.mxu2 %v5740_v53  ;;  %v6060_v53 = vor.u32 %v6876_v28, %v6057_v51  ;;  %v6444_v6 = vor.u32 %v6972_v23, %v6441_v22  ;;  %v6936_v7 = vld [vmem:[%s7273_s30 + $0xeac] sm:$0xf]  ;;  %v6297_v45 = vld [vmem:[%s7273_s30 + $0xeb8] sm:$0xf0] }
 0x21a   : > { %4191 = vmatpush.bf16.msra.mxu3 %v5868_v59  ;;  %v6316_v59 = vor.u32 %v6940_v12, %v6313_v52  ;;  %v6968_v39 = vld [vmem:[%s7273_s30 + $0xfac] sm:$0xf]  ;;  %v6300_v13 = vor.u32 %v6936_v7, %v6297_v45  ;;  %v6025_v44 = vld [vmem:[%s7273_s30 + $0xc98] sm:$0xf0] }
 0x21b   : > { %4150 = vmatpush.bf16.msra.mxu0 %v5468_v5  ;;  %v6169_v5 = vld [vmem:[%s7273_s30 + $0xdb8] sm:$0xf0]  ;;  %v6932_v15 = vld [vmem:[%s7273_s30 + $0xe8c] sm:$0xf] }
 0x21c   : > { %4164 = vmatpush.bf16.msra.mxu1 %v5596_v57  ;;  %v6425_v57 = vld [vmem:[%s7273_s30 + $0xfb8] sm:$0xf0]  ;;  %v6172_v43 = vor.u32 %v6904_v63, %v6169_v5  ;;  %v6864_v42 = vld [vmem:[%s7273_s30 + $0xc6c] sm:$0xf] }
 0x21d   : > { %4178 = vmatpush.bf16.msra.mxu2 %v5724_v11  ;;  %v3846_v11 = vadd.f32 %v8525_v56, %v3832_v54  ;;  %v6153_v47 = vld [vmem:[%s7273_s30 + $0xd98] sm:$0xf0]  ;;  %v6964_v56 = vld [vmem:[%s7273_s30 + $0xf8c] sm:$0xf] }
 0x21e   : > { %4192 = vmatpush.bf16.msra.mxu3 %v5852_v21  ;;  %v6428_v21 = vor.u32 %v6968_v39, %v6425_v57  ;;  %v6409_v16 = vld [vmem:[%s7273_s30 + $0xf98] sm:$0xf0]  ;;  %v6928_v17 = vld [vmem:[%s7273_s30 + $0xe6c] sm:$0xf] }
 0x21f   : > { %4151 = vmatpush.bf16.msra.mxu0 %v5452_v55  ;;  %v3860_v55 = vadd.f32 %v8530_v62, %v3846_v11  ;;  %v8603_v20 = vpop.f32.mrf.mxu3  ;;  %v6009_v8 = vld [vmem:[%s7273_s30 + $0xc78] sm:$0xf0]  ;;  %v3834_v62 = vadd.f32 %v8545_v14, %v3820_v25  ;;  %v6960_v26 = vld [vmem:[%s7273_s30 + $0xf6c] sm:$0xf]  ;;  %v3903_v45 = vpop.f32.mrf.mxu2 }
 0x220   : > { %4165 = vmatpush.bf16.msra.mxu1 %v5580_v4  ;;  %v6896_v4 = vld [vmem:[%s7273_s30 + $0xd6c] sm:$0xf]  ;;  %v6137_v19 = vld [vmem:[%s7273_s30 + $0xd78] sm:$0xf0]  ;;  %v6012_v28 = vor.u32 %v6864_v42, %v6009_v8 }
 0x221   : > { %4179 = vmatpush.bf16.msra.mxu2 %v5708_v48  ;;  %v6412_v48 = vor.u32 %v6964_v56, %v6409_v16  ;;  %v3874_v51 = vadd.f32 %v3873_v29, %v3860_v55  ;;  %v6140_v30 = vor.u32 %v6896_v4, %v6137_v19  ;;  %v6860_v49 = vld [vmem:[%s7273_s30 + $0xc4c] sm:$0xf]  ;;  %v5993_v12 = vld [vmem:[%s7273_s30 + $0xc58] sm:$0xf0]  ;;  %v3848_v54 = vadd.f32 %v8564_v37, %v3834_v62 }
 0x222   : > { %4193 = vmatpush.bf16.msra.mxu3 %v5836_v2  ;;  %4152 = vmatmul.bf16.vlgmr.msra.gmra.mxu0 %v7586_v31  ;;  %v6044_v31 = vor.u32 %v6872_v60, %v6041_v9  ;;  %v6265_v2 = vld [vmem:[%s7273_s30 + $0xe78] sm:$0xf0]  ;;  %v6892_v14 = vld [vmem:[%s7273_s30 + $0xd4c] sm:$0xf] }
 0x223   : > { %4200 = vmatpush.bf16.msrb.mxu0 %v6076_v24  ;;  %4166 = vmatmul.bf16.vlgmr.msra.gmra.mxu1 %v7593_v36  ;;  %v6900_v36 = vld [vmem:[%s7273_s30 + $0xd8c] sm:$0xf]  ;;  %v3875_v24 = vpop.f32.mrf.mxu0  ;;  %v6121_v23 = vld [vmem:[%s7273_s30 + $0xd58] sm:$0xf0]  ;;  %v3888_v60 = vadd.f32 %v8577_v50, %v3874_v51  ;;  %v3862_v50 = vadd.f32 %v8569_v3, %v3848_v54 }
 0x224   : > { %4214 = vmatpush.bf16.msrb.mxu1 %v6204_v33  ;;  %4180 = vmatmul.bf16.vlgmr.msra.gmra.mxu2 %v7591_v35  ;;  %v6868_v35 = vld [vmem:[%s7273_s30 + $0xc8c] sm:$0xf]  ;;  %v6156_v1 = vor.u32 %v6900_v36, %v6153_v47  ;;  %v6393_v33 = vld [vmem:[%s7273_s30 + $0xf78] sm:$0xf0]  ;;  %v6124_v9 = vor.u32 %v6892_v14, %v6121_v23 }
 0x225   : > { %4228 = vmatpush.bf16.msrb.mxu2 %v6332_v27  ;;  %4194 = vmatmul.bf16.vlgmr.msra.gmra.mxu3 %v7597_v40  ;;  %v6281_v40 = vld [vmem:[%s7273_s30 + $0xe98] sm:$0xf0]  ;;  %v6028_v18 = vor.u32 %v6868_v35, %v6025_v44  ;;  %v8614_v27 = vpop.f32.mrf.mxu1  ;;  %v6396_v52 = vor.u32 %v6960_v26, %v6393_v33  ;;  %v6924_v22 = vld [vmem:[%s7273_s30 + $0xe4c] sm:$0xf] }
 0x226   : > { %4242 = vmatpush.bf16.msrb.mxu3 %v6460_v34  ;;  %v6284_v10 = vor.u32 %v6932_v15, %v6281_v40  ;;  %v6268_v34 = vor.u32 %v6928_v17, %v6265_v2  ;;  %v6377_v29 = vld [vmem:[%s7273_s30 + $0xf58] sm:$0xf0]  ;;  %v6888_v7 = vld [vmem:[%s7273_s30 + $0xd2c] sm:$0xf] }
 0x227   : > { %4201 = vmatpush.bf16.msrb.mxu0 %v6060_v53  ;;  %v6249_v53 = vld [vmem:[%s7273_s30 + $0xe58] sm:$0xf0]  ;;  %v6920_v57 = vld [vmem:[%s7273_s30 + $0xe2c] sm:$0xf]  ;;  %v3917_v11 = vpop.f32.mrf.mxu3  ;;  %v3957_v19 = vpop.f32.mrf.mxu2 }
 0x228   : > { %4215 = vmatpush.bf16.msrb.mxu1 %v6188_v61  ;;  %v6956_v61 = vld [vmem:[%s7273_s30 + $0xf4c] sm:$0xf]  ;;  %v6252_v63 = vor.u32 %v6924_v22, %v6249_v53  ;;  %v5977_v5 = vld [vmem:[%s7273_s30 + $0xc38] sm:$0xf0] }
 0x229   : > { %4229 = vmatpush.bf16.msrb.mxu2 %v6316_v59  ;;  %v5996_v59 = vor.u32 %v6860_v49, %v5993_v12  ;;  %v6380_v37 = vor.u32 %v6956_v61, %v6377_v29  ;;  %v6105_v39 = vld [vmem:[%s7273_s30 + $0xd38] sm:$0xf0]  ;;  %v6852_v40 = vld [vmem:[%s7273_s30 + $0xc0c] sm:$0xf] }
 0x22a   : > { %4243 = vmatpush.bf16.msrb.mxu3 %v6444_v6  ;;  %v6856_v6 = vld [vmem:[%s7273_s30 + $0xc2c] sm:$0xf]  ;;  %v6361_v35 = vld [vmem:[%s7273_s30 + $0xf38] sm:$0xf0]  ;;  %v6108_v47 = vor.u32 %v6888_v7, %v6105_v39 }
 0x22b   : > { %4202 = vmatpush.bf16.msrb.mxu0 %v6044_v31  ;;  %v6233_v31 = vld [vmem:[%s7273_s30 + $0xe38] sm:$0xf0]  ;;  %v5980_v36 = vor.u32 %v6856_v6, %v5977_v5  ;;  %v6884_v25 = vld [vmem:[%s7273_s30 + $0xd0c] sm:$0xf] }
 0x22c   : > { %4216 = vmatpush.bf16.msrb.mxu1 %v6172_v43  ;;  %v3929_v43 = vpop.f32.mrf.mxu0  ;;  %v6236_v15 = vor.u32 %v6920_v57, %v6233_v31  ;;  %v5961_v3 = vld [vmem:[%s7273_s30 + $0xc18] sm:$0xf0] }
 0x22d   : > { %4230 = vmatpush.bf16.msrb.mxu2 %v6300_v13  ;;  %v6952_v13 = vld [vmem:[%s7273_s30 + $0xf2c] sm:$0xf]  ;;  %v3943_v44 = vpop.f32.mrf.mxu1  ;;  %v6089_v16 = vld [vmem:[%s7273_s30 + $0xd18] sm:$0xf0]  ;;  %v5964_v8 = vor.u32 %v6852_v40, %v5961_v3 }
 0x22e   : > { %4244 = vmatpush.bf16.msrb.mxu3 %v6428_v21  ;;  %v3902_v21 = vadd.f32 %v8600_v58, %v3888_v60  ;;  %v6364_v56 = vor.u32 %v6952_v13, %v6361_v35  ;;  %v6217_v55 = vld [vmem:[%s7273_s30 + $0xe18] sm:$0xf0]  ;;  %v6092_v58 = vor.u32 %v6884_v25, %v6089_v16 }
 0x22f   : > { %4203 = vmatpush.bf16.msrb.mxu0 %v6028_v18  ;;  %v6916_v18 = vld [vmem:[%s7273_s30 + $0xe0c] sm:$0xf]  ;;  %v6345_v42 = vld [vmem:[%s7273_s30 + $0xf18] sm:$0xf0]  ;;  %v3971_v26 = vpop.f32.mrf.mxu3 }
 0x230   : > { %4217 = vmatpush.bf16.msrb.mxu1 %v6156_v1  ;;  %v3876_v1 = vadd.f32 %v3875_v24, %v3862_v50  ;;  %v3916_v4 = vadd.f32 %v8603_v20, %v3902_v21 }
 0x231   : > { %4231 = vmatpush.bf16.msrb.mxu2 %v6284_v10  ;;  %v6948_v10 = vld [vmem:[%s7273_s30 + $0xf0c] sm:$0xf] }
 0x232   : > { %4245 = vmatpush.bf16.msrb.mxu3 %v6412_v48  ;;  %v6220_v48 = vor.u32 %v6916_v18, %v6217_v55  ;;  %v6348_v17 = vor.u32 %v6948_v10, %v6345_v42  ;;  %v3890_v2 = vadd.f32 %v8614_v27, %v3876_v1  ;;  %v3930_v62 = vadd.f32 %v3929_v43, %v3916_v4 }
 0x233   : > { %4204 = vmatpush.bf16.msrb.mxu0 %v6012_v28  ;;  %v795_v43 = vperm.slane %v8535_v0, 3 }
 0x234   : > { %4218 = vmatpush.bf16.msrb.mxu1 %v6140_v30  ;;  %v3904_v33 = vadd.f32 %v3903_v45, %v3890_v2  ;;  %v3931_v24 = vpop.f32.mrf.mxu0  ;;  %v3944_v51 = vadd.f32 %v3943_v44, %v3930_v62 }
 0x235   : > { %4232 = vmatpush.bf16.msrb.mxu2 %v6268_v34  ;;  %v3945_v28 = vpop.f32.mrf.mxu1  ;;  %v3959_v34 = vpop.f32.mrf.mxu2 }
 0x236   : > { %4246 = vmatpush.bf16.msrb.mxu3 %v6396_v52  ;;  %v3918_v20 = vadd.f32 %v3917_v11, %v3904_v33  ;;  %v3958_v30 = vadd.f32 %v3957_v19, %v3944_v51 }
 0x237   : > { %4205 = vmatpush.bf16.msrb.mxu0 %v5996_v59  ;;  %v3973_v12 = vpop.f32.mrf.mxu3 }
 0x238   : > { %4219 = vmatpush.bf16.msrb.mxu1 %v6124_v9  ;;  %v3932_v27 = vadd.f32 %v3931_v24, %v3918_v20  ;;  %v3972_v49 = vadd.f32 %v3971_v26, %v3958_v30 }
 0x239   : > { %4233 = vmatpush.bf16.msrb.mxu2 %v6252_v63 }
 0x23a   : > { %4247 = vmatpush.bf16.msrb.mxu3 %v6380_v37  ;;  %v3946_v23 = vadd.f32 %v3945_v28, %v3932_v27 }
 0x23b   : > { %4206 = vmatpush.bf16.msrb.mxu0 %v5980_v36 }
 0x23c   : > { %4220 = vmatpush.bf16.msrb.mxu1 %v6108_v47  ;;  %v3960_v53 = vadd.f32 %v3959_v34, %v3946_v23 }
 0x23d   : > { %4234 = vmatpush.bf16.msrb.mxu2 %v6236_v15 }
 0x23e   : > { %4248 = vmatpush.bf16.msrb.mxu3 %v6364_v56  ;;  %v3974_v61 = vadd.f32 %v3973_v12, %v3960_v53 }
 0x23f   : > { %4207 = vmatpush.bf16.msrb.mxu0 %v5964_v8  ;;  %v3985_v14 = vpop.f32.mrf.mxu0 }
 0x240   : > { %4221 = vmatpush.bf16.msrb.mxu1 %v6092_v58  ;;  %v3999_v52 = vpop.f32.mrf.mxu1  ;;  %v3986_v22 = vadd.f32 %v3985_v14, %v3972_v49 }
 0x241   : > { %4235 = vmatpush.bf16.msrb.mxu2 %v6220_v48 }
 0x242   : > { %4249 = vmatpush.bf16.msrb.mxu3 %v6348_v17  ;;  %4208 = vmatmul.bf16.vlgmr.msrb.gmra.mxu0 %v7686_v32  ;;  %v4000_v54 = vadd.f32 %v3999_v52, %v3986_v22 }
 0x243   : > { %4222 = vmatmul.bf16.vlgmr.msrb.gmra.mxu1 %v7693_v41 }
 0x244   : > { %4236 = vmatmul.bf16.vlgmr.msrb.gmra.mxu2 %v7691_v38 }
 0x245   : > { %4250 = vmatmul.bf16.vlgmr.msrb.gmra.mxu3 %v7697_v46 }
 0x247   : > { %v4013_v32 = vpop.f32.mrf.mxu2  ;;  %v3987_v38 = vpop.f32.mrf.mxu0 }
 0x248   : > { %v4014_v41 = vadd.f32 %v4013_v32, %v4000_v54  ;;  %v4027_v29 = vpop.f32.mrf.mxu3  ;;  %v3988_v59 = vadd.f32 %v3987_v38, %v3974_v61  ;;  %v4001_v46 = vpop.f32.mrf.mxu1 }
 0x24a   : > { %v4028_v60 = vadd.f32 %v4027_v29, %v4014_v41  ;;  %v4002_v9 = vadd.f32 %v4001_v46, %v3988_v59 }
 0x24c   : > { %7034 = vtanh.f32 %v4028_v60 }
 0x24f   : > { %v4015_v63 = vpop.f32.mrf.mxu2 }
 0x250   : > { %v4016_v6 = vadd.f32 %v4015_v63, %v4002_v9  ;;  %v4029_v5 = vpop.f32.mrf.mxu3 }
 0x252   : > { %v7035_v7 = vpop.eup %7034  ;;  %v4030_v45 = vadd.f32 %v4029_v5, %v4016_v6 }
 0x253   : > { %4266 = vst [vmem:[%s8081_s21 + $0x10] sm:$0xff] %v7035_v7 }
 0x254   : > { %7036 = vtanh.f32 %v4030_v45 }
 0x25a   : > { %v7037_v37 = vpop.eup %7036 }
 0x25b   : > { %4270 = vst [vmem:[%s8081_s21 + $0x30] sm:$0xff] %v7037_v37 }
 0x25f   : > { %v4041_v39 = vpop.f32.mrf.mxu0 }
 0x260   : > { %v4055_v57 = vpop.f32.mrf.mxu1  ;;  %v4042_v35 = vadd.f32 %v4041_v39, %v795_v43 }
 0x262   : > { %v4056_v21 = vadd.f32 %v4055_v57, %v4042_v35  ;;  %v4302_v35 = vld [vmem:[%s8081_s21 + $0x20] sm:$0xff] (%p7211_p9) }
 0x263   : > { %4303 = vst [vmem:[%s4281_s25 + $0x80] sm:$0xff] (%p7211_p9), %v4302_v35 }
 0x267   : > { %v4069_v31 = vpop.f32.mrf.mxu2  ;;  %v4043_v11 = vpop.f32.mrf.mxu0 }
 0x268   : > { %v4083_v50 = vpop.f32.mrf.mxu3  ;;  %v4057_v13 = vpop.f32.mrf.mxu1  ;;  %v4070_v40 = vadd.f32 %v4069_v31, %v4056_v21  ;;  %v4044_v3 = vadd.f32 %v4043_v11, %v795_v43  ;;  %v4296_v11 = vld [vmem:[%s8081_s21 + $0x8] sm:$0xff] (%p7211_p9)  ;;  %v4298_v43 = vld [vmem:[%s8081_s21 + $0x10] sm:$0xff] (%p7211_p9) }
 0x269   : > { %4297 = vst [vmem:[%s4281_s25 + $0x8] sm:$0xff] (%p7211_p9), %v4296_v11 }
 0x26a   : > { %v4084_v56 = vadd.f32 %v4083_v50, %v4070_v40  ;;  %v4058_v18 = vadd.f32 %v4057_v13, %v4044_v3  ;;  %v4294_v50 = vld [vmem:[%s8081_s21] sm:$0xff] (%p7211_p9)  ;;  %4299 = vst [vmem:[%s4281_s25 + $0x10] sm:$0xff] (%p7211_p9), %v4298_v43 }
 0x26b   : > { %4295 = vst [vmem:[%s4281_s25] sm:$0xff] (%p7211_p9), %v4294_v50 }
 0x26f   : > { %v4071_v44 = vpop.f32.mrf.mxu2 }
 0x270   : > { %v4085_v36 = vpop.f32.mrf.mxu3  ;;  %v4072_v42 = vadd.f32 %v4071_v44, %v4058_v18  ;;  %v4304_v44 = vld [vmem:[%s8081_s21 + $0x28] sm:$0xff] (%p7211_p9) }
 0x271   : > { %4305 = vst [vmem:[%s4281_s25 + $0x88] sm:$0xff] (%p7211_p9), %v4304_v44 }
 0x272   : > { %v4086_v0 = vadd.f32 %v4085_v36, %v4072_v42  ;;  %v4306_v36 = vld [vmem:[%s8081_s21 + $0x30] sm:$0xff] (%p7211_p9) }
 0x273   : > { %4307 = vst [vmem:[%s4281_s25 + $0x90] sm:$0xff] (%p7211_p9), %v4306_v36 }
 0x27f   : > { %v4097_v47 = vpop.f32.mrf.mxu0 }
 0x280   : > { %v4111_v15 = vpop.f32.mrf.mxu1  ;;  %v4098_v1 = vadd.f32 %v4097_v47, %v4084_v56 }
 0x282   : > { %v4112_v8 = vadd.f32 %v4111_v15, %v4098_v1 }
 0x287   : > { %v4125_v25 = vpop.f32.mrf.mxu2  ;;  %v4099_v55 = vpop.f32.mrf.mxu0 }
 0x288   : > { %v4139_v16 = vpop.f32.mrf.mxu3  ;;  %v4113_v10 = vpop.f32.mrf.mxu1  ;;  %v4126_v19 = vadd.f32 %v4125_v25, %v4112_v8  ;;  %v4100_v2 = vadd.f32 %v4099_v55, %v4086_v0 }
 0x28a   : > { %v4140_v62 = vadd.f32 %v4139_v16, %v4126_v19  ;;  %v4114_v33 = vadd.f32 %v4113_v10, %v4100_v2 }
 0x28f   : > { %v4127_v4 = vpop.f32.mrf.mxu2 }
 0x290   : > { %v4141_v58 = vpop.f32.mrf.mxu3  ;;  %v4128_v51 = vadd.f32 %v4127_v4, %v4114_v33 }
 0x292   : > { %v4142_v34 = vadd.f32 %v4141_v58, %v4128_v51 }
 0x29f   : > { %v4153_v48 = vpop.f32.mrf.mxu0 }
 0x2a0   : > { %v4167_v17 = vpop.f32.mrf.mxu1  ;;  %v4154_v24 = vadd.f32 %v4153_v48, %v4140_v62 }
 0x2a2   : > { %v4168_v30 = vadd.f32 %v4167_v17, %v4154_v24 }
 0x2a7   : > { %v4181_v26 = vpop.f32.mrf.mxu2  ;;  %v4155_v20 = vpop.f32.mrf.mxu0 }
 0x2a8   : > { %v4195_v28 = vpop.f32.mrf.mxu3  ;;  %v4169_v27 = vpop.f32.mrf.mxu1  ;;  %v4182_v49 = vadd.f32 %v4181_v26, %v4168_v30  ;;  %v4156_v12 = vadd.f32 %v4155_v20, %v4142_v34 }
 0x2aa   : > { %v4196_v52 = vadd.f32 %v4195_v28, %v4182_v49  ;;  %v4170_v53 = vadd.f32 %v4169_v27, %v4156_v12 }
 0x2af   : > { %v4183_v14 = vpop.f32.mrf.mxu2 }
 0x2b0   : > { %v4197_v23 = vpop.f32.mrf.mxu3  ;;  %v4184_v61 = vadd.f32 %v4183_v14, %v4170_v53 }
 0x2b2   : > { %v4198_v29 = vadd.f32 %v4197_v23, %v4184_v61 }
 0x2bf   : > { %v4209_v22 = vpop.f32.mrf.mxu0 }
 0x2c0   : > { %v4210_v54 = vadd.f32 %v4209_v22, %v4196_v52  ;;  %v4223_v32 = vpop.f32.mrf.mxu1 }
 0x2c2   : > { %v4224_v41 = vadd.f32 %v4223_v32, %v4210_v54 }
 0x2c7   : > { %v4237_v38 = vpop.f32.mrf.mxu2  ;;  %v4211_v46 = vpop.f32.mrf.mxu0 }
 0x2c8   : > { %v4238_v59 = vadd.f32 %v4237_v38, %v4224_v41  ;;  %v4251_v60 = vpop.f32.mrf.mxu3  ;;  %v4212_v63 = vadd.f32 %v4211_v46, %v4198_v29  ;;  %v4225_v6 = vpop.f32.mrf.mxu1 }
 0x2ca   : > { %v4252_v9 = vadd.f32 %v4251_v60, %v4238_v59  ;;  %v4226_v5 = vadd.f32 %v4225_v6, %v4212_v63 }
 0x2cc   : > { %7038 = vtanh.f32 %v4252_v9 }
 0x2cf   : > { %v4239_v7 = vpop.f32.mrf.mxu2 }
 0x2d0   : > { %v4240_v45 = vadd.f32 %v4239_v7, %v4226_v5  ;;  %v4253_v37 = vpop.f32.mrf.mxu3 }
 0x2d2   : > { %v7039_v39 = vpop.eup %7038  ;;  %v4254_v57 = vadd.f32 %v4253_v37, %v4240_v45 }
 0x2d3   : > { %4267 = vst [vmem:[%s8081_s21 + $0x18] sm:$0xff] %v7039_v39 }
 0x2d4   : > { %7040 = vtanh.f32 %v4254_v57 }
 0x2d7   : > { %4278 = sbr.rel (!%p7211_p9) target bundleno = 740 (0x2e4), region = 44 }
 0x2da   : > { %v7041_v31 = vpop.eup %7040  ;;  %v4300_v13 = vld [vmem:[%s8081_s21 + $0x18] sm:$0xff] (%p7211_p9) }
 0x2db   : > { %4271 = vst [vmem:[%s8081_s21 + $0x38] sm:$0xff] %v7041_v31 }
 0x2dc   : > { %4301 = vst [vmem:[%s4281_s25 + $0x18] sm:$0xff] %v4300_v13 }
 0x2e2   : > { %v4308_v21 = vld [vmem:[%s8081_s21 + $0x38] sm:$0xff] }
 0x2e3   : > { %4309 = vst [vmem:[%s4281_s25 + $0x98] sm:$0xff] %v4308_v21 }
 0x2e4 PF: > { %p16_p7 = scmp.ge.s32.totalorder %s7188_s17, 6   ;;  %s8691_s12 = smov %s7134_s13 }
 0x2e5   : > { %s8692_s13 = smov %s7138_s14  ;;  %s8693_s14 = smov %s7198_s20 }
 0x2e6   : > { %s8694_s15 = smov %s7188_s17  ;;  %18 = sbr.rel (!%p16_p7) target bundleno = 5 (0x5), region = 108 }
 0x2eb   :  { %4325 = vsyncpa [#allocation3], 1 }
 0x2ec   :  { %4327 = vsyncpa [#allocation3 + $0x1], 1 }
 0x2ed   :  { %4328 = vsyncpa [#allocation5], 1 }
 0x2ee   :  { %4330 = vsyncpa [#allocation5 + $0x1], 1 }

// kernel: get_derivatives_forward.3
= control target key start
LH: loop header
LB: loop body
LE: loop exit
PB: predicated region body
PF: predicated region fallthrough
CT: control target
= control target key end

     0   :  { %8 = vsyncpa [#allocation3], 0  ;;  %s8679_s0 = inlined_call_operand.vmem [shape: f32[16,2048], index: 0, kind: input, shape index: {}]   ;;  %s8680_s1 = inlined_call_operand.hbm [shape: bf16[3,4,2048,512], index: 1, kind: input, shape index: {}]   ;;  %s8681_s2 = inlined_call_operand.hbm [shape: f32[3,1,2048], index: 2, kind: input, shape index: {}]   ;;  %s8682_s3 = inlined_call_operand.vmem [shape: f32[16,2048], index: 3, kind: output, shape index: {}]  }
   0x1   :  { %10 = vsyncpa [#allocation3 + $0x1], 0 }
   0x2   :  { %11 = vsyncpa [#allocation5], 0 }
   0x3   :  { %13 = vsyncpa [#allocation5 + $0x1], 0  ;;  %s7161_s12 = smov 0   ;;  %s7163_s13 = smov 0  }
   0x4   :  { %s7165_s14 = smov 0   ;;  %s7167_s15 = smov 0  }
   0x5 LB: > { %s7180_s16 = sadd.s32 4294967295, %s7137_s15   ;;  %s7183_s17 = sadd.s32 1, %s7137_s15   ;;  %s7137_s15 = sphi %s7167_s15, %s8691_s15   ;;  %s7133_s14 = sphi %s7165_s14, %s8690_s14   ;;  %s7129_s13 = sphi %s7163_s13, %s8689_s13   ;;  %s7125_s12 = sphi %s7161_s12, %s8688_s12  }
   0x6   : > { %s44_s18 = ssub.s32 %s7137_s15, %s7183_s17  ;;  %s47_s19 = sadd.s32 1, %s7133_s14 }
   0x7   : > { %p45_p0 = scmp.eq.s32.totalorder %s44_s18, 0  ;;  %p54_p1 = scmp.ne.s32.totalorder %s7133_s14, %s7129_s13 }
   0x8   : > { %p55_p2 = scmp.eq.s32.totalorder %s7137_s15, 0  ;;  %p60_p3 = scmp.ne.s32.totalorder %s7129_s13, %s7125_s12 }
   0x9   : > { %s7193_s20 = scalar_select %p45_p0, %s7133_s14, %s47_s19  }
   0xa   : > { %p7195_p4 = por %p55_p2, %p54_p1  ;;  %p61_p5 = scmp.eq.s32.totalorder %s7180_s16, 0 }
   0xb   : > { %p110_p6 = scmp.eq.s32.totalorder %s7180_s16, 3  ;;  %p6986_p8 = scmp.lt.s32.totalorder %s7137_s15, 4 }
   0xc   : > { %p7201_p7 = por %p61_p5, %p60_p3  ;;  %s7211_s24 = sand.u32 1, %s7133_s14  }
   0xd   : > { %p7206_p9 = por %p110_p6, %p54_p1  ;;  %s4399_s25 = sshll.u32 %s7211_s24, 12 }
   0xe   : > { %s6461_s26 = sshll.u32 %s7137_s15, 12  ;;  %s143_s30 = scalar_lea.vmem [#allocation2], %s4399_s25 }
   0xf   : > { %s148_s29 = scalar_lea.hbm %s8680_s1, %s6461_s26  ;;  %s151_s4 = sshll.u32 %s143_s30, 4  ;;  %s152_s4 = int_to_ptr.vmem [resolvable:$true] %s151_s4 }
  0x10   : > { %s149_s5 = sshll.u32 %s148_s29, 4  ;;  %p7220_p10 = pnand %p6986_p8, %p7195_p4  ;;  %s150_s5 = int_to_ptr.hbm [resolvable:$true] %s149_s5 }
  0x11   : > { %p4404_p11 = scmp.ge.s32.totalorder %s7137_s15, 1  ;;  %s140_s7 = scalar_lea.sflag [#allocation3], %s7211_s24 }
  0x12   : > { %s7039_s8 = sshra.s32 %s150_s5, 4  ;;  %p7043_p13 = pneg %p7220_p10  ;;  %s7040_s8 = int_to_ptr.hbm [resolvable:$true] %s7039_s8 }
  0x13   : > { %s7041_s9 = scalar_lea.hbm %s7040_s8, 4096  ;;  %s7046_s12 = scalar_lea.hbm %s8680_s1, 49152 }
  0x14   : > { %p7042_p12 = scmp.ne.s32.totalorder %s7040_s8, %s7041_s9  ;;  %p7047_p2 = scmp.lt.s32.totalorder %s7040_s8, %s8680_s1 }
  0x15   : > { %p7048_p3 = scmp.lt.s32.totalorder %s7046_s12, %s7041_s9 }
  0x16   : > { %p7044_p0 = pnand %p7043_p13, %p7042_p12 }
  0x17   : > { %p7049_p4 = por %p7048_p3, %p7047_p2 }
  0x18   : > { %p7045_p1 = pneg %p7044_p0 }
  0x1a   : > { %p7050_p5 = pnand %p7049_p4, %p7045_p1 }
  0x1c   : > { %7053 = shalt.err (!%p7050_p5)
}
  0x1d   : > { %s7139_s21 = smov 256   ;;  %s7140_s25 = smov 16  }
  0x1e   : > { %6982 = dma.hbm_to_vmem [thread:$0]  (!%p7220_p10), %s150_s5, 65536, %s152_s4, %s140_s7, %s7139_s21, %s7139_s21, %s7140_s25  }
  0x1f   : > { %p178_p6 = scmp.lt.s32.totalorder %s7137_s15, 5  ;;  %s4402_s26 = sshll.u32 %s7211_s24, 2 }
  0x20   : > { %s4403_s27 = sshll.u32 %s7137_s15, 2  ;;  %s165_s9 = scalar_lea.vmem [#allocation4], %s4402_s26 }
  0x21   : > { %p7244_p8 = pnand %p4404_p11, %p178_p6  ;;  %s169_s8 = scalar_lea.hbm %s8681_s2, %s4403_s27 }
  0x22   : > { %s173_s10 = sshll.u32 %s165_s9, 4  ;;  %s171_s11 = sshll.u32 %s169_s8, 4  ;;  %s174_s10 = int_to_ptr.vmem [resolvable:$true] %s173_s10  ;;  %s172_s11 = int_to_ptr.hbm [resolvable:$true] %s171_s11 }
  0x23   : > { %s162_s12 = scalar_lea.sflag [#allocation5], %s7211_s24  ;;  %s7069_s4 = sshra.s32 %s172_s11, 4  ;;  %s7070_s4 = int_to_ptr.hbm [resolvable:$true] %s7069_s4 }
  0x24   : > { %s7071_s5 = scalar_lea.hbm %s7070_s4, 4  ;;  %s7076_s18 = scalar_lea.hbm %s8681_s2, 48 }
  0x25   : > { %p7072_p12 = scmp.ne.s32.totalorder %s7070_s4, %s7071_s5  ;;  %p7077_p1 = scmp.lt.s32.totalorder %s7070_s4, %s8681_s2 }
  0x26   : > { %p7078_p2 = scmp.lt.s32.totalorder %s7076_s18, %s7071_s5 }
  0x27   : > { %p7074_p11 = pnand %p7072_p12, %p7043_p13 }
  0x28   : > { %p7079_p3 = por %p7078_p2, %p7077_p1 }
  0x29   : > { %p7075_p0 = pneg %p7074_p11 }
  0x2b   : > { %p7080_p4 = pnand %p7079_p3, %p7075_p0 }
  0x2d   : > { %7083 = shalt.err (!%p7080_p4)
}
  0x2e   : > { %6985 = dma.hbm_to_vmem [thread:$0]  (!%p7220_p10), %s172_s11, 64, %s174_s10, %s162_s12  }
  0x2f   : > { %182 = sbr.rel (%p7244_p8) target bundleno = 738 (0x2e2), region = 32  ;;  %s7266_s24 = sand.u32 (!%p7244_p8), 1, %s7129_s13  }
  0x30   : > { %s4405_s25 = sshll.u32 (!%p7244_p8), %s7266_s24, 12  ;;  %s185_s26 = scalar_lea.sflag (!%p7244_p8), [#allocation3], %s7266_s24 }
  0x31   : > { %s7270_s27 = scalar_lea.vmem (!%p7244_p8), [#allocation2], %s4405_s25 }
  0x34   : > { %7116 = dma.done.wait (%p7201_p7), %s185_s26, 65536  }
  0x35   : > { %7118 = vsyncadd (%p7201_p7), %s185_s26, 4294901760  ;;  %s4406_s6 = sshll.u32 %s7266_s24, 2  ;;  %s195_s28 = scalar_lea.sflag [#allocation5], %s7266_s24 }
  0x36   : > { %s7278_s29 = scalar_lea.vmem [#allocation4], %s4406_s6 }
  0x37   : > { %7120 = dma.done.wait (%p7201_p7), %s195_s28, 64  }
  0x38   : > { %7122 = vsyncadd (%p7201_p7), %s195_s28, 4294967232  ;;  %v4522_v0 = vld [vmem:[%s7270_s27 + $0xe0] sm:$0xf]  ;;  %v6492_v1 = vld [vmem:[%s7270_s27 + $0xec] sm:$0xf0]  ;;  %s4407_s7 = sshll.u32 %s7266_s24, 6 }
  0x39   : > { %v4650_v2 = vld [vmem:[%s7270_s27 + $0x1e0] sm:$0xf]  ;;  %v4523_v3 = vor.u32 %v6492_v1, %v4522_v0  ;;  %v6524_v4 = vld [vmem:[%s7270_s27 + $0x1ec] sm:$0xf0]  ;;  %s8078_s18 = scalar_lea.vmem [#allocation6], %s4407_s7  ;;  %s6974_s24 = sshll.u32 (%p7206_p9), %s7180_s16, 5 }
  0x3a   : > { %v4778_v5 = vld [vmem:[%s7270_s27 + $0x2e0] sm:$0xf]  ;;  %v6556_v6 = vld [vmem:[%s7270_s27 + $0x2ec] sm:$0xf0]  ;;  %v4651_v7 = vor.u32 %v6524_v4, %v4650_v2  ;;  %s4279_s19 = scalar_lea.vmem (%p7206_p9), %s8682_s3, %s6974_s24 }
  0x3b   : > { %v4779_v8 = vor.u32 %v6556_v6, %v4778_v5  ;;  %v4906_v9 = vld [vmem:[%s7270_s27 + $0x3e0] sm:$0xf]  ;;  %v6588_v10 = vld [vmem:[%s7270_s27 + $0x3ec] sm:$0xf0]  ;;  %3358 = vmatpush.bf16.msra.mxu0 %v4523_v3 }
  0x3c   : > { %v4506_v11 = vld [vmem:[%s7270_s27 + $0xc0] sm:$0xf]  ;;  %v4907_v12 = vor.u32 %v6588_v10, %v4906_v9  ;;  %v6488_v13 = vld [vmem:[%s7270_s27 + $0xcc] sm:$0xf0]  ;;  %3372 = vmatpush.bf16.msra.mxu1 %v4651_v7 }
  0x3d   : > { %v4634_v14 = vld [vmem:[%s7270_s27 + $0x1c0] sm:$0xf]  ;;  %v6520_v15 = vld [vmem:[%s7270_s27 + $0x1cc] sm:$0xf0]  ;;  %3386 = vmatpush.bf16.msra.mxu2 %v4779_v8  ;;  %v4507_v16 = vor.u32 %v6488_v13, %v4506_v11 }
  0x3e   : > { %v4635_v17 = vor.u32 %v6520_v15, %v4634_v14  ;;  %v4762_v18 = vld [vmem:[%s7270_s27 + $0x2c0] sm:$0xf]  ;;  %v6552_v19 = vld [vmem:[%s7270_s27 + $0x2cc] sm:$0xf0]  ;;  %3400 = vmatpush.bf16.msra.mxu3 %v4907_v12 }
  0x3f   : > { %v4890_v20 = vld [vmem:[%s7270_s27 + $0x3c0] sm:$0xf]  ;;  %v4763_v21 = vor.u32 %v6552_v19, %v4762_v18  ;;  %v6584_v22 = vld [vmem:[%s7270_s27 + $0x3cc] sm:$0xf0]  ;;  %3359 = vmatpush.bf16.msra.mxu0 %v4507_v16 }
  0x40   : > { %v4490_v23 = vld [vmem:[%s7270_s27 + $0xa0] sm:$0xf]  ;;  %v6484_v24 = vld [vmem:[%s7270_s27 + $0xac] sm:$0xf0]  ;;  %v4891_v25 = vor.u32 %v6584_v22, %v4890_v20  ;;  %3373 = vmatpush.bf16.msra.mxu1 %v4635_v17 }
  0x41   : > { %v4618_v26 = vld [vmem:[%s7270_s27 + $0x1a0] sm:$0xf]  ;;  %v6516_v27 = vld [vmem:[%s7270_s27 + $0x1ac] sm:$0xf0]  ;;  %v4491_v29 = vor.u32 %v6484_v24, %v4490_v23  ;;  %3387 = vmatpush.bf16.msra.mxu2 %v4763_v21 }
  0x42   : > { %v4746_v28 = vld [vmem:[%s7270_s27 + $0x2a0] sm:$0xf]  ;;  %v6548_v30 = vld [vmem:[%s7270_s27 + $0x2ac] sm:$0xf0]  ;;  %v4619_v33 = vor.u32 %v6516_v27, %v4618_v26  ;;  %3401 = vmatpush.bf16.msra.mxu3 %v4891_v25 }
  0x43   : > { %v4874_v31 = vld [vmem:[%s7270_s27 + $0x3a0] sm:$0xf]  ;;  %v6580_v32 = vld [vmem:[%s7270_s27 + $0x3ac] sm:$0xf0]  ;;  %v4747_v34 = vor.u32 %v6548_v30, %v4746_v28  ;;  %3360 = vmatpush.bf16.msra.mxu0 %v4491_v29 }
  0x44   : > { %v4474_v35 = vld [vmem:[%s7270_s27 + $0x80] sm:$0xf]  ;;  %v6480_v36 = vld [vmem:[%s7270_s27 + $0x8c] sm:$0xf0]  ;;  %v4875_v38 = vor.u32 %v6580_v32, %v4874_v31  ;;  %3374 = vmatpush.bf16.msra.mxu1 %v4619_v33 }
  0x45   : > { %v4602_v37 = vld [vmem:[%s7270_s27 + $0x180] sm:$0xf]  ;;  %v6512_v39 = vld [vmem:[%s7270_s27 + $0x18c] sm:$0xf0]  ;;  %v4475_v44 = vor.u32 %v6480_v36, %v4474_v35  ;;  %3388 = vmatpush.bf16.msra.mxu2 %v4747_v34 }
  0x46   : > { %v4730_v40 = vld [vmem:[%s7270_s27 + $0x280] sm:$0xf]  ;;  %v6544_v41 = vld [vmem:[%s7270_s27 + $0x28c] sm:$0xf0]  ;;  %v4603_v45 = vor.u32 %v6512_v39, %v4602_v37  ;;  %3402 = vmatpush.bf16.msra.mxu3 %v4875_v38 }
  0x47   : > { %v4858_v42 = vld [vmem:[%s7270_s27 + $0x380] sm:$0xf]  ;;  %v6576_v43 = vld [vmem:[%s7270_s27 + $0x38c] sm:$0xf0]  ;;  %v4731_v46 = vor.u32 %v6544_v41, %v4730_v40  ;;  %3361 = vmatpush.bf16.msra.mxu0 %v4475_v44 }
  0x48   : > { %v4458_v47 = vld [vmem:[%s7270_s27 + $0x60] sm:$0xf]  ;;  %v6476_v48 = vld [vmem:[%s7270_s27 + $0x6c] sm:$0xf0]  ;;  %v4859_v50 = vor.u32 %v6576_v43, %v4858_v42  ;;  %3375 = vmatpush.bf16.msra.mxu1 %v4603_v45 }
  0x49   : > { %v4586_v49 = vld [vmem:[%s7270_s27 + $0x160] sm:$0xf]  ;;  %v6508_v51 = vld [vmem:[%s7270_s27 + $0x16c] sm:$0xf0]  ;;  %v4459_v56 = vor.u32 %v6476_v48, %v4458_v47  ;;  %3389 = vmatpush.bf16.msra.mxu2 %v4731_v46 }
  0x4a   : > { %v4714_v52 = vld [vmem:[%s7270_s27 + $0x260] sm:$0xf]  ;;  %v6540_v53 = vld [vmem:[%s7270_s27 + $0x26c] sm:$0xf0]  ;;  %v4587_v57 = vor.u32 %v6508_v51, %v4586_v49  ;;  %3403 = vmatpush.bf16.msra.mxu3 %v4859_v50 }
  0x4b   : > { %v4842_v54 = vld [vmem:[%s7270_s27 + $0x360] sm:$0xf]  ;;  %v6572_v55 = vld [vmem:[%s7270_s27 + $0x36c] sm:$0xf0]  ;;  %v4715_v58 = vor.u32 %v6540_v53, %v4714_v52  ;;  %3362 = vmatpush.bf16.msra.mxu0 %v4459_v56 }
  0x4c   : > { %v4442_v59 = vld [vmem:[%s7270_s27 + $0x40] sm:$0xf]  ;;  %v6472_v60 = vld [vmem:[%s7270_s27 + $0x4c] sm:$0xf0]  ;;  %v4843_v62 = vor.u32 %v6572_v55, %v4842_v54  ;;  %3376 = vmatpush.bf16.msra.mxu1 %v4587_v57 }
  0x4d   : > { %v4570_v61 = vld [vmem:[%s7270_s27 + $0x140] sm:$0xf]  ;;  %v6504_v63 = vld [vmem:[%s7270_s27 + $0x14c] sm:$0xf0]  ;;  %v4443_v4 = vor.u32 %v6472_v60, %v4442_v59  ;;  %3390 = vmatpush.bf16.msra.mxu2 %v4715_v58 }
  0x4e   : > { %v4698_v0 = vld [vmem:[%s7270_s27 + $0x240] sm:$0xf]  ;;  %v6536_v1 = vld [vmem:[%s7270_s27 + $0x24c] sm:$0xf0]  ;;  %v4571_v5 = vor.u32 %v6504_v63, %v4570_v61  ;;  %3404 = vmatpush.bf16.msra.mxu3 %v4843_v62 }
  0x4f   : > { %v4826_v2 = vld [vmem:[%s7270_s27 + $0x340] sm:$0xf]  ;;  %v6568_v3 = vld [vmem:[%s7270_s27 + $0x34c] sm:$0xf0]  ;;  %v4699_v6 = vor.u32 %v6536_v1, %v4698_v0  ;;  %3363 = vmatpush.bf16.msra.mxu0 %v4443_v4 }
  0x50   : > { %v4426_v7 = vld [vmem:[%s7270_s27 + $0x20] sm:$0xf]  ;;  %v6468_v8 = vld [vmem:[%s7270_s27 + $0x2c] sm:$0xf0]  ;;  %v4827_v10 = vor.u32 %v6568_v3, %v4826_v2  ;;  %3377 = vmatpush.bf16.msra.mxu1 %v4571_v5 }
  0x51   : > { %v4554_v9 = vld [vmem:[%s7270_s27 + $0x120] sm:$0xf]  ;;  %v6500_v11 = vld [vmem:[%s7270_s27 + $0x12c] sm:$0xf0]  ;;  %v4427_v16 = vor.u32 %v6468_v8, %v4426_v7  ;;  %3391 = vmatpush.bf16.msra.mxu2 %v4699_v6  ;;  %v229_v6 = vld [vmem:[%s8679_s0 + $0x8] sm:$0xff] }
  0x52   : > { %v4682_v12 = vld [vmem:[%s7270_s27 + $0x220] sm:$0xf]  ;;  %v6532_v13 = vld [vmem:[%s7270_s27 + $0x22c] sm:$0xf0]  ;;  %v4555_v19 = vor.u32 %v6500_v11, %v4554_v9  ;;  %3405 = vmatpush.bf16.msra.mxu3 %v4827_v10  ;;  %v245_v7 = vld [vmem:[%s8679_s0 + $0x88] sm:$0xff] }
  0x53   : > { %v4810_v14 = vld [vmem:[%s7270_s27 + $0x320] sm:$0xf]  ;;  %v6564_v15 = vld [vmem:[%s7270_s27 + $0x32c] sm:$0xf0]  ;;  %v4683_v20 = vor.u32 %v6532_v13, %v4682_v12  ;;  %3364 = vmatpush.bf16.msra.mxu0 %v4427_v16  ;;  %v231_v8 = vld [vmem:[%s8679_s0 + $0x18] sm:$0xff]  ;;  %v7399_v10 = vpack.c.bf16 %v245_v7, %v229_v6 }
  0x54   : > { %v4410_v17 = vld [vmem:[%s7270_s27] sm:$0xf]  ;;  %v6464_v18 = vld [vmem:[%s7270_s27 + $0xc] sm:$0xf0]  ;;  %v4811_v24 = vor.u32 %v6564_v15, %v4810_v14  ;;  %3378 = vmatpush.bf16.msra.mxu1 %v4555_v19  ;;  %v247_v11 = vld [vmem:[%s8679_s0 + $0x98] sm:$0xff] }
  0x55   : > { %v4538_v21 = vld [vmem:[%s7270_s27 + $0x100] sm:$0xf]  ;;  %v6496_v22 = vld [vmem:[%s7270_s27 + $0x10c] sm:$0xf0]  ;;  %v4411_v31 = vor.u32 %v6464_v18, %v4410_v17  ;;  %3392 = vmatpush.bf16.msra.mxu2 %v4683_v20  ;;  %v7407_v17 = vpack.c.bf16 %v247_v11, %v231_v8 }
  0x56   : > { %v4666_v23 = vld [vmem:[%s7270_s27 + $0x200] sm:$0xf]  ;;  %v6528_v25 = vld [vmem:[%s7270_s27 + $0x20c] sm:$0xf0]  ;;  %v4539_v35 = vor.u32 %v6496_v22, %v4538_v21  ;;  %3406 = vmatpush.bf16.msra.mxu3 %v4811_v24 }
  0x57   : > { %v4794_v26 = vld [vmem:[%s7270_s27 + $0x300] sm:$0xf]  ;;  %v6560_v27 = vld [vmem:[%s7270_s27 + $0x30c] sm:$0xf0]  ;;  %v4667_v36 = vor.u32 %v6528_v25, %v4666_v23  ;;  %3365 = vmatpush.bf16.msra.mxu0 %v4411_v31 }
  0x58   : > { %v5034_v28 = vld [vmem:[%s7270_s27 + $0x4e0] sm:$0xf]  ;;  %v6620_v29 = vld [vmem:[%s7270_s27 + $0x4ec] sm:$0xf0]  ;;  %v4795_v39 = vor.u32 %v6560_v27, %v4794_v26  ;;  %3379 = vmatpush.bf16.msra.mxu1 %v4539_v35 }
  0x59   : > { %v5162_v30 = vld [vmem:[%s7270_s27 + $0x5e0] sm:$0xf]  ;;  %v6652_v32 = vld [vmem:[%s7270_s27 + $0x5ec] sm:$0xf0]  ;;  %v5035_v40 = vor.u32 %v6620_v29, %v5034_v28  ;;  %3393 = vmatpush.bf16.msra.mxu2 %v4667_v36 }
  0x5a   : > { %v5290_v33 = vld [vmem:[%s7270_s27 + $0x6e0] sm:$0xf]  ;;  %v6684_v34 = vld [vmem:[%s7270_s27 + $0x6ec] sm:$0xf0]  ;;  %v5163_v43 = vor.u32 %v6652_v32, %v5162_v30  ;;  %3407 = vmatpush.bf16.msra.mxu3 %v4795_v39 }
  0x5b   : > { %v5418_v37 = vld [vmem:[%s7270_s27 + $0x7e0] sm:$0xf]  ;;  %v6716_v38 = vld [vmem:[%s7270_s27 + $0x7ec] sm:$0xf0]  ;;  %v5291_v44 = vor.u32 %v6684_v34, %v5290_v33  ;;  %3414 = vmatpush.bf16.msrb.mxu0 %v5035_v40  ;;  %3380 = vmatmul.bf16.vlgmr.msra.gmra.mxu1 %v7399_v10 }
  0x5c   : > { %v5018_v41 = vld [vmem:[%s7270_s27 + $0x4c0] sm:$0xf]  ;;  %v6616_v42 = vld [vmem:[%s7270_s27 + $0x4cc] sm:$0xf0]  ;;  %v5419_v48 = vor.u32 %v6716_v38, %v5418_v37  ;;  %3428 = vmatpush.bf16.msrb.mxu1 %v5163_v43 }
  0x5d   : > { %v5146_v45 = vld [vmem:[%s7270_s27 + $0x5c0] sm:$0xf]  ;;  %v6648_v46 = vld [vmem:[%s7270_s27 + $0x5cc] sm:$0xf0]  ;;  %v5019_v55 = vor.u32 %v6616_v42, %v5018_v41  ;;  %3442 = vmatpush.bf16.msrb.mxu2 %v5291_v44  ;;  %3408 = vmatmul.bf16.vlgmr.msra.gmra.mxu3 %v7407_v17 }
  0x5e   : > { %v5274_v47 = vld [vmem:[%s7270_s27 + $0x6c0] sm:$0xf]  ;;  %v6680_v49 = vld [vmem:[%s7270_s27 + $0x6cc] sm:$0xf0]  ;;  %v5147_v60 = vor.u32 %v6648_v46, %v5146_v45  ;;  %3456 = vmatpush.bf16.msrb.mxu3 %v5419_v48 }
  0x5f   : > { %v5402_v50 = vld [vmem:[%s7270_s27 + $0x7c0] sm:$0xf]  ;;  %v6712_v51 = vld [vmem:[%s7270_s27 + $0x7cc] sm:$0xf0]  ;;  %v5275_v61 = vor.u32 %v6680_v49, %v5274_v47  ;;  %3415 = vmatpush.bf16.msrb.mxu0 %v5019_v55 }
  0x60   : > { %v228_v52 = vld [vmem:[%s8679_s0] sm:$0xff]  ;;  %v230_v54 = vld [vmem:[%s8679_s0 + $0x10] sm:$0xff]  ;;  %v5403_v2 = vor.u32 %v6712_v51, %v5402_v50  ;;  %3429 = vmatpush.bf16.msrb.mxu1 %v5147_v60 }
  0x61   : > { %v244_v53 = vld [vmem:[%s8679_s0 + $0x80] sm:$0xff]  ;;  %v6612_v57 = vld [vmem:[%s7270_s27 + $0x4ac] sm:$0xf0]  ;;  %3443 = vmatpush.bf16.msrb.mxu2 %v5275_v61 }
  0x62   : > { %v5002_v56 = vld [vmem:[%s7270_s27 + $0x4a0] sm:$0xf]  ;;  %v7375_v58 = vpack.c.bf16 %v244_v53, %v228_v52  ;;  %v246_v59 = vld [vmem:[%s8679_s0 + $0x90] sm:$0xff]  ;;  %3457 = vmatpush.bf16.msrb.mxu3 %v5403_v2 }
  0x63   : > { %v5130_v62 = vld [vmem:[%s7270_s27 + $0x5a0] sm:$0xf]  ;;  %v6644_v63 = vld [vmem:[%s7270_s27 + $0x5ac] sm:$0xf0]  ;;  %v7383_v1 = vpack.c.bf16 %v246_v59, %v230_v54  ;;  %v5003_v9 = vor.u32 %v6612_v57, %v5002_v56 }
  0x64   : > { %v5258_v0 = vld [vmem:[%s7270_s27 + $0x6a0] sm:$0xf]  ;;  %v6676_v3 = vld [vmem:[%s7270_s27 + $0x6ac] sm:$0xf0]  ;;  %3366 = vmatmul.bf16.vlgmr.msra.gmra.mxu0 %v7375_v58  ;;  %v5131_v12 = vor.u32 %v6644_v63, %v5130_v62 }
  0x65   : > { %v5386_v4 = vld [vmem:[%s7270_s27 + $0x7a0] sm:$0xf]  ;;  %v6708_v5 = vld [vmem:[%s7270_s27 + $0x7ac] sm:$0xf0]  ;;  %3394 = vmatmul.bf16.vlgmr.msra.gmra.mxu2 %v7383_v1  ;;  %v5259_v13 = vor.u32 %v6676_v3, %v5258_v0  ;;  %3416 = vmatpush.bf16.msrb.mxu0 %v5003_v9 }
  0x66   : > { %v4986_v14 = vld [vmem:[%s7270_s27 + $0x480] sm:$0xf]  ;;  %v6608_v15 = vld [vmem:[%s7270_s27 + $0x48c] sm:$0xf0]  ;;  %v5387_v18 = vor.u32 %v6708_v5, %v5386_v4  ;;  %3430 = vmatpush.bf16.msrb.mxu1 %v5131_v12 }
  0x67   : > { %v5114_v16 = vld [vmem:[%s7270_s27 + $0x580] sm:$0xf]  ;;  %v6640_v19 = vld [vmem:[%s7270_s27 + $0x58c] sm:$0xf0]  ;;  %v4987_v24 = vor.u32 %v6608_v15, %v4986_v14  ;;  %3444 = vmatpush.bf16.msrb.mxu2 %v5259_v13 }
  0x68   : > { %v5242_v20 = vld [vmem:[%s7270_s27 + $0x680] sm:$0xf]  ;;  %v6672_v21 = vld [vmem:[%s7270_s27 + $0x68c] sm:$0xf0]  ;;  %v5115_v25 = vor.u32 %v6640_v19, %v5114_v16  ;;  %3458 = vmatpush.bf16.msrb.mxu3 %v5387_v18 }
  0x69   : > { %v5370_v22 = vld [vmem:[%s7270_s27 + $0x780] sm:$0xf]  ;;  %v6704_v23 = vld [vmem:[%s7270_s27 + $0x78c] sm:$0xf0]  ;;  %v5243_v26 = vor.u32 %v6672_v21, %v5242_v20  ;;  %3417 = vmatpush.bf16.msrb.mxu0 %v4987_v24 }
  0x6a   : > { %v4970_v27 = vld [vmem:[%s7270_s27 + $0x460] sm:$0xf]  ;;  %v6604_v28 = vld [vmem:[%s7270_s27 + $0x46c] sm:$0xf0]  ;;  %v5371_v30 = vor.u32 %v6704_v23, %v5370_v22  ;;  %3431 = vmatpush.bf16.msrb.mxu1 %v5115_v25 }
  0x6b   : > { %v5098_v29 = vld [vmem:[%s7270_s27 + $0x560] sm:$0xf]  ;;  %v6636_v31 = vld [vmem:[%s7270_s27 + $0x56c] sm:$0xf0]  ;;  %v4971_v36 = vor.u32 %v6604_v28, %v4970_v27  ;;  %3445 = vmatpush.bf16.msrb.mxu2 %v5243_v26  ;;  %v233_v27 = vld [vmem:[%s8679_s0 + $0x28] sm:$0xff] }
  0x6c   : > { %v5226_v32 = vld [vmem:[%s7270_s27 + $0x660] sm:$0xf]  ;;  %v6668_v33 = vld [vmem:[%s7270_s27 + $0x66c] sm:$0xf0]  ;;  %v5099_v37 = vor.u32 %v6636_v31, %v5098_v29  ;;  %3459 = vmatpush.bf16.msrb.mxu3 %v5371_v30  ;;  %v249_v30 = vld [vmem:[%s8679_s0 + $0xa8] sm:$0xff] }
  0x6d   : > { %v5354_v34 = vld [vmem:[%s7270_s27 + $0x760] sm:$0xf]  ;;  %v6700_v35 = vld [vmem:[%s7270_s27 + $0x76c] sm:$0xf0]  ;;  %v5227_v38 = vor.u32 %v6668_v33, %v5226_v32  ;;  %3418 = vmatpush.bf16.msrb.mxu0 %v4971_v36  ;;  %v235_v31 = vld [vmem:[%s8679_s0 + $0x38] sm:$0xff] }
  0x6e   : > { %v4954_v39 = vld [vmem:[%s7270_s27 + $0x440] sm:$0xf]  ;;  %v6600_v40 = vld [vmem:[%s7270_s27 + $0x44c] sm:$0xf0]  ;;  %v5355_v42 = vor.u32 %v6700_v35, %v5354_v34  ;;  %3432 = vmatpush.bf16.msrb.mxu1 %v5099_v37  ;;  %v251_v32 = vld [vmem:[%s8679_s0 + $0xb8] sm:$0xff] }
  0x6f   : > { %v5082_v41 = vld [vmem:[%s7270_s27 + $0x540] sm:$0xf]  ;;  %v6632_v43 = vld [vmem:[%s7270_s27 + $0x54c] sm:$0xf0]  ;;  %v4955_v48 = vor.u32 %v6600_v40, %v4954_v39  ;;  %3446 = vmatpush.bf16.msrb.mxu2 %v5227_v38 }
  0x70   : > { %v5210_v44 = vld [vmem:[%s7270_s27 + $0x640] sm:$0xf]  ;;  %v6664_v45 = vld [vmem:[%s7270_s27 + $0x64c] sm:$0xf0]  ;;  %v5083_v50 = vor.u32 %v6632_v43, %v5082_v41  ;;  %3460 = vmatpush.bf16.msrb.mxu3 %v5355_v42 }
  0x71   : > { %v5338_v46 = vld [vmem:[%s7270_s27 + $0x740] sm:$0xf]  ;;  %v6696_v47 = vld [vmem:[%s7270_s27 + $0x74c] sm:$0xf0]  ;;  %v5211_v51 = vor.u32 %v6664_v45, %v5210_v44  ;;  %3419 = vmatpush.bf16.msrb.mxu0 %v4955_v48  ;;  %v7490_v44 = vpack.c.bf16 %v249_v30, %v233_v27 }
  0x72   : > { %v4938_v49 = vld [vmem:[%s7270_s27 + $0x420] sm:$0xf]  ;;  %v6596_v52 = vld [vmem:[%s7270_s27 + $0x42c] sm:$0xf0]  ;;  %v5339_v55 = vor.u32 %v6696_v47, %v5338_v46  ;;  %3433 = vmatpush.bf16.msrb.mxu1 %v5083_v50  ;;  %v7494_v47 = vpack.c.bf16 %v251_v32, %v235_v31 }
  0x73   : > { %v5066_v53 = vld [vmem:[%s7270_s27 + $0x520] sm:$0xf]  ;;  %v6628_v54 = vld [vmem:[%s7270_s27 + $0x52c] sm:$0xf0]  ;;  %v4939_v63 = vor.u32 %v6596_v52, %v4938_v49  ;;  %3447 = vmatpush.bf16.msrb.mxu2 %v5211_v51 }
  0x74   : > { %v5194_v56 = vld [vmem:[%s7270_s27 + $0x620] sm:$0xf]  ;;  %v6660_v57 = vld [vmem:[%s7270_s27 + $0x62c] sm:$0xf0]  ;;  %v5067_v5 = vor.u32 %v6628_v54, %v5066_v53  ;;  %3461 = vmatpush.bf16.msrb.mxu3 %v5339_v55 }
  0x75   : > { %v5322_v59 = vld [vmem:[%s7270_s27 + $0x720] sm:$0xf]  ;;  %v6692_v60 = vld [vmem:[%s7270_s27 + $0x72c] sm:$0xf0]  ;;  %v5195_v6 = vor.u32 %v6660_v57, %v5194_v56  ;;  %3420 = vmatpush.bf16.msrb.mxu0 %v4939_v63 }
  0x76   : > { %v4922_v61 = vld [vmem:[%s7270_s27 + $0x400] sm:$0xf]  ;;  %v6592_v62 = vld [vmem:[%s7270_s27 + $0x40c] sm:$0xf0]  ;;  %v5323_v11 = vor.u32 %v6692_v60, %v5322_v59  ;;  %3434 = vmatpush.bf16.msrb.mxu1 %v5067_v5 }
  0x77   : > { %v5050_v0 = vld [vmem:[%s7270_s27 + $0x500] sm:$0xf]  ;;  %v6624_v2 = vld [vmem:[%s7270_s27 + $0x50c] sm:$0xf0]  ;;  %v4923_v19 = vor.u32 %v6592_v62, %v4922_v61  ;;  %3448 = vmatpush.bf16.msrb.mxu2 %v5195_v6 }
  0x78   : > { %v5178_v3 = vld [vmem:[%s7270_s27 + $0x600] sm:$0xf]  ;;  %v6656_v4 = vld [vmem:[%s7270_s27 + $0x60c] sm:$0xf0]  ;;  %v5051_v23 = vor.u32 %v6624_v2, %v5050_v0  ;;  %3462 = vmatpush.bf16.msrb.mxu3 %v5323_v11 }
  0x79   : > { %v5306_v7 = vld [vmem:[%s7270_s27 + $0x700] sm:$0xf]  ;;  %v6688_v8 = vld [vmem:[%s7270_s27 + $0x70c] sm:$0xf0]  ;;  %v5179_v24 = vor.u32 %v6656_v4, %v5178_v3  ;;  %3421 = vmatpush.bf16.msrb.mxu0 %v4923_v19 }
  0x7a   : > { %v5546_v9 = vld [vmem:[%s7270_s27 + $0x8e0] sm:$0xf]  ;;  %v6748_v12 = vld [vmem:[%s7270_s27 + $0x8ec] sm:$0xf0]  ;;  %v5307_v28 = vor.u32 %v6688_v8, %v5306_v7  ;;  %3435 = vmatpush.bf16.msrb.mxu1 %v5051_v23 }
  0x7b   : > { %v5674_v13 = vld [vmem:[%s7270_s27 + $0x9e0] sm:$0xf]  ;;  %v6780_v14 = vld [vmem:[%s7270_s27 + $0x9ec] sm:$0xf0]  ;;  %v5547_v29 = vor.u32 %v6748_v12, %v5546_v9  ;;  %3449 = vmatpush.bf16.msrb.mxu2 %v5179_v24 }
  0x7c   : > { %v5802_v15 = vld [vmem:[%s7270_s27 + $0xae0] sm:$0xf]  ;;  %v6812_v16 = vld [vmem:[%s7270_s27 + $0xaec] sm:$0xf0]  ;;  %v5675_v33 = vor.u32 %v6780_v14, %v5674_v13  ;;  %3463 = vmatpush.bf16.msrb.mxu3 %v5307_v28 }
  0x7d   : > { %v5930_v18 = vld [vmem:[%s7270_s27 + $0xbe0] sm:$0xf]  ;;  %v6844_v20 = vld [vmem:[%s7270_s27 + $0xbec] sm:$0xf0]  ;;  %v5803_v34 = vor.u32 %v6812_v16, %v5802_v15  ;;  %3470 = vmatpush.bf16.msra.mxu0 %v5547_v29  ;;  %3436 = vmatmul.bf16.vlgmr.msrb.gmra.mxu1 %v7490_v44 }
  0x7e   : > { %v232_v21 = vld [vmem:[%s8679_s0 + $0x20] sm:$0xff]  ;;  %v234_v25 = vld [vmem:[%s8679_s0 + $0x30] sm:$0xff]  ;;  %v5931_v38 = vor.u32 %v6844_v20, %v5930_v18  ;;  %3484 = vmatpush.bf16.msra.mxu1 %v5675_v33 }
  0x7f   : > { %v248_v22 = vld [vmem:[%s8679_s0 + $0xa0] sm:$0xff]  ;;  %v250_v26 = vld [vmem:[%s8679_s0 + $0xb0] sm:$0xff]  ;;  %3498 = vmatpush.bf16.msra.mxu2 %v5803_v34  ;;  %3464 = vmatmul.bf16.vlgmr.msrb.gmra.mxu3 %v7494_v47 }
  0x80   : > { %v5530_v35 = vld [vmem:[%s7270_s27 + $0x8c0] sm:$0xf]  ;;  %v6744_v36 = vld [vmem:[%s7270_s27 + $0x8cc] sm:$0xf0]  ;;  %v7483_v39 = vpack.c.bf16 %v248_v22, %v232_v21  ;;  %v7488_v43 = vpack.c.bf16 %v250_v26, %v234_v25  ;;  %3512 = vmatpush.bf16.msra.mxu3 %v5931_v38 }
  0x81   : > { %v5658_v37 = vld [vmem:[%s7270_s27 + $0x9c0] sm:$0xf]  ;;  %v6776_v40 = vld [vmem:[%s7270_s27 + $0x9cc] sm:$0xf0]  ;;  %v5531_v48 = vor.u32 %v6744_v36, %v5530_v35 }
  0x82   : > { %v5786_v41 = vld [vmem:[%s7270_s27 + $0xac0] sm:$0xf]  ;;  %v6808_v42 = vld [vmem:[%s7270_s27 + $0xacc] sm:$0xf0]  ;;  %v5659_v49 = vor.u32 %v6776_v40, %v5658_v37  ;;  %3422 = vmatmul.bf16.vlgmr.msrb.gmra.mxu0 %v7483_v39  ;;  %3450 = vmatmul.bf16.vlgmr.msrb.gmra.mxu2 %v7488_v43 }
  0x83   : > { %v5914_v45 = vld [vmem:[%s7270_s27 + $0xbc0] sm:$0xf]  ;;  %v6840_v46 = vld [vmem:[%s7270_s27 + $0xbcc] sm:$0xf0]  ;;  %v5787_v50 = vor.u32 %v6808_v42, %v5786_v41  ;;  %3471 = vmatpush.bf16.msra.mxu0 %v5531_v48 }
  0x84   : > { %v5514_v51 = vld [vmem:[%s7270_s27 + $0x8a0] sm:$0xf]  ;;  %v6740_v52 = vld [vmem:[%s7270_s27 + $0x8ac] sm:$0xf0]  ;;  %v5915_v54 = vor.u32 %v6840_v46, %v5914_v45  ;;  %3485 = vmatpush.bf16.msra.mxu1 %v5659_v49 }
  0x85   : > { %v5642_v53 = vld [vmem:[%s7270_s27 + $0x9a0] sm:$0xf]  ;;  %v6772_v55 = vld [vmem:[%s7270_s27 + $0x9ac] sm:$0xf0]  ;;  %v5515_v61 = vor.u32 %v6740_v52, %v5514_v51  ;;  %3499 = vmatpush.bf16.msra.mxu2 %v5787_v50 }
  0x86   : > { %v5770_v56 = vld [vmem:[%s7270_s27 + $0xaa0] sm:$0xf]  ;;  %v6804_v57 = vld [vmem:[%s7270_s27 + $0xaac] sm:$0xf0]  ;;  %v5643_v62 = vor.u32 %v6772_v55, %v5642_v53  ;;  %3513 = vmatpush.bf16.msra.mxu3 %v5915_v54 }
  0x87   : > { %v5898_v59 = vld [vmem:[%s7270_s27 + $0xba0] sm:$0xf]  ;;  %v6836_v60 = vld [vmem:[%s7270_s27 + $0xbac] sm:$0xf0]  ;;  %v5771_v63 = vor.u32 %v6804_v57, %v5770_v56  ;;  %3472 = vmatpush.bf16.msra.mxu0 %v5515_v61 }
  0x88   : > { %v5498_v0 = vld [vmem:[%s7270_s27 + $0x880] sm:$0xf]  ;;  %v6736_v2 = vld [vmem:[%s7270_s27 + $0x88c] sm:$0xf0]  ;;  %v5899_v4 = vor.u32 %v6836_v60, %v5898_v59  ;;  %3486 = vmatpush.bf16.msra.mxu1 %v5643_v62 }
  0x89   : > { %v5626_v3 = vld [vmem:[%s7270_s27 + $0x980] sm:$0xf]  ;;  %v6768_v5 = vld [vmem:[%s7270_s27 + $0x98c] sm:$0xf0]  ;;  %v5499_v11 = vor.u32 %v6736_v2, %v5498_v0  ;;  %3500 = vmatpush.bf16.msra.mxu2 %v5771_v63 }
  0x8a   : > { %v5754_v6 = vld [vmem:[%s7270_s27 + $0xa80] sm:$0xf]  ;;  %v6800_v7 = vld [vmem:[%s7270_s27 + $0xa8c] sm:$0xf0]  ;;  %v5627_v12 = vor.u32 %v6768_v5, %v5626_v3  ;;  %3514 = vmatpush.bf16.msra.mxu3 %v5899_v4 }
  0x8b   : > { %v5882_v8 = vld [vmem:[%s7270_s27 + $0xb80] sm:$0xf]  ;;  %v6832_v9 = vld [vmem:[%s7270_s27 + $0xb8c] sm:$0xf0]  ;;  %v5755_v13 = vor.u32 %v6800_v7, %v5754_v6  ;;  %3473 = vmatpush.bf16.msra.mxu0 %v5499_v11 }
  0x8c   : > { %v5482_v14 = vld [vmem:[%s7270_s27 + $0x860] sm:$0xf]  ;;  %v6732_v15 = vld [vmem:[%s7270_s27 + $0x86c] sm:$0xf0]  ;;  %v5883_v18 = vor.u32 %v6832_v9, %v5882_v8  ;;  %3487 = vmatpush.bf16.msra.mxu1 %v5627_v12 }
  0x8d   : > { %v5610_v16 = vld [vmem:[%s7270_s27 + $0x960] sm:$0xf]  ;;  %v6764_v19 = vld [vmem:[%s7270_s27 + $0x96c] sm:$0xf0]  ;;  %v5483_v24 = vor.u32 %v6732_v15, %v5482_v14  ;;  %3501 = vmatpush.bf16.msra.mxu2 %v5755_v13 }
  0x8e   : > { %v5738_v20 = vld [vmem:[%s7270_s27 + $0xa60] sm:$0xf]  ;;  %v6796_v21 = vld [vmem:[%s7270_s27 + $0xa6c] sm:$0xf0]  ;;  %v5611_v25 = vor.u32 %v6764_v19, %v5610_v16  ;;  %3515 = vmatpush.bf16.msra.mxu3 %v5883_v18  ;;  %v237_v19 = vld [vmem:[%s8679_s0 + $0x48] sm:$0xff] }
  0x8f   : > { %v5866_v22 = vld [vmem:[%s7270_s27 + $0xb60] sm:$0xf]  ;;  %v6828_v23 = vld [vmem:[%s7270_s27 + $0xb6c] sm:$0xf0]  ;;  %v5739_v26 = vor.u32 %v6796_v21, %v5738_v20  ;;  %3474 = vmatpush.bf16.msra.mxu0 %v5483_v24  ;;  %v255_v24 = vld [vmem:[%s8679_s0 + $0xd8] sm:$0xff] }
  0x90   : > { %v5466_v27 = vld [vmem:[%s7270_s27 + $0x840] sm:$0xf]  ;;  %v6728_v28 = vld [vmem:[%s7270_s27 + $0x84c] sm:$0xf0]  ;;  %v5867_v30 = vor.u32 %v6828_v23, %v5866_v22  ;;  %3488 = vmatpush.bf16.msra.mxu1 %v5611_v25  ;;  %v253_v22 = vld [vmem:[%s8679_s0 + $0xc8] sm:$0xff] }
  0x91   : > { %v5594_v29 = vld [vmem:[%s7270_s27 + $0x940] sm:$0xf]  ;;  %v6760_v31 = vld [vmem:[%s7270_s27 + $0x94c] sm:$0xf0]  ;;  %v5467_v36 = vor.u32 %v6728_v28, %v5466_v27  ;;  %3502 = vmatpush.bf16.msra.mxu2 %v5739_v26  ;;  %v239_v23 = vld [vmem:[%s8679_s0 + $0x58] sm:$0xff] }
  0x92   : > { %v5722_v32 = vld [vmem:[%s7270_s27 + $0xa40] sm:$0xf]  ;;  %v6792_v33 = vld [vmem:[%s7270_s27 + $0xa4c] sm:$0xf0]  ;;  %v5595_v38 = vor.u32 %v6760_v31, %v5594_v29  ;;  %3516 = vmatpush.bf16.msra.mxu3 %v5867_v30 }
  0x93   : > { %v5850_v34 = vld [vmem:[%s7270_s27 + $0xb40] sm:$0xf]  ;;  %v6824_v35 = vld [vmem:[%s7270_s27 + $0xb4c] sm:$0xf0]  ;;  %v5723_v40 = vor.u32 %v6792_v33, %v5722_v32  ;;  %3475 = vmatpush.bf16.msra.mxu0 %v5467_v36  ;;  %v7590_v36 = vpack.c.bf16 %v253_v22, %v237_v19 }
  0x94   : > { %v5450_v37 = vld [vmem:[%s7270_s27 + $0x820] sm:$0xf]  ;;  %v6724_v41 = vld [vmem:[%s7270_s27 + $0x82c] sm:$0xf0]  ;;  %v5851_v46 = vor.u32 %v6824_v35, %v5850_v34  ;;  %3489 = vmatpush.bf16.msra.mxu1 %v5595_v38 }
  0x95   : > { %v5578_v42 = vld [vmem:[%s7270_s27 + $0x920] sm:$0xf]  ;;  %v6756_v45 = vld [vmem:[%s7270_s27 + $0x92c] sm:$0xf0]  ;;  %v5451_v54 = vor.u32 %v6724_v41, %v5450_v37  ;;  %3503 = vmatpush.bf16.msra.mxu2 %v5723_v40  ;;  %v7594_v40 = vpack.c.bf16 %v255_v24, %v239_v23 }
  0x96   : > { %v5706_v48 = vld [vmem:[%s7270_s27 + $0xa20] sm:$0xf]  ;;  %v6788_v49 = vld [vmem:[%s7270_s27 + $0xa2c] sm:$0xf0]  ;;  %v5579_v60 = vor.u32 %v6756_v45, %v5578_v42  ;;  %3517 = vmatpush.bf16.msra.mxu3 %v5851_v46 }
  0x97   : > { %v5834_v50 = vld [vmem:[%s7270_s27 + $0xb20] sm:$0xf]  ;;  %v6820_v51 = vld [vmem:[%s7270_s27 + $0xb2c] sm:$0xf0]  ;;  %v5707_v61 = vor.u32 %v6788_v49, %v5706_v48  ;;  %3476 = vmatpush.bf16.msra.mxu0 %v5451_v54 }
  0x98   : > { %v5434_v52 = vld [vmem:[%s7270_s27 + $0x800] sm:$0xf]  ;;  %v6720_v53 = vld [vmem:[%s7270_s27 + $0x80c] sm:$0xf0]  ;;  %v5835_v2 = vor.u32 %v6820_v51, %v5834_v50  ;;  %3490 = vmatpush.bf16.msra.mxu1 %v5579_v60 }
  0x99   : > { %v5562_v55 = vld [vmem:[%s7270_s27 + $0x900] sm:$0xf]  ;;  %v6752_v56 = vld [vmem:[%s7270_s27 + $0x90c] sm:$0xf0]  ;;  %v5435_v9 = vor.u32 %v6720_v53, %v5434_v52  ;;  %3504 = vmatpush.bf16.msra.mxu2 %v5707_v61 }
  0x9a   : > { %v5690_v57 = vld [vmem:[%s7270_s27 + $0xa00] sm:$0xf]  ;;  %v6784_v59 = vld [vmem:[%s7270_s27 + $0xa0c] sm:$0xf0]  ;;  %v5563_v14 = vor.u32 %v6752_v56, %v5562_v55  ;;  %3518 = vmatpush.bf16.msra.mxu3 %v5835_v2 }
  0x9b   : > { %v5818_v62 = vld [vmem:[%s7270_s27 + $0xb00] sm:$0xf]  ;;  %v6816_v63 = vld [vmem:[%s7270_s27 + $0xb0c] sm:$0xf0]  ;;  %v5691_v15 = vor.u32 %v6784_v59, %v5690_v57  ;;  %3477 = vmatpush.bf16.msra.mxu0 %v5435_v9 }
  0x9c   : > { %v6058_v0 = vld [vmem:[%s7270_s27 + $0xce0] sm:$0xf]  ;;  %v6876_v3 = vld [vmem:[%s7270_s27 + $0xcec] sm:$0xf0]  ;;  %v5819_v20 = vor.u32 %v6816_v63, %v5818_v62  ;;  %3491 = vmatpush.bf16.msra.mxu1 %v5563_v14 }
  0x9d   : > { %v6186_v4 = vld [vmem:[%s7270_s27 + $0xde0] sm:$0xf]  ;;  %v6908_v5 = vld [vmem:[%s7270_s27 + $0xdec] sm:$0xf0]  ;;  %v6059_v21 = vor.u32 %v6876_v3, %v6058_v0  ;;  %3505 = vmatpush.bf16.msra.mxu2 %v5691_v15 }
  0x9e   : > { %v6314_v6 = vld [vmem:[%s7270_s27 + $0xee0] sm:$0xf]  ;;  %v6940_v7 = vld [vmem:[%s7270_s27 + $0xeec] sm:$0xf0]  ;;  %v6187_v25 = vor.u32 %v6908_v5, %v6186_v4  ;;  %3519 = vmatpush.bf16.msra.mxu3 %v5819_v20 }
  0x9f   : > { %v6442_v8 = vld [vmem:[%s7270_s27 + $0xfe0] sm:$0xf]  ;;  %v6972_v11 = vld [vmem:[%s7270_s27 + $0xfec] sm:$0xf0]  ;;  %v6315_v26 = vor.u32 %v6940_v7, %v6314_v6  ;;  %3526 = vmatpush.bf16.msrb.mxu0 %v6059_v21  ;;  %3492 = vmatmul.bf16.vlgmr.msra.gmra.mxu1 %v7590_v36 }
  0xa0   : > { %v236_v12 = vld [vmem:[%s8679_s0 + $0x40] sm:$0xff]  ;;  %v238_v16 = vld [vmem:[%s8679_s0 + $0x50] sm:$0xff]  ;;  %v6443_v30 = vor.u32 %v6972_v11, %v6442_v8  ;;  %3540 = vmatpush.bf16.msrb.mxu1 %v6187_v25 }
  0xa1   : > { %v252_v13 = vld [vmem:[%s8679_s0 + $0xc0] sm:$0xff]  ;;  %v254_v18 = vld [vmem:[%s8679_s0 + $0xd0] sm:$0xff]  ;;  %3554 = vmatpush.bf16.msrb.mxu2 %v6315_v26  ;;  %3520 = vmatmul.bf16.vlgmr.msra.gmra.mxu3 %v7594_v40 }
  0xa2   : > { %v6042_v27 = vld [vmem:[%s7270_s27 + $0xcc0] sm:$0xf]  ;;  %v6872_v28 = vld [vmem:[%s7270_s27 + $0xccc] sm:$0xf0]  ;;  %v7583_v31 = vpack.c.bf16 %v252_v13, %v236_v12  ;;  %v7588_v35 = vpack.c.bf16 %v254_v18, %v238_v16  ;;  %3568 = vmatpush.bf16.msrb.mxu3 %v6443_v30 }
  0xa3   : > { %v6170_v29 = vld [vmem:[%s7270_s27 + $0xdc0] sm:$0xf]  ;;  %v6904_v32 = vld [vmem:[%s7270_s27 + $0xdcc] sm:$0xf0]  ;;  %v6043_v41 = vor.u32 %v6872_v28, %v6042_v27 }
  0xa4   : > { %v6298_v33 = vld [vmem:[%s7270_s27 + $0xec0] sm:$0xf]  ;;  %v6936_v34 = vld [vmem:[%s7270_s27 + $0xecc] sm:$0xf0]  ;;  %v6171_v42 = vor.u32 %v6904_v32, %v6170_v29  ;;  %3478 = vmatmul.bf16.vlgmr.msra.gmra.mxu0 %v7583_v31  ;;  %3506 = vmatmul.bf16.vlgmr.msra.gmra.mxu2 %v7588_v35 }
  0xa5   : > { %v6426_v37 = vld [vmem:[%s7270_s27 + $0xfc0] sm:$0xf]  ;;  %v6968_v38 = vld [vmem:[%s7270_s27 + $0xfcc] sm:$0xf0]  ;;  %v6299_v45 = vor.u32 %v6936_v34, %v6298_v33  ;;  %3527 = vmatpush.bf16.msrb.mxu0 %v6043_v41 }
  0xa6   : > { %v6026_v46 = vld [vmem:[%s7270_s27 + $0xca0] sm:$0xf]  ;;  %v6868_v48 = vld [vmem:[%s7270_s27 + $0xcac] sm:$0xf0]  ;;  %v6427_v50 = vor.u32 %v6968_v38, %v6426_v37  ;;  %3541 = vmatpush.bf16.msrb.mxu1 %v6171_v42 }
  0xa7   : > { %v6154_v49 = vld [vmem:[%s7270_s27 + $0xda0] sm:$0xf]  ;;  %v6900_v51 = vld [vmem:[%s7270_s27 + $0xdac] sm:$0xf0]  ;;  %v6027_v56 = vor.u32 %v6868_v48, %v6026_v46  ;;  %3555 = vmatpush.bf16.msrb.mxu2 %v6299_v45 }
  0xa8   : > { %v6282_v52 = vld [vmem:[%s7270_s27 + $0xea0] sm:$0xf]  ;;  %v6932_v53 = vld [vmem:[%s7270_s27 + $0xeac] sm:$0xf0]  ;;  %v6155_v57 = vor.u32 %v6900_v51, %v6154_v49  ;;  %3569 = vmatpush.bf16.msrb.mxu3 %v6427_v50 }
  0xa9   : > { %v6410_v54 = vld [vmem:[%s7270_s27 + $0xfa0] sm:$0xf]  ;;  %v6964_v55 = vld [vmem:[%s7270_s27 + $0xfac] sm:$0xf0]  ;;  %v6283_v59 = vor.u32 %v6932_v53, %v6282_v52  ;;  %3528 = vmatpush.bf16.msrb.mxu0 %v6027_v56 }
  0xaa   : > { %v6010_v60 = vld [vmem:[%s7270_s27 + $0xc80] sm:$0xf]  ;;  %v6864_v61 = vld [vmem:[%s7270_s27 + $0xc8c] sm:$0xf0]  ;;  %v6411_v63 = vor.u32 %v6964_v55, %v6410_v54  ;;  %3542 = vmatpush.bf16.msrb.mxu1 %v6155_v57 }
  0xab   : > { %v6138_v62 = vld [vmem:[%s7270_s27 + $0xd80] sm:$0xf]  ;;  %v6896_v0 = vld [vmem:[%s7270_s27 + $0xd8c] sm:$0xf0]  ;;  %v6011_v6 = vor.u32 %v6864_v61, %v6010_v60  ;;  %3556 = vmatpush.bf16.msrb.mxu2 %v6283_v59 }
  0xac   : > { %v6266_v2 = vld [vmem:[%s7270_s27 + $0xe80] sm:$0xf]  ;;  %v6928_v3 = vld [vmem:[%s7270_s27 + $0xe8c] sm:$0xf0]  ;;  %v6139_v7 = vor.u32 %v6896_v0, %v6138_v62  ;;  %3570 = vmatpush.bf16.msrb.mxu3 %v6411_v63  ;;  %v6490_v0 = vld [vmem:[%s7270_s27 + $0xe4] sm:$0xf] }
  0xad   : > { %v6394_v4 = vld [vmem:[%s7270_s27 + $0xf80] sm:$0xf]  ;;  %v6960_v5 = vld [vmem:[%s7270_s27 + $0xf8c] sm:$0xf0]  ;;  %v6267_v8 = vor.u32 %v6928_v3, %v6266_v2  ;;  %3529 = vmatpush.bf16.msrb.mxu0 %v6011_v6  ;;  %v4524_v3 = vld [vmem:[%s7270_s27 + $0xf0] sm:$0xf0] }
  0xae   : > { %v5994_v9 = vld [vmem:[%s7270_s27 + $0xc60] sm:$0xf]  ;;  %v6860_v11 = vld [vmem:[%s7270_s27 + $0xc6c] sm:$0xf0]  ;;  %v6395_v13 = vor.u32 %v6960_v5, %v6394_v4  ;;  %3543 = vmatpush.bf16.msrb.mxu1 %v6139_v7  ;;  %v6522_v4 = vld [vmem:[%s7270_s27 + $0x1e4] sm:$0xf] }
  0xaf   : > { %v6122_v12 = vld [vmem:[%s7270_s27 + $0xd60] sm:$0xf]  ;;  %v6892_v14 = vld [vmem:[%s7270_s27 + $0xd6c] sm:$0xf0]  ;;  %v5995_v20 = vor.u32 %v6860_v11, %v5994_v9  ;;  %3557 = vmatpush.bf16.msrb.mxu2 %v6267_v8  ;;  %v4652_v5 = vld [vmem:[%s7270_s27 + $0x1f0] sm:$0xf0] }
  0xb0   : > { %v6250_v15 = vld [vmem:[%s7270_s27 + $0xe60] sm:$0xf]  ;;  %v6924_v16 = vld [vmem:[%s7270_s27 + $0xe6c] sm:$0xf0]  ;;  %v6123_v21 = vor.u32 %v6892_v14, %v6122_v12  ;;  %3571 = vmatpush.bf16.msrb.mxu3 %v6395_v13  ;;  %v6554_v6 = vld [vmem:[%s7270_s27 + $0x2e4] sm:$0xf] }
  0xb1   : > { %v6378_v18 = vld [vmem:[%s7270_s27 + $0xf60] sm:$0xf]  ;;  %v6956_v19 = vld [vmem:[%s7270_s27 + $0xf6c] sm:$0xf0]  ;;  %v6251_v22 = vor.u32 %v6924_v16, %v6250_v15  ;;  %3530 = vmatpush.bf16.msrb.mxu0 %v5995_v20  ;;  %v4780_v7 = vld [vmem:[%s7270_s27 + $0x2f0] sm:$0xf0] }
  0xb2   : > { %v5978_v23 = vld [vmem:[%s7270_s27 + $0xc40] sm:$0xf]  ;;  %v6856_v24 = vld [vmem:[%s7270_s27 + $0xc4c] sm:$0xf0]  ;;  %v6379_v26 = vor.u32 %v6956_v19, %v6378_v18  ;;  %3544 = vmatpush.bf16.msrb.mxu1 %v6123_v21  ;;  %v6586_v8 = vld [vmem:[%s7270_s27 + $0x3e4] sm:$0xf]  ;;  %v4527_v21 = vor.u32 %v6490_v0, %v4524_v3 }
  0xb3   : > { %v6106_v25 = vld [vmem:[%s7270_s27 + $0xd40] sm:$0xf]  ;;  %v6888_v27 = vld [vmem:[%s7270_s27 + $0xd4c] sm:$0xf0]  ;;  %v5979_v33 = vor.u32 %v6856_v24, %v5978_v23  ;;  %3558 = vmatpush.bf16.msrb.mxu2 %v6251_v22  ;;  %v4908_v11 = vld [vmem:[%s7270_s27 + $0x3f0] sm:$0xf0] }
  0xb4   : > { %v6234_v28 = vld [vmem:[%s7270_s27 + $0xe40] sm:$0xf]  ;;  %v6920_v29 = vld [vmem:[%s7270_s27 + $0xe4c] sm:$0xf0]  ;;  %v6107_v37 = vor.u32 %v6888_v27, %v6106_v25  ;;  %3572 = vmatpush.bf16.msrb.mxu3 %v6379_v26  ;;  %v241_v19 = vld [vmem:[%s8679_s0 + $0x68] sm:$0xff]  ;;  %v4655_v25 = vor.u32 %v6522_v4, %v4652_v5  ;;  %v4783_v26 = vor.u32 %v6554_v6, %v4780_v7 }
  0xb5   : > { %v6362_v30 = vld [vmem:[%s7270_s27 + $0xf40] sm:$0xf]  ;;  %v6952_v32 = vld [vmem:[%s7270_s27 + $0xf4c] sm:$0xf0]  ;;  %v6235_v38 = vor.u32 %v6920_v29, %v6234_v28  ;;  %3531 = vmatpush.bf16.msrb.mxu0 %v5979_v33  ;;  %v257_v22 = vld [vmem:[%s8679_s0 + $0xe8] sm:$0xff] }
  0xb6   : > { %v5962_v34 = vld [vmem:[%s7270_s27 + $0xc20] sm:$0xf]  ;;  %v6852_v41 = vld [vmem:[%s7270_s27 + $0xc2c] sm:$0xf0]  ;;  %v6363_v46 = vor.u32 %v6952_v32, %v6362_v30  ;;  %3545 = vmatpush.bf16.msrb.mxu1 %v6107_v37  ;;  %v243_v23 = vld [vmem:[%s8679_s0 + $0x78] sm:$0xff]  ;;  %v4911_v30 = vor.u32 %v6586_v8, %v4908_v11 }
  0xb7   : > { %v6090_v42 = vld [vmem:[%s7270_s27 + $0xd20] sm:$0xf]  ;;  %v6884_v45 = vld [vmem:[%s7270_s27 + $0xd2c] sm:$0xf0]  ;;  %v5963_v54 = vor.u32 %v6852_v41, %v5962_v34  ;;  %3559 = vmatpush.bf16.msrb.mxu2 %v6235_v38  ;;  %v259_v24 = vld [vmem:[%s8679_s0 + $0xf8] sm:$0xff]  ;;  %v7690_v41 = vpack.c.bf16 %v257_v22, %v241_v19 }
  0xb8   : > { %v6218_v48 = vld [vmem:[%s7270_s27 + $0xe20] sm:$0xf]  ;;  %v6916_v49 = vld [vmem:[%s7270_s27 + $0xe2c] sm:$0xf0]  ;;  %v6091_v60 = vor.u32 %v6884_v45, %v6090_v42  ;;  %3573 = vmatpush.bf16.msrb.mxu3 %v6363_v46  ;;  %v6486_v27 = vld [vmem:[%s7270_s27 + $0xc4] sm:$0xf]  ;;  %v7694_v46 = vpack.c.bf16 %v259_v24, %v243_v23 }
  0xb9   : > { %v6346_v50 = vld [vmem:[%s7270_s27 + $0xf20] sm:$0xf]  ;;  %v6948_v51 = vld [vmem:[%s7270_s27 + $0xf2c] sm:$0xf0]  ;;  %v6219_v61 = vor.u32 %v6916_v49, %v6218_v48  ;;  %3532 = vmatpush.bf16.msrb.mxu0 %v5963_v54  ;;  %v4508_v28 = vld [vmem:[%s7270_s27 + $0xd0] sm:$0xf0] }
  0xba   : > { %v5946_v52 = vld [vmem:[%s7270_s27 + $0xc00] sm:$0xf]  ;;  %v6848_v53 = vld [vmem:[%s7270_s27 + $0xc0c] sm:$0xf0]  ;;  %v6347_v2 = vor.u32 %v6948_v51, %v6346_v50  ;;  %3546 = vmatpush.bf16.msrb.mxu1 %v6091_v60  ;;  %v6518_v29 = vld [vmem:[%s7270_s27 + $0x1c4] sm:$0xf]  ;;  %v4511_v48 = vor.u32 %v6486_v27, %v4508_v28 }
  0xbb   : > { %v6074_v55 = vld [vmem:[%s7270_s27 + $0xd00] sm:$0xf]  ;;  %v6880_v56 = vld [vmem:[%s7270_s27 + $0xd0c] sm:$0xf0]  ;;  %v5947_v9 = vor.u32 %v6848_v53, %v5946_v52  ;;  %3560 = vmatpush.bf16.msrb.mxu2 %v6219_v61  ;;  %v4636_v33 = vld [vmem:[%s7270_s27 + $0x1d0] sm:$0xf0] }
  0xbc   : > { %v6202_v57 = vld [vmem:[%s7270_s27 + $0xe00] sm:$0xf]  ;;  %v6912_v59 = vld [vmem:[%s7270_s27 + $0xe0c] sm:$0xf0]  ;;  %v6075_v14 = vor.u32 %v6880_v56, %v6074_v55  ;;  %3574 = vmatpush.bf16.msrb.mxu3 %v6347_v2  ;;  %v6550_v34 = vld [vmem:[%s7270_s27 + $0x2c4] sm:$0xf]  ;;  %v4639_v49 = vor.u32 %v6518_v29, %v4636_v33 }
  0xbd   : > { %v6330_v62 = vld [vmem:[%s7270_s27 + $0xf00] sm:$0xf]  ;;  %v6944_v63 = vld [vmem:[%s7270_s27 + $0xf0c] sm:$0xf0]  ;;  %v6203_v15 = vor.u32 %v6912_v59, %v6202_v57  ;;  %3533 = vmatpush.bf16.msrb.mxu0 %v5947_v9  ;;  %v4764_v37 = vld [vmem:[%s7270_s27 + $0x2d0] sm:$0xf0] }
  0xbe   : > { %v240_v12 = vld [vmem:[%s8679_s0 + $0x60] sm:$0xff]  ;;  %v242_v16 = vld [vmem:[%s8679_s0 + $0x70] sm:$0xff]  ;;  %v6331_v20 = vor.u32 %v6944_v63, %v6330_v62  ;;  %3547 = vmatpush.bf16.msrb.mxu1 %v6075_v14  ;;  %v4767_v50 = vor.u32 %v6550_v34, %v4764_v37 }
  0xbf   : > { %v256_v13 = vld [vmem:[%s8679_s0 + $0xe0] sm:$0xff]  ;;  %v258_v18 = vld [vmem:[%s8679_s0 + $0xf0] sm:$0xff]  ;;  %3561 = vmatpush.bf16.msrb.mxu2 %v6203_v15 }
  0xc0   : > { %v7683_v32 = vpack.c.bf16 %v256_v13, %v240_v12  ;;  %v7688_v38 = vpack.c.bf16 %v258_v18, %v242_v16  ;;  %v6582_v42 = vld [vmem:[%s7270_s27 + $0x3c4] sm:$0xf]  ;;  %v4892_v45 = vld [vmem:[%s7270_s27 + $0x3d0] sm:$0xf0]  ;;  %3575 = vmatpush.bf16.msrb.mxu3 %v6331_v20 }
  0xc1   : > { %3582 = vmatpush.bf16.msra.mxu0 %v4527_v21  ;;  %v6482_v51 = vld [vmem:[%s7270_s27 + $0xa4] sm:$0xf]  ;;  %v4492_v52 = vld [vmem:[%s7270_s27 + $0xb0] sm:$0xf0]  ;;  %v4895_v54 = vor.u32 %v6582_v42, %v4892_v45  ;;  %3548 = vmatmul.bf16.vlgmr.msrb.gmra.mxu1 %v7690_v41 }
  0xc2   : > { %3596 = vmatpush.bf16.msra.mxu1 %v4655_v25  ;;  %v6514_v53 = vld [vmem:[%s7270_s27 + $0x1a4] sm:$0xf]  ;;  %3534 = vmatmul.bf16.vlgmr.msrb.gmra.mxu0 %v7683_v32  ;;  %v4620_v55 = vld [vmem:[%s7270_s27 + $0x1b0] sm:$0xf0]  ;;  %v4495_v61 = vor.u32 %v6482_v51, %v4492_v52 }
  0xc3   : > { %3610 = vmatpush.bf16.msra.mxu2 %v4783_v26  ;;  %v6546_v56 = vld [vmem:[%s7270_s27 + $0x2a4] sm:$0xf]  ;;  %v4748_v57 = vld [vmem:[%s7270_s27 + $0x2b0] sm:$0xf0]  ;;  %3576 = vmatmul.bf16.vlgmr.msrb.gmra.mxu3 %v7694_v46  ;;  %v4623_v62 = vor.u32 %v6514_v53, %v4620_v55 }
  0xc4   : > { %3624 = vmatpush.bf16.msra.mxu3 %v4911_v30  ;;  %3562 = vmatmul.bf16.vlgmr.msrb.gmra.mxu2 %v7688_v38  ;;  %v6578_v59 = vld [vmem:[%s7270_s27 + $0x3a4] sm:$0xf]  ;;  %v4876_v60 = vld [vmem:[%s7270_s27 + $0x3b0] sm:$0xf0]  ;;  %v4751_v63 = vor.u32 %v6546_v56, %v4748_v57 }
  0xc5   : > { %3583 = vmatpush.bf16.msra.mxu0 %v4511_v48  ;;  %v6478_v0 = vld [vmem:[%s7270_s27 + $0x84] sm:$0xf]  ;;  %v4476_v2 = vld [vmem:[%s7270_s27 + $0x90] sm:$0xf0]  ;;  %v4879_v4 = vor.u32 %v6578_v59, %v4876_v60 }
  0xc6   : > { %3597 = vmatpush.bf16.msra.mxu1 %v4639_v49  ;;  %v6510_v3 = vld [vmem:[%s7270_s27 + $0x184] sm:$0xf]  ;;  %v4604_v5 = vld [vmem:[%s7270_s27 + $0x190] sm:$0xf0]  ;;  %v4479_v11 = vor.u32 %v6478_v0, %v4476_v2 }
  0xc7   : > { %3611 = vmatpush.bf16.msra.mxu2 %v4767_v50  ;;  %v6542_v6 = vld [vmem:[%s7270_s27 + $0x284] sm:$0xf]  ;;  %v4732_v7 = vld [vmem:[%s7270_s27 + $0x290] sm:$0xf0]  ;;  %v4607_v12 = vor.u32 %v6510_v3, %v4604_v5 }
  0xc8   : > { %3625 = vmatpush.bf16.msra.mxu3 %v4895_v54  ;;  %v6574_v8 = vld [vmem:[%s7270_s27 + $0x384] sm:$0xf]  ;;  %v4860_v9 = vld [vmem:[%s7270_s27 + $0x390] sm:$0xf0]  ;;  %v4735_v13 = vor.u32 %v6542_v6, %v4732_v7 }
  0xc9   : > { %3584 = vmatpush.bf16.msra.mxu0 %v4495_v61  ;;  %v6474_v14 = vld [vmem:[%s7270_s27 + $0x64] sm:$0xf]  ;;  %v4460_v15 = vld [vmem:[%s7270_s27 + $0x70] sm:$0xf0]  ;;  %v4863_v18 = vor.u32 %v6574_v8, %v4860_v9 }
  0xca   : > { %3598 = vmatpush.bf16.msra.mxu1 %v4623_v62  ;;  %v6506_v16 = vld [vmem:[%s7270_s27 + $0x164] sm:$0xf]  ;;  %v4588_v19 = vld [vmem:[%s7270_s27 + $0x170] sm:$0xf0]  ;;  %v4463_v24 = vor.u32 %v6474_v14, %v4460_v15 }
  0xcb   : > { %3612 = vmatpush.bf16.msra.mxu2 %v4751_v63  ;;  %v6538_v20 = vld [vmem:[%s7270_s27 + $0x264] sm:$0xf]  ;;  %v4716_v21 = vld [vmem:[%s7270_s27 + $0x270] sm:$0xf0]  ;;  %v4591_v25 = vor.u32 %v6506_v16, %v4588_v19 }
  0xcc   : > { %3626 = vmatpush.bf16.msra.mxu3 %v4879_v4  ;;  %v6570_v22 = vld [vmem:[%s7270_s27 + $0x364] sm:$0xf]  ;;  %v4844_v23 = vld [vmem:[%s7270_s27 + $0x370] sm:$0xf0]  ;;  %v4719_v26 = vor.u32 %v6538_v20, %v4716_v21 }
  0xcd   : > { %3585 = vmatpush.bf16.msra.mxu0 %v4479_v11  ;;  %v6470_v27 = vld [vmem:[%s7270_s27 + $0x44] sm:$0xf]  ;;  %v4444_v28 = vld [vmem:[%s7270_s27 + $0x50] sm:$0xf0]  ;;  %v4847_v30 = vor.u32 %v6570_v22, %v4844_v23 }
  0xce   : > { %3599 = vmatpush.bf16.msra.mxu1 %v4607_v12  ;;  %v6502_v29 = vld [vmem:[%s7270_s27 + $0x144] sm:$0xf]  ;;  %v4572_v33 = vld [vmem:[%s7270_s27 + $0x150] sm:$0xf0]  ;;  %v4447_v48 = vor.u32 %v6470_v27, %v4444_v28 }
  0xcf   : > { %3613 = vmatpush.bf16.msra.mxu2 %v4735_v13  ;;  %v6534_v34 = vld [vmem:[%s7270_s27 + $0x244] sm:$0xf]  ;;  %v4700_v37 = vld [vmem:[%s7270_s27 + $0x250] sm:$0xf0]  ;;  %v4575_v49 = vor.u32 %v6502_v29, %v4572_v33 }
  0xd0   : > { %3627 = vmatpush.bf16.msra.mxu3 %v4863_v18  ;;  %v6566_v42 = vld [vmem:[%s7270_s27 + $0x344] sm:$0xf]  ;;  %v4828_v45 = vld [vmem:[%s7270_s27 + $0x350] sm:$0xf0]  ;;  %v4703_v50 = vor.u32 %v6534_v34, %v4700_v37 }
  0xd1   : > { %3586 = vmatpush.bf16.msra.mxu0 %v4463_v24  ;;  %v6466_v51 = vld [vmem:[%s7270_s27 + $0x24] sm:$0xf]  ;;  %v4428_v52 = vld [vmem:[%s7270_s27 + $0x30] sm:$0xf0]  ;;  %v4831_v54 = vor.u32 %v6566_v42, %v4828_v45 }
  0xd2   : > { %3600 = vmatpush.bf16.msra.mxu1 %v4591_v25  ;;  %v6498_v53 = vld [vmem:[%s7270_s27 + $0x124] sm:$0xf]  ;;  %v4556_v55 = vld [vmem:[%s7270_s27 + $0x130] sm:$0xf0]  ;;  %v4431_v61 = vor.u32 %v6466_v51, %v4428_v52 }
  0xd3   : > { %3614 = vmatpush.bf16.msra.mxu2 %v4719_v26  ;;  %v6530_v56 = vld [vmem:[%s7270_s27 + $0x224] sm:$0xf]  ;;  %v4684_v57 = vld [vmem:[%s7270_s27 + $0x230] sm:$0xf0]  ;;  %v4559_v0 = vor.u32 %v6498_v53, %v4556_v55 }
  0xd4   : > { %3628 = vmatpush.bf16.msra.mxu3 %v4847_v30  ;;  %v6562_v59 = vld [vmem:[%s7270_s27 + $0x324] sm:$0xf]  ;;  %v4812_v60 = vld [vmem:[%s7270_s27 + $0x330] sm:$0xf0]  ;;  %v4687_v2 = vor.u32 %v6530_v56, %v4684_v57 }
  0xd5   : > { %3587 = vmatpush.bf16.msra.mxu0 %v4447_v48  ;;  %v6462_v62 = vld [vmem:[%s7270_s27 + $0x4] sm:$0xf]  ;;  %v4412_v63 = vld [vmem:[%s7270_s27 + $0x10] sm:$0xf0]  ;;  %v4815_v6 = vor.u32 %v6562_v59, %v4812_v60 }
  0xd6   : > { %3601 = vmatpush.bf16.msra.mxu1 %v4575_v49  ;;  %v6494_v3 = vld [vmem:[%s7270_s27 + $0x104] sm:$0xf]  ;;  %v4540_v4 = vld [vmem:[%s7270_s27 + $0x110] sm:$0xf0]  ;;  %v4415_v14 = vor.u32 %v6462_v62, %v4412_v63 }
  0xd7   : > { %3615 = vmatpush.bf16.msra.mxu2 %v4703_v50  ;;  %v6526_v5 = vld [vmem:[%s7270_s27 + $0x204] sm:$0xf]  ;;  %v4668_v7 = vld [vmem:[%s7270_s27 + $0x210] sm:$0xf0]  ;;  %v4543_v19 = vor.u32 %v6494_v3, %v4540_v4 }
  0xd8   : > { %3629 = vmatpush.bf16.msra.mxu3 %v4831_v54  ;;  %v6558_v8 = vld [vmem:[%s7270_s27 + $0x304] sm:$0xf]  ;;  %v4796_v9 = vld [vmem:[%s7270_s27 + $0x310] sm:$0xf0]  ;;  %v4671_v20 = vor.u32 %v6526_v5, %v4668_v7 }
  0xd9   : > { %v6618_v11 = vld [vmem:[%s7270_s27 + $0x4e4] sm:$0xf]  ;;  %v5036_v12 = vld [vmem:[%s7270_s27 + $0x4f0] sm:$0xf0]  ;;  %3588 = vmatpush.bf16.msra.mxu0 %v4431_v61  ;;  %v4799_v23 = vor.u32 %v6558_v8, %v4796_v9 }
  0xda   : > { %v6650_v13 = vld [vmem:[%s7270_s27 + $0x5e4] sm:$0xf]  ;;  %v5164_v15 = vld [vmem:[%s7270_s27 + $0x5f0] sm:$0xf0]  ;;  %3602 = vmatpush.bf16.msra.mxu1 %v4559_v0  ;;  %v5039_v24 = vor.u32 %v6618_v11, %v5036_v12 }
  0xdb   : > { %v6682_v16 = vld [vmem:[%s7270_s27 + $0x6e4] sm:$0xf]  ;;  %v5292_v18 = vld [vmem:[%s7270_s27 + $0x6f0] sm:$0xf0]  ;;  %3616 = vmatpush.bf16.msra.mxu2 %v4687_v2  ;;  %v5167_v25 = vor.u32 %v6650_v13, %v5164_v15 }
  0xdc   : > { %v6714_v21 = vld [vmem:[%s7270_s27 + $0x7e4] sm:$0xf]  ;;  %v5420_v22 = vld [vmem:[%s7270_s27 + $0x7f0] sm:$0xf0]  ;;  %3630 = vmatpush.bf16.msra.mxu3 %v4815_v6  ;;  %v5295_v26 = vor.u32 %v6682_v16, %v5292_v18 }
  0xdd   : > { %v6614_v27 = vld [vmem:[%s7270_s27 + $0x4c4] sm:$0xf]  ;;  %v5020_v28 = vld [vmem:[%s7270_s27 + $0x4d0] sm:$0xf0]  ;;  %3589 = vmatpush.bf16.msra.mxu0 %v4415_v14  ;;  %v5423_v30 = vor.u32 %v6714_v21, %v5420_v22 }
  0xde   : > { %v6646_v29 = vld [vmem:[%s7270_s27 + $0x5c4] sm:$0xf]  ;;  %v5148_v33 = vld [vmem:[%s7270_s27 + $0x5d0] sm:$0xf0]  ;;  %3603 = vmatpush.bf16.msra.mxu1 %v4543_v19  ;;  %v5023_v48 = vor.u32 %v6614_v27, %v5020_v28 }
  0xdf   : > { %v6678_v34 = vld [vmem:[%s7270_s27 + $0x6c4] sm:$0xf]  ;;  %v5276_v37 = vld [vmem:[%s7270_s27 + $0x6d0] sm:$0xf0]  ;;  %3617 = vmatpush.bf16.msra.mxu2 %v4671_v20  ;;  %v5151_v49 = vor.u32 %v6646_v29, %v5148_v33 }
  0xe0   : > { %v6710_v42 = vld [vmem:[%s7270_s27 + $0x7c4] sm:$0xf]  ;;  %v5404_v45 = vld [vmem:[%s7270_s27 + $0x7d0] sm:$0xf0]  ;;  %3631 = vmatpush.bf16.msra.mxu3 %v4799_v23  ;;  %v5279_v50 = vor.u32 %v6678_v34, %v5276_v37  ;;  %3590 = vmatmul.bf16.vlgmr.msra.gmra.mxu0 %v7375_v58 }
  0xe1   : > { %3638 = vmatpush.bf16.msrb.mxu0 %v5039_v24  ;;  %v6610_v51 = vld [vmem:[%s7270_s27 + $0x4a4] sm:$0xf]  ;;  %v5004_v52 = vld [vmem:[%s7270_s27 + $0x4b0] sm:$0xf0]  ;;  %v5407_v54 = vor.u32 %v6710_v42, %v5404_v45  ;;  %3604 = vmatmul.bf16.vlgmr.msra.gmra.mxu1 %v7399_v10 }
  0xe2   : > { %3652 = vmatpush.bf16.msrb.mxu1 %v5167_v25  ;;  %v6642_v53 = vld [vmem:[%s7270_s27 + $0x5a4] sm:$0xf]  ;;  %v5132_v55 = vld [vmem:[%s7270_s27 + $0x5b0] sm:$0xf0]  ;;  %3618 = vmatmul.bf16.vlgmr.msra.gmra.mxu2 %v7383_v1  ;;  %v5007_v61 = vor.u32 %v6610_v51, %v5004_v52 }
  0xe3   : > { %3666 = vmatpush.bf16.msrb.mxu2 %v5295_v26  ;;  %v6674_v56 = vld [vmem:[%s7270_s27 + $0x6a4] sm:$0xf]  ;;  %v5260_v57 = vld [vmem:[%s7270_s27 + $0x6b0] sm:$0xf0]  ;;  %3632 = vmatmul.bf16.vlgmr.msra.gmra.mxu3 %v7407_v17  ;;  %v5135_v62 = vor.u32 %v6642_v53, %v5132_v55 }
  0xe4   : > { %3680 = vmatpush.bf16.msrb.mxu3 %v5423_v30  ;;  %v6706_v59 = vld [vmem:[%s7270_s27 + $0x7a4] sm:$0xf]  ;;  %v5388_v60 = vld [vmem:[%s7270_s27 + $0x7b0] sm:$0xf0]  ;;  %v5263_v63 = vor.u32 %v6674_v56, %v5260_v57 }
  0xe5   : > { %3639 = vmatpush.bf16.msrb.mxu0 %v5023_v48  ;;  %v6606_v0 = vld [vmem:[%s7270_s27 + $0x484] sm:$0xf]  ;;  %v4988_v2 = vld [vmem:[%s7270_s27 + $0x490] sm:$0xf0]  ;;  %v5391_v4 = vor.u32 %v6706_v59, %v5388_v60 }
  0xe6   : > { %3653 = vmatpush.bf16.msrb.mxu1 %v5151_v49  ;;  %v6638_v3 = vld [vmem:[%s7270_s27 + $0x584] sm:$0xf]  ;;  %v5116_v5 = vld [vmem:[%s7270_s27 + $0x590] sm:$0xf0]  ;;  %v4991_v11 = vor.u32 %v6606_v0, %v4988_v2 }
  0xe7   : > { %3667 = vmatpush.bf16.msrb.mxu2 %v5279_v50  ;;  %v6670_v6 = vld [vmem:[%s7270_s27 + $0x684] sm:$0xf]  ;;  %v5244_v7 = vld [vmem:[%s7270_s27 + $0x690] sm:$0xf0]  ;;  %v5119_v12 = vor.u32 %v6638_v3, %v5116_v5 }
  0xe8   : > { %3681 = vmatpush.bf16.msrb.mxu3 %v5407_v54  ;;  %v6702_v8 = vld [vmem:[%s7270_s27 + $0x784] sm:$0xf]  ;;  %v5372_v9 = vld [vmem:[%s7270_s27 + $0x790] sm:$0xf0]  ;;  %v5247_v13 = vor.u32 %v6670_v6, %v5244_v7 }
  0xe9   : > { %3640 = vmatpush.bf16.msrb.mxu0 %v5007_v61  ;;  %v6602_v14 = vld [vmem:[%s7270_s27 + $0x464] sm:$0xf]  ;;  %v4972_v15 = vld [vmem:[%s7270_s27 + $0x470] sm:$0xf0]  ;;  %v5375_v18 = vor.u32 %v6702_v8, %v5372_v9 }
  0xea   : > { %3654 = vmatpush.bf16.msrb.mxu1 %v5135_v62  ;;  %v6634_v16 = vld [vmem:[%s7270_s27 + $0x564] sm:$0xf]  ;;  %v5100_v19 = vld [vmem:[%s7270_s27 + $0x570] sm:$0xf0]  ;;  %v4975_v24 = vor.u32 %v6602_v14, %v4972_v15 }
  0xeb   : > { %3668 = vmatpush.bf16.msrb.mxu2 %v5263_v63  ;;  %v6666_v20 = vld [vmem:[%s7270_s27 + $0x664] sm:$0xf]  ;;  %v5228_v21 = vld [vmem:[%s7270_s27 + $0x670] sm:$0xf0]  ;;  %v5103_v25 = vor.u32 %v6634_v16, %v5100_v19 }
  0xec   : > { %3682 = vmatpush.bf16.msrb.mxu3 %v5391_v4  ;;  %v6698_v22 = vld [vmem:[%s7270_s27 + $0x764] sm:$0xf]  ;;  %v5356_v23 = vld [vmem:[%s7270_s27 + $0x770] sm:$0xf0]  ;;  %v5231_v26 = vor.u32 %v6666_v20, %v5228_v21 }
  0xed   : > { %3641 = vmatpush.bf16.msrb.mxu0 %v4991_v11  ;;  %v6598_v27 = vld [vmem:[%s7270_s27 + $0x444] sm:$0xf]  ;;  %v4956_v28 = vld [vmem:[%s7270_s27 + $0x450] sm:$0xf0]  ;;  %v5359_v30 = vor.u32 %v6698_v22, %v5356_v23 }
  0xee   : > { %3655 = vmatpush.bf16.msrb.mxu1 %v5119_v12  ;;  %v6630_v29 = vld [vmem:[%s7270_s27 + $0x544] sm:$0xf]  ;;  %v5084_v33 = vld [vmem:[%s7270_s27 + $0x550] sm:$0xf0]  ;;  %v4959_v48 = vor.u32 %v6598_v27, %v4956_v28 }
  0xef   : > { %3669 = vmatpush.bf16.msrb.mxu2 %v5247_v13  ;;  %v6662_v34 = vld [vmem:[%s7270_s27 + $0x644] sm:$0xf]  ;;  %v5212_v37 = vld [vmem:[%s7270_s27 + $0x650] sm:$0xf0]  ;;  %v5087_v49 = vor.u32 %v6630_v29, %v5084_v33 }
  0xf0   : > { %3683 = vmatpush.bf16.msrb.mxu3 %v5375_v18  ;;  %v6694_v42 = vld [vmem:[%s7270_s27 + $0x744] sm:$0xf]  ;;  %v5340_v45 = vld [vmem:[%s7270_s27 + $0x750] sm:$0xf0]  ;;  %v5215_v50 = vor.u32 %v6662_v34, %v5212_v37 }
  0xf1   : > { %3642 = vmatpush.bf16.msrb.mxu0 %v4975_v24  ;;  %v6594_v51 = vld [vmem:[%s7270_s27 + $0x424] sm:$0xf]  ;;  %v4940_v52 = vld [vmem:[%s7270_s27 + $0x430] sm:$0xf0]  ;;  %v5343_v54 = vor.u32 %v6694_v42, %v5340_v45 }
  0xf2   : > { %3656 = vmatpush.bf16.msrb.mxu1 %v5103_v25  ;;  %v6626_v53 = vld [vmem:[%s7270_s27 + $0x524] sm:$0xf]  ;;  %v5068_v55 = vld [vmem:[%s7270_s27 + $0x530] sm:$0xf0]  ;;  %v4943_v61 = vor.u32 %v6594_v51, %v4940_v52 }
  0xf3   : > { %3670 = vmatpush.bf16.msrb.mxu2 %v5231_v26  ;;  %v6658_v56 = vld [vmem:[%s7270_s27 + $0x624] sm:$0xf]  ;;  %v5196_v57 = vld [vmem:[%s7270_s27 + $0x630] sm:$0xf0]  ;;  %v5071_v0 = vor.u32 %v6626_v53, %v5068_v55 }
  0xf4   : > { %3684 = vmatpush.bf16.msrb.mxu3 %v5359_v30  ;;  %v6690_v59 = vld [vmem:[%s7270_s27 + $0x724] sm:$0xf]  ;;  %v5324_v60 = vld [vmem:[%s7270_s27 + $0x730] sm:$0xf0]  ;;  %v5199_v2 = vor.u32 %v6658_v56, %v5196_v57 }
  0xf5   : > { %3643 = vmatpush.bf16.msrb.mxu0 %v4959_v48  ;;  %v6590_v62 = vld [vmem:[%s7270_s27 + $0x404] sm:$0xf]  ;;  %v4924_v63 = vld [vmem:[%s7270_s27 + $0x410] sm:$0xf0]  ;;  %v5327_v6 = vor.u32 %v6690_v59, %v5324_v60 }
  0xf6   : > { %3657 = vmatpush.bf16.msrb.mxu1 %v5087_v49  ;;  %v6622_v3 = vld [vmem:[%s7270_s27 + $0x504] sm:$0xf]  ;;  %v5052_v4 = vld [vmem:[%s7270_s27 + $0x510] sm:$0xf0]  ;;  %v4927_v14 = vor.u32 %v6590_v62, %v4924_v63 }
  0xf7   : > { %3671 = vmatpush.bf16.msrb.mxu2 %v5215_v50  ;;  %v6654_v5 = vld [vmem:[%s7270_s27 + $0x604] sm:$0xf]  ;;  %v5180_v7 = vld [vmem:[%s7270_s27 + $0x610] sm:$0xf0]  ;;  %v5055_v19 = vor.u32 %v6622_v3, %v5052_v4 }
  0xf8   : > { %3685 = vmatpush.bf16.msrb.mxu3 %v5343_v54  ;;  %v6686_v8 = vld [vmem:[%s7270_s27 + $0x704] sm:$0xf]  ;;  %v5308_v9 = vld [vmem:[%s7270_s27 + $0x710] sm:$0xf0]  ;;  %v5183_v20 = vor.u32 %v6654_v5, %v5180_v7 }
  0xf9   : > { %v6746_v11 = vld [vmem:[%s7270_s27 + $0x8e4] sm:$0xf]  ;;  %v5548_v12 = vld [vmem:[%s7270_s27 + $0x8f0] sm:$0xf0]  ;;  %3644 = vmatpush.bf16.msrb.mxu0 %v4943_v61  ;;  %v5311_v23 = vor.u32 %v6686_v8, %v5308_v9 }
  0xfa   : > { %v6778_v13 = vld [vmem:[%s7270_s27 + $0x9e4] sm:$0xf]  ;;  %v5676_v15 = vld [vmem:[%s7270_s27 + $0x9f0] sm:$0xf0]  ;;  %3658 = vmatpush.bf16.msrb.mxu1 %v5071_v0  ;;  %v5551_v24 = vor.u32 %v6746_v11, %v5548_v12 }
  0xfb   : > { %v6810_v16 = vld [vmem:[%s7270_s27 + $0xae4] sm:$0xf]  ;;  %v5804_v18 = vld [vmem:[%s7270_s27 + $0xaf0] sm:$0xf0]  ;;  %3672 = vmatpush.bf16.msrb.mxu2 %v5199_v2  ;;  %v5679_v25 = vor.u32 %v6778_v13, %v5676_v15 }
  0xfc   : > { %v6842_v21 = vld [vmem:[%s7270_s27 + $0xbe4] sm:$0xf]  ;;  %v5932_v22 = vld [vmem:[%s7270_s27 + $0xbf0] sm:$0xf0]  ;;  %3686 = vmatpush.bf16.msrb.mxu3 %v5327_v6  ;;  %v5807_v26 = vor.u32 %v6810_v16, %v5804_v18 }
  0xfd   : > { %v6742_v27 = vld [vmem:[%s7270_s27 + $0x8c4] sm:$0xf]  ;;  %v5532_v28 = vld [vmem:[%s7270_s27 + $0x8d0] sm:$0xf0]  ;;  %3645 = vmatpush.bf16.msrb.mxu0 %v4927_v14  ;;  %v5935_v30 = vor.u32 %v6842_v21, %v5932_v22  ;;  %v7858_v22 = vpop.f32.mrf.mxu0 }
  0xfe   : > { %v6774_v29 = vld [vmem:[%s7270_s27 + $0x9c4] sm:$0xf]  ;;  %v5660_v33 = vld [vmem:[%s7270_s27 + $0x9d0] sm:$0xf0]  ;;  %3659 = vmatpush.bf16.msrb.mxu1 %v5055_v19  ;;  %v5535_v48 = vor.u32 %v6742_v27, %v5532_v28 }
  0xff   : > { %v6806_v34 = vld [vmem:[%s7270_s27 + $0xac4] sm:$0xf]  ;;  %v5788_v37 = vld [vmem:[%s7270_s27 + $0xad0] sm:$0xf0]  ;;  %3673 = vmatpush.bf16.msrb.mxu2 %v5183_v20  ;;  %v5663_v49 = vor.u32 %v6774_v29, %v5660_v33 }
 0x100   : > { %v6838_v42 = vld [vmem:[%s7270_s27 + $0xbc4] sm:$0xf]  ;;  %v5916_v45 = vld [vmem:[%s7270_s27 + $0xbd0] sm:$0xf0]  ;;  %3687 = vmatpush.bf16.msrb.mxu3 %v5311_v23  ;;  %v5791_v50 = vor.u32 %v6806_v34, %v5788_v37  ;;  %3646 = vmatmul.bf16.vlgmr.msrb.gmra.mxu0 %v7483_v39 }
 0x101   : > { %3694 = vmatpush.bf16.msra.mxu0 %v5551_v24  ;;  %v6738_v51 = vld [vmem:[%s7270_s27 + $0x8a4] sm:$0xf]  ;;  %v5516_v52 = vld [vmem:[%s7270_s27 + $0x8b0] sm:$0xf0]  ;;  %v5919_v54 = vor.u32 %v6838_v42, %v5916_v45  ;;  %3660 = vmatmul.bf16.vlgmr.msrb.gmra.mxu1 %v7490_v44 }
 0x102   : > { %3708 = vmatpush.bf16.msra.mxu1 %v5679_v25  ;;  %v6770_v53 = vld [vmem:[%s7270_s27 + $0x9a4] sm:$0xf]  ;;  %v5644_v55 = vld [vmem:[%s7270_s27 + $0x9b0] sm:$0xf0]  ;;  %3674 = vmatmul.bf16.vlgmr.msrb.gmra.mxu2 %v7488_v43  ;;  %v5519_v61 = vor.u32 %v6738_v51, %v5516_v52  ;;  %v7862_v25 = vpop.f32.mrf.mxu1 }
 0x103   : > { %3722 = vmatpush.bf16.msra.mxu2 %v5807_v26  ;;  %v6802_v56 = vld [vmem:[%s7270_s27 + $0xaa4] sm:$0xf]  ;;  %v5772_v57 = vld [vmem:[%s7270_s27 + $0xab0] sm:$0xf0]  ;;  %3688 = vmatmul.bf16.vlgmr.msrb.gmra.mxu3 %v7494_v47  ;;  %v5647_v62 = vor.u32 %v6770_v53, %v5644_v55 }
 0x104   : > { %3736 = vmatpush.bf16.msra.mxu3 %v5935_v30  ;;  %v6834_v59 = vld [vmem:[%s7270_s27 + $0xba4] sm:$0xf]  ;;  %v5900_v60 = vld [vmem:[%s7270_s27 + $0xbb0] sm:$0xf0]  ;;  %v5775_v63 = vor.u32 %v6802_v56, %v5772_v57  ;;  %v7878_v57 = vpop.f32.mrf.mxu2 }
 0x105   : > { %3695 = vmatpush.bf16.msra.mxu0 %v5535_v48  ;;  %v6734_v0 = vld [vmem:[%s7270_s27 + $0x884] sm:$0xf]  ;;  %v5500_v2 = vld [vmem:[%s7270_s27 + $0x890] sm:$0xf0]  ;;  %v5903_v4 = vor.u32 %v6834_v59, %v5900_v60 }
 0x106   : > { %3709 = vmatpush.bf16.msra.mxu1 %v5663_v49  ;;  %v6766_v3 = vld [vmem:[%s7270_s27 + $0x984] sm:$0xf]  ;;  %v5628_v5 = vld [vmem:[%s7270_s27 + $0x990] sm:$0xf0]  ;;  %v5503_v11 = vor.u32 %v6734_v0, %v5500_v2 }
 0x107   : > { %3723 = vmatpush.bf16.msra.mxu2 %v5791_v50  ;;  %v6798_v6 = vld [vmem:[%s7270_s27 + $0xa84] sm:$0xf]  ;;  %v5756_v7 = vld [vmem:[%s7270_s27 + $0xa90] sm:$0xf0]  ;;  %v5631_v12 = vor.u32 %v6766_v3, %v5628_v5 }
 0x108   : > { %3737 = vmatpush.bf16.msra.mxu3 %v5919_v54  ;;  %v6830_v8 = vld [vmem:[%s7270_s27 + $0xb84] sm:$0xf]  ;;  %v5884_v9 = vld [vmem:[%s7270_s27 + $0xb90] sm:$0xf0]  ;;  %v5759_v13 = vor.u32 %v6798_v6, %v5756_v7  ;;  %v7890_v7 = vpop.f32.mrf.mxu0 }
 0x109   : > { %3696 = vmatpush.bf16.msra.mxu0 %v5519_v61  ;;  %v6730_v14 = vld [vmem:[%s7270_s27 + $0x864] sm:$0xf]  ;;  %v5484_v15 = vld [vmem:[%s7270_s27 + $0x870] sm:$0xf0]  ;;  %v5887_v18 = vor.u32 %v6830_v8, %v5884_v9 }
 0x10a   : > { %3710 = vmatpush.bf16.msra.mxu1 %v5647_v62  ;;  %v6762_v16 = vld [vmem:[%s7270_s27 + $0x964] sm:$0xf]  ;;  %v5612_v19 = vld [vmem:[%s7270_s27 + $0x970] sm:$0xf0]  ;;  %v5487_v26 = vor.u32 %v6730_v14, %v5484_v15  ;;  %v7895_v14 = vpop.f32.mrf.mxu1 }
 0x10b   : > { %3724 = vmatpush.bf16.msra.mxu2 %v5775_v63  ;;  %v6794_v20 = vld [vmem:[%s7270_s27 + $0xa64] sm:$0xf]  ;;  %v5740_v21 = vld [vmem:[%s7270_s27 + $0xa70] sm:$0xf0]  ;;  %v5615_v27 = vor.u32 %v6762_v16, %v5612_v19  ;;  %v7883_v63 = vpop.f32.mrf.mxu3 }
 0x10c   : > { %3738 = vmatpush.bf16.msra.mxu3 %v5903_v4  ;;  %v6826_v23 = vld [vmem:[%s7270_s27 + $0xb64] sm:$0xf]  ;;  %v5868_v24 = vld [vmem:[%s7270_s27 + $0xb70] sm:$0xf0]  ;;  %v5743_v28 = vor.u32 %v6794_v20, %v5740_v21 }
 0x10d   : > { %3697 = vmatpush.bf16.msra.mxu0 %v5503_v11  ;;  %v6726_v29 = vld [vmem:[%s7270_s27 + $0x844] sm:$0xf]  ;;  %v5468_v30 = vld [vmem:[%s7270_s27 + $0x850] sm:$0xf0]  ;;  %v5871_v34 = vor.u32 %v6826_v23, %v5868_v24 }
 0x10e   : > { %3711 = vmatpush.bf16.msra.mxu1 %v5631_v12  ;;  %v6758_v33 = vld [vmem:[%s7270_s27 + $0x944] sm:$0xf]  ;;  %v5596_v37 = vld [vmem:[%s7270_s27 + $0x950] sm:$0xf0]  ;;  %v5471_v51 = vor.u32 %v6726_v29, %v5468_v30 }
 0x10f   : > { %3725 = vmatpush.bf16.msra.mxu2 %v5759_v13  ;;  %v6790_v42 = vld [vmem:[%s7270_s27 + $0xa44] sm:$0xf]  ;;  %v5724_v45 = vld [vmem:[%s7270_s27 + $0xa50] sm:$0xf0]  ;;  %v5599_v52 = vor.u32 %v6758_v33, %v5596_v37 }
 0x110   : > { %3739 = vmatpush.bf16.msra.mxu3 %v5887_v18  ;;  %v6822_v48 = vld [vmem:[%s7270_s27 + $0xb44] sm:$0xf]  ;;  %v5852_v49 = vld [vmem:[%s7270_s27 + $0xb50] sm:$0xf0]  ;;  %v5727_v53 = vor.u32 %v6790_v42, %v5724_v45 }
 0x111   : > { %v7873_v50 = vld [vmem:[%s7278_s29] sm:$0xf]  ;;  %3698 = vmatpush.bf16.msra.mxu0 %v5487_v26  ;;  %v5452_v55 = vld [vmem:[%s7270_s27 + $0x830] sm:$0xf0]  ;;  %v5855_v59 = vor.u32 %v6822_v48, %v5852_v49 }
 0x112   : > { %3712 = vmatpush.bf16.msra.mxu1 %v5615_v27  ;;  %v6722_v54 = vld [vmem:[%s7270_s27 + $0x824] sm:$0xf]  ;;  %v5580_v60 = vld [vmem:[%s7270_s27 + $0x930] sm:$0xf0]  ;;  %v790_v3 = vperm.slane %v7873_v50, 0 }
 0x113   : > { %3726 = vmatpush.bf16.msra.mxu2 %v5743_v28  ;;  %v6754_v56 = vld [vmem:[%s7270_s27 + $0x924] sm:$0xf]  ;;  %v5708_v62 = vld [vmem:[%s7270_s27 + $0xa30] sm:$0xf0]  ;;  %v5455_v4 = vor.u32 %v6722_v54, %v5452_v55  ;;  %v7914_v54 = vpop.f32.mrf.mxu2 }
 0x114   : > { %3740 = vmatpush.bf16.msra.mxu3 %v5871_v34  ;;  %v6786_v61 = vld [vmem:[%s7270_s27 + $0xa24] sm:$0xf]  ;;  %v5836_v2 = vld [vmem:[%s7270_s27 + $0xb30] sm:$0xf0]  ;;  %v5583_v8 = vor.u32 %v6754_v56, %v5580_v60  ;;  %v3368_v45 = vadd.f32 %v7858_v22, %v790_v3 }
 0x115   : > { %v6818_v0 = vld [vmem:[%s7270_s27 + $0xb24] sm:$0xf]  ;;  %3699 = vmatpush.bf16.msra.mxu0 %v5471_v51  ;;  %v5436_v6 = vld [vmem:[%s7270_s27 + $0x810] sm:$0xf0]  ;;  %v5711_v9 = vor.u32 %v6786_v61, %v5708_v62  ;;  %v7919_v61 = vpop.f32.mrf.mxu3 }
 0x116   : > { %v6718_v5 = vld [vmem:[%s7270_s27 + $0x804] sm:$0xf]  ;;  %3713 = vmatpush.bf16.msra.mxu1 %v5599_v52  ;;  %v5564_v12 = vld [vmem:[%s7270_s27 + $0x910] sm:$0xf0]  ;;  %v5839_v15 = vor.u32 %v6818_v0, %v5836_v2  ;;  %v3382_v2 = vadd.f32 %v7862_v25, %v3368_v45 }
 0x117   : > { %3727 = vmatpush.bf16.msra.mxu2 %v5727_v53  ;;  %v6750_v11 = vld [vmem:[%s7270_s27 + $0x904] sm:$0xf]  ;;  %v5692_v16 = vld [vmem:[%s7270_s27 + $0xa10] sm:$0xf0]  ;;  %v5439_v24 = vor.u32 %v6718_v5, %v5436_v6 }
 0x118   : > { %v6782_v13 = vld [vmem:[%s7270_s27 + $0xa04] sm:$0xf]  ;;  %3741 = vmatpush.bf16.msra.mxu3 %v5855_v59  ;;  %v5820_v19 = vld [vmem:[%s7270_s27 + $0xb10] sm:$0xf0]  ;;  %v5567_v29 = vor.u32 %v6750_v11, %v5564_v12  ;;  %v7927_v12 = vpop.f32.mrf.mxu1 }
 0x119   : > { %v6814_v18 = vld [vmem:[%s7270_s27 + $0xb04] sm:$0xf]  ;;  %v6060_v21 = vld [vmem:[%s7270_s27 + $0xcf0] sm:$0xf0]  ;;  %3700 = vmatpush.bf16.msra.mxu0 %v5455_v4  ;;  %v5695_v30 = vor.u32 %v6782_v13, %v5692_v16  ;;  %v3423_v4 = vpop.f32.mrf.mxu0 }
 0x11a   : > { %v6874_v20 = vld [vmem:[%s7270_s27 + $0xce4] sm:$0xf]  ;;  %v6188_v26 = vld [vmem:[%s7270_s27 + $0xdf0] sm:$0xf0]  ;;  %3714 = vmatpush.bf16.msra.mxu1 %v5583_v8  ;;  %v5823_v37 = vor.u32 %v6814_v18, %v5820_v19 }
 0x11b   : > { %v6906_v23 = vld [vmem:[%s7270_s27 + $0xde4] sm:$0xf]  ;;  %v6316_v28 = vld [vmem:[%s7270_s27 + $0xef0] sm:$0xf0]  ;;  %3728 = vmatpush.bf16.msra.mxu2 %v5711_v9  ;;  %v6063_v42 = vor.u32 %v6874_v20, %v6060_v21  ;;  %v3396_v21 = vadd.f32 %v7878_v57, %v3382_v2  ;;  %v7950_v45 = vpop.f32.mrf.mxu2 }
 0x11c   : > { %v6938_v27 = vld [vmem:[%s7270_s27 + $0xee4] sm:$0xf]  ;;  %v6444_v34 = vld [vmem:[%s7270_s27 + $0xff0] sm:$0xf0]  ;;  %3742 = vmatpush.bf16.msra.mxu3 %v5839_v15  ;;  %v6191_v48 = vor.u32 %v6906_v23, %v6188_v26 }
 0x11d   : > { %v6970_v33 = vld [vmem:[%s7270_s27 + $0xfe4] sm:$0xf]  ;;  %v6319_v49 = vor.u32 %v6938_v27, %v6316_v28  ;;  %v6044_v52 = vld [vmem:[%s7270_s27 + $0xcd0] sm:$0xf0]  ;;  %3701 = vmatpush.bf16.msra.mxu0 %v5439_v24 }
 0x11e   : > { %v6870_v51 = vld [vmem:[%s7270_s27 + $0xcc4] sm:$0xf]  ;;  %v6447_v55 = vor.u32 %v6970_v33, %v6444_v34  ;;  %v6172_v56 = vld [vmem:[%s7270_s27 + $0xdd0] sm:$0xf0]  ;;  %3715 = vmatpush.bf16.msra.mxu1 %v5567_v29 }
 0x11f   : > { %v6902_v53 = vld [vmem:[%s7270_s27 + $0xdc4] sm:$0xf]  ;;  %v6300_v60 = vld [vmem:[%s7270_s27 + $0xed0] sm:$0xf0]  ;;  %3729 = vmatpush.bf16.msra.mxu2 %v5695_v30  ;;  %v6047_v0 = vor.u32 %v6870_v51, %v6044_v52  ;;  %v7953_v51 = vpop.f32.mrf.mxu3 }
 0x120   : > { %v6934_v59 = vld [vmem:[%s7270_s27 + $0xec4] sm:$0xf]  ;;  %v6428_v62 = vld [vmem:[%s7270_s27 + $0xfd0] sm:$0xf0]  ;;  %3743 = vmatpush.bf16.msra.mxu3 %v5823_v37  ;;  %v6175_v5 = vor.u32 %v6902_v53, %v6172_v56  ;;  %3702 = vmatmul.bf16.vlgmr.msra.gmra.mxu0 %v7583_v31  ;;  %v3370_v37 = vadd.f32 %v7890_v7, %v790_v3  ;;  %v7964_v2 = vpop.f32.mrf.mxu1 }
 0x121   : > { %v6966_v22 = vld [vmem:[%s7270_s27 + $0xfc4] sm:$0xf]  ;;  %3750 = vmatpush.bf16.msrb.mxu0 %v6063_v42  ;;  %v6303_v6 = vor.u32 %v6934_v59, %v6300_v60  ;;  %v6028_v9 = vld [vmem:[%s7270_s27 + $0xcb0] sm:$0xf0]  ;;  %3716 = vmatmul.bf16.vlgmr.msra.gmra.mxu1 %v7590_v36 }
 0x122   : > { %3764 = vmatpush.bf16.msrb.mxu1 %v6191_v48  ;;  %v6866_v8 = vld [vmem:[%s7270_s27 + $0xca4] sm:$0xf]  ;;  %v6431_v13 = vor.u32 %v6966_v22, %v6428_v62  ;;  %v6156_v15 = vld [vmem:[%s7270_s27 + $0xdb0] sm:$0xf0]  ;;  %3730 = vmatmul.bf16.vlgmr.msra.gmra.mxu2 %v7588_v35  ;;  %v3425_v22 = vpop.f32.mrf.mxu0 }
 0x123   : > { %3778 = vmatpush.bf16.msrb.mxu2 %v6319_v49  ;;  %v6898_v11 = vld [vmem:[%s7270_s27 + $0xda4] sm:$0xf]  ;;  %v6284_v16 = vld [vmem:[%s7270_s27 + $0xeb0] sm:$0xf0]  ;;  %3744 = vmatmul.bf16.vlgmr.msra.gmra.mxu3 %v7594_v40  ;;  %v6031_v20 = vor.u32 %v6866_v8, %v6028_v9  ;;  %v3410_v49 = vadd.f32 %v7883_v63, %v3396_v21  ;;  %v3384_v63 = vadd.f32 %v7895_v14, %v3370_v37 }
 0x124   : > { %3792 = vmatpush.bf16.msrb.mxu3 %v6447_v55  ;;  %v6930_v25 = vld [vmem:[%s7270_s27 + $0xea4] sm:$0xf]  ;;  %v6412_v19 = vld [vmem:[%s7270_s27 + $0xfb0] sm:$0xf0]  ;;  %v6159_v23 = vor.u32 %v6898_v11, %v6156_v15 }
 0x125   : > { %v6962_v18 = vld [vmem:[%s7270_s27 + $0xfa4] sm:$0xf]  ;;  %3751 = vmatpush.bf16.msrb.mxu0 %v6047_v0  ;;  %v6287_v24 = vor.u32 %v6930_v25, %v6284_v16  ;;  %v6012_v27 = vld [vmem:[%s7270_s27 + $0xc90] sm:$0xf0] }
 0x126   : > { %3765 = vmatpush.bf16.msrb.mxu1 %v6175_v5  ;;  %v6862_v26 = vld [vmem:[%s7270_s27 + $0xc84] sm:$0xf]  ;;  %v6415_v29 = vor.u32 %v6962_v18, %v6412_v19  ;;  %v6140_v30 = vld [vmem:[%s7270_s27 + $0xd90] sm:$0xf0]  ;;  %v3398_v19 = vadd.f32 %v7914_v54, %v3384_v63  ;;  %v3453_v54 = vpop.f32.mrf.mxu2 }
 0x127   : > { %3779 = vmatpush.bf16.msrb.mxu2 %v6303_v6  ;;  %v6894_v28 = vld [vmem:[%s7270_s27 + $0xd84] sm:$0xf]  ;;  %v6268_v34 = vld [vmem:[%s7270_s27 + $0xe90] sm:$0xf0]  ;;  %v6015_v48 = vor.u32 %v6862_v26, %v6012_v27  ;;  %v3424_v6 = vadd.f32 %v3423_v4, %v3410_v49 }
 0x128   : > { %3793 = vmatpush.bf16.msrb.mxu3 %v6431_v13  ;;  %v6926_v33 = vld [vmem:[%s7270_s27 + $0xe84] sm:$0xf]  ;;  %v6396_v42 = vld [vmem:[%s7270_s27 + $0xf90] sm:$0xf0]  ;;  %v6143_v50 = vor.u32 %v6894_v28, %v6140_v30 }
 0x129   : > { %v6958_v57 = vld [vmem:[%s7270_s27 + $0xf84] sm:$0xf]  ;;  %3752 = vmatpush.bf16.msrb.mxu0 %v6031_v20  ;;  %v6271_v52 = vor.u32 %v6926_v33, %v6268_v34  ;;  %v5996_v7 = vld [vmem:[%s7270_s27 + $0xc70] sm:$0xf0] }
 0x12a   : > { %3766 = vmatpush.bf16.msrb.mxu1 %v6159_v23  ;;  %v6858_v3 = vld [vmem:[%s7270_s27 + $0xc64] sm:$0xf]  ;;  %v6399_v55 = vor.u32 %v6958_v57, %v6396_v42  ;;  %v6124_v56 = vld [vmem:[%s7270_s27 + $0xd70] sm:$0xf0]  ;;  %v3438_v23 = vadd.f32 %v7927_v12, %v3424_v6  ;;  %v3412_v12 = vadd.f32 %v7919_v61, %v3398_v19  ;;  %v7983_v57 = vpop.f32.mrf.mxu3  ;;  %v3479_v42 = vpop.f32.mrf.mxu0  ;;  %v4914_v19 = vld [vmem:[%s7270_s27 + $0x3e8] sm:$0xf] }
 0x12b   : > { %3780 = vmatpush.bf16.msrb.mxu2 %v6287_v24  ;;  %v6890_v53 = vld [vmem:[%s7270_s27 + $0xd64] sm:$0xf]  ;;  %v6252_v60 = vld [vmem:[%s7270_s27 + $0xe70] sm:$0xf0]  ;;  %v5999_v5 = vor.u32 %v6858_v3, %v5996_v7 }
 0x12c   : > { %3794 = vmatpush.bf16.msrb.mxu3 %v6415_v29  ;;  %v6922_v59 = vld [vmem:[%s7270_s27 + $0xe64] sm:$0xf]  ;;  %v6380_v0 = vld [vmem:[%s7270_s27 + $0xf70] sm:$0xf0]  ;;  %v6127_v8 = vor.u32 %v6890_v53, %v6124_v56  ;;  %v3452_v53 = vadd.f32 %v7950_v45, %v3438_v23  ;;  %v3426_v6 = vadd.f32 %v3425_v22, %v3412_v12  ;;  %v4530_v45 = vld [vmem:[%s7270_s27 + $0xe8] sm:$0xf] }
 0x12d   : > { %v6954_v62 = vld [vmem:[%s7270_s27 + $0xf64] sm:$0xf]  ;;  %3753 = vmatpush.bf16.msrb.mxu0 %v6015_v48  ;;  %v6255_v9 = vor.u32 %v6922_v59, %v6252_v60  ;;  %v5980_v13 = vld [vmem:[%s7270_s27 + $0xc50] sm:$0xf0]  ;;  %v6589_v22 = vld [vmem:[%s7270_s27 + $0x3f4] sm:$0xf0] }
 0x12e   : > { %3767 = vmatpush.bf16.msrb.mxu1 %v6143_v50  ;;  %v6854_v11 = vld [vmem:[%s7270_s27 + $0xc44] sm:$0xf]  ;;  %v6383_v15 = vor.u32 %v6954_v62, %v6380_v0  ;;  %v6108_v25 = vld [vmem:[%s7270_s27 + $0xd50] sm:$0xf0]  ;;  %v3493_v50 = vpop.f32.mrf.mxu1  ;;  %v3440_v23 = vadd.f32 %v7964_v2, %v3426_v6  ;;  %v6553_v12 = vld [vmem:[%s7270_s27 + $0x2d4] sm:$0xf0] }
 0x12f   : > { %3781 = vmatpush.bf16.msrb.mxu2 %v6271_v52  ;;  %v6886_v14 = vld [vmem:[%s7270_s27 + $0xd44] sm:$0xf]  ;;  %v6236_v18 = vld [vmem:[%s7270_s27 + $0xe50] sm:$0xf0]  ;;  %v5983_v21 = vor.u32 %v6854_v11, %v5980_v13  ;;  %v6525_v13 = vld [vmem:[%s7270_s27 + $0x1f4] sm:$0xf0] }
 0x130   : > { %3795 = vmatpush.bf16.msrb.mxu3 %v6399_v55  ;;  %v6918_v16 = vld [vmem:[%s7270_s27 + $0xe44] sm:$0xf]  ;;  %v6364_v4 = vld [vmem:[%s7270_s27 + $0xf50] sm:$0xf0]  ;;  %v6111_v24 = vor.u32 %v6886_v14, %v6108_v25  ;;  %v4786_v14 = vld [vmem:[%s7270_s27 + $0x2e8] sm:$0xf]  ;;  %v3466_v25 = vadd.f32 %v7953_v51, %v3452_v53 }
 0x131   : > { %v6950_v20 = vld [vmem:[%s7270_s27 + $0xf44] sm:$0xf]  ;;  %3754 = vmatpush.bf16.msrb.mxu0 %v5999_v5  ;;  %v6239_v26 = vor.u32 %v6918_v16, %v6236_v18  ;;  %v5964_v28 = vld [vmem:[%s7270_s27 + $0xc30] sm:$0xf0]  ;;  %v4898_v2 = vld [vmem:[%s7270_s27 + $0x3c8] sm:$0xf] }
 0x132   : > { %3768 = vmatpush.bf16.msrb.mxu1 %v6127_v8  ;;  %v6850_v27 = vld [vmem:[%s7270_s27 + $0xc24] sm:$0xf]  ;;  %v6367_v30 = vor.u32 %v6950_v20, %v6364_v4  ;;  %v6092_v33 = vld [vmem:[%s7270_s27 + $0xd30] sm:$0xf0]  ;;  %v6493_v8 = vld [vmem:[%s7270_s27 + $0xf4] sm:$0xf0]  ;;  %v3507_v20 = vpop.f32.mrf.mxu2  ;;  %v3521_v51 = vpop.f32.mrf.mxu3 }
 0x133   : > { %3782 = vmatpush.bf16.msrb.mxu2 %v6255_v9  ;;  %v6882_v29 = vld [vmem:[%s7270_s27 + $0xd24] sm:$0xf]  ;;  %v6220_v37 = vld [vmem:[%s7270_s27 + $0xe30] sm:$0xf0]  ;;  %v5967_v52 = vor.u32 %v6850_v27, %v5964_v28  ;;  %v4658_v9 = vld [vmem:[%s7270_s27 + $0x1e8] sm:$0xf] }
 0x134   : > { %3796 = vmatpush.bf16.msrb.mxu3 %v6383_v15  ;;  %v6914_v34 = vld [vmem:[%s7270_s27 + $0xe24] sm:$0xf]  ;;  %v6348_v49 = vld [vmem:[%s7270_s27 + $0xf30] sm:$0xf0]  ;;  %v6095_v61 = vor.u32 %v6882_v29, %v6092_v33  ;;  %v6557_v15 = vld [vmem:[%s7270_s27 + $0x2f4] sm:$0xf0]  ;;  %v4915_v33 = vor.u32 %v6589_v22, %v4914_v19 }
 0x135   : > { %v6946_v48 = vld [vmem:[%s7270_s27 + $0xf24] sm:$0xf]  ;;  %3755 = vmatpush.bf16.msrb.mxu0 %v5983_v21  ;;  %v5948_v7 = vld [vmem:[%s7270_s27 + $0xc10] sm:$0xf0]  ;;  %v6223_v55 = vor.u32 %v6914_v34, %v6220_v37  ;;  %v4531_v21 = vor.u32 %v6493_v8, %v4530_v45  ;;  %v4787_v27 = vor.u32 %v6557_v15, %v4786_v14  ;;  %v4514_v28 = vld [vmem:[%s7270_s27 + $0xc8] sm:$0xf] }
 0x136   : > { %v6846_v3 = vld [vmem:[%s7270_s27 + $0xc04] sm:$0xf]  ;;  %3769 = vmatpush.bf16.msrb.mxu1 %v6111_v24  ;;  %v6076_v59 = vld [vmem:[%s7270_s27 + $0xd10] sm:$0xf0]  ;;  %v6351_v63 = vor.u32 %v6946_v48, %v6348_v49  ;;  %v3480_v24 = vadd.f32 %v3479_v42, %v3466_v25  ;;  %v6489_v29 = vld [vmem:[%s7270_s27 + $0xd4] sm:$0xf0]  ;;  %v3454_v48 = vadd.f32 %v3453_v54, %v3440_v23  ;;  %v3481_v49 = vpop.f32.mrf.mxu0 }
 0x137   : > { %3783 = vmatpush.bf16.msrb.mxu2 %v6239_v26  ;;  %v6878_v56 = vld [vmem:[%s7270_s27 + $0xd04] sm:$0xf]  ;;  %v6204_v62 = vld [vmem:[%s7270_s27 + $0xe10] sm:$0xf0]  ;;  %v5951_v11 = vor.u32 %v6846_v3, %v5948_v7  ;;  %v4659_v26 = vor.u32 %v6525_v13, %v4658_v9  ;;  %v6521_v34 = vld [vmem:[%s7270_s27 + $0x1d4] sm:$0xf0]  ;;  %v4515_v3 = vor.u32 %v6489_v29, %v4514_v28 }
 0x138   : > { %v6910_v60 = vld [vmem:[%s7270_s27 + $0xe04] sm:$0xf]  ;;  %3797 = vmatpush.bf16.msrb.mxu3 %v6367_v30  ;;  %v6332_v5 = vld [vmem:[%s7270_s27 + $0xf10] sm:$0xf0]  ;;  %v6079_v16 = vor.u32 %v6878_v56, %v6076_v59  ;;  %v4642_v30 = vld [vmem:[%s7270_s27 + $0x1c8] sm:$0xf]  ;;  %v3494_v7 = vadd.f32 %v3493_v50, %v3480_v24  ;;  %v3468_v50 = vadd.f32 %v7983_v57, %v3454_v48 }
 0x139   : > { %v6942_v0 = vld [vmem:[%s7270_s27 + $0xf04] sm:$0xf]  ;;  %3756 = vmatpush.bf16.msrb.mxu0 %v5967_v52  ;;  %v6207_v18 = vor.u32 %v6910_v60, %v6204_v62  ;;  %v4770_v37 = vld [vmem:[%s7270_s27 + $0x2c8] sm:$0xf]  ;;  %v6585_v42 = vld [vmem:[%s7270_s27 + $0x3d4] sm:$0xf0]  ;;  %v3495_v52 = vpop.f32.mrf.mxu1  ;;  %v4643_v53 = vor.u32 %v6521_v34, %v4642_v30 }
 0x13a   : > { %3770 = vmatpush.bf16.msrb.mxu1 %v6095_v61  ;;  %v6335_v4 = vor.u32 %v6942_v0, %v6332_v5  ;;  %v4771_v54 = vor.u32 %v6553_v12, %v4770_v37  ;;  %v4498_v61 = vld [vmem:[%s7270_s27 + $0xa8] sm:$0xf]  ;;  %v4899_v59 = vor.u32 %v6585_v42, %v4898_v2  ;;  %v6517_v60 = vld [vmem:[%s7270_s27 + $0x1b4] sm:$0xf0]  ;;  %v3508_v0 = vadd.f32 %v3507_v20, %v3494_v7  ;;  %v3509_v25 = vpop.f32.mrf.mxu2  ;;  %v3523_v20 = vpop.f32.mrf.mxu3 }
 0x13b   : > { %3784 = vmatpush.bf16.msrb.mxu2 %v6223_v55  ;;  %v6485_v55 = vld [vmem:[%s7270_s27 + $0xb4] sm:$0xf0]  ;;  %v4626_v56 = vld [vmem:[%s7270_s27 + $0x1a8] sm:$0xf]  ;;  %v3482_v9 = vadd.f32 %v3481_v49, %v3468_v50 }
 0x13c   : > { %3798 = vmatpush.bf16.msrb.mxu3 %v6351_v63  ;;  %v4754_v63 = vld [vmem:[%s7270_s27 + $0x2a8] sm:$0xf]  ;;  %v6549_v62 = vld [vmem:[%s7270_s27 + $0x2b4] sm:$0xf0]  ;;  %v4499_v45 = vor.u32 %v6485_v55, %v4498_v61  ;;  %v4627_v57 = vor.u32 %v6517_v60, %v4626_v56  ;;  %v3522_v22 = vadd.f32 %v3521_v51, %v3508_v0 }
 0x13d   : > { %3757 = vmatpush.bf16.msrb.mxu0 %v5951_v11  ;;  %v4882_v5 = vld [vmem:[%s7270_s27 + $0x3a8] sm:$0xf]  ;;  %v6581_v6 = vld [vmem:[%s7270_s27 + $0x3b4] sm:$0xf0]  ;;  %v4755_v11 = vor.u32 %v6549_v62, %v4754_v63  ;;  %v3496_v28 = vadd.f32 %v3495_v52, %v3482_v9 }
 0x13e   : > { %3771 = vmatpush.bf16.msrb.mxu1 %v6079_v16  ;;  %v4482_v8 = vld [vmem:[%s7270_s27 + $0x88] sm:$0xf]  ;;  %v6481_v13 = vld [vmem:[%s7270_s27 + $0x94] sm:$0xf0]  ;;  %v4883_v16 = vor.u32 %v6581_v6, %v4882_v5 }
 0x13f   : > { %3785 = vmatpush.bf16.msrb.mxu2 %v6207_v18  ;;  %v4610_v14 = vld [vmem:[%s7270_s27 + $0x188] sm:$0xf]  ;;  %v6513_v15 = vld [vmem:[%s7270_s27 + $0x194] sm:$0xf0]  ;;  %v4483_v24 = vor.u32 %v6481_v13, %v4482_v8  ;;  %v3510_v2 = vadd.f32 %v3509_v25, %v3496_v28 }
 0x140   : > { %3799 = vmatpush.bf16.msrb.mxu3 %v6335_v4  ;;  %3758 = vmatmul.bf16.vlgmr.msrb.gmra.mxu0 %v7683_v32  ;;  %v4738_v18 = vld [vmem:[%s7270_s27 + $0x288] sm:$0xf]  ;;  %v6545_v19 = vld [vmem:[%s7270_s27 + $0x294] sm:$0xf0]  ;;  %v3535_v4 = vpop.f32.mrf.mxu0 }
 0x141   : > { %3806 = vmatpush.bf16.msra.mxu0 %v4531_v21  ;;  %3772 = vmatmul.bf16.vlgmr.msrb.gmra.mxu1 %v7690_v41  ;;  %v4866_v21 = vld [vmem:[%s7270_s27 + $0x388] sm:$0xf]  ;;  %v6577_v23 = vld [vmem:[%s7270_s27 + $0x394] sm:$0xf0]  ;;  %v3536_v29 = vadd.f32 %v3535_v4, %v3522_v22  ;;  %v4739_v51 = vor.u32 %v6545_v19, %v4738_v18  ;;  %v3524_v0 = vadd.f32 %v3523_v20, %v3510_v2 }
 0x142   : > { %3820 = vmatpush.bf16.msra.mxu1 %v4659_v26  ;;  %3786 = vmatmul.bf16.vlgmr.msrb.gmra.mxu2 %v7688_v38  ;;  %v4611_v26 = vor.u32 %v6513_v15, %v4610_v14  ;;  %v4466_v30 = vld [vmem:[%s7270_s27 + $0x68] sm:$0xf]  ;;  %v4867_v37 = vor.u32 %v6577_v23, %v4866_v21  ;;  %v6509_v12 = vld [vmem:[%s7270_s27 + $0x174] sm:$0xf0] }
 0x143   : > { %3834 = vmatpush.bf16.msra.mxu2 %v4787_v27  ;;  %3800 = vmatmul.bf16.vlgmr.msrb.gmra.mxu3 %v7694_v46  ;;  %v3549_v27 = vpop.f32.mrf.mxu1  ;;  %v4594_v34 = vld [vmem:[%s7270_s27 + $0x168] sm:$0xf]  ;;  %v6541_v49 = vld [vmem:[%s7270_s27 + $0x274] sm:$0xf0] }
 0x144   : > { %3848 = vmatpush.bf16.msra.mxu3 %v4915_v33  ;;  %v6477_v33 = vld [vmem:[%s7270_s27 + $0x74] sm:$0xf0]  ;;  %v4722_v48 = vld [vmem:[%s7270_s27 + $0x268] sm:$0xf] }
 0x145   : > { %3807 = vmatpush.bf16.msra.mxu0 %v4515_v3  ;;  %v4850_v42 = vld [vmem:[%s7270_s27 + $0x368] sm:$0xf]  ;;  %v6573_v52 = vld [vmem:[%s7270_s27 + $0x374] sm:$0xf0]  ;;  %v4467_v3 = vor.u32 %v6477_v33, %v4466_v30  ;;  %v4723_v61 = vor.u32 %v6541_v49, %v4722_v48 }
 0x146   : > { %3821 = vmatpush.bf16.msra.mxu1 %v4643_v53  ;;  %v4450_v7 = vld [vmem:[%s7270_s27 + $0x48] sm:$0xf]  ;;  %v3550_v53 = vadd.f32 %v3549_v27, %v3536_v29  ;;  %v6473_v55 = vld [vmem:[%s7270_s27 + $0x54] sm:$0xf0]  ;;  %v4851_v60 = vor.u32 %v6573_v52, %v4850_v42 }
 0x147   : > { %3835 = vmatpush.bf16.msra.mxu2 %v4771_v54  ;;  %v4595_v54 = vor.u32 %v6509_v12, %v4594_v34  ;;  %v4578_v56 = vld [vmem:[%s7270_s27 + $0x148] sm:$0xf]  ;;  %v3563_v63 = vpop.f32.mrf.mxu2  ;;  %v6537_v50 = vld [vmem:[%s7270_s27 + $0x254] sm:$0xf0] }
 0x148   : > { %3849 = vmatpush.bf16.msra.mxu3 %v4899_v59  ;;  %v6505_v59 = vld [vmem:[%s7270_s27 + $0x154] sm:$0xf0]  ;;  %v4706_v62 = vld [vmem:[%s7270_s27 + $0x248] sm:$0xf]  ;;  %v3564_v5 = vadd.f32 %v3563_v63, %v3550_v53  ;;  %v3537_v6 = vpop.f32.mrf.mxu0 }
 0x149   : > { %3808 = vmatpush.bf16.msra.mxu0 %v4499_v45  ;;  %v3577_v45 = vpop.f32.mrf.mxu3  ;;  %v4834_v8 = vld [vmem:[%s7270_s27 + $0x348] sm:$0xf]  ;;  %v6569_v9 = vld [vmem:[%s7270_s27 + $0x354] sm:$0xf0]  ;;  %v3538_v13 = vadd.f32 %v3537_v6, %v3524_v0  ;;  %v4707_v15 = vor.u32 %v6537_v50, %v4706_v62 }
 0x14a   : > { %3822 = vmatpush.bf16.msra.mxu1 %v4627_v57  ;;  %v4451_v57 = vor.u32 %v6473_v55, %v4450_v7  ;;  %v3578_v14 = vadd.f32 %v3577_v45, %v3564_v5  ;;  %v4434_v25 = vld [vmem:[%s7270_s27 + $0x28] sm:$0xf]  ;;  %v4835_v19 = vor.u32 %v6569_v9, %v4834_v8  ;;  %v6501_v20 = vld [vmem:[%s7270_s27 + $0x134] sm:$0xf0] }
 0x14b   : > { %3836 = vmatpush.bf16.msra.mxu2 %v4755_v11  ;;  %v4579_v11 = vor.u32 %v6505_v59, %v4578_v56  ;;  %v4562_v18 = vld [vmem:[%s7270_s27 + $0x128] sm:$0xf]  ;;  %v3551_v22 = vpop.f32.mrf.mxu1  ;;  %v6533_v21 = vld [vmem:[%s7270_s27 + $0x234] sm:$0xf0] }
 0x14c   : > { %3850 = vmatpush.bf16.msra.mxu3 %v4883_v16  ;;  %v6469_v16 = vld [vmem:[%s7270_s27 + $0x34] sm:$0xf0]  ;;  %v4690_v4 = vld [vmem:[%s7270_s27 + $0x228] sm:$0xf]  ;;  %7021 = vtanh.f32 %v3578_v14  ;;  %v3552_v29 = vadd.f32 %v3551_v22, %v3538_v13 }
 0x14d   : > { %3809 = vmatpush.bf16.msra.mxu0 %v4483_v24  ;;  %v4818_v23 = vld [vmem:[%s7270_s27 + $0x328] sm:$0xf]  ;;  %v6565_v24 = vld [vmem:[%s7270_s27 + $0x334] sm:$0xf0]  ;;  %v4691_v30 = vor.u32 %v6533_v21, %v4690_v4 }
 0x14e   : > { %3823 = vmatpush.bf16.msra.mxu1 %v4611_v26  ;;  %v4435_v26 = vor.u32 %v6469_v16, %v4434_v25  ;;  %v4418_v27 = vld [vmem:[%s7270_s27 + $0x8] sm:$0xf]  ;;  %v6465_v28 = vld [vmem:[%s7270_s27 + $0x14] sm:$0xf0]  ;;  %v4819_v12 = vor.u32 %v6565_v24, %v4818_v23 }
 0x14f   : > { %3837 = vmatpush.bf16.msra.mxu2 %v4739_v51  ;;  %v4563_v51 = vor.u32 %v6501_v20, %v4562_v18  ;;  %v4546_v33 = vld [vmem:[%s7270_s27 + $0x108] sm:$0xf]  ;;  %v6497_v34 = vld [vmem:[%s7270_s27 + $0x114] sm:$0xf0]  ;;  %v3565_v48 = vpop.f32.mrf.mxu2 }
 0x150   : > { %3851 = vmatpush.bf16.msra.mxu3 %v4867_v37  ;;  %v4674_v37 = vld [vmem:[%s7270_s27 + $0x208] sm:$0xf]  ;;  %v6529_v49 = vld [vmem:[%s7270_s27 + $0x214] sm:$0xf0]  ;;  %v3566_v52 = vadd.f32 %v3565_v48, %v3552_v29  ;;  %v4547_v62 = vor.u32 %v6497_v34, %v4546_v33 }
 0x151   : > { %3810 = vmatpush.bf16.msra.mxu0 %v4467_v3  ;;  %v4802_v2 = vld [vmem:[%s7270_s27 + $0x308] sm:$0xf]  ;;  %v6561_v42 = vld [vmem:[%s7270_s27 + $0x314] sm:$0xf0]  ;;  %v3579_v3 = vpop.f32.mrf.mxu3  ;;  %v4675_v50 = vor.u32 %v6529_v49, %v4674_v37 }
 0x152   : > { %3824 = vmatpush.bf16.msra.mxu1 %v4595_v54  ;;  %v5042_v7 = vld [vmem:[%s7270_s27 + $0x4e8] sm:$0xf]  ;;  %v6621_v53 = vld [vmem:[%s7270_s27 + $0x4f4] sm:$0xf0]  ;;  %v3580_v63 = vadd.f32 %v3579_v3, %v3566_v52  ;;  %v4803_v6 = vor.u32 %v6561_v42, %v4802_v2 }
 0x153   : > { %3838 = vmatpush.bf16.msra.mxu2 %v4723_v61  ;;  %v5170_v54 = vld [vmem:[%s7270_s27 + $0x5e8] sm:$0xf]  ;;  %v4419_v61 = vor.u32 %v6465_v28, %v4418_v27  ;;  %v6653_v55 = vld [vmem:[%s7270_s27 + $0x5f4] sm:$0xf0]  ;;  %v5043_v45 = vor.u32 %v6621_v53, %v5042_v7 }
 0x154   : > { %3852 = vmatpush.bf16.msra.mxu3 %v4851_v60  ;;  %v5298_v56 = vld [vmem:[%s7270_s27 + $0x6e8] sm:$0xf]  ;;  %v6685_v59 = vld [vmem:[%s7270_s27 + $0x6f4] sm:$0xf0]  ;;  %v7022_v60 = vpop.eup %7021  ;;  %7023 = vtanh.f32 %v3580_v63  ;;  %v5171_v8 = vor.u32 %v6653_v55, %v5170_v54 }
 0x155   : > { %3811 = vmatpush.bf16.msra.mxu0 %v4451_v57  ;;  %v5426_v0 = vld [vmem:[%s7270_s27 + $0x7e8] sm:$0xf]  ;;  %v6717_v5 = vld [vmem:[%s7270_s27 + $0x7f4] sm:$0xf0]  ;;  %4262 = vst [vmem:[%s8078_s18] sm:$0xff] %v7022_v60  ;;  %v5299_v9 = vor.u32 %v6685_v59, %v5298_v56 }
 0x156   : > { %3825 = vmatpush.bf16.msra.mxu1 %v4579_v11  ;;  %v5026_v57 = vld [vmem:[%s7270_s27 + $0x4c8] sm:$0xf]  ;;  %v6617_v11 = vld [vmem:[%s7270_s27 + $0x4d4] sm:$0xf0]  ;;  %v5427_v14 = vor.u32 %v6717_v5, %v5426_v0 }
 0x157   : > { %3839 = vmatpush.bf16.msra.mxu2 %v4707_v15  ;;  %v5154_v13 = vld [vmem:[%s7270_s27 + $0x5c8] sm:$0xf]  ;;  %v6649_v15 = vld [vmem:[%s7270_s27 + $0x5d4] sm:$0xf0]  ;;  %v5027_v22 = vor.u32 %v6617_v11, %v5026_v57 }
 0x158   : > { %3853 = vmatpush.bf16.msra.mxu3 %v4835_v19  ;;  %v5282_v25 = vld [vmem:[%s7270_s27 + $0x6c8] sm:$0xf]  ;;  %v6681_v16 = vld [vmem:[%s7270_s27 + $0x6d4] sm:$0xf0]  ;;  %v5155_v20 = vor.u32 %v6649_v15, %v5154_v13 }
 0x159   : > { %3812 = vmatpush.bf16.msra.mxu0 %v4435_v26  ;;  %v5410_v18 = vld [vmem:[%s7270_s27 + $0x7c8] sm:$0xf]  ;;  %v6713_v19 = vld [vmem:[%s7270_s27 + $0x7d4] sm:$0xf0]  ;;  %v5283_v4 = vor.u32 %v6681_v16, %v5282_v25 }
 0x15a   : > { %3826 = vmatpush.bf16.msra.mxu1 %v4563_v51  ;;  %v5010_v21 = vld [vmem:[%s7270_s27 + $0x4a8] sm:$0xf]  ;;  %v6613_v23 = vld [vmem:[%s7270_s27 + $0x4b4] sm:$0xf0]  ;;  %v5411_v26 = vor.u32 %v6713_v19, %v5410_v18  ;;  %v7024_v51 = vpop.eup %7023 }
 0x15b   : > { %3840 = vmatpush.bf16.msra.mxu2 %v4691_v30  ;;  %v5138_v24 = vld [vmem:[%s7270_s27 + $0x5a8] sm:$0xf]  ;;  %v6645_v27 = vld [vmem:[%s7270_s27 + $0x5b4] sm:$0xf0]  ;;  %4266 = vst [vmem:[%s8078_s18 + $0x20] sm:$0xff] %v7024_v51  ;;  %v5011_v34 = vor.u32 %v6613_v23, %v5010_v21 }
 0x15c   : > { %3854 = vmatpush.bf16.msra.mxu3 %v4819_v12  ;;  %v5266_v28 = vld [vmem:[%s7270_s27 + $0x6a8] sm:$0xf]  ;;  %v6677_v29 = vld [vmem:[%s7270_s27 + $0x6b4] sm:$0xf0]  ;;  %v5139_v37 = vor.u32 %v6645_v27, %v5138_v24 }
 0x15d   : > { %3813 = vmatpush.bf16.msra.mxu0 %v4419_v61  ;;  %v5394_v30 = vld [vmem:[%s7270_s27 + $0x7a8] sm:$0xf]  ;;  %v6709_v33 = vld [vmem:[%s7270_s27 + $0x7b4] sm:$0xf0]  ;;  %v5267_v12 = vor.u32 %v6677_v29, %v5266_v28 }
 0x15e   : > { %3827 = vmatpush.bf16.msra.mxu1 %v4547_v62  ;;  %v4994_v48 = vld [vmem:[%s7270_s27 + $0x488] sm:$0xf]  ;;  %v6609_v49 = vld [vmem:[%s7270_s27 + $0x494] sm:$0xf0]  ;;  %v5395_v42 = vor.u32 %v6709_v33, %v5394_v30 }
 0x15f   : > { %3841 = vmatpush.bf16.msra.mxu2 %v4675_v50  ;;  %v5122_v2 = vld [vmem:[%s7270_s27 + $0x588] sm:$0xf]  ;;  %v6641_v52 = vld [vmem:[%s7270_s27 + $0x594] sm:$0xf0]  ;;  %v4995_v61 = vor.u32 %v6609_v49, %v4994_v48 }
 0x160   : > { %3855 = vmatpush.bf16.msra.mxu3 %v4803_v6  ;;  %3814 = vmatmul.bf16.vlgmr.msra.gmra.mxu0 %v7375_v58  ;;  %v5250_v3 = vld [vmem:[%s7270_s27 + $0x688] sm:$0xf]  ;;  %v6673_v7 = vld [vmem:[%s7270_s27 + $0x694] sm:$0xf0]  ;;  %v5123_v55 = vor.u32 %v6641_v52, %v5122_v2 }
 0x161   : > { %3862 = vmatpush.bf16.msrb.mxu0 %v5043_v45  ;;  %3828 = vmatmul.bf16.vlgmr.msra.gmra.mxu1 %v7399_v10  ;;  %v5378_v53 = vld [vmem:[%s7270_s27 + $0x788] sm:$0xf]  ;;  %v6705_v54 = vld [vmem:[%s7270_s27 + $0x794] sm:$0xf0]  ;;  %v5251_v56 = vor.u32 %v6673_v7, %v5250_v3 }
 0x162   : > { %3876 = vmatpush.bf16.msrb.mxu1 %v5171_v8  ;;  %3842 = vmatmul.bf16.vlgmr.msra.gmra.mxu2 %v7383_v1  ;;  %v4978_v59 = vld [vmem:[%s7270_s27 + $0x468] sm:$0xf]  ;;  %v6605_v60 = vld [vmem:[%s7270_s27 + $0x474] sm:$0xf0]  ;;  %v5379_v62 = vor.u32 %v6705_v54, %v5378_v53 }
 0x163   : > { %3890 = vmatpush.bf16.msrb.mxu2 %v5299_v9  ;;  %3856 = vmatmul.bf16.vlgmr.msra.gmra.mxu3 %v7407_v17  ;;  %v5106_v63 = vld [vmem:[%s7270_s27 + $0x568] sm:$0xf]  ;;  %v6637_v50 = vld [vmem:[%s7270_s27 + $0x574] sm:$0xf0]  ;;  %v4979_v8 = vor.u32 %v6605_v60, %v4978_v59 }
 0x164   : > { %3904 = vmatpush.bf16.msrb.mxu3 %v5427_v14  ;;  %v5234_v0 = vld [vmem:[%s7270_s27 + $0x668] sm:$0xf]  ;;  %v6669_v5 = vld [vmem:[%s7270_s27 + $0x674] sm:$0xf0]  ;;  %v5107_v9 = vor.u32 %v6637_v50, %v5106_v63 }
 0x165   : > { %3863 = vmatpush.bf16.msrb.mxu0 %v5027_v22  ;;  %v5362_v6 = vld [vmem:[%s7270_s27 + $0x768] sm:$0xf]  ;;  %v6701_v45 = vld [vmem:[%s7270_s27 + $0x774] sm:$0xf0]  ;;  %v5235_v57 = vor.u32 %v6669_v5, %v5234_v0 }
 0x166   : > { %3877 = vmatpush.bf16.msrb.mxu1 %v5155_v20  ;;  %v4962_v11 = vld [vmem:[%s7270_s27 + $0x448] sm:$0xf]  ;;  %v6601_v13 = vld [vmem:[%s7270_s27 + $0x454] sm:$0xf0]  ;;  %v5363_v15 = vor.u32 %v6701_v45, %v5362_v6 }
 0x167   : > { %3891 = vmatpush.bf16.msrb.mxu2 %v5283_v4  ;;  %v5090_v14 = vld [vmem:[%s7270_s27 + $0x548] sm:$0xf]  ;;  %v6633_v25 = vld [vmem:[%s7270_s27 + $0x554] sm:$0xf0]  ;;  %v4963_v20 = vor.u32 %v6601_v13, %v4962_v11 }
 0x168   : > { %3905 = vmatpush.bf16.msrb.mxu3 %v5411_v26  ;;  %v5218_v16 = vld [vmem:[%s7270_s27 + $0x648] sm:$0xf]  ;;  %v6665_v18 = vld [vmem:[%s7270_s27 + $0x654] sm:$0xf0]  ;;  %v5091_v4 = vor.u32 %v6633_v25, %v5090_v14 }
 0x169   : > { %3864 = vmatpush.bf16.msrb.mxu0 %v5011_v34  ;;  %v5346_v19 = vld [vmem:[%s7270_s27 + $0x748] sm:$0xf]  ;;  %v6697_v22 = vld [vmem:[%s7270_s27 + $0x754] sm:$0xf0]  ;;  %v5219_v21 = vor.u32 %v6665_v18, %v5218_v16 }
 0x16a   : > { %3878 = vmatpush.bf16.msrb.mxu1 %v5139_v37  ;;  %v4946_v23 = vld [vmem:[%s7270_s27 + $0x428] sm:$0xf]  ;;  %v6597_v24 = vld [vmem:[%s7270_s27 + $0x434] sm:$0xf0]  ;;  %v5347_v27 = vor.u32 %v6697_v22, %v5346_v19 }
 0x16b   : > { %3892 = vmatpush.bf16.msrb.mxu2 %v5267_v12  ;;  %v5074_v26 = vld [vmem:[%s7270_s27 + $0x528] sm:$0xf]  ;;  %v6629_v28 = vld [vmem:[%s7270_s27 + $0x534] sm:$0xf0]  ;;  %v4947_v34 = vor.u32 %v6597_v24, %v4946_v23 }
 0x16c   : > { %3906 = vmatpush.bf16.msrb.mxu3 %v5395_v42  ;;  %v5202_v29 = vld [vmem:[%s7270_s27 + $0x628] sm:$0xf]  ;;  %v6661_v51 = vld [vmem:[%s7270_s27 + $0x634] sm:$0xf0]  ;;  %v5075_v48 = vor.u32 %v6629_v28, %v5074_v26 }
 0x16d   : > { %3865 = vmatpush.bf16.msrb.mxu0 %v4995_v61  ;;  %v5330_v30 = vld [vmem:[%s7270_s27 + $0x728] sm:$0xf]  ;;  %v6693_v33 = vld [vmem:[%s7270_s27 + $0x734] sm:$0xf0]  ;;  %v5203_v49 = vor.u32 %v6661_v51, %v5202_v29 }
 0x16e   : > { %3879 = vmatpush.bf16.msrb.mxu1 %v5123_v55  ;;  %v4930_v37 = vld [vmem:[%s7270_s27 + $0x408] sm:$0xf]  ;;  %v6593_v12 = vld [vmem:[%s7270_s27 + $0x414] sm:$0xf0]  ;;  %v5331_v3 = vor.u32 %v6693_v33, %v5330_v30 }
 0x16f   : > { %3893 = vmatpush.bf16.msrb.mxu2 %v5251_v56  ;;  %v5058_v2 = vld [vmem:[%s7270_s27 + $0x508] sm:$0xf]  ;;  %v6625_v42 = vld [vmem:[%s7270_s27 + $0x514] sm:$0xf0]  ;;  %v4931_v59 = vor.u32 %v6593_v12, %v4930_v37 }
 0x170   : > { %3907 = vmatpush.bf16.msrb.mxu3 %v5379_v62  ;;  %v5186_v52 = vld [vmem:[%s7270_s27 + $0x608] sm:$0xf]  ;;  %v6657_v7 = vld [vmem:[%s7270_s27 + $0x614] sm:$0xf0]  ;;  %v5059_v50 = vor.u32 %v6625_v42, %v5058_v2 }
 0x171   : > { %3866 = vmatpush.bf16.msrb.mxu0 %v4979_v8  ;;  %v5314_v53 = vld [vmem:[%s7270_s27 + $0x708] sm:$0xf]  ;;  %v6689_v54 = vld [vmem:[%s7270_s27 + $0x714] sm:$0xf0]  ;;  %v5187_v0 = vor.u32 %v6657_v7, %v5186_v52 }
 0x172   : > { %3880 = vmatpush.bf16.msrb.mxu1 %v5107_v9  ;;  %v5554_v61 = vld [vmem:[%s7270_s27 + $0x8e8] sm:$0xf]  ;;  %v6749_v55 = vld [vmem:[%s7270_s27 + $0x8f4] sm:$0xf0]  ;;  %v5315_v45 = vor.u32 %v6689_v54, %v5314_v53 }
 0x173   : > { %3894 = vmatpush.bf16.msrb.mxu2 %v5235_v57  ;;  %v5682_v56 = vld [vmem:[%s7270_s27 + $0x9e8] sm:$0xf]  ;;  %v6781_v60 = vld [vmem:[%s7270_s27 + $0x9f4] sm:$0xf0]  ;;  %v5555_v8 = vor.u32 %v6749_v55, %v5554_v61 }
 0x174   : > { %3908 = vmatpush.bf16.msrb.mxu3 %v5363_v15  ;;  %v5810_v63 = vld [vmem:[%s7270_s27 + $0xae8] sm:$0xf]  ;;  %v6813_v62 = vld [vmem:[%s7270_s27 + $0xaf4] sm:$0xf0]  ;;  %v5683_v9 = vor.u32 %v6781_v60, %v5682_v56 }
 0x175   : > { %3867 = vmatpush.bf16.msrb.mxu0 %v4963_v20  ;;  %v5938_v5 = vld [vmem:[%s7270_s27 + $0xbe8] sm:$0xf]  ;;  %v6845_v6 = vld [vmem:[%s7270_s27 + $0xbf4] sm:$0xf0]  ;;  %v5811_v57 = vor.u32 %v6813_v62, %v5810_v63 }
 0x176   : > { %3881 = vmatpush.bf16.msrb.mxu1 %v5091_v4  ;;  %v5538_v11 = vld [vmem:[%s7270_s27 + $0x8c8] sm:$0xf]  ;;  %v6745_v13 = vld [vmem:[%s7270_s27 + $0x8d4] sm:$0xf0]  ;;  %v5939_v15 = vor.u32 %v6845_v6, %v5938_v5  ;;  %v8184_v6 = vpop.f32.mrf.mxu0 }
 0x177   : > { %3895 = vmatpush.bf16.msrb.mxu2 %v5219_v21  ;;  %v5666_v14 = vld [vmem:[%s7270_s27 + $0x9c8] sm:$0xf]  ;;  %v6777_v25 = vld [vmem:[%s7270_s27 + $0x9d4] sm:$0xf0]  ;;  %v5539_v20 = vor.u32 %v6745_v13, %v5538_v11 }
 0x178   : > { %3909 = vmatpush.bf16.msrb.mxu3 %v5347_v27  ;;  %v5794_v16 = vld [vmem:[%s7270_s27 + $0xac8] sm:$0xf]  ;;  %v6809_v18 = vld [vmem:[%s7270_s27 + $0xad4] sm:$0xf0]  ;;  %v5667_v4 = vor.u32 %v6777_v25, %v5666_v14 }
 0x179   : > { %3868 = vmatpush.bf16.msrb.mxu0 %v4947_v34  ;;  %v5922_v19 = vld [vmem:[%s7270_s27 + $0xbc8] sm:$0xf]  ;;  %v6841_v22 = vld [vmem:[%s7270_s27 + $0xbd4] sm:$0xf0]  ;;  %v5795_v21 = vor.u32 %v6809_v18, %v5794_v16 }
 0x17a   : > { %3882 = vmatpush.bf16.msrb.mxu1 %v5075_v48  ;;  %v5522_v23 = vld [vmem:[%s7270_s27 + $0x8a8] sm:$0xf]  ;;  %v6741_v24 = vld [vmem:[%s7270_s27 + $0x8b4] sm:$0xf0]  ;;  %v5923_v27 = vor.u32 %v6841_v22, %v5922_v19 }
 0x17b   : > { %3896 = vmatpush.bf16.msrb.mxu2 %v5203_v49  ;;  %v5650_v26 = vld [vmem:[%s7270_s27 + $0x9a8] sm:$0xf]  ;;  %v6773_v28 = vld [vmem:[%s7270_s27 + $0x9b4] sm:$0xf0]  ;;  %v5523_v34 = vor.u32 %v6741_v24, %v5522_v23 }
 0x17c   : > { %3910 = vmatpush.bf16.msrb.mxu3 %v5331_v3  ;;  %v5778_v29 = vld [vmem:[%s7270_s27 + $0xaa8] sm:$0xf]  ;;  %v6805_v51 = vld [vmem:[%s7270_s27 + $0xab4] sm:$0xf0]  ;;  %v5651_v37 = vor.u32 %v6773_v28, %v5650_v26 }
 0x17d   : > { %3869 = vmatpush.bf16.msrb.mxu0 %v4931_v59  ;;  %v5906_v30 = vld [vmem:[%s7270_s27 + $0xba8] sm:$0xf]  ;;  %v6837_v33 = vld [vmem:[%s7270_s27 + $0xbb4] sm:$0xf0]  ;;  %v5779_v12 = vor.u32 %v6805_v51, %v5778_v29  ;;  %v8201_v29 = vpop.f32.mrf.mxu2 }
 0x17e   : > { %3883 = vmatpush.bf16.msrb.mxu1 %v5059_v50  ;;  %v5506_v48 = vld [vmem:[%s7270_s27 + $0x888] sm:$0xf]  ;;  %v6737_v49 = vld [vmem:[%s7270_s27 + $0x894] sm:$0xf0]  ;;  %v5907_v42 = vor.u32 %v6837_v33, %v5906_v30 }
 0x17f   : > { %3897 = vmatpush.bf16.msrb.mxu2 %v5187_v0  ;;  %v5634_v2 = vld [vmem:[%s7270_s27 + $0x988] sm:$0xf]  ;;  %v6769_v52 = vld [vmem:[%s7270_s27 + $0x994] sm:$0xf0]  ;;  %v5507_v61 = vor.u32 %v6737_v49, %v5506_v48  ;;  %v8211_v49 = vld [vmem:[%s7278_s29] sm:$0xf] }
 0x180   : > { %3911 = vmatpush.bf16.msrb.mxu3 %v5315_v45  ;;  %3870 = vmatmul.bf16.vlgmr.msrb.gmra.mxu0 %v7483_v39  ;;  %v5762_v3 = vld [vmem:[%s7270_s27 + $0xa88] sm:$0xf]  ;;  %v6801_v7 = vld [vmem:[%s7270_s27 + $0xa94] sm:$0xf0]  ;;  %v5635_v55 = vor.u32 %v6769_v52, %v5634_v2  ;;  %v791_v2 = vperm.slane %v8211_v49, 1 }
 0x181   : > { %3918 = vmatpush.bf16.msra.mxu0 %v5555_v8  ;;  %3884 = vmatmul.bf16.vlgmr.msrb.gmra.mxu1 %v7490_v44  ;;  %v5890_v53 = vld [vmem:[%s7270_s27 + $0xb88] sm:$0xf]  ;;  %v6833_v54 = vld [vmem:[%s7270_s27 + $0xb94] sm:$0xf0]  ;;  %v5763_v56 = vor.u32 %v6801_v7, %v5762_v3  ;;  %v8216_v7 = vpop.f32.mrf.mxu0 }
 0x182   : > { %3932 = vmatpush.bf16.msra.mxu1 %v5683_v9  ;;  %3898 = vmatmul.bf16.vlgmr.msrb.gmra.mxu2 %v7488_v43  ;;  %v5490_v59 = vld [vmem:[%s7270_s27 + $0x868] sm:$0xf]  ;;  %v6733_v60 = vld [vmem:[%s7270_s27 + $0x874] sm:$0xf0]  ;;  %v5891_v62 = vor.u32 %v6833_v54, %v5890_v53  ;;  %v8188_v9 = vpop.f32.mrf.mxu1 }
 0x183   : > { %3946 = vmatpush.bf16.msra.mxu2 %v5811_v57  ;;  %3912 = vmatmul.bf16.vlgmr.msrb.gmra.mxu3 %v7494_v47  ;;  %v5618_v63 = vld [vmem:[%s7270_s27 + $0x968] sm:$0xf]  ;;  %v6765_v50 = vld [vmem:[%s7270_s27 + $0x974] sm:$0xf0]  ;;  %v5491_v57 = vor.u32 %v6733_v60, %v5490_v59 }
 0x184   : > { %3960 = vmatpush.bf16.msra.mxu3 %v5939_v15  ;;  %v5746_v0 = vld [vmem:[%s7270_s27 + $0xa68] sm:$0xf]  ;;  %v6797_v5 = vld [vmem:[%s7270_s27 + $0xa74] sm:$0xf0]  ;;  %v5619_v11 = vor.u32 %v6765_v50, %v5618_v63 }
 0x185   : > { %3919 = vmatpush.bf16.msra.mxu0 %v5539_v20  ;;  %v5874_v45 = vld [vmem:[%s7270_s27 + $0xb68] sm:$0xf]  ;;  %v6829_v8 = vld [vmem:[%s7270_s27 + $0xb74] sm:$0xf0]  ;;  %v5747_v13 = vor.u32 %v6797_v5, %v5746_v0 }
 0x186   : > { %3933 = vmatpush.bf16.msra.mxu1 %v5667_v4  ;;  %v5474_v14 = vld [vmem:[%s7270_s27 + $0x848] sm:$0xf]  ;;  %v6729_v15 = vld [vmem:[%s7270_s27 + $0x854] sm:$0xf0]  ;;  %v5875_v16 = vor.u32 %v6829_v8, %v5874_v45 }
 0x187   : > { %3947 = vmatpush.bf16.msra.mxu2 %v5795_v21  ;;  %v5602_v25 = vld [vmem:[%s7270_s27 + $0x948] sm:$0xf]  ;;  %v6761_v18 = vld [vmem:[%s7270_s27 + $0x954] sm:$0xf0]  ;;  %v5475_v21 = vor.u32 %v6729_v15, %v5474_v14 }
 0x188   : > { %3961 = vmatpush.bf16.msra.mxu3 %v5923_v27  ;;  %v5730_v19 = vld [vmem:[%s7270_s27 + $0xa48] sm:$0xf]  ;;  %v6793_v22 = vld [vmem:[%s7270_s27 + $0xa54] sm:$0xf0]  ;;  %v5603_v23 = vor.u32 %v6761_v18, %v5602_v25 }
 0x189   : > { %3920 = vmatpush.bf16.msra.mxu0 %v5523_v34  ;;  %v5858_v20 = vld [vmem:[%s7270_s27 + $0xb48] sm:$0xf]  ;;  %v6825_v4 = vld [vmem:[%s7270_s27 + $0xb54] sm:$0xf0]  ;;  %v5731_v24 = vor.u32 %v6793_v22, %v5730_v19  ;;  %v3592_v22 = vadd.f32 %v8184_v6, %v791_v2 }
 0x18a   : > { %3934 = vmatpush.bf16.msra.mxu1 %v5651_v37  ;;  %v5458_v26 = vld [vmem:[%s7270_s27 + $0x828] sm:$0xf]  ;;  %v6725_v27 = vld [vmem:[%s7270_s27 + $0x834] sm:$0xf0]  ;;  %v5859_v51 = vor.u32 %v6825_v4, %v5858_v20  ;;  %v8206_v37 = vpop.f32.mrf.mxu3  ;;  %v8221_v59 = vpop.f32.mrf.mxu1 }
 0x18b   : > { %3948 = vmatpush.bf16.msra.mxu2 %v5779_v12  ;;  %v5586_v28 = vld [vmem:[%s7270_s27 + $0x928] sm:$0xf]  ;;  %v6757_v30 = vld [vmem:[%s7270_s27 + $0x934] sm:$0xf0] }
 0x18c   : > { %3962 = vmatpush.bf16.msra.mxu3 %v5907_v42  ;;  %v5714_v33 = vld [vmem:[%s7270_s27 + $0xa28] sm:$0xf]  ;;  %v6789_v34 = vld [vmem:[%s7270_s27 + $0xa34] sm:$0xf0]  ;;  %v5459_v42 = vor.u32 %v6725_v27, %v5458_v26  ;;  %v5587_v53 = vor.u32 %v6757_v30, %v5586_v28  ;;  %v8240_v26 = vpop.f32.mrf.mxu2 }
 0x18d   : > { %3921 = vmatpush.bf16.msra.mxu0 %v5507_v61  ;;  %v5842_v12 = vld [vmem:[%s7270_s27 + $0xb28] sm:$0xf]  ;;  %v6821_v48 = vld [vmem:[%s7270_s27 + $0xb34] sm:$0xf0]  ;;  %v5715_v54 = vor.u32 %v6789_v34, %v5714_v33 }
 0x18e   : > { %3935 = vmatpush.bf16.msra.mxu1 %v5635_v55  ;;  %v5442_v52 = vld [vmem:[%s7270_s27 + $0x808] sm:$0xf]  ;;  %v6721_v3 = vld [vmem:[%s7270_s27 + $0x814] sm:$0xf0]  ;;  %v5843_v60 = vor.u32 %v6821_v48, %v5842_v12  ;;  %v3606_v48 = vadd.f32 %v8188_v9, %v3592_v22 }
 0x18f   : > { %3949 = vmatpush.bf16.msra.mxu2 %v5763_v56  ;;  %v5570_v61 = vld [vmem:[%s7270_s27 + $0x908] sm:$0xf]  ;;  %v6753_v55 = vld [vmem:[%s7270_s27 + $0x914] sm:$0xf0]  ;;  %v5443_v8 = vor.u32 %v6721_v3, %v5442_v52 }
 0x190   : > { %3963 = vmatpush.bf16.msra.mxu3 %v5891_v62  ;;  %v5698_v56 = vld [vmem:[%s7270_s27 + $0xa08] sm:$0xf]  ;;  %v6785_v63 = vld [vmem:[%s7270_s27 + $0xa14] sm:$0xf0]  ;;  %v5571_v14 = vor.u32 %v6753_v55, %v5570_v61 }
 0x191   : > { %3922 = vmatpush.bf16.msra.mxu0 %v5491_v57  ;;  %v5826_v62 = vld [vmem:[%s7270_s27 + $0xb08] sm:$0xf]  ;;  %v6817_v50 = vld [vmem:[%s7270_s27 + $0xb14] sm:$0xf0]  ;;  %v5699_v15 = vor.u32 %v6785_v63, %v5698_v56 }
 0x192   : > { %3936 = vmatpush.bf16.msra.mxu1 %v5619_v11  ;;  %v6066_v0 = vld [vmem:[%s7270_s27 + $0xce8] sm:$0xf]  ;;  %v6877_v5 = vld [vmem:[%s7270_s27 + $0xcf4] sm:$0xf0]  ;;  %v5827_v18 = vor.u32 %v6817_v50, %v5826_v62  ;;  %v8245_v33 = vpop.f32.mrf.mxu3  ;;  %v8253_v55 = vpop.f32.mrf.mxu1 }
 0x193   : > { %3950 = vmatpush.bf16.msra.mxu2 %v5747_v13  ;;  %v6194_v45 = vld [vmem:[%s7270_s27 + $0xde8] sm:$0xf]  ;;  %v6909_v57 = vld [vmem:[%s7270_s27 + $0xdf4] sm:$0xf0]  ;;  %v6067_v19 = vor.u32 %v6877_v5, %v6066_v0  ;;  %v3620_v5 = vadd.f32 %v8201_v29, %v3606_v48 }
 0x194   : > { %3964 = vmatpush.bf16.msra.mxu3 %v5875_v16  ;;  %v6322_v11 = vld [vmem:[%s7270_s27 + $0xee8] sm:$0xf]  ;;  %v6941_v13 = vld [vmem:[%s7270_s27 + $0xef4] sm:$0xf0]  ;;  %v6195_v20 = vor.u32 %v6909_v57, %v6194_v45  ;;  %v8276_v22 = vpop.f32.mrf.mxu2 }
 0x195   : > { %3923 = vmatpush.bf16.msra.mxu0 %v5475_v21  ;;  %v6450_v25 = vld [vmem:[%s7270_s27 + $0xfe8] sm:$0xf]  ;;  %v6973_v16 = vld [vmem:[%s7270_s27 + $0xff4] sm:$0xf0]  ;;  %v6323_v4 = vor.u32 %v6941_v13, %v6322_v11 }
 0x196   : > { %3937 = vmatpush.bf16.msra.mxu1 %v5603_v23  ;;  %v6050_v21 = vld [vmem:[%s7270_s27 + $0xcc8] sm:$0xf]  ;;  %v6873_v23 = vld [vmem:[%s7270_s27 + $0xcd4] sm:$0xf0]  ;;  %v6451_v27 = vor.u32 %v6973_v16, %v6450_v25 }
 0x197   : > { %3951 = vmatpush.bf16.msra.mxu2 %v5731_v24  ;;  %v6178_v24 = vld [vmem:[%s7270_s27 + $0xdc8] sm:$0xf]  ;;  %v6905_v28 = vld [vmem:[%s7270_s27 + $0xdd4] sm:$0xf0]  ;;  %v6051_v12 = vor.u32 %v6873_v23, %v6050_v21 }
 0x198   : > { %3965 = vmatpush.bf16.msra.mxu3 %v5859_v51  ;;  %v6306_v51 = vld [vmem:[%s7270_s27 + $0xec8] sm:$0xf]  ;;  %v6937_v30 = vld [vmem:[%s7270_s27 + $0xed4] sm:$0xf0]  ;;  %v6179_v52 = vor.u32 %v6905_v28, %v6178_v24 }
 0x199   : > { %3924 = vmatpush.bf16.msra.mxu0 %v5459_v42  ;;  %v6434_v6 = vld [vmem:[%s7270_s27 + $0xfc8] sm:$0xf]  ;;  %v6969_v34 = vld [vmem:[%s7270_s27 + $0xfd4] sm:$0xf0]  ;;  %v3647_v42 = vpop.f32.mrf.mxu0  ;;  %v6307_v3 = vor.u32 %v6937_v30, %v6306_v51 }
 0x19a   : > { %3938 = vmatpush.bf16.msra.mxu1 %v5587_v53  ;;  %v6034_v53 = vld [vmem:[%s7270_s27 + $0xca8] sm:$0xf]  ;;  %v6435_v56 = vor.u32 %v6969_v34, %v6434_v6  ;;  %v6933_v63 = vld [vmem:[%s7270_s27 + $0xeb4] sm:$0xf0]  ;;  %v8279_v21 = vpop.f32.mrf.mxu3  ;;  %v8290_v48 = vpop.f32.mrf.mxu1 }
 0x19b   : > { %3952 = vmatpush.bf16.msra.mxu2 %v5715_v54  ;;  %v6869_v54 = vld [vmem:[%s7270_s27 + $0xcb4] sm:$0xf0]  ;;  %v6162_v61 = vld [vmem:[%s7270_s27 + $0xda8] sm:$0xf] }
 0x19c   : > { %3966 = vmatpush.bf16.msra.mxu3 %v5843_v60  ;;  %v6901_v60 = vld [vmem:[%s7270_s27 + $0xdb4] sm:$0xf0]  ;;  %v6290_v9 = vld [vmem:[%s7270_s27 + $0xea8] sm:$0xf]  ;;  %v6035_v0 = vor.u32 %v6869_v54, %v6034_v53 }
 0x19d   : > { %3925 = vmatpush.bf16.msra.mxu0 %v5443_v8  ;;  %v6418_v62 = vld [vmem:[%s7270_s27 + $0xfa8] sm:$0xf]  ;;  %v6965_v50 = vld [vmem:[%s7270_s27 + $0xfb4] sm:$0xf0]  ;;  %v6163_v45 = vor.u32 %v6901_v60, %v6162_v61  ;;  %v6291_v8 = vor.u32 %v6933_v63, %v6290_v9 }
 0x19e   : > { %3939 = vmatpush.bf16.msra.mxu1 %v5571_v14  ;;  %v6018_v57 = vld [vmem:[%s7270_s27 + $0xc88] sm:$0xf]  ;;  %v6865_v11 = vld [vmem:[%s7270_s27 + $0xc94] sm:$0xf0]  ;;  %v6419_v14 = vor.u32 %v6965_v50, %v6418_v62 }
 0x19f   : > { %3953 = vmatpush.bf16.msra.mxu2 %v5699_v15  ;;  %v6146_v13 = vld [vmem:[%s7270_s27 + $0xd88] sm:$0xf]  ;;  %v6897_v15 = vld [vmem:[%s7270_s27 + $0xd94] sm:$0xf0] }
 0x1a0   : > { %3967 = vmatpush.bf16.msra.mxu3 %v5827_v18  ;;  %3926 = vmatmul.bf16.vlgmr.msra.gmra.mxu0 %v7583_v31  ;;  %v6274_v25 = vld [vmem:[%s7270_s27 + $0xe88] sm:$0xf]  ;;  %v6929_v16 = vld [vmem:[%s7270_s27 + $0xe94] sm:$0xf0]  ;;  %v3594_v18 = vadd.f32 %v8216_v7, %v791_v2  ;;  %v6147_v49 = vor.u32 %v6897_v15, %v6146_v13 }
 0x1a1   : > { %3974 = vmatpush.bf16.msrb.mxu0 %v6067_v19  ;;  %3940 = vmatmul.bf16.vlgmr.msra.gmra.mxu1 %v7590_v36  ;;  %v6402_v29 = vld [vmem:[%s7270_s27 + $0xf88] sm:$0xf]  ;;  %v6961_v19 = vld [vmem:[%s7270_s27 + $0xf94] sm:$0xf0]  ;;  %v6275_v23 = vor.u32 %v6929_v16, %v6274_v25  ;;  %v3649_v6 = vpop.f32.mrf.mxu0 }
 0x1a2   : > { %3988 = vmatpush.bf16.msrb.mxu1 %v6195_v20  ;;  %3954 = vmatmul.bf16.vlgmr.msra.gmra.mxu2 %v7588_v35  ;;  %v6019_v20 = vor.u32 %v6865_v11, %v6018_v57  ;;  %v6002_v2 = vld [vmem:[%s7270_s27 + $0xc68] sm:$0xf]  ;;  %v6861_v7 = vld [vmem:[%s7270_s27 + $0xc74] sm:$0xf0] }
 0x1a3   : > { %4002 = vmatpush.bf16.msrb.mxu2 %v6323_v4  ;;  %3968 = vmatmul.bf16.vlgmr.msra.gmra.mxu3 %v7594_v40  ;;  %v3634_v4 = vadd.f32 %v8206_v37, %v3620_v5  ;;  %v6130_v24 = vld [vmem:[%s7270_s27 + $0xd68] sm:$0xf]  ;;  %v6893_v28 = vld [vmem:[%s7270_s27 + $0xd74] sm:$0xf0]  ;;  %v3608_v37 = vadd.f32 %v8221_v59, %v3594_v18 }
 0x1a4   : > { %4016 = vmatpush.bf16.msrb.mxu3 %v6451_v27  ;;  %v6403_v27 = vor.u32 %v6961_v19, %v6402_v29  ;;  %v6258_v51 = vld [vmem:[%s7270_s27 + $0xe68] sm:$0xf]  ;;  %v6925_v30 = vld [vmem:[%s7270_s27 + $0xe74] sm:$0xf0]  ;;  %v6131_v53 = vor.u32 %v6893_v28, %v6130_v24  ;;  %v8309_v29 = vpop.f32.mrf.mxu3 }
 0x1a5   : > { %3975 = vmatpush.bf16.msrb.mxu0 %v6051_v12  ;;  %v6386_v34 = vld [vmem:[%s7270_s27 + $0xf68] sm:$0xf]  ;;  %v6957_v12 = vld [vmem:[%s7270_s27 + $0xf74] sm:$0xf0]  ;;  %v6259_v54 = vor.u32 %v6925_v30, %v6258_v51  ;;  %v3622_v50 = vadd.f32 %v8240_v26, %v3608_v37  ;;  %v3677_v26 = vpop.f32.mrf.mxu2 }
 0x1a6   : > { %3989 = vmatpush.bf16.msrb.mxu1 %v6179_v52  ;;  %v6003_v52 = vor.u32 %v6861_v7, %v6002_v2  ;;  %v5986_v61 = vld [vmem:[%s7270_s27 + $0xc48] sm:$0xf]  ;;  %v6387_v60 = vor.u32 %v6957_v12, %v6386_v34  ;;  %v6889_v9 = vld [vmem:[%s7270_s27 + $0xd54] sm:$0xf0] }
 0x1a7   : > { %4003 = vmatpush.bf16.msrb.mxu2 %v6307_v3  ;;  %v3648_v3 = vadd.f32 %v3647_v42, %v3634_v4  ;;  %v6114_v59 = vld [vmem:[%s7270_s27 + $0xd48] sm:$0xf]  ;;  %v6921_v62 = vld [vmem:[%s7270_s27 + $0xe54] sm:$0xf0] }
 0x1a8   : > { %4017 = vmatpush.bf16.msrb.mxu3 %v6435_v56  ;;  %v6857_v56 = vld [vmem:[%s7270_s27 + $0xc54] sm:$0xf0]  ;;  %v6242_v63 = vld [vmem:[%s7270_s27 + $0xe48] sm:$0xf] }
 0x1a9   : > { %3976 = vmatpush.bf16.msrb.mxu0 %v6035_v0  ;;  %v6370_v0 = vld [vmem:[%s7270_s27 + $0xf48] sm:$0xf]  ;;  %v6953_v42 = vld [vmem:[%s7270_s27 + $0xf54] sm:$0xf0]  ;;  %v5987_v5 = vor.u32 %v6857_v56, %v5986_v61  ;;  %v6243_v57 = vor.u32 %v6921_v62, %v6242_v63  ;;  %v3703_v19 = vpop.f32.mrf.mxu0  ;;  %v4660_v56 = vld [vmem:[%s7270_s27 + $0x1f8] sm:$0xf0] }
 0x1aa   : > { %3990 = vmatpush.bf16.msrb.mxu1 %v6163_v45  ;;  %v3662_v45 = vadd.f32 %v8253_v55, %v3648_v3  ;;  %v5970_v11 = vld [vmem:[%s7270_s27 + $0xc28] sm:$0xf]  ;;  %v6853_v13 = vld [vmem:[%s7270_s27 + $0xc34] sm:$0xf0]  ;;  %v6371_v15 = vor.u32 %v6953_v42, %v6370_v0  ;;  %v3636_v55 = vadd.f32 %v8245_v33, %v3622_v50  ;;  %v6587_v50 = vld [vmem:[%s7270_s27 + $0x3ec] sm:$0xf] }
 0x1ab   : > { %4004 = vmatpush.bf16.msrb.mxu2 %v6291_v8  ;;  %v6115_v8 = vor.u32 %v6889_v9, %v6114_v59  ;;  %v6885_v25 = vld [vmem:[%s7270_s27 + $0xd34] sm:$0xf0]  ;;  %v6226_v16 = vld [vmem:[%s7270_s27 + $0xe28] sm:$0xf]  ;;  %v6555_v59 = vld [vmem:[%s7270_s27 + $0x2ec] sm:$0xf] }
 0x1ac   : > { %4018 = vmatpush.bf16.msrb.mxu3 %v6419_v14  ;;  %v6098_v14 = vld [vmem:[%s7270_s27 + $0xd28] sm:$0xf]  ;;  %v6917_v18 = vld [vmem:[%s7270_s27 + $0xe34] sm:$0xf0]  ;;  %v3676_v24 = vadd.f32 %v8276_v22, %v3662_v45  ;;  %v3650_v3 = vadd.f32 %v3649_v6, %v3636_v55  ;;  %v6491_v22 = vld [vmem:[%s7270_s27 + $0xec] sm:$0xf] }
 0x1ad   : > { %3977 = vmatpush.bf16.msrb.mxu0 %v6019_v20  ;;  %v6354_v20 = vld [vmem:[%s7270_s27 + $0xf28] sm:$0xf]  ;;  %v6949_v4 = vld [vmem:[%s7270_s27 + $0xf34] sm:$0xf0]  ;;  %v6099_v33 = vor.u32 %v6885_v25, %v6098_v14  ;;  %v4916_v6 = vld [vmem:[%s7270_s27 + $0x3f8] sm:$0xf0]  ;;  %v3731_v0 = vpop.f32.mrf.mxu2 }
 0x1ae   : > { %3991 = vmatpush.bf16.msrb.mxu1 %v6147_v49  ;;  %v3717_v49 = vpop.f32.mrf.mxu1  ;;  %v5954_v2 = vld [vmem:[%s7270_s27 + $0xc08] sm:$0xf]  ;;  %v6849_v7 = vld [vmem:[%s7270_s27 + $0xc14] sm:$0xf0]  ;;  %v6355_v37 = vor.u32 %v6949_v4, %v6354_v20  ;;  %v3690_v9 = vadd.f32 %v8279_v21, %v3676_v24  ;;  %v3664_v45 = vadd.f32 %v8290_v48, %v3650_v3  ;;  %v3745_v21 = vpop.f32.mrf.mxu3  ;;  %v4516_v14 = vld [vmem:[%s7270_s27 + $0xd8] sm:$0xf0]  ;;  %v4919_v25 = vor.u32 %v6587_v50, %v4916_v6 }
 0x1af   : > { %4005 = vmatpush.bf16.msrb.mxu2 %v6275_v23  ;;  %v5971_v23 = vor.u32 %v6853_v13, %v5970_v11  ;;  %v6082_v28 = vld [vmem:[%s7270_s27 + $0xd08] sm:$0xf]  ;;  %v6881_v51 = vld [vmem:[%s7270_s27 + $0xd14] sm:$0xf0]  ;;  %v5955_v61 = vor.u32 %v6849_v7, %v5954_v2  ;;  %v6487_v13 = vld [vmem:[%s7270_s27 + $0xcc] sm:$0xf] }
 0x1b0   : > { %4019 = vmatpush.bf16.msrb.mxu3 %v6403_v27  ;;  %v6227_v27 = vor.u32 %v6917_v18, %v6226_v16  ;;  %v6210_v30 = vld [vmem:[%s7270_s27 + $0xe08] sm:$0xf]  ;;  %v6913_v34 = vld [vmem:[%s7270_s27 + $0xe14] sm:$0xf0]  ;;  %v6083_v63 = vor.u32 %v6881_v51, %v6082_v28  ;;  %v4644_v16 = vld [vmem:[%s7270_s27 + $0x1d8] sm:$0xf0]  ;;  %v3678_v20 = vadd.f32 %v3677_v26, %v3664_v45  ;;  %v4519_v2 = vor.u32 %v6487_v13, %v4516_v14 }
 0x1b1   : > { %3978 = vmatpush.bf16.msrb.mxu0 %v6003_v52  ;;  %v6338_v12 = vld [vmem:[%s7270_s27 + $0xf08] sm:$0xf]  ;;  %v6945_v52 = vld [vmem:[%s7270_s27 + $0xf14] sm:$0xf0]  ;;  %v6211_v62 = vor.u32 %v6913_v34, %v6210_v30  ;;  %v6551_v18 = vld [vmem:[%s7270_s27 + $0x2cc] sm:$0xf]  ;;  %v3705_v4 = vpop.f32.mrf.mxu0 }
 0x1b2   : > { %3992 = vmatpush.bf16.msrb.mxu1 %v6131_v53  ;;  %v4532_v53 = vld [vmem:[%s7270_s27 + $0xf8] sm:$0xf0]  ;;  %v6339_v42 = vor.u32 %v6945_v52, %v6338_v12  ;;  %v6583_v48 = vld [vmem:[%s7270_s27 + $0x3cc] sm:$0xf] }
 0x1b3   : > { %4006 = vmatpush.bf16.msrb.mxu2 %v6259_v54  ;;  %v6523_v54 = vld [vmem:[%s7270_s27 + $0x1ec] sm:$0xf]  ;;  %v4772_v55 = vld [vmem:[%s7270_s27 + $0x2d8] sm:$0xf0] }
 0x1b4   : > { %4020 = vmatpush.bf16.msrb.mxu3 %v6387_v60  ;;  %v4788_v60 = vld [vmem:[%s7270_s27 + $0x2f8] sm:$0xf0]  ;;  %v4775_v26 = vor.u32 %v6551_v18, %v4772_v55  ;;  %v6515_v28 = vld [vmem:[%s7270_s27 + $0x1ac] sm:$0xf] }
 0x1b5   : > { %3979 = vmatpush.bf16.msrb.mxu0 %v5987_v5  ;;  %v4535_v5 = vor.u32 %v6491_v22, %v4532_v53  ;;  %v4791_v11 = vor.u32 %v6555_v59, %v4788_v60  ;;  %v4628_v30 = vld [vmem:[%s7270_s27 + $0x1b8] sm:$0xf0]  ;;  %v6579_v52 = vld [vmem:[%s7270_s27 + $0x3ac] sm:$0xf] }
 0x1b6   : > { %3993 = vmatpush.bf16.msrb.mxu1 %v6115_v8  ;;  %v3704_v8 = vadd.f32 %v3703_v19, %v3690_v9  ;;  %v4900_v19 = vld [vmem:[%s7270_s27 + $0x3d8] sm:$0xf0]  ;;  %v6479_v53 = vld [vmem:[%s7270_s27 + $0x8c] sm:$0xf]  ;;  %v3733_v9 = vpop.f32.mrf.mxu2 }
 0x1b7   : > { %4007 = vmatpush.bf16.msrb.mxu2 %v6243_v57  ;;  %v4663_v57 = vor.u32 %v6523_v54, %v4660_v56  ;;  %v4903_v51 = vor.u32 %v6583_v48, %v4900_v19  ;;  %v4756_v34 = vld [vmem:[%s7270_s27 + $0x2b8] sm:$0xf0]  ;;  %v6511_v59 = vld [vmem:[%s7270_s27 + $0x18c] sm:$0xf] }
 0x1b8   : > { %4021 = vmatpush.bf16.msrb.mxu3 %v6371_v15  ;;  %v6519_v15 = vld [vmem:[%s7270_s27 + $0x1cc] sm:$0xf]  ;;  %v3718_v7 = vadd.f32 %v3717_v49, %v3704_v8  ;;  %v3692_v49 = vadd.f32 %v8309_v29, %v3678_v20  ;;  %v4884_v3 = vld [vmem:[%s7270_s27 + $0x3b8] sm:$0xf0]  ;;  %v4631_v29 = vor.u32 %v6515_v28, %v4628_v30 }
 0x1b9   : > { %3980 = vmatpush.bf16.msrb.mxu0 %v5971_v23  ;;  %v3719_v23 = vpop.f32.mrf.mxu1  ;;  %v4647_v24 = vor.u32 %v6519_v15, %v4644_v16  ;;  %v4484_v56 = vld [vmem:[%s7270_s27 + $0x98] sm:$0xf0]  ;;  %v6475_v15 = vld [vmem:[%s7270_s27 + $0x6c] sm:$0xf] }
 0x1ba   : > { %3994 = vmatpush.bf16.msrb.mxu1 %v6099_v33  ;;  %v6483_v33 = vld [vmem:[%s7270_s27 + $0xac] sm:$0xf]  ;;  %v3732_v12 = vadd.f32 %v3731_v0, %v3718_v7  ;;  %v3706_v54 = vadd.f32 %v3705_v4, %v3692_v49  ;;  %v4612_v60 = vld [vmem:[%s7270_s27 + $0x198] sm:$0xf0]  ;;  %v3747_v0 = vpop.f32.mrf.mxu3  ;;  %v4487_v8 = vor.u32 %v6479_v53, %v4484_v56 }
 0x1bb   : > { %4008 = vmatpush.bf16.msrb.mxu2 %v6227_v27  ;;  %v4500_v27 = vld [vmem:[%s7270_s27 + $0xb8] sm:$0xf0]  ;;  %v6507_v16 = vld [vmem:[%s7270_s27 + $0x16c] sm:$0xf] }
 0x1bc   : > { %4022 = vmatpush.bf16.msrb.mxu3 %v6355_v37  ;;  %v6547_v37 = vld [vmem:[%s7270_s27 + $0x2ac] sm:$0xf]  ;;  %v4503_v22 = vor.u32 %v6483_v33, %v4500_v27  ;;  %v4740_v50 = vld [vmem:[%s7270_s27 + $0x298] sm:$0xf0]  ;;  %v3746_v6 = vadd.f32 %v3745_v21, %v3732_v12  ;;  %v3720_v13 = vadd.f32 %v3719_v23, %v3706_v54 }
 0x1bd   : > { %3981 = vmatpush.bf16.msrb.mxu0 %v5955_v61  ;;  %v4759_v61 = vor.u32 %v6547_v37, %v4756_v34  ;;  %v4868_v45 = vld [vmem:[%s7270_s27 + $0x398] sm:$0xf0]  ;;  %v6539_v20 = vld [vmem:[%s7270_s27 + $0x26c] sm:$0xf] }
 0x1be   : > { %3995 = vmatpush.bf16.msrb.mxu1 %v6083_v63  ;;  %v4887_v63 = vor.u32 %v6579_v52, %v4884_v3  ;;  %v4596_v55 = vld [vmem:[%s7270_s27 + $0x178] sm:$0xf0]  ;;  %v3734_v48 = vadd.f32 %v3733_v9, %v3720_v13  ;;  %v6571_v19 = vld [vmem:[%s7270_s27 + $0x36c] sm:$0xf] }
 0x1bf   : > { %4009 = vmatpush.bf16.msrb.mxu2 %v6211_v62  ;;  %v6543_v62 = vld [vmem:[%s7270_s27 + $0x28c] sm:$0xf]  ;;  %v4724_v4 = vld [vmem:[%s7270_s27 + $0x278] sm:$0xf0] }
 0x1c0   : > { %4023 = vmatpush.bf16.msrb.mxu3 %v6339_v42  ;;  %3982 = vmatmul.bf16.vlgmr.msrb.gmra.mxu0 %v7683_v32  ;;  %v3759_v42 = vpop.f32.mrf.mxu0  ;;  %v4743_v21 = vor.u32 %v6543_v62, %v4740_v50  ;;  %v4852_v23 = vld [vmem:[%s7270_s27 + $0x378] sm:$0xf0]  ;;  %v6471_v7 = vld [vmem:[%s7270_s27 + $0x4c] sm:$0xf]  ;;  %v4727_v33 = vor.u32 %v6539_v20, %v4724_v4  ;;  %v3748_v12 = vadd.f32 %v3747_v0, %v3734_v48 }
 0x1c1   : > { %4030 = vmatpush.bf16.msra.mxu0 %v4535_v5  ;;  %3996 = vmatmul.bf16.vlgmr.msrb.gmra.mxu1 %v7690_v41  ;;  %v6575_v5 = vld [vmem:[%s7270_s27 + $0x38c] sm:$0xf]  ;;  %v3760_v14 = vadd.f32 %v3759_v42, %v3746_v6  ;;  %v4452_v27 = vld [vmem:[%s7270_s27 + $0x58] sm:$0xf0]  ;;  %v4855_v30 = vor.u32 %v6571_v19, %v4852_v23 }
 0x1c2   : > { %4044 = vmatpush.bf16.msra.mxu1 %v4663_v57  ;;  %4010 = vmatmul.bf16.vlgmr.msrb.gmra.mxu2 %v7688_v38  ;;  %v4615_v57 = vor.u32 %v6511_v59, %v4612_v60  ;;  %v4871_v18 = vor.u32 %v6575_v5, %v4868_v45  ;;  %v6503_v28 = vld [vmem:[%s7270_s27 + $0x14c] sm:$0xf]  ;;  %v4708_v49 = vld [vmem:[%s7270_s27 + $0x258] sm:$0xf0] }
 0x1c3   : > { %4058 = vmatpush.bf16.msra.mxu2 %v4791_v11  ;;  %4024 = vmatmul.bf16.vlgmr.msrb.gmra.mxu3 %v7694_v46  ;;  %v3773_v11 = vpop.f32.mrf.mxu1  ;;  %v6535_v34 = vld [vmem:[%s7270_s27 + $0x24c] sm:$0xf]  ;;  %v4836_v54 = vld [vmem:[%s7270_s27 + $0x358] sm:$0xf0] }
 0x1c4   : > { %4072 = vmatpush.bf16.msra.mxu3 %v4919_v25  ;;  %v4468_v25 = vld [vmem:[%s7270_s27 + $0x78] sm:$0xf0]  ;;  %v6567_v53 = vld [vmem:[%s7270_s27 + $0x34c] sm:$0xf]  ;;  %v4711_v60 = vor.u32 %v6535_v34, %v4708_v49 }
 0x1c5   : > { %4031 = vmatpush.bf16.msra.mxu0 %v4519_v2  ;;  %v4471_v2 = vor.u32 %v6475_v15, %v4468_v25  ;;  %v3787_v37 = vpop.f32.mrf.mxu2  ;;  %v6467_v9 = vld [vmem:[%s7270_s27 + $0x2c] sm:$0xf]  ;;  %v4839_v50 = vor.u32 %v6567_v53, %v4836_v54  ;;  %v4564_v0 = vld [vmem:[%s7270_s27 + $0x138] sm:$0xf0] }
 0x1c6   : > { %4045 = vmatpush.bf16.msra.mxu1 %v4647_v24  ;;  %v3774_v24 = vadd.f32 %v3773_v11, %v3760_v14  ;;  %v6499_v62 = vld [vmem:[%s7270_s27 + $0x12c] sm:$0xf]  ;;  %v4692_v5 = vld [vmem:[%s7270_s27 + $0x238] sm:$0xf0] }
 0x1c7   : > { %4059 = vmatpush.bf16.msra.mxu2 %v4775_v26  ;;  %v4599_v26 = vor.u32 %v6507_v16, %v4596_v55  ;;  %v6531_v42 = vld [vmem:[%s7270_s27 + $0x22c] sm:$0xf]  ;;  %v4420_v13 = vld [vmem:[%s7270_s27 + $0x18] sm:$0xf0] }
 0x1c8   : > { %4073 = vmatpush.bf16.msra.mxu3 %v4903_v51  ;;  %v4580_v51 = vld [vmem:[%s7270_s27 + $0x158] sm:$0xf0]  ;;  %v3788_v52 = vadd.f32 %v3787_v37, %v3774_v24  ;;  %v3761_v3 = vpop.f32.mrf.mxu0  ;;  %v6563_v45 = vld [vmem:[%s7270_s27 + $0x32c] sm:$0xf]  ;;  %v4695_v15 = vor.u32 %v6531_v42, %v4692_v5 }
 0x1c9   : > { %4032 = vmatpush.bf16.msra.mxu0 %v4503_v22  ;;  %v3801_v22 = vpop.f32.mrf.mxu3  ;;  %v3762_v56 = vadd.f32 %v3761_v3, %v3748_v12  ;;  %v6463_v11 = vld [vmem:[%s7270_s27 + $0xc] sm:$0xf]  ;;  %v4548_v16 = vld [vmem:[%s7270_s27 + $0x118] sm:$0xf0] }
 0x1ca   : > { %4046 = vmatpush.bf16.msra.mxu1 %v4631_v29  ;;  %v4455_v29 = vor.u32 %v6471_v7, %v4452_v27  ;;  %v3802_v59 = vadd.f32 %v3801_v22, %v3788_v52  ;;  %v6495_v25 = vld [vmem:[%s7270_s27 + $0x10c] sm:$0xf]  ;;  %v4676_v4 = vld [vmem:[%s7270_s27 + $0x218] sm:$0xf0] }
 0x1cb   : > { %4060 = vmatpush.bf16.msra.mxu2 %v4759_v61  ;;  %v4583_v61 = vor.u32 %v6503_v28, %v4580_v51  ;;  %v3775_v6 = vpop.f32.mrf.mxu1  ;;  %v6559_v48 = vld [vmem:[%s7270_s27 + $0x30c] sm:$0xf]  ;;  %v4804_v19 = vld [vmem:[%s7270_s27 + $0x318] sm:$0xf0]  ;;  %v4551_v34 = vor.u32 %v6495_v25, %v4548_v16 }
 0x1cc   : > { %4074 = vmatpush.bf16.msra.mxu3 %v4887_v63  ;;  %v4436_v63 = vld [vmem:[%s7270_s27 + $0x38] sm:$0xf0]  ;;  %7025 = vtanh.f32 %v3802_v59  ;;  %v3776_v14 = vadd.f32 %v3775_v6, %v3762_v56  ;;  %v6619_v7 = vld [vmem:[%s7270_s27 + $0x4ec] sm:$0xf]  ;;  %v4807_v3 = vor.u32 %v6559_v48, %v4804_v19 }
 0x1cd   : > { %4033 = vmatpush.bf16.msra.mxu0 %v4487_v8  ;;  %v4820_v8 = vld [vmem:[%s7270_s27 + $0x338] sm:$0xf0]  ;;  %v3789_v20 = vpop.f32.mrf.mxu2  ;;  %v6683_v28 = vld [vmem:[%s7270_s27 + $0x6ec] sm:$0xf] }
 0x1ce   : > { %4047 = vmatpush.bf16.msra.mxu1 %v4615_v57  ;;  %v4439_v57 = vor.u32 %v6467_v9, %v4436_v63  ;;  %v4823_v55 = vor.u32 %v6563_v45, %v4820_v8  ;;  %v3790_v23 = vadd.f32 %v3789_v20, %v3776_v14  ;;  %v5044_v24 = vld [vmem:[%s7270_s27 + $0x4f8] sm:$0xf0]  ;;  %v6715_v12 = vld [vmem:[%s7270_s27 + $0x7ec] sm:$0xf] }
 0x1cf   : > { %4061 = vmatpush.bf16.msra.mxu2 %v4743_v21  ;;  %v4567_v21 = vor.u32 %v6499_v62, %v4564_v0  ;;  %v5172_v27 = vld [vmem:[%s7270_s27 + $0x5f8] sm:$0xf0]  ;;  %v5047_v22 = vor.u32 %v6619_v7, %v5044_v24  ;;  %v6647_v56 = vld [vmem:[%s7270_s27 + $0x5cc] sm:$0xf] }
 0x1d0   : > { %4075 = vmatpush.bf16.msra.mxu3 %v4871_v18  ;;  %v6527_v18 = vld [vmem:[%s7270_s27 + $0x20c] sm:$0xf]  ;;  %v5300_v51 = vld [vmem:[%s7270_s27 + $0x6f8] sm:$0xf0] }
 0x1d1   : > { %4034 = vmatpush.bf16.msra.mxu0 %v4471_v2  ;;  %v3803_v2 = vpop.f32.mrf.mxu3  ;;  %v4679_v49 = vor.u32 %v6527_v18, %v4676_v4  ;;  %v5428_v52 = vld [vmem:[%s7270_s27 + $0x7f8] sm:$0xf0]  ;;  %v5303_v54 = vor.u32 %v6683_v28, %v5300_v51  ;;  %v6679_v9 = vld [vmem:[%s7270_s27 + $0x6cc] sm:$0xf] }
 0x1d2   : > { %4048 = vmatpush.bf16.msra.mxu1 %v4599_v26  ;;  %v6651_v26 = vld [vmem:[%s7270_s27 + $0x5ec] sm:$0xf]  ;;  %v3804_v37 = vadd.f32 %v3803_v2, %v3790_v23  ;;  %v5431_v59 = vor.u32 %v6715_v12, %v5428_v52  ;;  %v5284_v63 = vld [vmem:[%s7270_s27 + $0x6d8] sm:$0xf0] }
 0x1d3   : > { %4062 = vmatpush.bf16.msra.mxu2 %v4727_v33  ;;  %v4423_v33 = vor.u32 %v6463_v11, %v4420_v13  ;;  %v5175_v53 = vor.u32 %v6651_v26, %v5172_v27  ;;  %v6711_v62 = vld [vmem:[%s7270_s27 + $0x7cc] sm:$0xf]  ;;  %v5287_v42 = vor.u32 %v6679_v9, %v5284_v63  ;;  %v5012_v45 = vld [vmem:[%s7270_s27 + $0x4b8] sm:$0xf0] }
 0x1d4   : > { %4076 = vmatpush.bf16.msra.mxu3 %v4855_v30  ;;  %v7026_v30 = vpop.eup %7025  ;;  %7027 = vtanh.f32 %v3804_v37  ;;  %v6611_v5 = vld [vmem:[%s7270_s27 + $0x4ac] sm:$0xf]  ;;  %v5140_v11 = vld [vmem:[%s7270_s27 + $0x5b8] sm:$0xf0] }
 0x1d5   : > { %4035 = vmatpush.bf16.msra.mxu0 %v4455_v29  ;;  %4263 = vst [vmem:[%s8078_s18 + $0x8] sm:$0xff] %v7026_v30  ;;  %v6615_v29 = vld [vmem:[%s7270_s27 + $0x4cc] sm:$0xf]  ;;  %v5268_v14 = vld [vmem:[%s7270_s27 + $0x6b8] sm:$0xf0]  ;;  %v5015_v16 = vor.u32 %v6611_v5, %v5012_v45 }
 0x1d6   : > { %4049 = vmatpush.bf16.msra.mxu1 %v4583_v61  ;;  %v5028_v61 = vld [vmem:[%s7270_s27 + $0x4d8] sm:$0xf0]  ;;  %v6643_v8 = vld [vmem:[%s7270_s27 + $0x5ac] sm:$0xf] }
 0x1d7   : > { %4063 = vmatpush.bf16.msra.mxu2 %v4711_v60  ;;  %v5156_v60 = vld [vmem:[%s7270_s27 + $0x5d8] sm:$0xf0]  ;;  %v5031_v6 = vor.u32 %v6615_v29, %v5028_v61  ;;  %v6675_v13 = vld [vmem:[%s7270_s27 + $0x6ac] sm:$0xf] }
 0x1d8   : > { %4077 = vmatpush.bf16.msra.mxu3 %v4839_v50  ;;  %v5412_v50 = vld [vmem:[%s7270_s27 + $0x7d8] sm:$0xf0]  ;;  %v5159_v0 = vor.u32 %v6647_v56, %v5156_v60  ;;  %v5271_v18 = vor.u32 %v6675_v13, %v5268_v14  ;;  %v6671_v48 = vld [vmem:[%s7270_s27 + $0x68c] sm:$0xf] }
 0x1d9   : > { %4036 = vmatpush.bf16.msra.mxu0 %v4439_v57  ;;  %v5415_v57 = vor.u32 %v6711_v62, %v5412_v50  ;;  %v5396_v25 = vld [vmem:[%s7270_s27 + $0x7b8] sm:$0xf0]  ;;  %v6703_v23 = vld [vmem:[%s7270_s27 + $0x78c] sm:$0xf] }
 0x1da   : > { %4050 = vmatpush.bf16.msra.mxu1 %v4567_v21  ;;  %v7028_v21 = vpop.eup %7027  ;;  %v4996_v20 = vld [vmem:[%s7270_s27 + $0x498] sm:$0xf0]  ;;  %v6603_v26 = vld [vmem:[%s7270_s27 + $0x46c] sm:$0xf] }
 0x1db   : > { %4064 = vmatpush.bf16.msra.mxu2 %v4695_v15  ;;  %v6707_v15 = vld [vmem:[%s7270_s27 + $0x7ac] sm:$0xf]  ;;  %4267 = vst [vmem:[%s8078_s18 + $0x28] sm:$0xff] %v7028_v21  ;;  %v5124_v4 = vld [vmem:[%s7270_s27 + $0x598] sm:$0xf0] }
 0x1dc   : > { %4078 = vmatpush.bf16.msra.mxu3 %v4823_v55  ;;  %v6607_v55 = vld [vmem:[%s7270_s27 + $0x48c] sm:$0xf]  ;;  %v5252_v19 = vld [vmem:[%s7270_s27 + $0x698] sm:$0xf0] }
 0x1dd   : > { %4037 = vmatpush.bf16.msra.mxu0 %v4423_v33  ;;  %v4999_v2 = vor.u32 %v6607_v55, %v4996_v20  ;;  %v5255_v24 = vor.u32 %v6671_v48, %v5252_v19  ;;  %v4980_v33 = vld [vmem:[%s7270_s27 + $0x478] sm:$0xf0]  ;;  %v6635_v27 = vld [vmem:[%s7270_s27 + $0x56c] sm:$0xf] }
 0x1de   : > { %4051 = vmatpush.bf16.msra.mxu1 %v4551_v34  ;;  %v5108_v51 = vld [vmem:[%s7270_s27 + $0x578] sm:$0xf0]  ;;  %v6667_v30 = vld [vmem:[%s7270_s27 + $0x66c] sm:$0xf]  ;;  %v4983_v12 = vor.u32 %v6603_v26, %v4980_v33 }
 0x1df   : > { %4065 = vmatpush.bf16.msra.mxu2 %v4679_v49  ;;  %v5236_v37 = vld [vmem:[%s7270_s27 + $0x678] sm:$0xf0]  ;;  %v6699_v34 = vld [vmem:[%s7270_s27 + $0x76c] sm:$0xf]  ;;  %v5111_v52 = vor.u32 %v6635_v27, %v5108_v51 }
 0x1e0   : > { %4079 = vmatpush.bf16.msra.mxu3 %v4807_v3  ;;  %4038 = vmatmul.bf16.vlgmr.msra.gmra.mxu0 %v7375_v58  ;;  %v5143_v58 = vor.u32 %v6643_v8, %v5140_v11  ;;  %v5364_v49 = vld [vmem:[%s7270_s27 + $0x778] sm:$0xf0]  ;;  %v5239_v3 = vor.u32 %v6667_v30, %v5236_v37  ;;  %v6663_v56 = vld [vmem:[%s7270_s27 + $0x64c] sm:$0xf] }
 0x1e1   : > { %4086 = vmatpush.bf16.msrb.mxu0 %v5047_v22  ;;  %4052 = vmatmul.bf16.vlgmr.msra.gmra.mxu1 %v7399_v10  ;;  %v5399_v10 = vor.u32 %v6707_v15, %v5396_v25  ;;  %v6599_v22 = vld [vmem:[%s7270_s27 + $0x44c] sm:$0xf]  ;;  %v5367_v29 = vor.u32 %v6699_v34, %v5364_v49  ;;  %v5092_v61 = vld [vmem:[%s7270_s27 + $0x558] sm:$0xf0] }
 0x1e2   : > { %4100 = vmatpush.bf16.msrb.mxu1 %v5175_v53  ;;  %4066 = vmatmul.bf16.vlgmr.msra.gmra.mxu2 %v7383_v1  ;;  %v6639_v1 = vld [vmem:[%s7270_s27 + $0x58c] sm:$0xf]  ;;  %v4964_v53 = vld [vmem:[%s7270_s27 + $0x458] sm:$0xf0] }
 0x1e3   : > { %4114 = vmatpush.bf16.msrb.mxu2 %v5303_v54  ;;  %4080 = vmatmul.bf16.vlgmr.msra.gmra.mxu3 %v7407_v17  ;;  %v5380_v17 = vld [vmem:[%s7270_s27 + $0x798] sm:$0xf0]  ;;  %v5127_v7 = vor.u32 %v6639_v1, %v5124_v4  ;;  %v6631_v54 = vld [vmem:[%s7270_s27 + $0x54c] sm:$0xf]  ;;  %v4967_v63 = vor.u32 %v6599_v22, %v4964_v53 }
 0x1e4   : > { %4128 = vmatpush.bf16.msrb.mxu3 %v5431_v59  ;;  %v5383_v28 = vor.u32 %v6703_v23, %v5380_v17  ;;  %v5220_v59 = vld [vmem:[%s7270_s27 + $0x658] sm:$0xf0]  ;;  %v6695_v60 = vld [vmem:[%s7270_s27 + $0x74c] sm:$0xf]  ;;  %v5095_v62 = vor.u32 %v6631_v54, %v5092_v61 }
 0x1e5   : > { %4087 = vmatpush.bf16.msrb.mxu0 %v5031_v6  ;;  %v5348_v9 = vld [vmem:[%s7270_s27 + $0x758] sm:$0xf0]  ;;  %v5223_v50 = vor.u32 %v6663_v56, %v5220_v59  ;;  %v6595_v6 = vld [vmem:[%s7270_s27 + $0x42c] sm:$0xf] }
 0x1e6   : > { %4101 = vmatpush.bf16.msrb.mxu1 %v5159_v0  ;;  %v4948_v0 = vld [vmem:[%s7270_s27 + $0x438] sm:$0xf0]  ;;  %v5351_v5 = vor.u32 %v6695_v60, %v5348_v9  ;;  %v6659_v8 = vld [vmem:[%s7270_s27 + $0x62c] sm:$0xf] }
 0x1e7   : > { %4115 = vmatpush.bf16.msrb.mxu2 %v5287_v42  ;;  %v6627_v42 = vld [vmem:[%s7270_s27 + $0x52c] sm:$0xf]  ;;  %v5076_v45 = vld [vmem:[%s7270_s27 + $0x538] sm:$0xf0]  ;;  %v4951_v14 = vor.u32 %v6595_v6, %v4948_v0 }
 0x1e8   : > { %4129 = vmatpush.bf16.msrb.mxu3 %v5415_v57  ;;  %v5204_v57 = vld [vmem:[%s7270_s27 + $0x638] sm:$0xf0]  ;;  %v6691_v11 = vld [vmem:[%s7270_s27 + $0x72c] sm:$0xf]  ;;  %v5079_v25 = vor.u32 %v6627_v42, %v5076_v45 }
 0x1e9   : > { %4088 = vmatpush.bf16.msrb.mxu0 %v5015_v16  ;;  %v5332_v13 = vld [vmem:[%s7270_s27 + $0x738] sm:$0xf0]  ;;  %v6591_v21 = vld [vmem:[%s7270_s27 + $0x40c] sm:$0xf]  ;;  %v5207_v16 = vor.u32 %v6659_v8, %v5204_v57 }
 0x1ea   : > { %4102 = vmatpush.bf16.msrb.mxu1 %v5143_v58  ;;  %v4932_v15 = vld [vmem:[%s7270_s27 + $0x418] sm:$0xf0]  ;;  %v6623_v58 = vld [vmem:[%s7270_s27 + $0x50c] sm:$0xf]  ;;  %v5335_v20 = vor.u32 %v6691_v11, %v5332_v13 }
 0x1eb   : > { %4116 = vmatpush.bf16.msrb.mxu2 %v5271_v18  ;;  %v5060_v18 = vld [vmem:[%s7270_s27 + $0x518] sm:$0xf0]  ;;  %v6655_v55 = vld [vmem:[%s7270_s27 + $0x60c] sm:$0xf]  ;;  %v4935_v17 = vor.u32 %v6591_v21, %v4932_v15 }
 0x1ec   : > { %4130 = vmatpush.bf16.msrb.mxu3 %v5399_v10  ;;  %v5188_v1 = vld [vmem:[%s7270_s27 + $0x618] sm:$0xf0]  ;;  %v6687_v10 = vld [vmem:[%s7270_s27 + $0x70c] sm:$0xf]  ;;  %v5063_v26 = vor.u32 %v6623_v58, %v5060_v18 }
 0x1ed   : > { %4089 = vmatpush.bf16.msrb.mxu0 %v4999_v2  ;;  %v5316_v4 = vld [vmem:[%s7270_s27 + $0x718] sm:$0xf0]  ;;  %v6747_v48 = vld [vmem:[%s7270_s27 + $0x8ec] sm:$0xf]  ;;  %v5191_v33 = vor.u32 %v6655_v55, %v5188_v1 }
 0x1ee   : > { %4103 = vmatpush.bf16.msrb.mxu1 %v5127_v7  ;;  %v5556_v19 = vld [vmem:[%s7270_s27 + $0x8f8] sm:$0xf0]  ;;  %v6779_v23 = vld [vmem:[%s7270_s27 + $0x9ec] sm:$0xf]  ;;  %v5319_v51 = vor.u32 %v6687_v10, %v5316_v4 }
 0x1ef   : > { %4117 = vmatpush.bf16.msrb.mxu2 %v5255_v24  ;;  %v5684_v2 = vld [vmem:[%s7270_s27 + $0x9f8] sm:$0xf0]  ;;  %v6811_v7 = vld [vmem:[%s7270_s27 + $0xaec] sm:$0xf]  ;;  %v5559_v30 = vor.u32 %v6747_v48, %v5556_v19 }
 0x1f0   : > { %4131 = vmatpush.bf16.msrb.mxu3 %v5383_v28  ;;  %v5812_v24 = vld [vmem:[%s7270_s27 + $0xaf8] sm:$0xf0]  ;;  %v6843_v27 = vld [vmem:[%s7270_s27 + $0xbec] sm:$0xf]  ;;  %v5687_v37 = vor.u32 %v6779_v23, %v5684_v2  ;;  %v8505_v23 = vpop.f32.mrf.mxu0 }
 0x1f1   : > { %4090 = vmatpush.bf16.msrb.mxu0 %v4983_v12  ;;  %v5940_v28 = vld [vmem:[%s7270_s27 + $0xbf8] sm:$0xf0]  ;;  %v5815_v34 = vor.u32 %v6811_v7, %v5812_v24  ;;  %v6743_v49 = vld [vmem:[%s7270_s27 + $0x8cc] sm:$0xf]  ;;  %v8509_v7 = vpop.f32.mrf.mxu1 }
 0x1f2   : > { %4104 = vmatpush.bf16.msrb.mxu1 %v5111_v52  ;;  %v5540_v12 = vld [vmem:[%s7270_s27 + $0x8d8] sm:$0xf0]  ;;  %v6775_v52 = vld [vmem:[%s7270_s27 + $0x9cc] sm:$0xf] }
 0x1f3   : > { %4118 = vmatpush.bf16.msrb.mxu2 %v5239_v3  ;;  %v5943_v3 = vor.u32 %v6843_v27, %v5940_v28  ;;  %v5668_v22 = vld [vmem:[%s7270_s27 + $0x9d8] sm:$0xf0]  ;;  %v6807_v53 = vld [vmem:[%s7270_s27 + $0xacc] sm:$0xf]  ;;  %v5543_v56 = vor.u32 %v6743_v49, %v5540_v12 }
 0x1f4   : > { %4132 = vmatpush.bf16.msrb.mxu3 %v5367_v29  ;;  %v5796_v54 = vld [vmem:[%s7270_s27 + $0xad8] sm:$0xf0]  ;;  %v6839_v29 = vld [vmem:[%s7270_s27 + $0xbcc] sm:$0xf]  ;;  %v5671_v59 = vor.u32 %v6775_v52, %v5668_v22 }
 0x1f5   : > { %4091 = vmatpush.bf16.msrb.mxu0 %v4967_v63  ;;  %v5924_v61 = vld [vmem:[%s7270_s27 + $0xbd8] sm:$0xf0]  ;;  %v5799_v60 = vor.u32 %v6807_v53, %v5796_v54  ;;  %v6739_v9 = vld [vmem:[%s7270_s27 + $0x8ac] sm:$0xf] }
 0x1f6   : > { %4105 = vmatpush.bf16.msrb.mxu1 %v5095_v62  ;;  %v5524_v63 = vld [vmem:[%s7270_s27 + $0x8b8] sm:$0xf0]  ;;  %v6771_v62 = vld [vmem:[%s7270_s27 + $0x9ac] sm:$0xf] }
 0x1f7   : > { %4119 = vmatpush.bf16.msrb.mxu2 %v5223_v50  ;;  %v5927_v50 = vor.u32 %v6839_v29, %v5924_v61  ;;  %v5652_v6 = vld [vmem:[%s7270_s27 + $0x9b8] sm:$0xf0]  ;;  %v6803_v0 = vld [vmem:[%s7270_s27 + $0xaac] sm:$0xf] }
 0x1f8   : > { %4133 = vmatpush.bf16.msrb.mxu3 %v5351_v5  ;;  %v5780_v42 = vld [vmem:[%s7270_s27 + $0xab8] sm:$0xf0]  ;;  %v6835_v5 = vld [vmem:[%s7270_s27 + $0xbac] sm:$0xf]  ;;  %v5655_v8 = vor.u32 %v6771_v62, %v5652_v6  ;;  %v8527_v62 = vpop.f32.mrf.mxu3 }
 0x1f9   : > { %4092 = vmatpush.bf16.msrb.mxu0 %v4951_v14  ;;  %v5908_v45 = vld [vmem:[%s7270_s27 + $0xbb8] sm:$0xf0]  ;;  %v5783_v57 = vor.u32 %v6803_v0, %v5780_v42  ;;  %v6735_v11 = vld [vmem:[%s7270_s27 + $0x88c] sm:$0xf]  ;;  %v8532_v0 = vld [vmem:[%s7278_s29] sm:$0xf] }
 0x1fa   : > { %4106 = vmatpush.bf16.msrb.mxu1 %v5079_v25  ;;  %v6767_v13 = vld [vmem:[%s7270_s27 + $0x98c] sm:$0xf]  ;;  %v5636_v14 = vld [vmem:[%s7270_s27 + $0x998] sm:$0xf0]  ;;  %v792_v42 = vperm.slane %v8532_v0, 2 }
 0x1fb   : > { %4120 = vmatpush.bf16.msrb.mxu2 %v5207_v16  ;;  %v6799_v21 = vld [vmem:[%s7270_s27 + $0xa8c] sm:$0xf]  ;;  %v5892_v25 = vld [vmem:[%s7270_s27 + $0xb98] sm:$0xf0]  ;;  %v5639_v58 = vor.u32 %v6767_v13, %v5636_v14  ;;  %v8542_v14 = vpop.f32.mrf.mxu1 }
 0x1fc   : > { %4134 = vmatpush.bf16.msrb.mxu3 %v5335_v20  ;;  %v6831_v15 = vld [vmem:[%s7270_s27 + $0xb8c] sm:$0xf]  ;;  %v5492_v20 = vld [vmem:[%s7270_s27 + $0x878] sm:$0xf0] }
 0x1fd   : > { %4093 = vmatpush.bf16.msrb.mxu0 %v4935_v17  ;;  %v6731_v55 = vld [vmem:[%s7270_s27 + $0x86c] sm:$0xf]  ;;  %v5895_v10 = vor.u32 %v6831_v15, %v5892_v25  ;;  %v5620_v4 = vld [vmem:[%s7270_s27 + $0x978] sm:$0xf0] }
 0x1fe   : > { %4107 = vmatpush.bf16.msrb.mxu1 %v5063_v26  ;;  %v6763_v1 = vld [vmem:[%s7270_s27 + $0x96c] sm:$0xf]  ;;  %v5748_v19 = vld [vmem:[%s7270_s27 + $0xa78] sm:$0xf0]  ;;  %v5495_v24 = vor.u32 %v6731_v55, %v5492_v20 }
 0x1ff   : > { %4121 = vmatpush.bf16.msrb.mxu2 %v5191_v33  ;;  %v6795_v48 = vld [vmem:[%s7270_s27 + $0xa6c] sm:$0xf]  ;;  %v5876_v2 = vld [vmem:[%s7270_s27 + $0xb78] sm:$0xf0]  ;;  %v5623_v26 = vor.u32 %v6763_v1, %v5620_v4 }
 0x200   : > { %4135 = vmatpush.bf16.msrb.mxu3 %v5319_v51  ;;  %4094 = vmatmul.bf16.vlgmr.msrb.gmra.mxu0 %v7483_v39  ;;  %v5527_v39 = vor.u32 %v6739_v9, %v5524_v63  ;;  %v6827_v17 = vld [vmem:[%s7270_s27 + $0xb6c] sm:$0xf]  ;;  %v5751_v33 = vor.u32 %v6795_v48, %v5748_v19  ;;  %v5476_v28 = vld [vmem:[%s7270_s27 + $0x858] sm:$0xf0] }
 0x201   : > { %4142 = vmatpush.bf16.msra.mxu0 %v5559_v30  ;;  %4108 = vmatmul.bf16.vlgmr.msrb.gmra.mxu1 %v7490_v44  ;;  %v5911_v44 = vor.u32 %v6835_v5, %v5908_v45  ;;  %v6727_v27 = vld [vmem:[%s7270_s27 + $0x84c] sm:$0xf]  ;;  %v5879_v30 = vor.u32 %v6827_v17, %v5876_v2  ;;  %v5732_v49 = vld [vmem:[%s7270_s27 + $0xa58] sm:$0xf0] }
 0x202   : > { %4156 = vmatpush.bf16.msra.mxu1 %v5687_v37  ;;  %4122 = vmatmul.bf16.vlgmr.msrb.gmra.mxu2 %v7488_v43  ;;  %v5508_v43 = vld [vmem:[%s7270_s27 + $0x898] sm:$0xf0]  ;;  %v6759_v51 = vld [vmem:[%s7270_s27 + $0x94c] sm:$0xf] }
 0x203   : > { %4170 = vmatpush.bf16.msra.mxu2 %v5815_v34  ;;  %4136 = vmatmul.bf16.vlgmr.msrb.gmra.mxu3 %v7494_v47  ;;  %v5764_v47 = vld [vmem:[%s7270_s27 + $0xa98] sm:$0xf0]  ;;  %v5511_v16 = vor.u32 %v6735_v11, %v5508_v43  ;;  %v6791_v34 = vld [vmem:[%s7270_s27 + $0xa4c] sm:$0xf] }
 0x204   : > { %4184 = vmatpush.bf16.msra.mxu3 %v5943_v3  ;;  %v5767_v18 = vor.u32 %v6799_v21, %v5764_v47  ;;  %v5604_v37 = vld [vmem:[%s7270_s27 + $0x958] sm:$0xf0]  ;;  %v6823_v12 = vld [vmem:[%s7270_s27 + $0xb4c] sm:$0xf]  ;;  %v5479_v3 = vor.u32 %v6727_v27, %v5476_v28  ;;  %v5735_v53 = vor.u32 %v6791_v34, %v5732_v49 }
 0x205   : > { %4143 = vmatpush.bf16.msra.mxu0 %v5543_v56  ;;  %v5860_v52 = vld [vmem:[%s7270_s27 + $0xb58] sm:$0xf0]  ;;  %v5607_v22 = vor.u32 %v6759_v51, %v5604_v37  ;;  %v6723_v54 = vld [vmem:[%s7270_s27 + $0x82c] sm:$0xf]  ;;  %v8522_v56 = vpop.f32.mrf.mxu2 }
 0x206   : > { %4157 = vmatpush.bf16.msra.mxu1 %v5671_v59  ;;  %v5460_v29 = vld [vmem:[%s7270_s27 + $0x838] sm:$0xf0]  ;;  %v6755_v61 = vld [vmem:[%s7270_s27 + $0x92c] sm:$0xf]  ;;  %v5863_v59 = vor.u32 %v6823_v12, %v5860_v52 }
 0x207   : > { %4171 = vmatpush.bf16.msra.mxu2 %v5799_v60  ;;  %v5588_v60 = vld [vmem:[%s7270_s27 + $0x938] sm:$0xf0]  ;;  %v6787_v9 = vld [vmem:[%s7270_s27 + $0xa2c] sm:$0xf]  ;;  %v5463_v5 = vor.u32 %v6723_v54, %v5460_v29 }
 0x208   : > { %4185 = vmatpush.bf16.msra.mxu3 %v5927_v50  ;;  %v5716_v63 = vld [vmem:[%s7270_s27 + $0xa38] sm:$0xf0]  ;;  %v6819_v50 = vld [vmem:[%s7270_s27 + $0xb2c] sm:$0xf] }
 0x209   : > { %4144 = vmatpush.bf16.msra.mxu0 %v5527_v39  ;;  %v5844_v6 = vld [vmem:[%s7270_s27 + $0xb38] sm:$0xf0]  ;;  %v6719_v45 = vld [vmem:[%s7270_s27 + $0x80c] sm:$0xf]  ;;  %v5719_v11 = vor.u32 %v6787_v9, %v5716_v63 }
 0x20a   : > { %4158 = vmatpush.bf16.msra.mxu1 %v5655_v8  ;;  %v5444_v39 = vld [vmem:[%s7270_s27 + $0x818] sm:$0xf0]  ;;  %v8537_v8 = vpop.f32.mrf.mxu0  ;;  %v6751_v43 = vld [vmem:[%s7270_s27 + $0x90c] sm:$0xf]  ;;  %v5847_v21 = vor.u32 %v6819_v50, %v5844_v6  ;;  %v8574_v50 = vpop.f32.mrf.mxu1 }
 0x20b   : > { %4172 = vmatpush.bf16.msra.mxu2 %v5783_v57  ;;  %v5591_v57 = vor.u32 %v6755_v61, %v5588_v60  ;;  %v5572_v13 = vld [vmem:[%s7270_s27 + $0x918] sm:$0xf0]  ;;  %v6815_v15 = vld [vmem:[%s7270_s27 + $0xb0c] sm:$0xf]  ;;  %v5447_v55 = vor.u32 %v6719_v45, %v5444_v39 }
 0x20c   : > { %4186 = vmatpush.bf16.msra.mxu3 %v5911_v44  ;;  %v6783_v44 = vld [vmem:[%s7270_s27 + $0xa0c] sm:$0xf]  ;;  %v5700_v47 = vld [vmem:[%s7270_s27 + $0xa18] sm:$0xf0]  ;;  %v5575_v4 = vor.u32 %v6751_v43, %v5572_v13 }
 0x20d   : > { %4145 = vmatpush.bf16.msra.mxu0 %v5511_v16  ;;  %v5828_v25 = vld [vmem:[%s7270_s27 + $0xb18] sm:$0xf0]  ;;  %v6875_v16 = vld [vmem:[%s7270_s27 + $0xcec] sm:$0xf]  ;;  %v5703_v48 = vor.u32 %v6783_v44, %v5700_v47  ;;  %v8561_v37 = vpop.f32.mrf.mxu2 }
 0x20e   : > { %4159 = vmatpush.bf16.msra.mxu1 %v5639_v58  ;;  %v6068_v58 = vld [vmem:[%s7270_s27 + $0xcf8] sm:$0xf0]  ;;  %v6939_v1 = vld [vmem:[%s7270_s27 + $0xeec] sm:$0xf]  ;;  %v5831_v2 = vor.u32 %v6815_v15, %v5828_v25  ;;  %v3818_v25 = vadd.f32 %v8537_v8, %v792_v42 }
 0x20f   : > { %4173 = vmatpush.bf16.msra.mxu2 %v5767_v18  ;;  %v6907_v18 = vld [vmem:[%s7270_s27 + $0xdec] sm:$0xf]  ;;  %v6196_v20 = vld [vmem:[%s7270_s27 + $0xdf8] sm:$0xf0] }
 0x210   : > { %4187 = vmatpush.bf16.msra.mxu3 %v5895_v10  ;;  %v6324_v10 = vld [vmem:[%s7270_s27 + $0xef8] sm:$0xf0]  ;;  %v6971_v19 = vld [vmem:[%s7270_s27 + $0xfec] sm:$0xf] }
 0x211   : > { %4146 = vmatpush.bf16.msra.mxu0 %v5495_v24  ;;  %v6452_v17 = vld [vmem:[%s7270_s27 + $0xff8] sm:$0xf0]  ;;  %v6071_v24 = vor.u32 %v6875_v16, %v6068_v58  ;;  %v6327_v27 = vor.u32 %v6939_v1, %v6324_v10  ;;  %v6871_v28 = vld [vmem:[%s7270_s27 + $0xccc] sm:$0xf] }
 0x212   : > { %4160 = vmatpush.bf16.msra.mxu1 %v5623_v26  ;;  %v3816_v26 = vadd.f32 %v8505_v23, %v792_v42  ;;  %v6052_v51 = vld [vmem:[%s7270_s27 + $0xcd8] sm:$0xf0]  ;;  %v6455_v34 = vor.u32 %v6971_v19, %v6452_v17  ;;  %v6935_v12 = vld [vmem:[%s7270_s27 + $0xecc] sm:$0xf]  ;;  %v3871_v29 = vpop.f32.mrf.mxu0 }
 0x213   : > { %4174 = vmatpush.bf16.msra.mxu2 %v5751_v33  ;;  %v6199_v33 = vor.u32 %v6907_v18, %v6196_v20  ;;  %v6180_v49 = vld [vmem:[%s7270_s27 + $0xdd8] sm:$0xf0]  ;;  %v6967_v23 = vld [vmem:[%s7270_s27 + $0xfcc] sm:$0xf] }
 0x214   : > { %4188 = vmatpush.bf16.msra.mxu3 %v5879_v30  ;;  %v6903_v30 = vld [vmem:[%s7270_s27 + $0xdcc] sm:$0xf]  ;;  %v6308_v52 = vld [vmem:[%s7270_s27 + $0xed8] sm:$0xf0]  ;;  %v3830_v54 = vadd.f32 %v8509_v7, %v3816_v26 }
 0x215   : > { %4147 = vmatpush.bf16.msra.mxu0 %v5479_v3  ;;  %v8566_v3 = vpop.f32.mrf.mxu3  ;;  %v6183_v61 = vor.u32 %v6903_v30, %v6180_v49  ;;  %v6867_v60 = vld [vmem:[%s7270_s27 + $0xcac] sm:$0xf]  ;;  %v6036_v9 = vld [vmem:[%s7270_s27 + $0xcb8] sm:$0xf0]  ;;  %v8597_v58 = vpop.f32.mrf.mxu2 }
 0x216   : > { %4161 = vmatpush.bf16.msra.mxu1 %v5607_v22  ;;  %v6436_v22 = vld [vmem:[%s7270_s27 + $0xfd8] sm:$0xf0]  ;;  %v6899_v63 = vld [vmem:[%s7270_s27 + $0xdac] sm:$0xf] }
 0x217   : > { %4175 = vmatpush.bf16.msra.mxu2 %v5735_v53  ;;  %v6055_v53 = vor.u32 %v6871_v28, %v6052_v51  ;;  %v6439_v6 = vor.u32 %v6967_v23, %v6436_v22  ;;  %v6931_v7 = vld [vmem:[%s7270_s27 + $0xeac] sm:$0xf]  ;;  %v6292_v45 = vld [vmem:[%s7270_s27 + $0xeb8] sm:$0xf0] }
 0x218   : > { %4189 = vmatpush.bf16.msra.mxu3 %v5863_v59  ;;  %v6311_v59 = vor.u32 %v6935_v12, %v6308_v52  ;;  %v6963_v39 = vld [vmem:[%s7270_s27 + $0xfac] sm:$0xf]  ;;  %v6295_v13 = vor.u32 %v6931_v7, %v6292_v45  ;;  %v6020_v44 = vld [vmem:[%s7270_s27 + $0xc98] sm:$0xf0] }
 0x219   : > { %4148 = vmatpush.bf16.msra.mxu0 %v5463_v5  ;;  %v6164_v5 = vld [vmem:[%s7270_s27 + $0xdb8] sm:$0xf0]  ;;  %v6927_v15 = vld [vmem:[%s7270_s27 + $0xe8c] sm:$0xf] }
 0x21a   : > { %4162 = vmatpush.bf16.msra.mxu1 %v5591_v57  ;;  %v6420_v57 = vld [vmem:[%s7270_s27 + $0xfb8] sm:$0xf0]  ;;  %v6167_v43 = vor.u32 %v6899_v63, %v6164_v5  ;;  %v6859_v42 = vld [vmem:[%s7270_s27 + $0xc6c] sm:$0xf] }
 0x21b   : > { %4176 = vmatpush.bf16.msra.mxu2 %v5719_v11  ;;  %v3844_v11 = vadd.f32 %v8522_v56, %v3830_v54  ;;  %v6148_v47 = vld [vmem:[%s7270_s27 + $0xd98] sm:$0xf0]  ;;  %v6959_v56 = vld [vmem:[%s7270_s27 + $0xf8c] sm:$0xf] }
 0x21c   : > { %4190 = vmatpush.bf16.msra.mxu3 %v5847_v21  ;;  %v6423_v21 = vor.u32 %v6963_v39, %v6420_v57  ;;  %v6404_v16 = vld [vmem:[%s7270_s27 + $0xf98] sm:$0xf0]  ;;  %v6923_v17 = vld [vmem:[%s7270_s27 + $0xe6c] sm:$0xf] }
 0x21d   : > { %4149 = vmatpush.bf16.msra.mxu0 %v5447_v55  ;;  %v3858_v55 = vadd.f32 %v8527_v62, %v3844_v11  ;;  %v8600_v20 = vpop.f32.mrf.mxu3  ;;  %v6004_v8 = vld [vmem:[%s7270_s27 + $0xc78] sm:$0xf0]  ;;  %v3832_v62 = vadd.f32 %v8542_v14, %v3818_v25  ;;  %v6955_v26 = vld [vmem:[%s7270_s27 + $0xf6c] sm:$0xf]  ;;  %v3901_v45 = vpop.f32.mrf.mxu2 }
 0x21e   : > { %4163 = vmatpush.bf16.msra.mxu1 %v5575_v4  ;;  %v6891_v4 = vld [vmem:[%s7270_s27 + $0xd6c] sm:$0xf]  ;;  %v6132_v19 = vld [vmem:[%s7270_s27 + $0xd78] sm:$0xf0]  ;;  %v6007_v28 = vor.u32 %v6859_v42, %v6004_v8 }
 0x21f   : > { %4177 = vmatpush.bf16.msra.mxu2 %v5703_v48  ;;  %v6407_v48 = vor.u32 %v6959_v56, %v6404_v16  ;;  %v3872_v51 = vadd.f32 %v3871_v29, %v3858_v55  ;;  %v6135_v30 = vor.u32 %v6891_v4, %v6132_v19  ;;  %v6855_v49 = vld [vmem:[%s7270_s27 + $0xc4c] sm:$0xf]  ;;  %v5988_v12 = vld [vmem:[%s7270_s27 + $0xc58] sm:$0xf0]  ;;  %v3846_v54 = vadd.f32 %v8561_v37, %v3832_v62 }
 0x220   : > { %4191 = vmatpush.bf16.msra.mxu3 %v5831_v2  ;;  %4150 = vmatmul.bf16.vlgmr.msra.gmra.mxu0 %v7583_v31  ;;  %v6039_v31 = vor.u32 %v6867_v60, %v6036_v9  ;;  %v6260_v2 = vld [vmem:[%s7270_s27 + $0xe78] sm:$0xf0]  ;;  %v6887_v14 = vld [vmem:[%s7270_s27 + $0xd4c] sm:$0xf] }
 0x221   : > { %4198 = vmatpush.bf16.msrb.mxu0 %v6071_v24  ;;  %4164 = vmatmul.bf16.vlgmr.msra.gmra.mxu1 %v7590_v36  ;;  %v6895_v36 = vld [vmem:[%s7270_s27 + $0xd8c] sm:$0xf]  ;;  %v3873_v24 = vpop.f32.mrf.mxu0  ;;  %v6116_v23 = vld [vmem:[%s7270_s27 + $0xd58] sm:$0xf0]  ;;  %v3886_v60 = vadd.f32 %v8574_v50, %v3872_v51  ;;  %v3860_v50 = vadd.f32 %v8566_v3, %v3846_v54 }
 0x222   : > { %4212 = vmatpush.bf16.msrb.mxu1 %v6199_v33  ;;  %4178 = vmatmul.bf16.vlgmr.msra.gmra.mxu2 %v7588_v35  ;;  %v6863_v35 = vld [vmem:[%s7270_s27 + $0xc8c] sm:$0xf]  ;;  %v6151_v1 = vor.u32 %v6895_v36, %v6148_v47  ;;  %v6388_v33 = vld [vmem:[%s7270_s27 + $0xf78] sm:$0xf0]  ;;  %v6119_v9 = vor.u32 %v6887_v14, %v6116_v23 }
 0x223   : > { %4226 = vmatpush.bf16.msrb.mxu2 %v6327_v27  ;;  %4192 = vmatmul.bf16.vlgmr.msra.gmra.mxu3 %v7594_v40  ;;  %v6276_v40 = vld [vmem:[%s7270_s27 + $0xe98] sm:$0xf0]  ;;  %v6023_v18 = vor.u32 %v6863_v35, %v6020_v44  ;;  %v8611_v27 = vpop.f32.mrf.mxu1  ;;  %v6391_v52 = vor.u32 %v6955_v26, %v6388_v33  ;;  %v6919_v22 = vld [vmem:[%s7270_s27 + $0xe4c] sm:$0xf] }
 0x224   : > { %4240 = vmatpush.bf16.msrb.mxu3 %v6455_v34  ;;  %v6279_v10 = vor.u32 %v6927_v15, %v6276_v40  ;;  %v6263_v34 = vor.u32 %v6923_v17, %v6260_v2  ;;  %v6372_v29 = vld [vmem:[%s7270_s27 + $0xf58] sm:$0xf0]  ;;  %v6883_v7 = vld [vmem:[%s7270_s27 + $0xd2c] sm:$0xf] }
 0x225   : > { %4199 = vmatpush.bf16.msrb.mxu0 %v6055_v53  ;;  %v6244_v53 = vld [vmem:[%s7270_s27 + $0xe58] sm:$0xf0]  ;;  %v6915_v57 = vld [vmem:[%s7270_s27 + $0xe2c] sm:$0xf]  ;;  %v3915_v11 = vpop.f32.mrf.mxu3  ;;  %v3955_v19 = vpop.f32.mrf.mxu2 }
 0x226   : > { %4213 = vmatpush.bf16.msrb.mxu1 %v6183_v61  ;;  %v6951_v61 = vld [vmem:[%s7270_s27 + $0xf4c] sm:$0xf]  ;;  %v6247_v63 = vor.u32 %v6919_v22, %v6244_v53  ;;  %v5972_v5 = vld [vmem:[%s7270_s27 + $0xc38] sm:$0xf0] }
 0x227   : > { %4227 = vmatpush.bf16.msrb.mxu2 %v6311_v59  ;;  %v5991_v59 = vor.u32 %v6855_v49, %v5988_v12  ;;  %v6375_v37 = vor.u32 %v6951_v61, %v6372_v29  ;;  %v6100_v39 = vld [vmem:[%s7270_s27 + $0xd38] sm:$0xf0]  ;;  %v6847_v40 = vld [vmem:[%s7270_s27 + $0xc0c] sm:$0xf] }
 0x228   : > { %4241 = vmatpush.bf16.msrb.mxu3 %v6439_v6  ;;  %v6851_v6 = vld [vmem:[%s7270_s27 + $0xc2c] sm:$0xf]  ;;  %v6356_v35 = vld [vmem:[%s7270_s27 + $0xf38] sm:$0xf0]  ;;  %v6103_v47 = vor.u32 %v6883_v7, %v6100_v39 }
 0x229   : > { %4200 = vmatpush.bf16.msrb.mxu0 %v6039_v31  ;;  %v6228_v31 = vld [vmem:[%s7270_s27 + $0xe38] sm:$0xf0]  ;;  %v5975_v36 = vor.u32 %v6851_v6, %v5972_v5  ;;  %v6879_v25 = vld [vmem:[%s7270_s27 + $0xd0c] sm:$0xf] }
 0x22a   : > { %4214 = vmatpush.bf16.msrb.mxu1 %v6167_v43  ;;  %v3927_v43 = vpop.f32.mrf.mxu0  ;;  %v6231_v15 = vor.u32 %v6915_v57, %v6228_v31  ;;  %v5956_v3 = vld [vmem:[%s7270_s27 + $0xc18] sm:$0xf0] }
 0x22b   : > { %4228 = vmatpush.bf16.msrb.mxu2 %v6295_v13  ;;  %v6947_v13 = vld [vmem:[%s7270_s27 + $0xf2c] sm:$0xf]  ;;  %v3941_v44 = vpop.f32.mrf.mxu1  ;;  %v6084_v16 = vld [vmem:[%s7270_s27 + $0xd18] sm:$0xf0]  ;;  %v5959_v8 = vor.u32 %v6847_v40, %v5956_v3 }
 0x22c   : > { %4242 = vmatpush.bf16.msrb.mxu3 %v6423_v21  ;;  %v3900_v21 = vadd.f32 %v8597_v58, %v3886_v60  ;;  %v6359_v56 = vor.u32 %v6947_v13, %v6356_v35  ;;  %v6212_v55 = vld [vmem:[%s7270_s27 + $0xe18] sm:$0xf0]  ;;  %v6087_v58 = vor.u32 %v6879_v25, %v6084_v16 }
 0x22d   : > { %4201 = vmatpush.bf16.msrb.mxu0 %v6023_v18  ;;  %v6911_v18 = vld [vmem:[%s7270_s27 + $0xe0c] sm:$0xf]  ;;  %v6340_v42 = vld [vmem:[%s7270_s27 + $0xf18] sm:$0xf0]  ;;  %v3969_v26 = vpop.f32.mrf.mxu3 }
 0x22e   : > { %4215 = vmatpush.bf16.msrb.mxu1 %v6151_v1  ;;  %v3874_v1 = vadd.f32 %v3873_v24, %v3860_v50  ;;  %v3914_v4 = vadd.f32 %v8600_v20, %v3900_v21 }
 0x22f   : > { %4229 = vmatpush.bf16.msrb.mxu2 %v6279_v10  ;;  %v6943_v10 = vld [vmem:[%s7270_s27 + $0xf0c] sm:$0xf] }
 0x230   : > { %4243 = vmatpush.bf16.msrb.mxu3 %v6407_v48  ;;  %v6215_v48 = vor.u32 %v6911_v18, %v6212_v55  ;;  %v6343_v17 = vor.u32 %v6943_v10, %v6340_v42  ;;  %v3888_v2 = vadd.f32 %v8611_v27, %v3874_v1  ;;  %v3928_v62 = vadd.f32 %v3927_v43, %v3914_v4 }
 0x231   : > { %4202 = vmatpush.bf16.msrb.mxu0 %v6007_v28  ;;  %v793_v43 = vperm.slane %v8532_v0, 3 }
 0x232   : > { %4216 = vmatpush.bf16.msrb.mxu1 %v6135_v30  ;;  %v3902_v33 = vadd.f32 %v3901_v45, %v3888_v2  ;;  %v3929_v24 = vpop.f32.mrf.mxu0  ;;  %v3942_v51 = vadd.f32 %v3941_v44, %v3928_v62 }
 0x233   : > { %4230 = vmatpush.bf16.msrb.mxu2 %v6263_v34  ;;  %v3943_v28 = vpop.f32.mrf.mxu1  ;;  %v3957_v34 = vpop.f32.mrf.mxu2 }
 0x234   : > { %4244 = vmatpush.bf16.msrb.mxu3 %v6391_v52  ;;  %v3916_v20 = vadd.f32 %v3915_v11, %v3902_v33  ;;  %v3956_v30 = vadd.f32 %v3955_v19, %v3942_v51 }
 0x235   : > { %4203 = vmatpush.bf16.msrb.mxu0 %v5991_v59  ;;  %v3971_v12 = vpop.f32.mrf.mxu3 }
 0x236   : > { %4217 = vmatpush.bf16.msrb.mxu1 %v6119_v9  ;;  %v3930_v27 = vadd.f32 %v3929_v24, %v3916_v20  ;;  %v3970_v49 = vadd.f32 %v3969_v26, %v3956_v30 }
 0x237   : > { %4231 = vmatpush.bf16.msrb.mxu2 %v6247_v63 }
 0x238   : > { %4245 = vmatpush.bf16.msrb.mxu3 %v6375_v37  ;;  %v3944_v23 = vadd.f32 %v3943_v28, %v3930_v27 }
 0x239   : > { %4204 = vmatpush.bf16.msrb.mxu0 %v5975_v36 }
 0x23a   : > { %4218 = vmatpush.bf16.msrb.mxu1 %v6103_v47  ;;  %v3958_v53 = vadd.f32 %v3957_v34, %v3944_v23 }
 0x23b   : > { %4232 = vmatpush.bf16.msrb.mxu2 %v6231_v15 }
 0x23c   : > { %4246 = vmatpush.bf16.msrb.mxu3 %v6359_v56  ;;  %v3972_v61 = vadd.f32 %v3971_v12, %v3958_v53 }
 0x23d   : > { %4205 = vmatpush.bf16.msrb.mxu0 %v5959_v8  ;;  %v3983_v14 = vpop.f32.mrf.mxu0 }
 0x23e   : > { %4219 = vmatpush.bf16.msrb.mxu1 %v6087_v58  ;;  %v3997_v52 = vpop.f32.mrf.mxu1  ;;  %v3984_v22 = vadd.f32 %v3983_v14, %v3970_v49 }
 0x23f   : > { %4233 = vmatpush.bf16.msrb.mxu2 %v6215_v48 }
 0x240   : > { %4247 = vmatpush.bf16.msrb.mxu3 %v6343_v17  ;;  %4206 = vmatmul.bf16.vlgmr.msrb.gmra.mxu0 %v7683_v32  ;;  %v3998_v54 = vadd.f32 %v3997_v52, %v3984_v22 }
 0x241   : > { %4220 = vmatmul.bf16.vlgmr.msrb.gmra.mxu1 %v7690_v41 }
 0x242   : > { %4234 = vmatmul.bf16.vlgmr.msrb.gmra.mxu2 %v7688_v38 }
 0x243   : > { %4248 = vmatmul.bf16.vlgmr.msrb.gmra.mxu3 %v7694_v46 }
 0x245   : > { %v4011_v32 = vpop.f32.mrf.mxu2  ;;  %v3985_v38 = vpop.f32.mrf.mxu0 }
 0x246   : > { %v4012_v41 = vadd.f32 %v4011_v32, %v3998_v54  ;;  %v4025_v29 = vpop.f32.mrf.mxu3  ;;  %v3986_v59 = vadd.f32 %v3985_v38, %v3972_v61  ;;  %v3999_v46 = vpop.f32.mrf.mxu1 }
 0x248   : > { %v4026_v60 = vadd.f32 %v4025_v29, %v4012_v41  ;;  %v4000_v9 = vadd.f32 %v3999_v46, %v3986_v59 }
 0x24a   : > { %7029 = vtanh.f32 %v4026_v60 }
 0x24d   : > { %v4013_v63 = vpop.f32.mrf.mxu2 }
 0x24e   : > { %v4014_v6 = vadd.f32 %v4013_v63, %v4000_v9  ;;  %v4027_v5 = vpop.f32.mrf.mxu3 }
 0x250   : > { %v7030_v7 = vpop.eup %7029  ;;  %v4028_v45 = vadd.f32 %v4027_v5, %v4014_v6 }
 0x251   : > { %4264 = vst [vmem:[%s8078_s18 + $0x10] sm:$0xff] %v7030_v7 }
 0x252   : > { %7031 = vtanh.f32 %v4028_v45 }
 0x258   : > { %v7032_v37 = vpop.eup %7031 }
 0x259   : > { %4268 = vst [vmem:[%s8078_s18 + $0x30] sm:$0xff] %v7032_v37 }
 0x25d   : > { %v4039_v39 = vpop.f32.mrf.mxu0 }
 0x25e   : > { %v4053_v57 = vpop.f32.mrf.mxu1  ;;  %v4040_v35 = vadd.f32 %v4039_v39, %v793_v43 }
 0x260   : > { %v4054_v21 = vadd.f32 %v4053_v57, %v4040_v35  ;;  %v4300_v35 = vld [vmem:[%s8078_s18 + $0x20] sm:$0xff] (%p7206_p9) }
 0x261   : > { %4301 = vst [vmem:[%s4279_s19 + $0x80] sm:$0xff] (%p7206_p9), %v4300_v35 }
 0x265   : > { %v4067_v31 = vpop.f32.mrf.mxu2  ;;  %v4041_v11 = vpop.f32.mrf.mxu0 }
 0x266   : > { %v4081_v50 = vpop.f32.mrf.mxu3  ;;  %v4055_v13 = vpop.f32.mrf.mxu1  ;;  %v4068_v40 = vadd.f32 %v4067_v31, %v4054_v21  ;;  %v4042_v3 = vadd.f32 %v4041_v11, %v793_v43  ;;  %v4294_v11 = vld [vmem:[%s8078_s18 + $0x8] sm:$0xff] (%p7206_p9)  ;;  %v4296_v43 = vld [vmem:[%s8078_s18 + $0x10] sm:$0xff] (%p7206_p9) }
 0x267   : > { %4295 = vst [vmem:[%s4279_s19 + $0x8] sm:$0xff] (%p7206_p9), %v4294_v11 }
 0x268   : > { %v4082_v56 = vadd.f32 %v4081_v50, %v4068_v40  ;;  %v4056_v18 = vadd.f32 %v4055_v13, %v4042_v3  ;;  %v4292_v50 = vld [vmem:[%s8078_s18] sm:$0xff] (%p7206_p9)  ;;  %4297 = vst [vmem:[%s4279_s19 + $0x10] sm:$0xff] (%p7206_p9), %v4296_v43 }
 0x269   : > { %4293 = vst [vmem:[%s4279_s19] sm:$0xff] (%p7206_p9), %v4292_v50 }
 0x26d   : > { %v4069_v44 = vpop.f32.mrf.mxu2 }
 0x26e   : > { %v4083_v36 = vpop.f32.mrf.mxu3  ;;  %v4070_v42 = vadd.f32 %v4069_v44, %v4056_v18  ;;  %v4302_v44 = vld [vmem:[%s8078_s18 + $0x28] sm:$0xff] (%p7206_p9) }
 0x26f   : > { %4303 = vst [vmem:[%s4279_s19 + $0x88] sm:$0xff] (%p7206_p9), %v4302_v44 }
 0x270   : > { %v4084_v0 = vadd.f32 %v4083_v36, %v4070_v42  ;;  %v4304_v36 = vld [vmem:[%s8078_s18 + $0x30] sm:$0xff] (%p7206_p9) }
 0x271   : > { %4305 = vst [vmem:[%s4279_s19 + $0x90] sm:$0xff] (%p7206_p9), %v4304_v36 }
 0x27d   : > { %v4095_v47 = vpop.f32.mrf.mxu0 }
 0x27e   : > { %v4109_v15 = vpop.f32.mrf.mxu1  ;;  %v4096_v1 = vadd.f32 %v4095_v47, %v4082_v56 }
 0x280   : > { %v4110_v8 = vadd.f32 %v4109_v15, %v4096_v1 }
 0x285   : > { %v4123_v25 = vpop.f32.mrf.mxu2  ;;  %v4097_v55 = vpop.f32.mrf.mxu0 }
 0x286   : > { %v4137_v16 = vpop.f32.mrf.mxu3  ;;  %v4111_v10 = vpop.f32.mrf.mxu1  ;;  %v4124_v19 = vadd.f32 %v4123_v25, %v4110_v8  ;;  %v4098_v2 = vadd.f32 %v4097_v55, %v4084_v0 }
 0x288   : > { %v4138_v62 = vadd.f32 %v4137_v16, %v4124_v19  ;;  %v4112_v33 = vadd.f32 %v4111_v10, %v4098_v2 }
 0x28d   : > { %v4125_v4 = vpop.f32.mrf.mxu2 }
 0x28e   : > { %v4139_v58 = vpop.f32.mrf.mxu3  ;;  %v4126_v51 = vadd.f32 %v4125_v4, %v4112_v33 }
 0x290   : > { %v4140_v34 = vadd.f32 %v4139_v58, %v4126_v51 }
 0x29d   : > { %v4151_v48 = vpop.f32.mrf.mxu0 }
 0x29e   : > { %v4165_v17 = vpop.f32.mrf.mxu1  ;;  %v4152_v24 = vadd.f32 %v4151_v48, %v4138_v62 }
 0x2a0   : > { %v4166_v30 = vadd.f32 %v4165_v17, %v4152_v24 }
 0x2a5   : > { %v4179_v26 = vpop.f32.mrf.mxu2  ;;  %v4153_v20 = vpop.f32.mrf.mxu0 }
 0x2a6   : > { %v4193_v28 = vpop.f32.mrf.mxu3  ;;  %v4167_v27 = vpop.f32.mrf.mxu1  ;;  %v4180_v49 = vadd.f32 %v4179_v26, %v4166_v30  ;;  %v4154_v12 = vadd.f32 %v4153_v20, %v4140_v34 }
 0x2a8   : > { %v4194_v52 = vadd.f32 %v4193_v28, %v4180_v49  ;;  %v4168_v53 = vadd.f32 %v4167_v27, %v4154_v12 }
 0x2ad   : > { %v4181_v14 = vpop.f32.mrf.mxu2 }
 0x2ae   : > { %v4195_v23 = vpop.f32.mrf.mxu3  ;;  %v4182_v61 = vadd.f32 %v4181_v14, %v4168_v53 }
 0x2b0   : > { %v4196_v29 = vadd.f32 %v4195_v23, %v4182_v61 }
 0x2bd   : > { %v4207_v22 = vpop.f32.mrf.mxu0 }
 0x2be   : > { %v4208_v54 = vadd.f32 %v4207_v22, %v4194_v52  ;;  %v4221_v32 = vpop.f32.mrf.mxu1 }
 0x2c0   : > { %v4222_v41 = vadd.f32 %v4221_v32, %v4208_v54 }
 0x2c5   : > { %v4235_v38 = vpop.f32.mrf.mxu2  ;;  %v4209_v46 = vpop.f32.mrf.mxu0 }
 0x2c6   : > { %v4236_v59 = vadd.f32 %v4235_v38, %v4222_v41  ;;  %v4249_v60 = vpop.f32.mrf.mxu3  ;;  %v4210_v63 = vadd.f32 %v4209_v46, %v4196_v29  ;;  %v4223_v6 = vpop.f32.mrf.mxu1 }
 0x2c8   : > { %v4250_v9 = vadd.f32 %v4249_v60, %v4236_v59  ;;  %v4224_v5 = vadd.f32 %v4223_v6, %v4210_v63 }
 0x2ca   : > { %7033 = vtanh.f32 %v4250_v9 }
 0x2cd   : > { %v4237_v7 = vpop.f32.mrf.mxu2 }
 0x2ce   : > { %v4238_v45 = vadd.f32 %v4237_v7, %v4224_v5  ;;  %v4251_v37 = vpop.f32.mrf.mxu3 }
 0x2d0   : > { %v7034_v39 = vpop.eup %7033  ;;  %v4252_v57 = vadd.f32 %v4251_v37, %v4238_v45 }
 0x2d1   : > { %4265 = vst [vmem:[%s8078_s18 + $0x18] sm:$0xff] %v7034_v39 }
 0x2d2   : > { %7035 = vtanh.f32 %v4252_v57 }
 0x2d5   : > { %4276 = sbr.rel (!%p7206_p9) target bundleno = 738 (0x2e2), region = 44 }
 0x2d8   : > { %v7036_v31 = vpop.eup %7035  ;;  %v4298_v13 = vld [vmem:[%s8078_s18 + $0x18] sm:$0xff] (%p7206_p9) }
 0x2d9   : > { %4269 = vst [vmem:[%s8078_s18 + $0x38] sm:$0xff] %v7036_v31 }
 0x2da   : > { %4299 = vst [vmem:[%s4279_s19 + $0x18] sm:$0xff] %v4298_v13 }
 0x2e0   : > { %v4306_v21 = vld [vmem:[%s8078_s18 + $0x38] sm:$0xff] }
 0x2e1   : > { %4307 = vst [vmem:[%s4279_s19 + $0x98] sm:$0xff] %v4306_v21 }
 0x2e2 PF: > { %p16_p7 = scmp.ge.s32.totalorder %s7183_s17, 6   ;;  %s8688_s12 = smov %s7129_s13 }
 0x2e3   : > { %s8689_s13 = smov %s7133_s14  ;;  %s8690_s14 = smov %s7193_s20 }
 0x2e4   : > { %s8691_s15 = smov %s7183_s17  ;;  %18 = sbr.rel (!%p16_p7) target bundleno = 5 (0x5), region = 108 }
 0x2e9   :  { %4323 = vsyncpa [#allocation3], 1 }
 0x2ea   :  { %4325 = vsyncpa [#allocation3 + $0x1], 1 }
 0x2eb   :  { %4326 = vsyncpa [#allocation5], 1 }
 0x2ec   :  { %4328 = vsyncpa [#allocation5 + $0x1], 1 }

</bundles_post_ra>
